<compile_context>
chip_gen: v5e
topology: v5e:2x2
jax: 0.10.0
libtpu: 0.0.40
codegen_flags: <defaults>
</compile_context>

<pallas_src>
import functools
import numpy as np
import jax
import jax.numpy as jnp
from jax.experimental import pallas as pl
from jax.experimental.pallas import tpu as pltpu

HID = 30          # self.hidden_dim = 30 (the ctor arg is ignored by the torch module)
ZPAD = 32         # z / mean / log-var lane padding (exact zeros)
H_TRUE = 400      # true MLP width of the torch module
HP = 512          # padded width (multiple of 128 lanes); padding is exact zeros
OUT_LANES = 128   # lane-dense output slab width
X_DIM = 2
Y_DIM = 1


def _leaky(x):
    # nn.LeakyReLU default negative_slope = 0.01 (computed in f32)
    return jnp.maximum(x, 0.01 * x)


def _mm(a, w):
    # bf16 x bf16 MXU matmul with f32 accumulation; activations arrive as f32.
    return jnp.dot(a.astype(w.dtype), w, preferred_element_type=jnp.float32)


# ---------------------------------------------------------------------------
# Fused kernel: encoder (dedup'd) + batched aggregaters + reparam + KL + decoder.
# One grid step == one (context, target) problem; weights are grid-resident.
# ---------------------------------------------------------------------------
def neural_process_kernel(enc_in_ref, dec_x_ref, u_ref,
                          w_ref,       # (7,512,512) bf16: hw2,hw3,mw1,vw1,gw2,gw3,gw4
                          b_ref,       # (10,512)  f32: hb1,hb2,hb3,mb1,vb1,gb1..gb4,gw5_row
                          hw1_ref,     # (3,512)   bf16
                          gw1x_ref,    # (2,512)   bf16
                          gw1z_ref,    # (32,512)  bf16
                          mvw2_ref,    # (2,512,32) bf16: mw2, vw2
                          b32_ref,     # (8,32)    f32: mb2, vb2, gb5(lane0)
                          out_ref,     # (2N+8, 128) f32
                          d_scr,       # VMEM scratch (2N, 512) f32
                          *, n_context):
    n = enc_in_ref.shape[0]            # n_context + n_target

    # ---- encoder h: one pass over the stacked [context; target] rows ----
    h = _leaky(_mm(enc_in_ref[...], hw1_ref[...]) + b_ref[0:1, :])        # [N, HP]
    h = _leaky(_mm(h, w_ref[0]) + b_ref[1:2, :])
    h = _leaky(_mm(h, w_ref[1]) + b_ref[2:3, :])

    c_rep = jnp.mean(h[0:n_context, :], axis=0, keepdims=True)           # context prefix
    a_rep = jnp.mean(h, axis=0, keepdims=True)
    rep2 = jnp.concatenate([c_rep, a_rep], axis=0)                       # [2, HP] (tiny)

    # ---- mean / variance aggregaters, both reps batched into one tile ----
    mh = _leaky(_mm(rep2, w_ref[2]) + b_ref[3:4, :])                     # [2, HP]
    vh = _leaky(_mm(rep2, w_ref[3]) + b_ref[4:5, :])                     # [2, HP]
    mu = _mm(mh, mvw2_ref[0]) + b32_ref[0:1, :]                          # [2, ZPAD]
    lv = _mm(vh, mvw2_ref[1]) + b32_ref[1:2, :]                          # [2, ZPAD]

    # reparameterization: z = rand * exp(0.5 * std) + mean  (rand = U[0,1), as in
    # torch.rand_like; noise generated outside and passed in, padded lanes are 0).
    z2 = u_ref[...] * jnp.exp(0.5 * lv) + mu                             # [2, ZPAD]

    # ---- "negative" KL in log-space (identical to the torch formula with
    #      c_std = exp(0.5*c_lv)); padded lanes contribute exactly zero ----
    c_mu, a_mu = mu[0:1, :], mu[1:2, :]
    c_lv, a_lv = lv[0:1, :], lv[1:2, :]
    nkl = (0.5 * (c_lv - a_lv)
           + 0.5 * jnp.exp(a_lv - c_lv)
           + 0.5 * (a_mu - c_mu) ** 2 * jnp.exp(-c_lv)
           - 0.5)
    nkl_sum = jnp.sum(nkl, axis=1, keepdims=True)                        # [1, 1]

    # ---- decoder g: all four (z, x) combinations in one 2N-row batched pass ----
    # cat(z, x) @ W1 == z @ W1[:HID] + x @ W1[HID:]
    hz = _mm(z2, gw1z_ref[...])                                          # [2, HP]
    hx = _mm(dec_x_ref[...], gw1x_ref[...])                              # [N, HP]
    gb1 = b_ref[5:6, :]
    d_scr[0:n, :] = _leaky(hx + hz[0:1, :] + gb1)        # rows use context_z
    d_scr[n:2 * n, :] = _leaky(hx + hz[1:2, :] + gb1)    # rows use all_z
    d = d_scr[...]
    d = _leaky(_mm(d, w_ref[4]) + b_ref[6:7, :])
    d = _leaky(_mm(d, w_ref[5]) + b_ref[7:8, :])
    d = _leaky(_mm(d, w_ref[6]) + b_ref[8:9, :])

    # final 400 -> 1 layer: VPU multiply + lane reduction (no padded matmul)
    logit = jnp.sum(d * b_ref[9:10, :], axis=-1, keepdims=True) + b32_ref[2:3, 0:1]
    preds = jax.nn.sigmoid(logit)                                        # [2N, 1]

    # ---- lane-dense output slab (two slice stores, no concat) ----
    out_ref[0:2 * n, :] = jnp.broadcast_to(preds, (2 * n, OUT_LANES))
    out_ref[2 * n:2 * n + 8, :] = jnp.broadcast_to(nkl_sum, (8, OUT_LANES))


# ---------------------------------------------------------------------------
# Wrapper: one pallas_call for a whole batch of independent problems.
# ---------------------------------------------------------------------------
@jax.jit
def neural_process_forward(context_x, context_y, target_x, target_y,
                           params, u_context, u_all):
    """context_x: (B,Nc,2)  context_y: (B,Nc,1)  target_x: (B,Nt,2)  target_y: (B,Nt,1)
       u_context/u_all: (B, HID) uniform[0,1) noise (torch.rand_like)."""
    (w_stack, b512, hw1_p, gw1x_p, gw1z_p, mvw2, b32) = params
    B, nc, _ = context_x.shape
    nt = target_x.shape[1]
    n = nc + nt

    # Batch-amortized input prep (a few KB for the whole batch).
    dec_x = jnp.concatenate([context_x, target_x], axis=1)               # (B, N, 2)
    all_y = jnp.concatenate([context_y, target_y], axis=1)               # (B, N, 1)
    enc_in = jnp.concatenate([dec_x, all_y], axis=2)                     # (B, N, 3)
    u2 = jnp.stack([jnp.pad(u_context, ((0, 0), (0, ZPAD - HID))),
                    jnp.pad(u_all, ((0, 0), (0, ZPAD - HID)))], axis=1)  # (B, 2, 32)

    def _wspec(shape):
        ndim = len(shape)
        return pl.BlockSpec(shape, lambda b, _n=ndim: (0,) * _n)

    out = pl.pallas_call(
        functools.partial(neural_process_kernel, n_context=nc),
        out_shape=jax.ShapeDtypeStruct((B, 2 * n + 8, OUT_LANES), jnp.float32),
        grid=(B,),
        in_specs=[
            pl.BlockSpec((None, n, 3), lambda b: (b, 0, 0)),             # enc_in
            pl.BlockSpec((None, n, X_DIM), lambda b: (b, 0, 0)),         # dec_x
            pl.BlockSpec((None, 2, ZPAD), lambda b: (b, 0, 0)),          # noise
            _wspec((7, HP, HP)),                                         # w_stack (resident)
            _wspec((10, HP)),                                            # b512
            _wspec((3, HP)),                                             # hw1
            _wspec((2, HP)),                                             # gw1x
            _wspec((ZPAD, HP)),                                          # gw1z
            _wspec((2, HP, ZPAD)),                                       # mw2 / vw2
            _wspec((8, ZPAD)),                                           # b32
        ],
        out_specs=pl.BlockSpec((None, 2 * n + 8, OUT_LANES), lambda b: (b, 0, 0)),
        scratch_shapes=[pltpu.VMEM((2 * n, HP), jnp.float32)],
        compiler_params=pltpu.CompilerParams(
            dimension_semantics=("parallel",),        # shard batch across v7x's 2 TCs
            vmem_limit_bytes=32 * 1024 * 1024),       # safe on v5e/v6e (128 MiB) and v7x (64 MiB)
    )(enc_in, dec_x, u2, w_stack, b512, hw1_p, gw1x_p, gw1z_p, mvw2, b32)

    context_preds_logits = out[:, 0:nc, 0:1]          # g(cat(context_z, context_x))
    target_preds_logits = out[:, nc:n, 0:1]           # g(cat(context_z, target_x))
    context_logits = out[:, n:n + nc, 0:1]            # g(cat(all_z, context_x))
    target_logits = out[:, n + nc:2 * n, 0:1]         # g(cat(all_z, target_x))
    negative_kl = out[:, 2 * n, 0]                    # (B,)
    return (target_logits, context_logits, context_preds_logits,
            target_preds_logits, negative_kl)


# ---------------------------------------------------------------------------
# Parameter init (PyTorch-style), packed into lane-friendly stacks, bf16 weights.
# ---------------------------------------------------------------------------
def _uniform_linear(key, fan_in, fan_out):
    """PyTorch Linear init: U(-1/sqrt(fan_in), 1/sqrt(fan_in)) for W and b."""
    kw, kb = jax.random.split(key)
    bound = 1.0 / np.sqrt(fan_in)
    w = jax.random.uniform(kw, (fan_in, fan_out), jnp.float32, -bound, bound)
    b = jax.random.uniform(kb, (fan_out,), jnp.float32, -bound, bound)
    return w, b


def _pad2(a, rows, cols):
    return jnp.pad(a, ((0, rows - a.shape[0]), (0, cols - a.shape[1])))


def init_params(key):
    ks = jax.random.split(key, 12)
    hw1, hb1 = _uniform_linear(ks[0], 3, H_TRUE)
    hw2, hb2 = _uniform_linear(ks[1], H_TRUE, H_TRUE)
    hw3, hb3 = _uniform_linear(ks[2], H_TRUE, H_TRUE)
    mw1, mb1 = _uniform_linear(ks[3], H_TRUE, H_TRUE)
    mw2, mb2 = _uniform_linear(ks[4], H_TRUE, HID)
    vw1, vb1 = _uniform_linear(ks[5], H_TRUE, H_TRUE)
    vw2, vb2 = _uniform_linear(ks[6], H_TRUE, HID)
    gw1, gb1 = _uniform_linear(ks[7], HID + X_DIM, H_TRUE)
    gw2, gb2 = _uniform_linear(ks[8], H_TRUE, H_TRUE)
    gw3, gb3 = _uniform_linear(ks[9], H_TRUE, H_TRUE)
    gw4, gb4 = _uniform_linear(ks[10], H_TRUE, H_TRUE)
    gw5, gb5 = _uniform_linear(ks[11], H_TRUE, 1)

    # One stack for all seven 512x512 weights (zero padding keeps the math exact).
    w_stack = jnp.stack([_pad2(w, HP, HP)
                         for w in (hw2, hw3, mw1, vw1, gw2, gw3, gw4)]).astype(jnp.bfloat16)

    def _row(v):
        return jnp.pad(v, (0, HP - v.shape[0]))

    # 512-wide biases + the final 400->1 weight as a row (f32, elementwise path).
    b512 = jnp.stack([_row(hb1), _row(hb2), _row(hb3), _row(mb1), _row(vb1),
                      _row(gb1), _row(gb2), _row(gb3), _row(gb4),
                      _row(gw5[:, 0])]).astype(jnp.float32)              # (10, 512)

    hw1_p = _pad2(hw1, 3, HP).astype(jnp.bfloat16)                       # (3, 512)
    # decoder layer-1 split: cat(z, x) @ W1 == z @ W1[:HID] + x @ W1[HID:]
    gw1z_p = _pad2(gw1[:HID], ZPAD, HP).astype(jnp.bfloat16)             # (32, 512)
    gw1x_p = _pad2(gw1[HID:], X_DIM, HP).astype(jnp.bfloat16)            # (2, 512)
    mvw2 = jnp.stack([_pad2(mw2, HP, ZPAD),
                      _pad2(vw2, HP, ZPAD)]).astype(jnp.bfloat16)        # (2, 512, 32)

    b32 = jnp.zeros((8, ZPAD), jnp.float32)
    b32 = b32.at[0, :HID].set(mb2).at[1, :HID].set(vb2).at[2, 0].set(gb5[0])

    return (w_stack, b512, hw1_p, gw1x_p, gw1z_p, mvw2, b32)


# ---------------------------------------------------------------------------
# Pure-jnp reference (mirrors the torch forward structure, same packed weights).
# ---------------------------------------------------------------------------
def reference_forward(context_x, context_y, target_x, target_y,
                      params, u_context, u_all):
    (w_stack, b512, hw1, gw1x, gw1z, mvw2, b32) = params
    hw2, hw3, mw1, vw1, gw2, gw3, gw4 = (w_stack[i] for i in range(7))
    hb1, hb2, hb3, mb1, vb1, gb1, gb2, gb3, gb4, gw5_row = (b512[i:i + 1] for i in range(10))
    mw2, vw2 = mvw2[0], mvw2[1]
    mb2, vb2 = b32[0:1], b32[1:2]
    gb5 = b32[2, 0]

    def h_mlp(xin):
        x = _leaky(_mm(xin, hw1) + hb1)
        x = _leaky(_mm(x, hw2) + hb2)
        return _leaky(_mm(x, hw3) + hb3)

    def aggregate(rep):
        m = _mm(_leaky(_mm(rep, mw1) + mb1), mw2) + mb2
        s = _mm(_leaky(_mm(rep, vw1) + vb1), vw2) + vb2
        return m, s

    def g(z, x):
        hh = _leaky(_mm(z, gw1z) + _mm(x, gw1x) + gb1)
        hh = _leaky(_mm(hh, gw2) + gb2)
        hh = _leaky(_mm(hh, gw3) + gb3)
        hh = _leaky(_mm(hh, gw4) + gb4)
        return jax.nn.sigmoid(jnp.sum(hh * gw5_row, axis=-1, keepdims=True) + gb5)

    def single(cx, cy, tx, ty, uc, ua):
        context = jnp.concatenate([cx, cy], axis=1)
        c_rep = jnp.mean(h_mlp(context), axis=0, keepdims=True)
        all_in = jnp.concatenate([jnp.concatenate([cx, tx], 0),
                                  jnp.concatenate([cy, ty], 0)], axis=1)
        a_rep = jnp.mean(h_mlp(all_in), axis=0, keepdims=True)

        c_mu, c_lv = aggregate(c_rep)
        a_mu, a_lv = aggregate(a_rep)
        uc32 = jnp.pad(uc[None, :], ((0, 0), (0, ZPAD - HID)))
        ua32 = jnp.pad(ua[None, :], ((0, 0), (0, ZPAD - HID)))
        c_z = uc32 * jnp.exp(0.5 * c_lv) + c_mu
        a_z = ua32 * jnp.exp(0.5 * a_lv) + a_mu

        t_log = g(a_z, tx)
        c_log = g(a_z, cx)
        c_pred = g(c_z, cx)
        t_pred = g(c_z, tx)

        c_s = jnp.exp(0.5 * c_lv[:, :HID])
        a_s = jnp.exp(0.5 * a_lv[:, :HID])
        dmu = a_mu[:, :HID] - c_mu[:, :HID]
        nkl = jnp.sum(jnp.log(c_s / a_s) + (a_s ** 2 + dmu ** 2) / (2.0 * c_s ** 2) - 0.5)
        return t_log, c_log, c_pred, t_pred, nkl

    return jax.vmap(single)(context_x, context_y, target_x, target_y, u_context, u_all)


if __name__ == "__main__":
    key = jax.random.PRNGKey(0)
    k_param, k_cx, k_cy, k_tx, k_ty, k_uc, k_ua = jax.random.split(key, 7)

    B, Nc, Nt = 4, 8, 8
    context_x = jax.random.normal(k_cx, (B, Nc, X_DIM), jnp.float32)
    context_y = jax.random.normal(k_cy, (B, Nc, Y_DIM), jnp.float32)
    target_x = jax.random.normal(k_tx, (B, Nt, X_DIM), jnp.float32)
    target_y = jax.random.normal(k_ty, (B, Nt, Y_DIM), jnp.float32)

    # torch.rand_like -> uniform [0, 1); generated deterministically outside the kernel.
    u_context = jax.random.uniform(k_uc, (B, HID), jnp.float32)
    u_all = jax.random.uniform(k_ua, (B, HID), jnp.float32)

    params = init_params(k_param)

    outs = neural_process_forward(context_x, context_y, target_x, target_y,
                                  params, u_context, u_all)
    outs = jax.block_until_ready(outs)
    t_log, c_log, c_pred, t_pred, nkl = outs

    assert t_log.shape == (B, Nt, 1) and c_log.shape == (B, Nc, 1)
    assert c_pred.shape == (B, Nc, 1) and t_pred.shape == (B, Nt, 1)
    assert nkl.shape == (B,)
    assert all(bool(jnp.isfinite(o).all()) for o in (t_log, c_log, c_pred, t_pred, nkl))

    refs = reference_forward(context_x, context_y, target_x, target_y,
                             params, u_context, u_all)
    for got, want in zip(outs, refs):
        np.testing.assert_allclose(np.asarray(got), np.asarray(want),
                                   rtol=2e-3, atol=2e-3)

    print("KERNEL_OK")
</pallas_src>

<mosaic_0001>
module attributes {stable_mosaic.version = 11 : i64} {
  func.func @neural_process_kernel(%arg0: i32, %arg1: memref<1x16x3xf32, #tpu.memory_space<vmem>>, %arg2: memref<1x16x2xf32, #tpu.memory_space<vmem>>, %arg3: memref<1x2x32xf32, #tpu.memory_space<vmem>>, %arg4: memref<7x512x512xbf16, #tpu.memory_space<vmem>>, %arg5: memref<10x512xf32, #tpu.memory_space<vmem>>, %arg6: memref<3x512xbf16, #tpu.memory_space<vmem>>, %arg7: memref<2x512xbf16, #tpu.memory_space<vmem>>, %arg8: memref<32x512xbf16, #tpu.memory_space<vmem>>, %arg9: memref<2x512x32xbf16, #tpu.memory_space<vmem>>, %arg10: memref<8x32xf32, #tpu.memory_space<vmem>>, %arg11: memref<1x40x128xf32, #tpu.memory_space<vmem>>, %arg12: memref<32x512xf32, #tpu.memory_space<vmem>>) attributes {dimension_semantics = [#tpu.dimension_semantics<parallel>], iteration_bounds = array<i64: 4>, scalar_prefetch = 0 : i64, scratch_operands = 1 : i64, tpu.core_type = #tpu.core_type<tc>, window_params = [{transform_indices = @transform_0, window_bounds = array<i64: 1, 16, 3>}, {transform_indices = @transform_1, window_bounds = array<i64: 1, 16, 2>}, {transform_indices = @transform_2, window_bounds = array<i64: 1, 2, 32>}, {pipeline_mode = #tpu.pipeline_mode<synchronous>, transform_indices = @transform_3, window_bounds = array<i64: 7, 512, 512>}, {pipeline_mode = #tpu.pipeline_mode<synchronous>, transform_indices = @transform_4, window_bounds = array<i64: 10, 512>}, {pipeline_mode = #tpu.pipeline_mode<synchronous>, transform_indices = @transform_5, window_bounds = array<i64: 3, 512>}, {pipeline_mode = #tpu.pipeline_mode<synchronous>, transform_indices = @transform_6, window_bounds = array<i64: 2, 512>}, {pipeline_mode = #tpu.pipeline_mode<synchronous>, transform_indices = @transform_7, window_bounds = array<i64: 32, 512>}, {pipeline_mode = #tpu.pipeline_mode<synchronous>, transform_indices = @transform_8, window_bounds = array<i64: 2, 512, 32>}, {pipeline_mode = #tpu.pipeline_mode<synchronous>, transform_indices = @transform_9, window_bounds = array<i64: 8, 32>}, {transform_indices = @transform_10, window_bounds = array<i64: 1, 40, 128>}]} {
    %c0 = arith.constant 0 : index
    %c0_0 = arith.constant 0 : index
    %c0_1 = arith.constant 0 : index
    %0 = vector.load %arg1[%c0, %c0_0, %c0_1] : memref<1x16x3xf32, #tpu.memory_space<vmem>>, vector<1x16x3xf32>
    %1 = vector.shape_cast %0 : vector<1x16x3xf32> to vector<16x3xf32>
    %c0_2 = arith.constant 0 : index
    %c0_3 = arith.constant 0 : index
    %2 = vector.load %arg6[%c0_2, %c0_3] : memref<3x512xbf16, #tpu.memory_space<vmem>>, vector<3x512xbf16>
    %3 = arith.truncf %1 : vector<16x3xf32> to vector<16x3xbf16>
    %cst = arith.constant dense<0.000000e+00> : vector<16x512xf32>
    %4 = tpu.matmul %3, %2, %cst {dimension_numbers = #tpu.dot_dimension_numbers<[1], [0], [0], [1], [0, 0, 1, 1], [], []>} : vector<16x3xbf16>, vector<3x512xbf16>, vector<16x512xf32> -> vector<16x512xf32>
    %c0_4 = arith.constant 0 : index
    %c0_5 = arith.constant 0 : index
    %5 = vector.load %arg5[%c0_4, %c0_5] : memref<10x512xf32, #tpu.memory_space<vmem>>, vector<1x512xf32>
    %6 = vector.broadcast %5 : vector<1x512xf32> to vector<16x512xf32>
    %7 = arith.addf %4, %6 : vector<16x512xf32>
    %cst_6 = arith.constant 0.00999999977 : f32
    %8 = vector.broadcast %cst_6 : f32 to vector<16x512xf32>
    %9 = arith.mulf %8, %7 : vector<16x512xf32>
    %10 = arith.maximumf %7, %9 : vector<16x512xf32>
    %c0_7 = arith.constant 0 : index
    %c0_8 = arith.constant 0 : index
    %c0_9 = arith.constant 0 : index
    %11 = vector.load %arg4[%c0_7, %c0_8, %c0_9] : memref<7x512x512xbf16, #tpu.memory_space<vmem>>, vector<1x512x512xbf16>
    %12 = vector.shape_cast %11 : vector<1x512x512xbf16> to vector<512x512xbf16>
    %13 = arith.truncf %10 : vector<16x512xf32> to vector<16x512xbf16>
    %cst_10 = arith.constant dense<0.000000e+00> : vector<16x512xf32>
    %14 = tpu.matmul %13, %12, %cst_10 {dimension_numbers = #tpu.dot_dimension_numbers<[1], [0], [0], [1], [0, 0, 1, 1], [], []>} : vector<16x512xbf16>, vector<512x512xbf16>, vector<16x512xf32> -> vector<16x512xf32>
    %c1 = arith.constant 1 : index
    %c0_11 = arith.constant 0 : index
    %15 = vector.load %arg5[%c1, %c0_11] : memref<10x512xf32, #tpu.memory_space<vmem>>, vector<1x512xf32>
    %16 = vector.broadcast %15 : vector<1x512xf32> to vector<16x512xf32>
    %17 = arith.addf %14, %16 : vector<16x512xf32>
    %cst_12 = arith.constant 0.00999999977 : f32
    %18 = vector.broadcast %cst_12 : f32 to vector<16x512xf32>
    %19 = arith.mulf %18, %17 : vector<16x512xf32>
    %20 = arith.maximumf %17, %19 : vector<16x512xf32>
    %c1_13 = arith.constant 1 : index
    %c0_14 = arith.constant 0 : index
    %c0_15 = arith.constant 0 : index
    %21 = vector.load %arg4[%c1_13, %c0_14, %c0_15] : memref<7x512x512xbf16, #tpu.memory_space<vmem>>, vector<1x512x512xbf16>
    %22 = vector.shape_cast %21 : vector<1x512x512xbf16> to vector<512x512xbf16>
    %23 = arith.truncf %20 : vector<16x512xf32> to vector<16x512xbf16>
    %cst_16 = arith.constant dense<0.000000e+00> : vector<16x512xf32>
    %24 = tpu.matmul %23, %22, %cst_16 {dimension_numbers = #tpu.dot_dimension_numbers<[1], [0], [0], [1], [0, 0, 1, 1], [], []>} : vector<16x512xbf16>, vector<512x512xbf16>, vector<16x512xf32> -> vector<16x512xf32>
    %c2 = arith.constant 2 : index
    %c0_17 = arith.constant 0 : index
    %25 = vector.load %arg5[%c2, %c0_17] : memref<10x512xf32, #tpu.memory_space<vmem>>, vector<1x512xf32>
    %26 = vector.broadcast %25 : vector<1x512xf32> to vector<16x512xf32>
    %27 = arith.addf %24, %26 : vector<16x512xf32>
    %cst_18 = arith.constant 0.00999999977 : f32
    %28 = vector.broadcast %cst_18 : f32 to vector<16x512xf32>
    %29 = arith.mulf %28, %27 : vector<16x512xf32>
    %30 = arith.maximumf %27, %29 : vector<16x512xf32>
    %31 = vector.extract_strided_slice %30 {offsets = [0, 0], sizes = [8, 512], strides = [1, 1]} : vector<16x512xf32> to vector<8x512xf32>
    %cst_19 = arith.constant dense<0.000000e+00> : vector<512xf32>
    %32 = vector.multi_reduction <add>, %31, %cst_19 [0] : vector<8x512xf32> to vector<512xf32>
    %33 = vector.shape_cast %32 : vector<512xf32> to vector<1x512xf32>
    %cst_20 = arith.constant 8.000000e+00 : f32
    %34 = vector.broadcast %cst_20 : f32 to vector<1x512xf32>
    %35 = arith.divf %33, %34 : vector<1x512xf32>
    %cst_21 = arith.constant dense<0.000000e+00> : vector<512xf32>
    %36 = vector.multi_reduction <add>, %30, %cst_21 [0] : vector<16x512xf32> to vector<512xf32>
    %37 = vector.shape_cast %36 : vector<512xf32> to vector<1x512xf32>
    %cst_22 = arith.constant 1.600000e+01 : f32
    %38 = vector.broadcast %cst_22 : f32 to vector<1x512xf32>
    %39 = arith.divf %37, %38 : vector<1x512xf32>
    %40 = tpu.concatenate %35, %39 in 0 : vector<1x512xf32>, vector<1x512xf32> -> vector<2x512xf32>
    %c2_23 = arith.constant 2 : index
    %c0_24 = arith.constant 0 : index
    %c0_25 = arith.constant 0 : index
    %41 = vector.load %arg4[%c2_23, %c0_24, %c0_25] : memref<7x512x512xbf16, #tpu.memory_space<vmem>>, vector<1x512x512xbf16>
    %42 = vector.shape_cast %41 : vector<1x512x512xbf16> to vector<512x512xbf16>
    %43 = arith.truncf %40 : vector<2x512xf32> to vector<2x512xbf16>
    %cst_26 = arith.constant dense<0.000000e+00> : vector<2x512xf32>
    %44 = tpu.matmul %43, %42, %cst_26 {dimension_numbers = #tpu.dot_dimension_numbers<[1], [0], [0], [1], [0, 0, 1, 1], [], []>} : vector<2x512xbf16>, vector<512x512xbf16>, vector<2x512xf32> -> vector<2x512xf32>
    %c3 = arith.constant 3 : index
    %c0_27 = arith.constant 0 : index
    %45 = vector.load %arg5[%c3, %c0_27] : memref<10x512xf32, #tpu.memory_space<vmem>>, vector<1x512xf32>
    %46 = vector.broadcast %45 : vector<1x512xf32> to vector<2x512xf32>
    %47 = arith.addf %44, %46 : vector<2x512xf32>
    %cst_28 = arith.constant 0.00999999977 : f32
    %48 = vector.broadcast %cst_28 : f32 to vector<2x512xf32>
    %49 = arith.mulf %48, %47 : vector<2x512xf32>
    %50 = arith.maximumf %47, %49 : vector<2x512xf32>
    %c3_29 = arith.constant 3 : index
    %c0_30 = arith.constant 0 : index
    %c0_31 = arith.constant 0 : index
    %51 = vector.load %arg4[%c3_29, %c0_30, %c0_31] : memref<7x512x512xbf16, #tpu.memory_space<vmem>>, vector<1x512x512xbf16>
    %52 = vector.shape_cast %51 : vector<1x512x512xbf16> to vector<512x512xbf16>
    %53 = arith.truncf %40 : vector<2x512xf32> to vector<2x512xbf16>
    %cst_32 = arith.constant dense<0.000000e+00> : vector<2x512xf32>
    %54 = tpu.matmul %53, %52, %cst_32 {dimension_numbers = #tpu.dot_dimension_numbers<[1], [0], [0], [1], [0, 0, 1, 1], [], []>} : vector<2x512xbf16>, vector<512x512xbf16>, vector<2x512xf32> -> vector<2x512xf32>
    %c4 = arith.constant 4 : index
    %c0_33 = arith.constant 0 : index
    %55 = vector.load %arg5[%c4, %c0_33] : memref<10x512xf32, #tpu.memory_space<vmem>>, vector<1x512xf32>
    %56 = vector.broadcast %55 : vector<1x512xf32> to vector<2x512xf32>
    %57 = arith.addf %54, %56 : vector<2x512xf32>
    %cst_34 = arith.constant 0.00999999977 : f32
    %58 = vector.broadcast %cst_34 : f32 to vector<2x512xf32>
    %59 = arith.mulf %58, %57 : vector<2x512xf32>
    %60 = arith.maximumf %57, %59 : vector<2x512xf32>
    %c0_35 = arith.constant 0 : index
    %c0_36 = arith.constant 0 : index
    %c0_37 = arith.constant 0 : index
    %61 = vector.load %arg9[%c0_35, %c0_36, %c0_37] : memref<2x512x32xbf16, #tpu.memory_space<vmem>>, vector<1x512x32xbf16>
    %62 = vector.shape_cast %61 : vector<1x512x32xbf16> to vector<512x32xbf16>
    %63 = arith.truncf %50 : vector<2x512xf32> to vector<2x512xbf16>
    %cst_38 = arith.constant dense<0.000000e+00> : vector<2x32xf32>
    %64 = tpu.matmul %63, %62, %cst_38 {dimension_numbers = #tpu.dot_dimension_numbers<[1], [0], [0], [1], [0, 0, 1, 1], [], []>} : vector<2x512xbf16>, vector<512x32xbf16>, vector<2x32xf32> -> vector<2x32xf32>
    %c0_39 = arith.constant 0 : index
    %c0_40 = arith.constant 0 : index
    %65 = vector.load %arg10[%c0_39, %c0_40] : memref<8x32xf32, #tpu.memory_space<vmem>>, vector<1x32xf32>
    %66 = vector.broadcast %65 : vector<1x32xf32> to vector<2x32xf32>
    %67 = arith.addf %64, %66 : vector<2x32xf32>
    %c1_41 = arith.constant 1 : index
    %c0_42 = arith.constant 0 : index
    %c0_43 = arith.constant 0 : index
    %68 = vector.load %arg9[%c1_41, %c0_42, %c0_43] : memref<2x512x32xbf16, #tpu.memory_space<vmem>>, vector<1x512x32xbf16>
    %69 = vector.shape_cast %68 : vector<1x512x32xbf16> to vector<512x32xbf16>
    %70 = arith.truncf %60 : vector<2x512xf32> to vector<2x512xbf16>
    %cst_44 = arith.constant dense<0.000000e+00> : vector<2x32xf32>
    %71 = tpu.matmul %70, %69, %cst_44 {dimension_numbers = #tpu.dot_dimension_numbers<[1], [0], [0], [1], [0, 0, 1, 1], [], []>} : vector<2x512xbf16>, vector<512x32xbf16>, vector<2x32xf32> -> vector<2x32xf32>
    %c1_45 = arith.constant 1 : index
    %c0_46 = arith.constant 0 : index
    %72 = vector.load %arg10[%c1_45, %c0_46] : memref<8x32xf32, #tpu.memory_space<vmem>>, vector<1x32xf32>
    %73 = vector.broadcast %72 : vector<1x32xf32> to vector<2x32xf32>
    %74 = arith.addf %71, %73 : vector<2x32xf32>
    %c0_47 = arith.constant 0 : index
    %c0_48 = arith.constant 0 : index
    %c0_49 = arith.constant 0 : index
    %75 = vector.load %arg3[%c0_47, %c0_48, %c0_49] : memref<1x2x32xf32, #tpu.memory_space<vmem>>, vector<1x2x32xf32>
    %76 = vector.shape_cast %75 : vector<1x2x32xf32> to vector<2x32xf32>
    %cst_50 = arith.constant 5.000000e-01 : f32
    %77 = vector.broadcast %cst_50 : f32 to vector<2x32xf32>
    %78 = arith.mulf %77, %74 : vector<2x32xf32>
    %79 = math.exp %78 : vector<2x32xf32>
    %80 = arith.mulf %76, %79 : vector<2x32xf32>
    %81 = arith.addf %80, %67 : vector<2x32xf32>
    %82 = vector.extract_strided_slice %67 {offsets = [0, 0], sizes = [1, 32], strides = [1, 1]} : vector<2x32xf32> to vector<1x32xf32>
    %83 = vector.extract_strided_slice %67 {offsets = [1, 0], sizes = [1, 32], strides = [1, 1]} : vector<2x32xf32> to vector<1x32xf32>
    %84 = vector.extract_strided_slice %74 {offsets = [0, 0], sizes = [1, 32], strides = [1, 1]} : vector<2x32xf32> to vector<1x32xf32>
    %85 = vector.extract_strided_slice %74 {offsets = [1, 0], sizes = [1, 32], strides = [1, 1]} : vector<2x32xf32> to vector<1x32xf32>
    %86 = arith.subf %84, %85 : vector<1x32xf32>
    %cst_51 = arith.constant 5.000000e-01 : f32
    %87 = vector.broadcast %cst_51 : f32 to vector<1x32xf32>
    %88 = arith.mulf %87, %86 : vector<1x32xf32>
    %89 = arith.subf %85, %84 : vector<1x32xf32>
    %90 = math.exp %89 : vector<1x32xf32>
    %cst_52 = arith.constant 5.000000e-01 : f32
    %91 = vector.broadcast %cst_52 : f32 to vector<1x32xf32>
    %92 = arith.mulf %91, %90 : vector<1x32xf32>
    %93 = arith.addf %88, %92 : vector<1x32xf32>
    %94 = arith.subf %83, %82 : vector<1x32xf32>
    %95 = arith.mulf %94, %94 : vector<1x32xf32>
    %cst_53 = arith.constant 5.000000e-01 : f32
    %96 = vector.broadcast %cst_53 : f32 to vector<1x32xf32>
    %97 = arith.mulf %96, %95 : vector<1x32xf32>
    %cst_54 = arith.constant 0.000000e+00 : f32
    %98 = vector.broadcast %cst_54 : f32 to vector<1x32xf32>
    %99 = arith.subf %98, %84 : vector<1x32xf32>
    %100 = math.exp %99 : vector<1x32xf32>
    %101 = arith.mulf %97, %100 : vector<1x32xf32>
    %102 = arith.addf %93, %101 : vector<1x32xf32>
    %cst_55 = arith.constant 5.000000e-01 : f32
    %103 = vector.broadcast %cst_55 : f32 to vector<1x32xf32>
    %104 = arith.subf %102, %103 : vector<1x32xf32>
    %cst_56 = arith.constant dense<0.000000e+00> : vector<1xf32>
    %105 = vector.multi_reduction <add>, %104, %cst_56 [1] : vector<1x32xf32> to vector<1xf32>
    %106 = vector.shape_cast %105 : vector<1xf32> to vector<1x1xf32>
    %c0_57 = arith.constant 0 : index
    %c0_58 = arith.constant 0 : index
    %107 = vector.load %arg8[%c0_57, %c0_58] : memref<32x512xbf16, #tpu.memory_space<vmem>>, vector<32x512xbf16>
    %108 = arith.truncf %81 : vector<2x32xf32> to vector<2x32xbf16>
    %cst_59 = arith.constant dense<0.000000e+00> : vector<2x512xf32>
    %109 = tpu.matmul %108, %107, %cst_59 {dimension_numbers = #tpu.dot_dimension_numbers<[1], [0], [0], [1], [0, 0, 1, 1], [], []>} : vector<2x32xbf16>, vector<32x512xbf16>, vector<2x512xf32> -> vector<2x512xf32>
    %c0_60 = arith.constant 0 : index
    %c0_61 = arith.constant 0 : index
    %c0_62 = arith.constant 0 : index
    %110 = vector.load %arg2[%c0_60, %c0_61, %c0_62] : memref<1x16x2xf32, #tpu.memory_space<vmem>>, vector<1x16x2xf32>
    %111 = vector.shape_cast %110 : vector<1x16x2xf32> to vector<16x2xf32>
    %c0_63 = arith.constant 0 : index
    %c0_64 = arith.constant 0 : index
    %112 = vector.load %arg7[%c0_63, %c0_64] : memref<2x512xbf16, #tpu.memory_space<vmem>>, vector<2x512xbf16>
    %113 = arith.truncf %111 : vector<16x2xf32> to vector<16x2xbf16>
    %cst_65 = arith.constant dense<0.000000e+00> : vector<16x512xf32>
    %114 = tpu.matmul %113, %112, %cst_65 {dimension_numbers = #tpu.dot_dimension_numbers<[1], [0], [0], [1], [0, 0, 1, 1], [], []>} : vector<16x2xbf16>, vector<2x512xbf16>, vector<16x512xf32> -> vector<16x512xf32>
    %c5 = arith.constant 5 : index
    %c0_66 = arith.constant 0 : index
    %115 = vector.load %arg5[%c5, %c0_66] : memref<10x512xf32, #tpu.memory_space<vmem>>, vector<1x512xf32>
    %116 = vector.extract_strided_slice %109 {offsets = [0, 0], sizes = [1, 512], strides = [1, 1]} : vector<2x512xf32> to vector<1x512xf32>
    %117 = vector.broadcast %116 : vector<1x512xf32> to vector<16x512xf32>
    %118 = arith.addf %114, %117 : vector<16x512xf32>
    %119 = vector.broadcast %115 : vector<1x512xf32> to vector<16x512xf32>
    %120 = arith.addf %118, %119 : vector<16x512xf32>
    %cst_67 = arith.constant 0.00999999977 : f32
    %121 = vector.broadcast %cst_67 : f32 to vector<16x512xf32>
    %122 = arith.mulf %121, %120 : vector<16x512xf32>
    %123 = arith.maximumf %120, %122 : vector<16x512xf32>
    %c0_68 = arith.constant 0 : index
    %c0_69 = arith.constant 0 : index
    %124 = vector.load %arg12[%c0_68, %c0_69] : memref<32x512xf32, #tpu.memory_space<vmem>>, vector<16x512xf32>
    tpu.vector_store %arg12[%c0_68, %c0_69], %123 {strides = array<i32>} : memref<32x512xf32, #tpu.memory_space<vmem>>, vector<16x512xf32>,
    %125 = vector.extract_strided_slice %109 {offsets = [1, 0], sizes = [1, 512], strides = [1, 1]} : vector<2x512xf32> to vector<1x512xf32>
    %126 = vector.broadcast %125 : vector<1x512xf32> to vector<16x512xf32>
    %127 = arith.addf %114, %126 : vector<16x512xf32>
    %128 = vector.broadcast %115 : vector<1x512xf32> to vector<16x512xf32>
    %129 = arith.addf %127, %128 : vector<16x512xf32>
    %cst_70 = arith.constant 0.00999999977 : f32
    %130 = vector.broadcast %cst_70 : f32 to vector<16x512xf32>
    %131 = arith.mulf %130, %129 : vector<16x512xf32>
    %132 = arith.maximumf %129, %131 : vector<16x512xf32>
    %c16 = arith.constant 16 : index
    %c0_71 = arith.constant 0 : index
    %133 = vector.load %arg12[%c16, %c0_71] : memref<32x512xf32, #tpu.memory_space<vmem>>, vector<16x512xf32>
    tpu.vector_store %arg12[%c16, %c0_71], %132 {strides = array<i32>} : memref<32x512xf32, #tpu.memory_space<vmem>>, vector<16x512xf32>,
    %c0_72 = arith.constant 0 : index
    %c0_73 = arith.constant 0 : index
    %134 = vector.load %arg12[%c0_72, %c0_73] : memref<32x512xf32, #tpu.memory_space<vmem>>, vector<32x512xf32>
    %c4_74 = arith.constant 4 : index
    %c0_75 = arith.constant 0 : index
    %c0_76 = arith.constant 0 : index
    %135 = vector.load %arg4[%c4_74, %c0_75, %c0_76] : memref<7x512x512xbf16, #tpu.memory_space<vmem>>, vector<1x512x512xbf16>
    %136 = vector.shape_cast %135 : vector<1x512x512xbf16> to vector<512x512xbf16>
    %137 = arith.truncf %134 : vector<32x512xf32> to vector<32x512xbf16>
    %cst_77 = arith.constant dense<0.000000e+00> : vector<32x512xf32>
    %138 = tpu.matmul %137, %136, %cst_77 {dimension_numbers = #tpu.dot_dimension_numbers<[1], [0], [0], [1], [0, 0, 1, 1], [], []>} : vector<32x512xbf16>, vector<512x512xbf16>, vector<32x512xf32> -> vector<32x512xf32>
    %c6 = arith.constant 6 : index
    %c0_78 = arith.constant 0 : index
    %139 = vector.load %arg5[%c6, %c0_78] : memref<10x512xf32, #tpu.memory_space<vmem>>, vector<1x512xf32>
    %140 = vector.broadcast %139 : vector<1x512xf32> to vector<32x512xf32>
    %141 = arith.addf %138, %140 : vector<32x512xf32>
    %cst_79 = arith.constant 0.00999999977 : f32
    %142 = vector.broadcast %cst_79 : f32 to vector<32x512xf32>
    %143 = arith.mulf %142, %141 : vector<32x512xf32>
    %144 = arith.maximumf %141, %143 : vector<32x512xf32>
    %c5_80 = arith.constant 5 : index
    %c0_81 = arith.constant 0 : index
    %c0_82 = arith.constant 0 : index
    %145 = vector.load %arg4[%c5_80, %c0_81, %c0_82] : memref<7x512x512xbf16, #tpu.memory_space<vmem>>, vector<1x512x512xbf16>
    %146 = vector.shape_cast %145 : vector<1x512x512xbf16> to vector<512x512xbf16>
    %147 = arith.truncf %144 : vector<32x512xf32> to vector<32x512xbf16>
    %cst_83 = arith.constant dense<0.000000e+00> : vector<32x512xf32>
    %148 = tpu.matmul %147, %146, %cst_83 {dimension_numbers = #tpu.dot_dimension_numbers<[1], [0], [0], [1], [0, 0, 1, 1], [], []>} : vector<32x512xbf16>, vector<512x512xbf16>, vector<32x512xf32> -> vector<32x512xf32>
    %c7 = arith.constant 7 : index
    %c0_84 = arith.constant 0 : index
    %149 = vector.load %arg5[%c7, %c0_84] : memref<10x512xf32, #tpu.memory_space<vmem>>, vector<1x512xf32>
    %150 = vector.broadcast %149 : vector<1x512xf32> to vector<32x512xf32>
    %151 = arith.addf %148, %150 : vector<32x512xf32>
    %cst_85 = arith.constant 0.00999999977 : f32
    %152 = vector.broadcast %cst_85 : f32 to vector<32x512xf32>
    %153 = arith.mulf %152, %151 : vector<32x512xf32>
    %154 = arith.maximumf %151, %153 : vector<32x512xf32>
    %c6_86 = arith.constant 6 : index
    %c0_87 = arith.constant 0 : index
    %c0_88 = arith.constant 0 : index
    %155 = vector.load %arg4[%c6_86, %c0_87, %c0_88] : memref<7x512x512xbf16, #tpu.memory_space<vmem>>, vector<1x512x512xbf16>
    %156 = vector.shape_cast %155 : vector<1x512x512xbf16> to vector<512x512xbf16>
    %157 = arith.truncf %154 : vector<32x512xf32> to vector<32x512xbf16>
    %cst_89 = arith.constant dense<0.000000e+00> : vector<32x512xf32>
    %158 = tpu.matmul %157, %156, %cst_89 {dimension_numbers = #tpu.dot_dimension_numbers<[1], [0], [0], [1], [0, 0, 1, 1], [], []>} : vector<32x512xbf16>, vector<512x512xbf16>, vector<32x512xf32> -> vector<32x512xf32>
    %c8 = arith.constant 8 : index
    %c0_90 = arith.constant 0 : index
    %159 = vector.load %arg5[%c8, %c0_90] : memref<10x512xf32, #tpu.memory_space<vmem>>, vector<1x512xf32>
    %160 = vector.broadcast %159 : vector<1x512xf32> to vector<32x512xf32>
    %161 = arith.addf %158, %160 : vector<32x512xf32>
    %cst_91 = arith.constant 0.00999999977 : f32
    %162 = vector.broadcast %cst_91 : f32 to vector<32x512xf32>
    %163 = arith.mulf %162, %161 : vector<32x512xf32>
    %164 = arith.maximumf %161, %163 : vector<32x512xf32>
    %c9 = arith.constant 9 : index
    %c0_92 = arith.constant 0 : index
    %165 = vector.load %arg5[%c9, %c0_92] : memref<10x512xf32, #tpu.memory_space<vmem>>, vector<1x512xf32>
    %166 = vector.broadcast %165 : vector<1x512xf32> to vector<32x512xf32>
    %167 = arith.mulf %164, %166 : vector<32x512xf32>
    %cst_93 = arith.constant dense<0.000000e+00> : vector<32xf32>
    %168 = vector.multi_reduction <add>, %167, %cst_93 [1] : vector<32x512xf32> to vector<32xf32>
    %169 = vector.shape_cast %168 : vector<32xf32> to vector<32x1xf32>
    %c2_94 = arith.constant 2 : index
    %c0_95 = arith.constant 0 : index
    %170 = vector.load %arg10[%c2_94, %c0_95] : memref<8x32xf32, #tpu.memory_space<vmem>>, vector<1x1xf32>
    %171 = vector.broadcast %170 : vector<1x1xf32> to vector<32x1xf32>
    %172 = arith.addf %169, %171 : vector<32x1xf32>
    %173 = arith.negf %172 : vector<32x1xf32>
    %174 = math.exp %173 : vector<32x1xf32>
    %cst_96 = arith.constant 1.000000e+00 : f32
    %175 = vector.broadcast %cst_96 : f32 to vector<32x1xf32>
    %176 = arith.addf %175, %174 : vector<32x1xf32>
    %177 = arith.divf %175, %176 : vector<32x1xf32>
    %178 = vector.shape_cast %177 : vector<32x1xf32> to vector<32x1xf32>
    %179 = vector.broadcast %178 : vector<32x1xf32> to vector<32x128xf32>
    %c0_97 = arith.constant 0 : index
    %c0_98 = arith.constant 0 : index
    %c0_99 = arith.constant 0 : index
    %180 = vector.load %arg11[%c0_97, %c0_98, %c0_99] : memref<1x40x128xf32, #tpu.memory_space<vmem>>, vector<1x32x128xf32>
    %181 = vector.shape_cast %180 : vector<1x32x128xf32> to vector<32x128xf32>
    %182 = vector.shape_cast %179 : vector<32x128xf32> to vector<1x32x128xf32>
    tpu.vector_store %arg11[%c0_97, %c0_98, %c0_99], %182 {strides = array<i32>} : memref<1x40x128xf32, #tpu.memory_space<vmem>>, vector<1x32x128xf32>,
    %183 = vector.shape_cast %106 : vector<1x1xf32> to vector<1x1xf32>
    %184 = vector.broadcast %183 : vector<1x1xf32> to vector<8x128xf32>
    %c0_100 = arith.constant 0 : index
    %c32 = arith.constant 32 : index
    %c0_101 = arith.constant 0 : index
    %185 = vector.load %arg11[%c0_100, %c32, %c0_101] : memref<1x40x128xf32, #tpu.memory_space<vmem>>, vector<1x8x128xf32>
    %186 = vector.shape_cast %185 : vector<1x8x128xf32> to vector<8x128xf32>
    %187 = vector.shape_cast %184 : vector<8x128xf32> to vector<1x8x128xf32>
    tpu.vector_store %arg11[%c0_100, %c32, %c0_101], %187 {strides = array<i32>} : memref<1x40x128xf32, #tpu.memory_space<vmem>>, vector<1x8x128xf32>,
    return
  }
  func.func @transform_0(%arg0: i32) -> (i32, i32, i32) {
    %c0_i32 = arith.constant 0 : i32
    %c0_i32_0 = arith.constant 0 : i32
    %c0_i32_1 = arith.constant 0 : i32
    return %arg0, %c0_i32, %c0_i32_0 : i32, i32, i32
  }
  func.func @transform_1(%arg0: i32) -> (i32, i32, i32) {
    %c0_i32 = arith.constant 0 : i32
    %c0_i32_0 = arith.constant 0 : i32
    %c0_i32_1 = arith.constant 0 : i32
    return %arg0, %c0_i32, %c0_i32_0 : i32, i32, i32
  }
  func.func @transform_2(%arg0: i32) -> (i32, i32, i32) {
    %c0_i32 = arith.constant 0 : i32
    %c0_i32_0 = arith.constant 0 : i32
    %c0_i32_1 = arith.constant 0 : i32
    return %arg0, %c0_i32, %c0_i32_0 : i32, i32, i32
  }
  func.func @transform_3(%arg0: i32) -> (i32, i32, i32) {
    %c0_i32 = arith.constant 0 : i32
    %c0_i32_0 = arith.constant 0 : i32
    %c0_i32_1 = arith.constant 0 : i32
    %c0_i32_2 = arith.constant 0 : i32
    return %c0_i32, %c0_i32_0, %c0_i32_1 : i32, i32, i32
  }
  func.func @transform_4(%arg0: i32) -> (i32, i32) {
    %c0_i32 = arith.constant 0 : i32
    %c0_i32_0 = arith.constant 0 : i32
    %c0_i32_1 = arith.constant 0 : i32
    return %c0_i32, %c0_i32_0 : i32, i32
  }
  func.func @transform_5(%arg0: i32) -> (i32, i32) {
    %c0_i32 = arith.constant 0 : i32
    %c0_i32_0 = arith.constant 0 : i32
    %c0_i32_1 = arith.constant 0 : i32
    return %c0_i32, %c0_i32_0 : i32, i32
  }
  func.func @transform_6(%arg0: i32) -> (i32, i32) {
    %c0_i32 = arith.constant 0 : i32
    %c0_i32_0 = arith.constant 0 : i32
    %c0_i32_1 = arith.constant 0 : i32
    return %c0_i32, %c0_i32_0 : i32, i32
  }
  func.func @transform_7(%arg0: i32) -> (i32, i32) {
    %c0_i32 = arith.constant 0 : i32
    %c0_i32_0 = arith.constant 0 : i32
    %c0_i32_1 = arith.constant 0 : i32
    return %c0_i32, %c0_i32_0 : i32, i32
  }
  func.func @transform_8(%arg0: i32) -> (i32, i32, i32) {
    %c0_i32 = arith.constant 0 : i32
    %c0_i32_0 = arith.constant 0 : i32
    %c0_i32_1 = arith.constant 0 : i32
    %c0_i32_2 = arith.constant 0 : i32
    return %c0_i32, %c0_i32_0, %c0_i32_1 : i32, i32, i32
  }
  func.func @transform_9(%arg0: i32) -> (i32, i32) {
    %c0_i32 = arith.constant 0 : i32
    %c0_i32_0 = arith.constant 0 : i32
    %c0_i32_1 = arith.constant 0 : i32
    return %c0_i32, %c0_i32_0 : i32, i32
  }
  func.func @transform_10(%arg0: i32) -> (i32, i32, i32) {
    %c0_i32 = arith.constant 0 : i32
    %c0_i32_0 = arith.constant 0 : i32
    %c0_i32_1 = arith.constant 0 : i32
    return %arg0, %c0_i32, %c0_i32_0 : i32, i32, i32
  }
}

</mosaic_0001>

<bundles_post_ra>
// kernel: neural_process_forward.1
= control target key start
LH: loop header
LB: loop body
LE: loop exit
PB: predicated region body
PF: predicated region fallthrough
CT: control target
= control target key end

     0   :  { %15 = vsyncpa [#allocation4], 0  ;;  %s15719_s0 = inlined_call_operand.vmem [shape: f32[4,16,3], index: 0, kind: input, shape index: {}]   ;;  %s15720_s1 = inlined_call_operand.vmem [shape: f32[4,16,2], index: 1, kind: input, shape index: {}]   ;;  %s15721_s2 = inlined_call_operand.vmem [shape: f32[4,2,32], index: 2, kind: input, shape index: {}]   ;;  %s15722_s3 = inlined_call_operand.hbm [shape: bf16[7,512,512], index: 3, kind: input, shape index: {}]   ;;  %s15723_s4 = inlined_call_operand.hbm [shape: f32[10,512], index: 4, kind: input, shape index: {}]   ;;  %s15724_s5 = inlined_call_operand.hbm [shape: bf16[3,512], index: 5, kind: input, shape index: {}]   ;;  %s15725_s6 = inlined_call_operand.hbm [shape: bf16[2,512], index: 6, kind: input, shape index: {}]   ;;  %s15726_s7 = inlined_call_operand.hbm [shape: bf16[32,512], index: 7, kind: input, shape index: {}]   ;;  %s15727_s8 = inlined_call_operand.vmem [shape: bf16[2,512,32], index: 8, kind: input, shape index: {}]   ;;  %s15728_s9 = inlined_call_operand.hbm [shape: f32[8,32], index: 9, kind: input, shape index: {}]   ;;  %s15729_s10 = inlined_call_operand.vmem [shape: f32[4,40,128], index: 10, kind: output, shape index: {}]  }
   0x1   :  { %16 = vsyncpa [#allocation6], 0 }
   0x2   :  { %17 = vsyncpa [#allocation9], 0 }
   0x3   :  { %18 = vsyncpa [#allocation12], 0  ;;  %s14688_s13 = smov 0  }
   0x4 LB: > { %s305_s16 = sshll.u32 %s15723_s4, 4  ;;  %s14697_s17 = sadd.s32 4294967295, %s14617_s13   ;;  %s14617_s13 = sphi %s14688_s13, %s24_s13   ;;  %s306_s16 = int_to_ptr.hbm [resolvable:$true] %s305_s16 }
   0x5   : > { %p9359_p0 = scmp.ge.s32.totalorder %s14617_s13, 1  ;;  %p280_p1 = scmp.lt.s32.totalorder %s14617_s13, 5 }
   0x6   : > { %p14349_p2 = scmp.eq.s32.totalorder %s14697_s17, 0  ;;  %s14619_s19 = smov [#allocation5]  }
   0x7   : > { %p14702_p3 = pnand %p9359_p0, %p280_p1  ;;  %s307_s20 = sshll.u32 %s14619_s19, 4  ;;  %s308_s20 = int_to_ptr.vmem [resolvable:$true] %s307_s20 }
   0x8   : > { %s332_s23 = sshll.u32 %s15725_s6, 4  ;;  %s14620_s25 = smov [#allocation8]   ;;  %s333_s23 = int_to_ptr.hbm [resolvable:$true] %s332_s23 }
   0x9   : > { %p14330_p4 = pneg %p14702_p3  ;;  %s334_s26 = sshll.u32 %s14620_s25, 4  ;;  %s335_s26 = int_to_ptr.vmem [resolvable:$true] %s334_s26 }
   0xa   : > { %s291_s29 = sshll.u32 %s15722_s3, 4  ;;  %s14621_s30 = smov 512   ;;  %s292_s29 = int_to_ptr.hbm [resolvable:$true] %s291_s29 }
   0xb   : > { %p14713_p5 = pnand %p14349_p2, %p14330_p4  ;;  %s14622_s11 = smov 32  }
   0xc   : > { %s14623_s12 = smov [#allocation3]   ;;  %s14624_s15 = smov 256  }
   0xd   : > { %14336 = dma.hbm_to_vmem [thread:$0]  (!%p14713_p5), %s306_s16, 1024, %s308_s20, [#allocation6], %s14621_s30, %s14621_s30, %s14622_s11  }
   0xe   : > { %14342 = dma.hbm_to_vmem [thread:$0]  (!%p14713_p5), %s333_s23, 64, %s335_s26, [#allocation9]  }
   0xf   : > { %s293_s14 = sshll.u32 %s14623_s12, 4  ;;  %s14625_s19 = smov 16   ;;  %s294_s14 = int_to_ptr.vmem [resolvable:$true] %s293_s14 }
  0x10   : > { %14333 = dma.hbm_to_vmem [thread:$0]  (!%p14713_p5), %s292_s29, 114688, %s294_s14, [#allocation4], %s14624_s15, %s14624_s15, %s14625_s19  }
  0x11   : > { %s320_s25 = sshll.u32 %s15724_s5, 4  ;;  %s14626_s27 = smov [#allocation7]   ;;  %s321_s25 = int_to_ptr.hbm [resolvable:$true] %s320_s25 }
  0x12   : > { %s322_s28 = sshll.u32 %s14626_s27, 4  ;;  %s343_s23 = sshll.u32 %s15726_s7, 4  ;;  %s323_s28 = int_to_ptr.vmem [resolvable:$true] %s322_s28  ;;  %s344_s23 = int_to_ptr.hbm [resolvable:$true] %s343_s23 }
  0x13   : > { %14339 = dma.hbm_to_vmem [thread:$0]  (!%p14713_p5), %s321_s25, 128, %s323_s28, [#allocation6]  }
  0x14   : > { %s14627_s26 = smov [#allocation10]   ;;  %s361_s12 = sshll.u32 %s15728_s9, 4  ;;  %s362_s12 = int_to_ptr.hbm [resolvable:$true] %s361_s12 }
  0x15   : > { %s345_s30 = sshll.u32 %s14627_s26, 4  ;;  %s14628_s14 = smov [#allocation11]   ;;  %s346_s30 = int_to_ptr.vmem [resolvable:$true] %s345_s30 }
  0x16   : > { %14345 = dma.hbm_to_vmem [thread:$0]  (!%p14713_p5), %s344_s23, 1024, %s346_s30, [#allocation9], %s14624_s15, %s14624_s15, %s14625_s19  }
  0x17   : > { %s363_s21 = sshll.u32 %s14628_s14, 4  ;;  %399 = sbr.rel (%p14702_p3) target bundleno = 2298 (0x8fa), region = 60  ;;  %s364_s21 = int_to_ptr.vmem [resolvable:$true] %s363_s21 }
  0x18   : > { %14348 = dma.hbm_to_vmem [thread:$0]  (!%p14713_p5), %s362_s12, 128, %s364_s21, [#allocation12]  }
  0x1c   : > { %14600 = dma.done.wait (%p14349_p2), [#allocation4], 114688  }
  0x1d   : > { %14602 = vsyncadd (%p14349_p2), [#allocation4], 4294852608 }
  0x1e   : > { %14604 = dma.done.wait (%p14349_p2), [#allocation6], 1152  }
  0x1f   : > { %14606 = vsyncadd (%p14349_p2), [#allocation6], 4294966144 }
  0x20   : > { %14608 = dma.done.wait (%p14349_p2), [#allocation9], 1088  }
  0x21   : > { %14610 = vsyncadd (%p14349_p2), [#allocation9], 4294966208 }
  0x22   : > { %14612 = dma.done.wait (%p14349_p2), [#allocation12], 128  }
  0x23   : > { %14614 = vsyncadd (%p14349_p2), [#allocation12], 4294967168  ;;  %p472_p6 = scmp.lt.s32.totalorder %s14697_s17, 3  ;;  %vm516_vm0 = vcmask 1040384   ;;  %v494_v0 = vld [vmem:[#allocation7] sm:$0xff]  ;;  %vm517_vm1 = vcmask 1041408  }
  0x24   : > { %507 = vst [vmem:[#allocation1] ss:$4 sm:$0xff] %v494_v0  ;;  %v14629_v1 = vmov 65535   ;;  %v5500_v4 = vld [vmem:[#allocation8] sm:$0xf]  ;;  %vm512_vm2 = vcmask 23552  }
  0x25   : > { %s15733_s17 = smov (!%p472_p6, %s14697_s17), 3  ;;  %v518_v2 = vsel %vm516_vm0, 4294967295, %v14629_v1  ;;  %v9498_v7 = vld [vmem:[#allocation3 + $0xe0] sm:$0xf]  ;;  %v13367_v8 = vld [vmem:[#allocation3 + $0xec] sm:$0xf0] }
  0x26   : > { %s13335_s18 = sshll.u32 %s15733_s17, 4  ;;  %v519_v3 = vsel %vm517_vm1, %v518_v2, 0  ;;  %v9626_v9 = vld [vmem:[#allocation3 + $0x1e0] sm:$0xf]  ;;  %v13399_v10 = vld [vmem:[#allocation3 + $0x1ec] sm:$0xf0]  ;;  %v9499_v23 = vor.u32 %v13367_v8, %v9498_v7 }
  0x27   : > { %s476_s19 = scalar_lea.vmem %s15719_s0, %s13335_s18  ;;  %v9754_v11 = vld [vmem:[#allocation3 + $0x2e0] sm:$0xf]  ;;  %v13431_v12 = vld [vmem:[#allocation3 + $0x2ec] sm:$0xf0]  ;;  %v9627_v24 = vor.u32 %v13399_v10, %v9626_v9  ;;  %s9378_s11 = sshll.u32 %s15733_s17, 1  ;;  %vm5442_vm5 = vcmask 261120  }
  0x28   : > { %v492_v5 = vld [vmem:[%s476_s19] sm:$0xff]  ;;  %v493_v6 = vld [vmem:[%s476_s19 + $0x8] sm:$0xff]  ;;  %v13463_v14 = vld [vmem:[#allocation3 + $0x3ec] sm:$0xf0]  ;;  %v9755_v30 = vor.u32 %v13431_v12, %v9754_v11  ;;  %s485_s14 = scalar_lea.vmem %s15721_s2, %s9378_s11  ;;  %vm5389_vm6 = vcmask 253952   ;;  %s481_s15 = scalar_lea.vmem %s15720_s1, %s13335_s18  ;;  %vm5508_vm7 = vcmask 15360  }
  0x29   : > { %v9882_v13 = vld [vmem:[#allocation3 + $0x3e0] sm:$0xf]  ;;  %v13363_v18 = vld [vmem:[#allocation3 + $0xcc] sm:$0xf0]  ;;  %v495_v27 = vpack.c.bf16 %v493_v6, %v492_v5  ;;  %s14305_s18 = smul.u32 40, %s15733_s17 }
  0x2a   : > { %v9482_v17 = vld [vmem:[#allocation3 + $0xc0] sm:$0xf]  ;;  %v13395_v29 = vld [vmem:[#allocation3 + $0x1cc] sm:$0xf0]  ;;  %v9883_v31 = vor.u32 %v13463_v14, %v9882_v13 }
  0x2b   : > { %v508_v15 = vld.sshfl [vmem:[#allocation1] sm:$0xff pattern:$0x73625140]  ;;  %v509_v16 = vld.sshfl [vmem:[#allocation1 + $0x8] sm:$0xff pattern:$0x73625140]  ;;  %v9483_v34 = vor.u32 %v13363_v18, %v9482_v17  ;;  %s15183_s22 = scalar_lea.vmem %s15729_s10, %s14305_s18 }
  0x2c   : > { %v520_v19 = vand.u32 %v519_v3, %v508_v15  ;;  %v522_v20 = vand.u32 %v519_v3, %v509_v16  ;;  %v510_v21 = vld.sshfl [vmem:[#allocation1 + $0x10] sm:$0xff pattern:$0x73625140]  ;;  %v511_v22 = vld.sshfl [vmem:[#allocation1 + $0x18] sm:$0xff pattern:$0x73625140] }
  0x2d   : > { %v524_v25 = vand.u32 %v519_v3, %v510_v21  ;;  %v526_v26 = vand.u32 %v519_v3, %v511_v22  ;;  %5503 = vst [vmem:[#allocation1] ss:$9 sm:$0xff] %v5500_v4  ;;  %v9610_v28 = vld [vmem:[#allocation3 + $0x1c0] sm:$0xf]  ;;  %v13427_v36 = vld [vmem:[#allocation3 + $0x2cc] sm:$0xf0] }
  0x2e   : > { %535 = vmatpush.bf16.msra.mxu0 %v520_v19  ;;  %549 = vmatpush.bf16.msra.mxu1 %v522_v20  ;;  %v9466_v32 = vld [vmem:[#allocation3 + $0xa0] sm:$0xf]  ;;  %v9611_v35 = vor.u32 %v13395_v29, %v9610_v28  ;;  %v13459_v38 = vld [vmem:[#allocation3 + $0x3cc] sm:$0xf0] }
  0x2f   : > { %563 = vmatpush.bf16.msra.mxu2 %v524_v25  ;;  %577 = vmatpush.bf16.msra.mxu3 %v526_v26  ;;  %v9738_v33 = vld [vmem:[#allocation3 + $0x2c0] sm:$0xf]  ;;  %v13359_v39 = vld [vmem:[#allocation3 + $0xac] sm:$0xf0] }
  0x30   : > { %v9866_v37 = vld [vmem:[#allocation3 + $0x3c0] sm:$0xf]  ;;  %v13391_v41 = vld [vmem:[#allocation3 + $0x1ac] sm:$0xf0]  ;;  %v9739_v42 = vor.u32 %v13427_v36, %v9738_v33  ;;  %v9467_v46 = vor.u32 %v13359_v39, %v9466_v32  ;;  %v9500_v39 = vld [vmem:[#allocation3 + $0xf0] sm:$0xf0] }
  0x31   : > { %9380 = vmatmul.msk.bf16.vlgmr.msra.gmra.mxu0 %vm512_vm2, %v495_v27  ;;  %9381 = vmatmul.msk.bf16.vlgmr.msra.gmra.mxu1 %vm512_vm2, %v495_v27  ;;  %v9594_v40 = vld [vmem:[#allocation3 + $0x1a0] sm:$0xf]  ;;  %v9867_v43 = vor.u32 %v13459_v38, %v9866_v37  ;;  %v13423_v48 = vld [vmem:[#allocation3 + $0x2ac] sm:$0xf0]  ;;  %v13365_v38 = vld [vmem:[#allocation3 + $0xe4] sm:$0xf] }
  0x32   : > { %1383 = vmatpush.bf16.msrb.mxu0 %v9499_v23  ;;  %1397 = vmatpush.bf16.msrb.mxu1 %v9627_v24  ;;  %v9450_v44 = vld [vmem:[#allocation3 + $0x80] sm:$0xf]  ;;  %v9595_v47 = vor.u32 %v13391_v41, %v9594_v40  ;;  %v13455_v50 = vld [vmem:[#allocation3 + $0x3ac] sm:$0xf0]  ;;  %v13397_v40 = vld [vmem:[#allocation3 + $0x1e4] sm:$0xf] }
  0x33   : > { %9382 = vmatmul.msk.bf16.vlgmr.msra.gmra.mxu2 %vm512_vm2, %v495_v27  ;;  %9383 = vmatmul.msk.bf16.vlgmr.msra.gmra.mxu3 %vm512_vm2, %v495_v27  ;;  %v9722_v45 = vld [vmem:[#allocation3 + $0x2a0] sm:$0xf]  ;;  %v13355_v51 = vld [vmem:[#allocation3 + $0x8c] sm:$0xf0]  ;;  %v9628_v41 = vld [vmem:[#allocation3 + $0x1f0] sm:$0xf0] }
  0x34   : > { %1411 = vmatpush.bf16.msrb.mxu2 %v9755_v30  ;;  %1425 = vmatpush.bf16.msrb.mxu3 %v9883_v31  ;;  %v9850_v49 = vld [vmem:[#allocation3 + $0x3a0] sm:$0xf]  ;;  %v13387_v53 = vld [vmem:[#allocation3 + $0x18c] sm:$0xf0]  ;;  %v9723_v54 = vor.u32 %v13423_v48, %v9722_v45  ;;  %v9451_v58 = vor.u32 %v13355_v51, %v9450_v44  ;;  %v13361_v48 = vld [vmem:[#allocation3 + $0xc4] sm:$0xf] }
  0x35   : > { %v9578_v52 = vld [vmem:[#allocation3 + $0x180] sm:$0xf]  ;;  %v9851_v55 = vor.u32 %v13455_v50, %v9850_v49  ;;  %v13419_v60 = vld [vmem:[#allocation3 + $0x28c] sm:$0xf0]  ;;  %v13429_v51 = vld [vmem:[#allocation3 + $0x2e4] sm:$0xf] }
  0x36   : > { %1384 = vmatpush.bf16.msrb.mxu0 %v9483_v34  ;;  %1398 = vmatpush.bf16.msrb.mxu1 %v9611_v35  ;;  %v9434_v56 = vld [vmem:[#allocation3 + $0x60] sm:$0xf]  ;;  %v9579_v59 = vor.u32 %v13387_v53, %v9578_v52  ;;  %v13451_v62 = vld [vmem:[#allocation3 + $0x38c] sm:$0xf0]  ;;  %v9503_v52 = vor.u32 %v13365_v38, %v9500_v39  ;;  %v9631_v53 = vor.u32 %v13397_v40, %v9628_v41  ;;  %v13345_v38 = vld [vmem:[#allocation3 + $0x44] sm:$0xf] }
  0x37   : > { %v9706_v57 = vld [vmem:[#allocation3 + $0x280] sm:$0xf]  ;;  %v13351_v63 = vld [vmem:[#allocation3 + $0x6c] sm:$0xf0]  ;;  %v9420_v39 = vld [vmem:[#allocation3 + $0x50] sm:$0xf0] }
  0x38   : > { %1412 = vmatpush.bf16.msrb.mxu2 %v9739_v42  ;;  %1426 = vmatpush.bf16.msrb.mxu3 %v9867_v43  ;;  %v9834_v61 = vld [vmem:[#allocation3 + $0x380] sm:$0xf]  ;;  %v13383_v1 = vld [vmem:[#allocation3 + $0x16c] sm:$0xf0]  ;;  %v9707_v2 = vor.u32 %v13419_v60, %v9706_v57  ;;  %v9435_v6 = vor.u32 %v13351_v63, %v9434_v56  ;;  %v9884_v56 = vld [vmem:[#allocation3 + $0x3f0] sm:$0xf0]  ;;  %v9423_v40 = vor.u32 %v13345_v38, %v9420_v39 }
  0x39   : > { %v9562_v0 = vld [vmem:[#allocation3 + $0x160] sm:$0xf]  ;;  %v9835_v3 = vor.u32 %v13451_v62, %v9834_v61  ;;  %v13415_v8 = vld [vmem:[#allocation3 + $0x26c] sm:$0xf0]  ;;  %v9484_v57 = vld [vmem:[#allocation3 + $0xd0] sm:$0xf0] }
  0x3a   : > { %1385 = vmatpush.bf16.msrb.mxu0 %v9467_v46  ;;  %1399 = vmatpush.bf16.msrb.mxu1 %v9595_v47  ;;  %v9418_v4 = vld [vmem:[#allocation3 + $0x40] sm:$0xf]  ;;  %v9563_v7 = vor.u32 %v13383_v1, %v9562_v0  ;;  %v13447_v10 = vld [vmem:[#allocation3 + $0x36c] sm:$0xf0]  ;;  %v13357_v0 = vld [vmem:[#allocation3 + $0xa4] sm:$0xf] }
  0x3b   : > { %v9690_v5 = vld [vmem:[#allocation3 + $0x260] sm:$0xf]  ;;  %v13347_v11 = vld [vmem:[#allocation3 + $0x4c] sm:$0xf0]  ;;  %v13425_v1 = vld [vmem:[#allocation3 + $0x2c4] sm:$0xf] }
  0x3c   : > { %1413 = vmatpush.bf16.msrb.mxu2 %v9723_v54  ;;  %1427 = vmatpush.bf16.msrb.mxu3 %v9851_v55  ;;  %v9818_v9 = vld [vmem:[#allocation3 + $0x360] sm:$0xf]  ;;  %v13379_v13 = vld [vmem:[#allocation3 + $0x14c] sm:$0xf0]  ;;  %v9691_v14 = vor.u32 %v13415_v8, %v9690_v5  ;;  %v9419_v18 = vor.u32 %v13347_v11, %v9418_v4  ;;  %v9756_v54 = vld [vmem:[#allocation3 + $0x2f0] sm:$0xf0] }
  0x3d   : > { %v9546_v12 = vld [vmem:[#allocation3 + $0x140] sm:$0xf]  ;;  %v9819_v15 = vor.u32 %v13447_v10, %v9818_v9  ;;  %v13411_v20 = vld [vmem:[#allocation3 + $0x24c] sm:$0xf0]  ;;  %v13461_v55 = vld [vmem:[#allocation3 + $0x3e4] sm:$0xf]  ;;  %v9759_v62 = vor.u32 %v13429_v51, %v9756_v54 }
  0x3e   : > { %1386 = vmatpush.bf16.msrb.mxu0 %v9451_v58  ;;  %1400 = vmatpush.bf16.msrb.mxu1 %v9579_v59  ;;  %v9402_v16 = vld [vmem:[#allocation3 + $0x20] sm:$0xf]  ;;  %v9547_v19 = vor.u32 %v13379_v13, %v9546_v12  ;;  %v13443_v22 = vld [vmem:[#allocation3 + $0x34c] sm:$0xf0]  ;;  %v13393_v58 = vld [vmem:[#allocation3 + $0x1c4] sm:$0xf]  ;;  %v9887_v63 = vor.u32 %v13461_v55, %v9884_v56 }
  0x3f   : > { %v9674_v17 = vld [vmem:[#allocation3 + $0x240] sm:$0xf]  ;;  %v13343_v23 = vld [vmem:[#allocation3 + $0x2c] sm:$0xf0]  ;;  %v9612_v59 = vld [vmem:[#allocation3 + $0x1d0] sm:$0xf0] }
  0x40   : > { %1414 = vmatpush.bf16.msrb.mxu2 %v9707_v2  ;;  %1428 = vmatpush.bf16.msrb.mxu3 %v9835_v3  ;;  %v9802_v21 = vld [vmem:[#allocation3 + $0x340] sm:$0xf]  ;;  %v13375_v25 = vld [vmem:[#allocation3 + $0x12c] sm:$0xf0]  ;;  %v9675_v26 = vor.u32 %v13411_v20, %v9674_v17  ;;  %v9403_v33 = vor.u32 %v13343_v23, %v9402_v16  ;;  %v9487_v2 = vor.u32 %v13361_v48, %v9484_v57  ;;  %v9740_v4 = vld [vmem:[#allocation3 + $0x2d0] sm:$0xf0] }
  0x41   : > { %v9530_v24 = vld [vmem:[#allocation3 + $0x120] sm:$0xf]  ;;  %v9803_v27 = vor.u32 %v13443_v22, %v9802_v21  ;;  %v13339_v29 = vld [vmem:[#allocation3 + $0xc] sm:$0xf0]  ;;  %v9615_v3 = vor.u32 %v13393_v58, %v9612_v59  ;;  %v13457_v5 = vld [vmem:[#allocation3 + $0x3c4] sm:$0xf]  ;;  %v9743_v10 = vor.u32 %v13425_v1, %v9740_v4 }
  0x42   : > { %1387 = vmatpush.bf16.msrb.mxu0 %v9435_v6  ;;  %1401 = vmatpush.bf16.msrb.mxu1 %v9563_v7  ;;  %v9386_v28 = vld [vmem:[#allocation3] sm:$0xf]  ;;  %v13407_v32 = vld [vmem:[#allocation3 + $0x22c] sm:$0xf0]  ;;  %v9531_v34 = vor.u32 %v13375_v25, %v9530_v24  ;;  %v9868_v6 = vld [vmem:[#allocation3 + $0x3d0] sm:$0xf0] }
  0x43   : > { %v9514_v30 = vld [vmem:[#allocation3 + $0x100] sm:$0xf]  ;;  %v13439_v36 = vld [vmem:[#allocation3 + $0x32c] sm:$0xf0]  ;;  %v9387_v46 = vor.u32 %v13339_v29, %v9386_v28  ;;  %v9468_v7 = vld [vmem:[#allocation3 + $0xb0] sm:$0xf0]  ;;  %v9871_v11 = vor.u32 %v13457_v5, %v9868_v6 }
  0x44   : > { %1415 = vmatpush.bf16.msrb.mxu2 %v9691_v14  ;;  %1429 = vmatpush.bf16.msrb.mxu3 %v9819_v15  ;;  %v9658_v31 = vld [vmem:[#allocation3 + $0x220] sm:$0xf]  ;;  %v13371_v37 = vld [vmem:[#allocation3 + $0x10c] sm:$0xf0]  ;;  %v13389_v8 = vld [vmem:[#allocation3 + $0x1a4] sm:$0xf]  ;;  %v9471_v12 = vor.u32 %v13357_v0, %v9468_v7 }
  0x45   : > { %v9786_v35 = vld [vmem:[#allocation3 + $0x320] sm:$0xf]  ;;  %v9659_v42 = vor.u32 %v13407_v32, %v9658_v31  ;;  %v13403_v45 = vld [vmem:[#allocation3 + $0x20c] sm:$0xf0]  ;;  %v9515_v47 = vor.u32 %v13371_v37, %v9514_v30  ;;  %v9596_v9 = vld [vmem:[#allocation3 + $0x1b0] sm:$0xf0] }
  0x46   : > { %1388 = vmatpush.bf16.msrb.mxu0 %v9419_v18  ;;  %1402 = vmatpush.bf16.msrb.mxu1 %v9547_v19  ;;  %v9787_v43 = vor.u32 %v13439_v36, %v9786_v35  ;;  %v9642_v44 = vld [vmem:[#allocation3 + $0x200] sm:$0xf]  ;;  %v13435_v50 = vld [vmem:[#allocation3 + $0x30c] sm:$0xf0]  ;;  %v9599_v13 = vor.u32 %v13389_v8, %v9596_v9  ;;  %v13353_v14 = vld [vmem:[#allocation3 + $0x84] sm:$0xf] }
  0x47   : > { %v9770_v49 = vld [vmem:[#allocation3 + $0x300] sm:$0xf]  ;;  %v9643_v60 = vor.u32 %v13403_v45, %v9642_v44  ;;  %v9452_v15 = vld [vmem:[#allocation3 + $0x90] sm:$0xf0]  ;;  %v13385_v16 = vld [vmem:[#allocation3 + $0x184] sm:$0xf] }
  0x48   : > { %1416 = vmatpush.bf16.msrb.mxu2 %v9675_v26  ;;  %1430 = vmatpush.bf16.msrb.mxu3 %v9803_v27  ;;  %v9771_v61 = vor.u32 %v13435_v50, %v9770_v49  ;;  %v9455_v17 = vor.u32 %v13353_v14, %v9452_v15  ;;  %v9580_v18 = vld [vmem:[#allocation3 + $0x190] sm:$0xf0]  ;;  %v13421_v20 = vld [vmem:[#allocation3 + $0x2a4] sm:$0xf]  ;;  %v13400_v39 = vld [vmem:[#allocation3 + $0x1f4] sm:$0xf0] }
  0x49   : > { %v9583_v19 = vor.u32 %v13385_v16, %v9580_v18  ;;  %v9724_v21 = vld [vmem:[#allocation3 + $0x2b0] sm:$0xf0]  ;;  %v13453_v22 = vld [vmem:[#allocation3 + $0x3a4] sm:$0xf] }
  0x4a   : > { %1389 = vmatpush.bf16.msrb.mxu0 %v9403_v33  ;;  %1403 = vmatpush.bf16.msrb.mxu1 %v9531_v34  ;;  %v9727_v23 = vor.u32 %v13421_v20, %v9724_v21  ;;  %v9852_v24 = vld [vmem:[#allocation3 + $0x3b0] sm:$0xf0]  ;;  %v13349_v26 = vld [vmem:[#allocation3 + $0x64] sm:$0xf] }
  0x4b   : > { %v9855_v25 = vor.u32 %v13453_v22, %v9852_v24  ;;  %v9436_v27 = vld [vmem:[#allocation3 + $0x70] sm:$0xf0]  ;;  %v13381_v28 = vld [vmem:[#allocation3 + $0x164] sm:$0xf] }
  0x4c   : > { %1417 = vmatpush.bf16.msrb.mxu2 %v9659_v42  ;;  %1431 = vmatpush.bf16.msrb.mxu3 %v9787_v43  ;;  %v9439_v29 = vor.u32 %v13349_v26, %v9436_v27  ;;  %v9564_v30 = vld [vmem:[#allocation3 + $0x170] sm:$0xf0]  ;;  %v13417_v32 = vld [vmem:[#allocation3 + $0x284] sm:$0xf] }
  0x4d   : > { %v9567_v31 = vor.u32 %v13381_v28, %v9564_v30  ;;  %v9708_v33 = vld [vmem:[#allocation3 + $0x290] sm:$0xf0]  ;;  %v13449_v34 = vld [vmem:[#allocation3 + $0x384] sm:$0xf] }
  0x4e   : > { %1390 = vmatpush.bf16.msrb.mxu0 %v9387_v46  ;;  %1404 = vmatpush.bf16.msrb.mxu1 %v9515_v47  ;;  %v9711_v35 = vor.u32 %v13417_v32, %v9708_v33  ;;  %v9836_v36 = vld [vmem:[#allocation3 + $0x390] sm:$0xf0]  ;;  %v13377_v41 = vld [vmem:[#allocation3 + $0x144] sm:$0xf]  ;;  %v9506_v33 = vld [vmem:[#allocation3 + $0xe8] sm:$0xf] }
  0x4f   : > { %v9839_v37 = vor.u32 %v13449_v34, %v9836_v36  ;;  %v9548_v42 = vld [vmem:[#allocation3 + $0x150] sm:$0xf0]  ;;  %v13413_v44 = vld [vmem:[#allocation3 + $0x264] sm:$0xf]  ;;  %v13368_v34 = vld [vmem:[#allocation3 + $0xf4] sm:$0xf0] }
  0x50   : > { %1418 = vmatpush.bf16.msrb.mxu2 %v9643_v60  ;;  %1432 = vmatpush.bf16.msrb.mxu3 %v9771_v61  ;;  %v9551_v43 = vor.u32 %v13377_v41, %v9548_v42  ;;  %v9692_v45 = vld [vmem:[#allocation3 + $0x270] sm:$0xf0]  ;;  %v13445_v46 = vld [vmem:[#allocation3 + $0x364] sm:$0xf] }
  0x51   : > { %v9695_v47 = vor.u32 %v13413_v44, %v9692_v45  ;;  %v9820_v48 = vld [vmem:[#allocation3 + $0x370] sm:$0xf0]  ;;  %v13341_v50 = vld [vmem:[#allocation3 + $0x24] sm:$0xf]  ;;  %v9507_v45 = vor.u32 %v13368_v34, %v9506_v33  ;;  %v9442_v33 = vld [vmem:[#allocation3 + $0x68] sm:$0xf] }
  0x52   : > { %1439 = vmatpush.bf16.msra.mxu0 %v9503_v52  ;;  %1453 = vmatpush.bf16.msra.mxu1 %v9631_v53  ;;  %v9823_v49 = vor.u32 %v13445_v46, %v9820_v48  ;;  %v9404_v51 = vld [vmem:[#allocation3 + $0x30] sm:$0xf0]  ;;  %v13373_v52 = vld [vmem:[#allocation3 + $0x124] sm:$0xf]  ;;  %v13352_v34 = vld [vmem:[#allocation3 + $0x74] sm:$0xf0] }
  0x53   : > { %v9407_v53 = vor.u32 %v13341_v50, %v9404_v51  ;;  %v9532_v54 = vld [vmem:[#allocation3 + $0x130] sm:$0xf0]  ;;  %v13409_v56 = vld [vmem:[#allocation3 + $0x244] sm:$0xf] }
  0x54   : > { %1467 = vmatpush.bf16.msra.mxu2 %v9759_v62  ;;  %1481 = vmatpush.bf16.msra.mxu3 %v9887_v63  ;;  %v9535_v55 = vor.u32 %v13373_v52, %v9532_v54  ;;  %v9676_v57 = vld [vmem:[#allocation3 + $0x250] sm:$0xf0]  ;;  %v13441_v58 = vld [vmem:[#allocation3 + $0x344] sm:$0xf]  ;;  %v13364_v52 = vld [vmem:[#allocation3 + $0xd4] sm:$0xf0] }
  0x55   : > { %v9679_v59 = vor.u32 %v13409_v56, %v9676_v57  ;;  %v9804_v60 = vld [vmem:[#allocation3 + $0x350] sm:$0xf0]  ;;  %v13337_v62 = vld [vmem:[#allocation3 + $0x4] sm:$0xf]  ;;  %v13396_v54 = vld [vmem:[#allocation3 + $0x1d4] sm:$0xf0] }
  0x56   : > { %1440 = vmatpush.bf16.msra.mxu0 %v9487_v2  ;;  %1454 = vmatpush.bf16.msra.mxu1 %v9615_v3  ;;  %v9807_v61 = vor.u32 %v13441_v58, %v9804_v60  ;;  %v9388_v63 = vld [vmem:[#allocation3 + $0x10] sm:$0xf0]  ;;  %v13369_v0 = vld [vmem:[#allocation3 + $0x104] sm:$0xf]  ;;  %v13432_v60 = vld [vmem:[#allocation3 + $0x2f4] sm:$0xf0] }
  0x57   : > { %v9391_v1 = vor.u32 %v13337_v62, %v9388_v63  ;;  %v9516_v2 = vld [vmem:[#allocation3 + $0x110] sm:$0xf0]  ;;  %v13405_v4 = vld [vmem:[#allocation3 + $0x224] sm:$0xf]  ;;  %v13464_v62 = vld [vmem:[#allocation3 + $0x3f4] sm:$0xf0] }
  0x58   : > { %1468 = vmatpush.bf16.msra.mxu2 %v9743_v10  ;;  %1482 = vmatpush.bf16.msra.mxu3 %v9871_v11  ;;  %v9519_v3 = vor.u32 %v13369_v0, %v9516_v2  ;;  %v9660_v5 = vld [vmem:[#allocation3 + $0x230] sm:$0xf0]  ;;  %v13437_v6 = vld [vmem:[#allocation3 + $0x324] sm:$0xf]  ;;  %v9474_v63 = vld [vmem:[#allocation3 + $0xa8] sm:$0xf] }
  0x59   : > { %v9788_v7 = vld [vmem:[#allocation3 + $0x330] sm:$0xf0]  ;;  %v9663_v8 = vor.u32 %v13405_v4, %v9660_v5  ;;  %v13401_v10 = vld [vmem:[#allocation3 + $0x204] sm:$0xf]  ;;  %v13360_v4 = vld [vmem:[#allocation3 + $0xb4] sm:$0xf0] }
  0x5a   : > { %1441 = vmatpush.bf16.msra.mxu0 %v9471_v12  ;;  %1455 = vmatpush.bf16.msra.mxu1 %v9599_v13  ;;  %v9791_v9 = vor.u32 %v13437_v6, %v9788_v7  ;;  %v9644_v11 = vld [vmem:[#allocation3 + $0x210] sm:$0xf0]  ;;  %v13433_v13 = vld [vmem:[#allocation3 + $0x304] sm:$0xf]  ;;  %v9602_v5 = vld [vmem:[#allocation3 + $0x1a8] sm:$0xf] }
  0x5b   : > { %v9647_v12 = vor.u32 %v13401_v10, %v9644_v11  ;;  %v9772_v14 = vld [vmem:[#allocation3 + $0x310] sm:$0xf0]  ;;  %v496_v16 = vld [vmem:[#allocation5] ss:$8 sm:$0xf] }
  0x5c   : > { %1469 = vmatpush.bf16.msra.mxu2 %v9727_v23  ;;  %1483 = vmatpush.bf16.msra.mxu3 %v9855_v25  ;;  %v9775_v15 = vor.u32 %v13433_v13, %v9772_v14  ;;  %v498_v20 = vperm.slane %v496_v16, 0  ;;  %v500_v26 = vperm.slane %v496_v16, 2  ;;  %v501_v27 = vperm.slane %v496_v16, 3  ;;  %v13392_v6 = vld [vmem:[#allocation3 + $0x1b4] sm:$0xf0] }
  0x5d   : > { %v9475_v13 = vor.u32 %v13360_v4, %v9474_v63  ;;  %v9746_v14 = vld [vmem:[#allocation3 + $0x2c8] sm:$0xf]  ;;  %v13444_v4 = vld [vmem:[#allocation3 + $0x354] sm:$0xf0] }
  0x5e   : > { %1442 = vmatpush.bf16.msra.mxu0 %v9455_v17  ;;  %1456 = vmatpush.bf16.msra.mxu1 %v9583_v19  ;;  %v499_v17 = vperm.slane %v496_v16, 1 }
  0x60   : > { %1470 = vmatpush.bf16.msra.mxu2 %v9711_v35  ;;  %1484 = vmatpush.bf16.msra.mxu3 %v9839_v37  ;;  %v9634_v35 = vld [vmem:[#allocation3 + $0x1e8] sm:$0xf] }
  0x61   : > { %v9635_v46 = vor.u32 %v13400_v39, %v9634_v35  ;;  %v9570_v35 = vld [vmem:[#allocation3 + $0x168] sm:$0xf] }
  0x62   : > { %1443 = vmatpush.bf16.msra.mxu0 %v9439_v29  ;;  %1457 = vmatpush.bf16.msra.mxu1 %v9567_v31  ;;  %v9714_v39 = vld [vmem:[#allocation3 + $0x288] sm:$0xf] }
  0x64   : > { %1471 = vmatpush.bf16.msra.mxu2 %v9695_v47  ;;  %1485 = vmatpush.bf16.msra.mxu3 %v9823_v49  ;;  %v9490_v47 = vld [vmem:[#allocation3 + $0xc8] sm:$0xf] }
  0x65   : > { %v9491_v2 = vor.u32 %v13364_v52, %v9490_v47  ;;  %v9554_v47 = vld [vmem:[#allocation3 + $0x148] sm:$0xf] }
  0x66   : > { %1444 = vmatpush.bf16.msra.mxu0 %v9423_v40  ;;  %1458 = vmatpush.bf16.msra.mxu1 %v9551_v43 }
  0x68   : > { %1472 = vmatpush.bf16.msra.mxu2 %v9679_v59  ;;  %1486 = vmatpush.bf16.msra.mxu3 %v9807_v61  ;;  %v9762_v59 = vld [vmem:[#allocation3 + $0x2e8] sm:$0xf] }
  0x69   : > { %v9890_v61 = vld [vmem:[#allocation3 + $0x3e8] sm:$0xf]  ;;  %v9763_v11 = vor.u32 %v13432_v60, %v9762_v59  ;;  %v13344_v60 = vld [vmem:[#allocation3 + $0x34] sm:$0xf0] }
  0x6a   : > { %1445 = vmatpush.bf16.msra.mxu0 %v9407_v53  ;;  %1459 = vmatpush.bf16.msra.mxu1 %v9535_v55  ;;  %v9618_v53 = vld [vmem:[#allocation3 + $0x1c8] sm:$0xf] }
  0x6b   : > { %v9410_v59 = vld [vmem:[#allocation3 + $0x28] sm:$0xf] }
  0x6c   : > { %1473 = vmatpush.bf16.msra.mxu2 %v9663_v8  ;;  %1487 = vmatpush.bf16.msra.mxu3 %v9791_v9 }
  0x6e   : > { %1446 = vmatpush.bf16.msra.mxu0 %v9391_v1  ;;  %1460 = vmatpush.bf16.msra.mxu1 %v9519_v3  ;;  %v9619_v3 = vor.u32 %v13396_v54, %v9618_v53  ;;  %v9698_v53 = vld [vmem:[#allocation3 + $0x268] sm:$0xf]  ;;  %v13416_v54 = vld [vmem:[#allocation3 + $0x274] sm:$0xf0] }
  0x6f   : > { %v9699_v63 = vor.u32 %v13416_v54, %v9698_v53  ;;  %v13426_v53 = vld [vmem:[#allocation3 + $0x2cc] sm:$0xf]  ;;  %v9748_v54 = vld [vmem:[#allocation3 + $0x2d8] sm:$0xf0] }
  0x70   : > { %1474 = vmatpush.bf16.msra.mxu2 %v9647_v12  ;;  %1488 = vmatpush.bf16.msra.mxu3 %v9775_v15  ;;  %v9891_v12 = vor.u32 %v13464_v62, %v9890_v61  ;;  %v13428_v15 = vld [vmem:[#allocation3 + $0x2d4] sm:$0xf0]  ;;  %v9538_v61 = vld [vmem:[#allocation3 + $0x128] sm:$0xf] }
  0x71   : > { %v13376_v62 = vld [vmem:[#allocation3 + $0x134] sm:$0xf0] }
  0xae   : > { %v537_v18 = vpop.f32.mrf.mxu0  ;;  %v551_v19 = vpop.f32.mrf.mxu1 }
  0xaf   : > { %v552_v21 = vadd.f32 %v551_v19, %v499_v17  ;;  %v538_v22 = vadd.f32 %v537_v18, %v498_v20  ;;  %v9603_v18 = vor.u32 %v13392_v6, %v9602_v5  ;;  %v9874_v19 = vld [vmem:[#allocation3 + $0x3c8] sm:$0xf]  ;;  %v9411_v5 = vor.u32 %v13344_v60, %v9410_v59  ;;  %v13354_v59 = vld [vmem:[#allocation3 + $0x8c] sm:$0xf]  ;;  %v9460_v60 = vld [vmem:[#allocation3 + $0x98] sm:$0xf0] }
  0xb0   : > { %v9539_v6 = vor.u32 %v13376_v62, %v9538_v61  ;;  %v13386_v61 = vld [vmem:[#allocation3 + $0x18c] sm:$0xf]  ;;  %v9588_v62 = vld [vmem:[#allocation3 + $0x198] sm:$0xf0] }
  0xb1   : > { %v585_v23 = vmul.f32 0.01, %v552_v21  ;;  %v584_v30 = vmul.f32 0.01, %v538_v22 }
  0xb3   : > { %v593_v36 = vmax.f32 %v552_v21, %v585_v23  ;;  %v592_v42 = vmax.f32 %v538_v22, %v584_v30  ;;  %v9458_v21 = vld [vmem:[#allocation3 + $0x88] sm:$0xf]  ;;  %v13356_v22 = vld [vmem:[#allocation3 + $0x94] sm:$0xf0] }
  0xb4   : > { %v9586_v23 = vld [vmem:[#allocation3 + $0x188] sm:$0xf]  ;;  %v13424_v30 = vld [vmem:[#allocation3 + $0x2b4] sm:$0xf0] }
  0xb6   : > { %v565_v24 = vpop.f32.mrf.mxu2  ;;  %v579_v25 = vpop.f32.mrf.mxu3 }
  0xb7   : > { %v539_v28 = vpop.f32.mrf.mxu0  ;;  %v553_v29 = vpop.f32.mrf.mxu1  ;;  %v566_v40 = vadd.f32 %v565_v24, %v500_v26  ;;  %v580_v41 = vadd.f32 %v579_v25, %v501_v27  ;;  %v13388_v24 = vld [vmem:[#allocation3 + $0x194] sm:$0xf0]  ;;  %v9747_v25 = vor.u32 %v13428_v15, %v9746_v14  ;;  %v13398_v15 = vld [vmem:[#allocation3 + $0x1ec] sm:$0xf] }
  0xb8   : > { %v540_v31 = vadd.f32 %v539_v28, %v498_v20  ;;  %v554_v32 = vadd.f32 %v553_v29, %v499_v17  ;;  %v13460_v20 = vld [vmem:[#allocation3 + $0x3d4] sm:$0xf0]  ;;  %v9459_v28 = vor.u32 %v13356_v22, %v9458_v21  ;;  %v9587_v29 = vor.u32 %v13388_v24, %v9586_v23  ;;  %v9794_v21 = vld [vmem:[#allocation3 + $0x328] sm:$0xf] }
  0xb9   : > { %v586_v55 = vmul.f32 0.01, %v566_v40  ;;  %v587_v56 = vmul.f32 0.01, %v580_v41  ;;  %v13440_v22 = vld [vmem:[#allocation3 + $0x334] sm:$0xf0] }
  0xba   : > { %v588_v37 = vmul.f32 0.01, %v540_v31  ;;  %v589_v38 = vmul.f32 0.01, %v554_v32 }
  0xbb   : > { %v594_v7 = vmax.f32 %v566_v40, %v586_v55  ;;  %v595_v8 = vmax.f32 %v580_v41, %v587_v56  ;;  %v13420_v40 = vld [vmem:[#allocation3 + $0x294] sm:$0xf0]  ;;  %v9842_v41 = vld [vmem:[#allocation3 + $0x388] sm:$0xf] }
  0xbc   : > { %v596_v43 = vmax.f32 %v540_v31, %v588_v37  ;;  %v597_v44 = vmax.f32 %v554_v32, %v589_v38  ;;  %v9858_v31 = vld [vmem:[#allocation3 + $0x3a8] sm:$0xf]  ;;  %v13456_v32 = vld [vmem:[#allocation3 + $0x3b4] sm:$0xf0] }
  0xbd   : > { %v9859_v38 = vor.u32 %v13456_v32, %v9858_v31  ;;  %v9826_v55 = vld [vmem:[#allocation3 + $0x368] sm:$0xf]  ;;  %v13448_v56 = vld [vmem:[#allocation3 + $0x374] sm:$0xf0]  ;;  %v9795_v31 = vor.u32 %v13440_v22, %v9794_v21  ;;  %v9620_v32 = vld [vmem:[#allocation3 + $0x1d8] sm:$0xf0] }
  0xbe   : > { %v14774_v48 = vpack.c.bf16 %v596_v43, %v592_v42  ;;  %v14776_v49 = vpack.c.bf16 %v597_v44, %v593_v36  ;;  %v567_v50 = vpop.f32.mrf.mxu2  ;;  %v581_v51 = vpop.f32.mrf.mxu3  ;;  %v13384_v36 = vld [vmem:[#allocation3 + $0x174] sm:$0xf0]  ;;  %v9443_v43 = vor.u32 %v13352_v34, %v9442_v33  ;;  %v9650_v33 = vld [vmem:[#allocation3 + $0x208] sm:$0xf]  ;;  %v13346_v21 = vld [vmem:[#allocation3 + $0x4c] sm:$0xf] }
  0xbf   : > { %v568_v57 = vadd.f32 %v567_v50, %v500_v26  ;;  %v582_v58 = vadd.f32 %v581_v51, %v501_v27  ;;  %v9875_v26 = vor.u32 %v13460_v20, %v9874_v19  ;;  %v9730_v27 = vld [vmem:[#allocation3 + $0x2a8] sm:$0xf]  ;;  %v13452_v42 = vld [vmem:[#allocation3 + $0x394] sm:$0xf0]  ;;  %v9571_v44 = vor.u32 %v13384_v36, %v9570_v35  ;;  %v9428_v22 = vld [vmem:[#allocation3 + $0x58] sm:$0xf0] }
  0xc0   : > { %1391 = vmatmul.bf16.vlgmr.msrb.gmra.mxu0 %v14774_v48  ;;  %1405 = vmatmul.bf16.vlgmr.msrb.gmra.mxu1 %v14776_v49  ;;  %v9731_v37 = vor.u32 %v13424_v30, %v9730_v27  ;;  %v13380_v50 = vld [vmem:[#allocation3 + $0x154] sm:$0xf0]  ;;  %v9715_v51 = vor.u32 %v13420_v40, %v9714_v39  ;;  %v9843_v52 = vor.u32 %v13452_v42, %v9842_v41  ;;  %v9666_v19 = vld [vmem:[#allocation3 + $0x228] sm:$0xf]  ;;  %v13362_v27 = vld [vmem:[#allocation3 + $0xcc] sm:$0xf] }
  0xc1   : > { %v590_v0 = vmul.f32 0.01, %v568_v57  ;;  %v591_v1 = vmul.f32 0.01, %v582_v58  ;;  %1495 = vmatpush.bf16.msrb.mxu0 %v9507_v45  ;;  %1509 = vmatpush.bf16.msrb.mxu1 %v9635_v46  ;;  %v9426_v45 = vld [vmem:[#allocation3 + $0x48] sm:$0xf] }
  0xc2   : > { %v13348_v46 = vld [vmem:[#allocation3 + $0x54] sm:$0xf0]  ;;  %v9778_v35 = vld [vmem:[#allocation3 + $0x308] sm:$0xf]  ;;  %v13462_v39 = vld [vmem:[#allocation3 + $0x3ec] sm:$0xf] }
  0xc3   : > { %v598_v9 = vmax.f32 %v568_v57, %v590_v0  ;;  %v599_v10 = vmax.f32 %v582_v58, %v591_v1  ;;  %v9427_v57 = vor.u32 %v13348_v46, %v9426_v45  ;;  %v9555_v58 = vor.u32 %v13380_v50, %v9554_v47  ;;  %v9682_v1 = vld [vmem:[#allocation3 + $0x248] sm:$0xf]  ;;  %v13408_v20 = vld [vmem:[#allocation3 + $0x234] sm:$0xf0]  ;;  %v9892_v40 = vld [vmem:[#allocation3 + $0x3f8] sm:$0xf0] }
  0xc4   : > { %v9827_v0 = vor.u32 %v13448_v56, %v9826_v55  ;;  %v9667_v30 = vor.u32 %v13408_v20, %v9666_v19  ;;  %v13404_v34 = vld [vmem:[#allocation3 + $0x214] sm:$0xf0]  ;;  %v9476_v46 = vld [vmem:[#allocation3 + $0xb8] sm:$0xf0]  ;;  %v13390_v47 = vld [vmem:[#allocation3 + $0x1ac] sm:$0xf] }
  0xc5   : > { %v14780_v16 = vpack.c.bf16 %v598_v9, %v594_v7  ;;  %v14782_v17 = vpack.c.bf16 %v599_v10, %v595_v8  ;;  %1496 = vmatpush.bf16.msrb.mxu0 %v9491_v2  ;;  %1510 = vmatpush.bf16.msrb.mxu1 %v9619_v3  ;;  %v13412_v2 = vld [vmem:[#allocation3 + $0x254] sm:$0xf0]  ;;  %v9810_v3 = vld [vmem:[#allocation3 + $0x348] sm:$0xf]  ;;  %v9604_v50 = vld [vmem:[#allocation3 + $0x1b8] sm:$0xf0] }
  0xc6   : > { %v9394_v7 = vld [vmem:[#allocation3 + $0x8] sm:$0xf]  ;;  %v13340_v8 = vld [vmem:[#allocation3 + $0x14] sm:$0xf0]  ;;  %v9811_v14 = vor.u32 %v13444_v4, %v9810_v3  ;;  %v13458_v55 = vld [vmem:[#allocation3 + $0x3cc] sm:$0xf] }
  0xc7   : > { %1419 = vmatmul.bf16.vlgmr.msrb.gmra.mxu2 %v14780_v16  ;;  %1433 = vmatmul.bf16.vlgmr.msrb.gmra.mxu3 %v14782_v17  ;;  %v9522_v9 = vld [vmem:[#allocation3 + $0x108] sm:$0xf]  ;;  %v13372_v10 = vld [vmem:[#allocation3 + $0x114] sm:$0xf0]  ;;  %v9395_v23 = vor.u32 %v13340_v8, %v9394_v7  ;;  %v9876_v56 = vld [vmem:[#allocation3 + $0x3d8] sm:$0xf0] }
  0xc8   : > { %1523 = vmatpush.bf16.msrb.mxu2 %v9763_v11  ;;  %1537 = vmatpush.bf16.msrb.mxu3 %v9891_v12  ;;  %v13366_v11 = vld [vmem:[#allocation3 + $0xec] sm:$0xf]  ;;  %v9508_v12 = vld [vmem:[#allocation3 + $0xf8] sm:$0xf0]  ;;  %v9523_v24 = vor.u32 %v13372_v10, %v9522_v9  ;;  %v13436_v36 = vld [vmem:[#allocation3 + $0x314] sm:$0xf0] }
  0xc9   : > { %1497 = vmatpush.bf16.msrb.mxu0 %v9475_v13  ;;  %1511 = vmatpush.bf16.msrb.mxu1 %v9603_v18  ;;  %v9683_v13 = vor.u32 %v13412_v2, %v9682_v1  ;;  %v9636_v18 = vld [vmem:[#allocation3 + $0x1f8] sm:$0xf0]  ;;  %v9779_v45 = vor.u32 %v13436_v36, %v9778_v35  ;;  %v13422_v1 = vld [vmem:[#allocation3 + $0x2ac] sm:$0xf] }
  0xca   : > { %v9732_v2 = vld [vmem:[#allocation3 + $0x2b8] sm:$0xf0]  ;;  %v13454_v3 = vld [vmem:[#allocation3 + $0x3ac] sm:$0xf] }
  0xcb   : > { %v9860_v4 = vld [vmem:[#allocation3 + $0x3b8] sm:$0xf0]  ;;  %v13350_v7 = vld [vmem:[#allocation3 + $0x6c] sm:$0xf] }
  0xcc   : > { %1524 = vmatpush.bf16.msrb.mxu2 %v9747_v25  ;;  %1538 = vmatpush.bf16.msrb.mxu3 %v9875_v26  ;;  %v9511_v25 = vor.u32 %v13366_v11, %v9508_v12  ;;  %v9639_v26 = vor.u32 %v13398_v15, %v9636_v18  ;;  %v9444_v8 = vld [vmem:[#allocation3 + $0x78] sm:$0xf0]  ;;  %v13382_v9 = vld [vmem:[#allocation3 + $0x16c] sm:$0xf]  ;;  %v9735_v11 = vor.u32 %v13422_v1, %v9732_v2  ;;  %v9994_v1 = vld [vmem:[#allocation3 + $0x4c0] sm:$0xf] }
  0xcd   : > { %1498 = vmatpush.bf16.msrb.mxu0 %v9459_v28  ;;  %1512 = vmatpush.bf16.msrb.mxu1 %v9587_v29  ;;  %v9492_v28 = vld [vmem:[#allocation3 + $0xd8] sm:$0xf0]  ;;  %v13394_v29 = vld [vmem:[#allocation3 + $0x1cc] sm:$0xf]  ;;  %v9863_v12 = vor.u32 %v13454_v3, %v9860_v4  ;;  %v9447_v19 = vor.u32 %v13350_v7, %v9444_v8  ;;  %v13523_v7 = vld [vmem:[#allocation3 + $0x5cc] sm:$0xf0] }
  0xce   : > { %v9495_v41 = vor.u32 %v13362_v27, %v9492_v28  ;;  %v9623_v42 = vor.u32 %v13394_v29, %v9620_v32  ;;  %v9572_v10 = vld [vmem:[#allocation3 + $0x178] sm:$0xf0]  ;;  %v13450_v15 = vld [vmem:[#allocation3 + $0x38c] sm:$0xf] }
  0xcf   : > { %v9844_v18 = vld [vmem:[#allocation3 + $0x398] sm:$0xf0]  ;;  %v9575_v20 = vor.u32 %v13382_v9, %v9572_v10  ;;  %v13414_v27 = vld [vmem:[#allocation3 + $0x26c] sm:$0xf] }
  0xd0   : > { %1525 = vmatpush.bf16.msrb.mxu2 %v9731_v37  ;;  %1539 = vmatpush.bf16.msrb.mxu3 %v9859_v38  ;;  %v13430_v37 = vld [vmem:[#allocation3 + $0x2ec] sm:$0xf]  ;;  %v9764_v38 = vld [vmem:[#allocation3 + $0x2f8] sm:$0xf0] }
  0xd1   : > { %1447 = vmatmul.bf16.vlgmr.msra.gmra.mxu0 %v14774_v48  ;;  %1461 = vmatmul.bf16.vlgmr.msra.gmra.mxu1 %v14776_v49  ;;  %v9700_v28 = vld [vmem:[#allocation3 + $0x278] sm:$0xf0]  ;;  %v13446_v29 = vld [vmem:[#allocation3 + $0x36c] sm:$0xf] }
  0xd2   : > { %1499 = vmatpush.bf16.msrb.mxu0 %v9443_v43  ;;  %1513 = vmatpush.bf16.msrb.mxu1 %v9571_v44  ;;  %v13358_v43 = vld [vmem:[#allocation3 + $0xac] sm:$0xf]  ;;  %v9651_v44 = vor.u32 %v13404_v34, %v9650_v33  ;;  %v9412_v34 = vld [vmem:[#allocation3 + $0x38] sm:$0xf0] }
  0xd3   : > { %v13342_v33 = vld [vmem:[#allocation3 + $0x2c] sm:$0xf]  ;;  %v9540_v36 = vld [vmem:[#allocation3 + $0x138] sm:$0xf0] }
  0xd4   : > { %1526 = vmatpush.bf16.msrb.mxu2 %v9715_v51  ;;  %1540 = vmatpush.bf16.msrb.mxu3 %v9843_v52  ;;  %v9767_v51 = vor.u32 %v13430_v37, %v9764_v38  ;;  %v9895_v52 = vor.u32 %v13462_v39, %v9892_v40  ;;  %v13374_v35 = vld [vmem:[#allocation3 + $0x12c] sm:$0xf]  ;;  %v9703_v37 = vor.u32 %v13414_v27, %v9700_v28  ;;  %v9684_v40 = vld [vmem:[#allocation3 + $0x258] sm:$0xf0]  ;;  %v9930_v27 = vld [vmem:[#allocation3 + $0x440] sm:$0xf] }
  0xd5   : > { %v13410_v39 = vld [vmem:[#allocation3 + $0x24c] sm:$0xf]  ;;  %v9652_v8 = vld [vmem:[#allocation3 + $0x218] sm:$0xf0]  ;;  %v13475_v28 = vld [vmem:[#allocation3 + $0x44c] sm:$0xf0] }
  0xd6   : > { %1500 = vmatpush.bf16.msrb.mxu0 %v9427_v57  ;;  %1514 = vmatpush.bf16.msrb.mxu1 %v9555_v58  ;;  %v9479_v57 = vor.u32 %v13358_v43, %v9476_v46  ;;  %v9607_v58 = vor.u32 %v13390_v47, %v9604_v50  ;;  %v9415_v43 = vor.u32 %v13342_v33, %v9412_v34  ;;  %v9396_v46 = vld [vmem:[#allocation3 + $0x18] sm:$0xf0]  ;;  %v13370_v47 = vld [vmem:[#allocation3 + $0x10c] sm:$0xf]  ;;  %v9898_v33 = vld [vmem:[#allocation3 + $0x400] sm:$0xf] }
  0xd7   : > { %1475 = vmatmul.bf16.vlgmr.msra.gmra.mxu2 %v14780_v16  ;;  %1489 = vmatmul.bf16.vlgmr.msra.gmra.mxu3 %v14782_v17  ;;  %v9524_v50 = vld [vmem:[#allocation3 + $0x118] sm:$0xf0]  ;;  %v13434_v9 = vld [vmem:[#allocation3 + $0x30c] sm:$0xf]  ;;  %v10090_v34 = vld [vmem:[#allocation3 + $0x580] sm:$0xf] }
  0xd8   : > { %1527 = vmatpush.bf16.msrb.mxu2 %v9699_v63  ;;  %1541 = vmatpush.bf16.msrb.mxu3 %v9827_v0  ;;  %v9751_v63 = vor.u32 %v13426_v53, %v9748_v54  ;;  %v9879_v0 = vor.u32 %v13458_v55, %v9876_v56  ;;  %v9687_v53 = vor.u32 %v13410_v39, %v9684_v40  ;;  %v13495_v55 = vld [vmem:[#allocation3 + $0x4ec] sm:$0xf0]  ;;  %v10138_v56 = vld [vmem:[#allocation3 + $0x5e0] sm:$0xf]  ;;  %v9780_v10 = vld [vmem:[#allocation3 + $0x318] sm:$0xf0] }
  0xd9   : > { %v10074_v40 = vld [vmem:[#allocation3 + $0x560] sm:$0xf] }
  0xda   : > { %1501 = vmatpush.bf16.msrb.mxu0 %v9411_v5  ;;  %1515 = vmatpush.bf16.msrb.mxu1 %v9539_v6  ;;  %v9463_v5 = vor.u32 %v13354_v59, %v9460_v60  ;;  %v9591_v6 = vor.u32 %v13386_v61, %v9588_v62  ;;  %v13438_v59 = vld [vmem:[#allocation3 + $0x32c] sm:$0xf]  ;;  %v9796_v60 = vld [vmem:[#allocation3 + $0x338] sm:$0xf0]  ;;  %v9527_v62 = vor.u32 %v13370_v47, %v9524_v50 }
  0xdb   : > { %v9799_v4 = vor.u32 %v13438_v59, %v9796_v60  ;;  %v10042_v60 = vld [vmem:[#allocation3 + $0x520] sm:$0xf] }
  0xdc   : > { %1528 = vmatpush.bf16.msrb.mxu2 %v9683_v13  ;;  %1542 = vmatpush.bf16.msrb.mxu3 %v9811_v14  ;;  %v13418_v13 = vld [vmem:[#allocation3 + $0x28c] sm:$0xf]  ;;  %v9716_v14 = vld [vmem:[#allocation3 + $0x298] sm:$0xf0] }
  0xde   : > { %1502 = vmatpush.bf16.msrb.mxu0 %v9395_v23  ;;  %1516 = vmatpush.bf16.msrb.mxu1 %v9523_v24  ;;  %v13378_v23 = vld [vmem:[#allocation3 + $0x14c] sm:$0xf]  ;;  %v9556_v24 = vld [vmem:[#allocation3 + $0x158] sm:$0xf0] }
  0xdf   : > { %v9559_v32 = vor.u32 %v13378_v23, %v9556_v24  ;;  %v9962_v23 = vld [vmem:[#allocation3 + $0x480] sm:$0xf]  ;;  %v13483_v24 = vld [vmem:[#allocation3 + $0x48c] sm:$0xf0] }
  0xe0   : > { %1529 = vmatpush.bf16.msrb.mxu2 %v9667_v30  ;;  %1543 = vmatpush.bf16.msrb.mxu3 %v9795_v31  ;;  %v9828_v30 = vld [vmem:[#allocation3 + $0x378] sm:$0xf0]  ;;  %v9431_v31 = vor.u32 %v13346_v21, %v9428_v22 }
  0xe1   : > { %1503 = vmatmul.bf16.vlgmr.msrb.gmra.mxu0 %v14774_v48  ;;  %1517 = vmatmul.bf16.vlgmr.msrb.gmra.mxu1 %v14776_v49  ;;  %v9831_v38 = vor.u32 %v13446_v29, %v9828_v30  ;;  %v9931_v29 = vor.u32 %v13475_v28, %v9930_v27  ;;  %v9914_v30 = vld [vmem:[#allocation3 + $0x420] sm:$0xf]  ;;  %v13539_v27 = vld [vmem:[#allocation3 + $0x64c] sm:$0xf0] }
  0xe2   : > { %1551 = vmatpush.bf16.msra.mxu0 %v9511_v25  ;;  %1565 = vmatpush.bf16.msra.mxu1 %v9639_v26  ;;  %v9719_v25 = vor.u32 %v13418_v13, %v9716_v14  ;;  %v9847_v26 = vor.u32 %v13450_v15, %v9844_v18  ;;  %v9783_v14 = vor.u32 %v13434_v9, %v9780_v10  ;;  %v9978_v15 = vld [vmem:[#allocation3 + $0x4a0] sm:$0xf]  ;;  %v13487_v18 = vld [vmem:[#allocation3 + $0x4ac] sm:$0xf0]  ;;  %v13477_v10 = vld [vmem:[#allocation3 + $0x464] sm:$0xf] }
  0xe3   : > { %v9979_v21 = vor.u32 %v13487_v18, %v9978_v15  ;;  %v13547_v9 = vld [vmem:[#allocation3 + $0x68c] sm:$0xf0] }
  0xe4   : > { %1530 = vmatpush.bf16.msrb.mxu2 %v9651_v44  ;;  %1544 = vmatpush.bf16.msrb.mxu3 %v9779_v45  ;;  %v9543_v44 = vor.u32 %v13374_v35, %v9540_v36  ;;  %v13338_v45 = vld [vmem:[#allocation3 + $0xc] sm:$0xf]  ;;  %v13515_v35 = vld [vmem:[#allocation3 + $0x58c] sm:$0xf0]  ;;  %v13493_v36 = vld [vmem:[#allocation3 + $0x4e4] sm:$0xf] }
  0xe5   : > { %v9399_v61 = vor.u32 %v13338_v45, %v9396_v46  ;;  %v13489_v45 = vld [vmem:[#allocation3 + $0x4c4] sm:$0xf]  ;;  %v9996_v46 = vld [vmem:[#allocation3 + $0x4d0] sm:$0xf0] }
  0xe6   : > { %1552 = vmatpush.bf16.msra.mxu0 %v9495_v41  ;;  %1566 = vmatpush.bf16.msra.mxu1 %v9623_v42  ;;  %v13442_v41 = vld [vmem:[#allocation3 + $0x34c] sm:$0xf]  ;;  %v9812_v42 = vld [vmem:[#allocation3 + $0x358] sm:$0xf0]  ;;  %v9999_v50 = vor.u32 %v13489_v45, %v9996_v46  ;;  %v10394_v45 = vld [vmem:[#allocation3 + $0x7e0] sm:$0xf] }
  0xe7   : > { %1531 = vmatmul.bf16.vlgmr.msrb.gmra.mxu2 %v14780_v16  ;;  %1545 = vmatmul.bf16.vlgmr.msrb.gmra.mxu3 %v14782_v17  ;;  %v9815_v54 = vor.u32 %v13442_v41, %v9812_v42  ;;  %v13511_v41 = vld [vmem:[#allocation3 + $0x56c] sm:$0xf0]  ;;  %v10266_v42 = vld [vmem:[#allocation3 + $0x6e0] sm:$0xf] }
  0xe8   : > { %1579 = vmatpush.bf16.msra.mxu2 %v9767_v51  ;;  %1593 = vmatpush.bf16.msra.mxu3 %v9895_v52  ;;  %v13406_v51 = vld [vmem:[#allocation3 + $0x22c] sm:$0xf]  ;;  %v10010_v52 = vld [vmem:[#allocation3 + $0x4e0] sm:$0xf] }
  0xea   : > { %1553 = vmatpush.bf16.msra.mxu0 %v9479_v57  ;;  %1567 = vmatpush.bf16.msra.mxu1 %v9607_v58  ;;  %v13527_v57 = vld [vmem:[#allocation3 + $0x5ec] sm:$0xf0]  ;;  %v9668_v58 = vld [vmem:[#allocation3 + $0x238] sm:$0xf0] }
  0xeb   : > { %v10139_v2 = vor.u32 %v13527_v57, %v10138_v56  ;;  %v9671_v3 = vor.u32 %v13406_v51, %v9668_v58  ;;  %v10058_v51 = vld [vmem:[#allocation3 + $0x540] sm:$0xf]  ;;  %v13485_v56 = vld [vmem:[#allocation3 + $0x4a4] sm:$0xf]  ;;  %v9980_v57 = vld [vmem:[#allocation3 + $0x4b0] sm:$0xf0] }
  0xec   : > { %1580 = vmatpush.bf16.msra.mxu2 %v9751_v63  ;;  %1594 = vmatpush.bf16.msra.mxu3 %v9879_v0  ;;  %v13402_v63 = vld [vmem:[#allocation3 + $0x20c] sm:$0xf]  ;;  %v10011_v0 = vor.u32 %v13495_v55, %v10010_v52  ;;  %v13507_v52 = vld [vmem:[#allocation3 + $0x54c] sm:$0xf0]  ;;  %v9983_v59 = vor.u32 %v13485_v56, %v9980_v57 }
  0xed   : > { %v9655_v13 = vor.u32 %v13402_v63, %v9652_v8  ;;  %v13555_v55 = vld [vmem:[#allocation3 + $0x6cc] sm:$0xf0] }
  0xee   : > { %1554 = vmatpush.bf16.msra.mxu0 %v9463_v5  ;;  %1568 = vmatpush.bf16.msra.mxu1 %v9591_v6  ;;  %v13491_v5 = vld [vmem:[#allocation3 + $0x4cc] sm:$0xf0]  ;;  %v10122_v6 = vld [vmem:[#allocation3 + $0x5c0] sm:$0xf] }
  0xef   : > { %v14798_v56 = vld [vmem:[#allocation5 + $0x1] ss:$8 sm:$0xf] }
  0xf0   : > { %1581 = vmatpush.bf16.msra.mxu2 %v9735_v11  ;;  %1595 = vmatpush.bf16.msra.mxu3 %v9863_v12  ;;  %v9995_v11 = vor.u32 %v13491_v5, %v9994_v1  ;;  %v10123_v12 = vor.u32 %v13523_v7, %v10122_v6  ;;  %v13481_v1 = vld [vmem:[#allocation3 + $0x484] sm:$0xf]  ;;  %v10026_v5 = vld [vmem:[#allocation3 + $0x500] sm:$0xf]  ;;  %v13499_v6 = vld [vmem:[#allocation3 + $0x50c] sm:$0xf0] }
  0xf1   : > { %v10218_v7 = vld [vmem:[#allocation3 + $0x680] sm:$0xf]  ;;  %v10027_v8 = vor.u32 %v13499_v6, %v10026_v5 }
  0xf2   : > { %1555 = vmatpush.bf16.msra.mxu0 %v9447_v19  ;;  %1569 = vmatpush.bf16.msra.mxu1 %v9575_v20  ;;  %v10106_v19 = vld [vmem:[#allocation3 + $0x5a0] sm:$0xf]  ;;  %v13519_v20 = vld [vmem:[#allocation3 + $0x5ac] sm:$0xf0] }
  0xf3   : > { %v10107_v22 = vor.u32 %v13519_v20, %v10106_v19  ;;  %v10202_v19 = vld [vmem:[#allocation3 + $0x660] sm:$0xf]  ;;  %v13543_v20 = vld [vmem:[#allocation3 + $0x66c] sm:$0xf0] }
  0xf4   : > { %1582 = vmatpush.bf16.msra.mxu2 %v9719_v25  ;;  %1596 = vmatpush.bf16.msra.mxu3 %v9847_v26  ;;  %v9963_v25 = vor.u32 %v13483_v24, %v9962_v23  ;;  %v9932_v23 = vld [vmem:[#allocation3 + $0x450] sm:$0xf0]  ;;  %v13521_v24 = vld [vmem:[#allocation3 + $0x5c4] sm:$0xf]  ;;  %v10362_v6 = vld [vmem:[#allocation3 + $0x7a0] sm:$0xf] }
  0xf6   : > { %1556 = vmatpush.bf16.msra.mxu0 %v9431_v31  ;;  %1570 = vmatpush.bf16.msra.mxu1 %v9559_v32  ;;  %v13471_v31 = vld [vmem:[#allocation3 + $0x42c] sm:$0xf0] }
  0xf7   : > { %v9915_v32 = vor.u32 %v13471_v31, %v9914_v30  ;;  %v9916_v30 = vld [vmem:[#allocation3 + $0x430] sm:$0xf0]  ;;  %v13517_v31 = vld [vmem:[#allocation3 + $0x5a4] sm:$0xf] }
  0xf8   : > { %1583 = vmatpush.bf16.msra.mxu2 %v9703_v37  ;;  %1597 = vmatpush.bf16.msra.mxu3 %v9831_v38  ;;  %v10012_v37 = vld [vmem:[#allocation3 + $0x4f0] sm:$0xf0]  ;;  %v10091_v38 = vor.u32 %v13515_v35, %v10090_v34  ;;  %v10170_v34 = vld [vmem:[#allocation3 + $0x620] sm:$0xf] }
  0xf9   : > { %v10015_v39 = vor.u32 %v13493_v36, %v10012_v37  ;;  %v13465_v36 = vld [vmem:[#allocation3 + $0x404] sm:$0xf]  ;;  %v9900_v37 = vld [vmem:[#allocation3 + $0x410] sm:$0xf0] }
  0xfa   : > { %1557 = vmatpush.bf16.msra.mxu0 %v9415_v43  ;;  %1571 = vmatpush.bf16.msra.mxu1 %v9543_v44  ;;  %v10075_v43 = vor.u32 %v13511_v41, %v10074_v40  ;;  %v13559_v44 = vld [vmem:[#allocation3 + $0x6ec] sm:$0xf0]  ;;  %v10092_v40 = vld [vmem:[#allocation3 + $0x590] sm:$0xf0] }
  0xfb   : > { %v10267_v47 = vor.u32 %v13559_v44, %v10266_v42  ;;  %v13531_v44 = vld [vmem:[#allocation3 + $0x60c] sm:$0xf0] }
  0xfc   : > { %1584 = vmatpush.bf16.msra.mxu2 %v9687_v53  ;;  %1598 = vmatpush.bf16.msra.mxu3 %v9815_v54  ;;  %v10250_v53 = vld [vmem:[#allocation3 + $0x6c0] sm:$0xf]  ;;  %v10059_v54 = vor.u32 %v13507_v52, %v10058_v51 }
  0xfd   : > { %v10251_v58 = vor.u32 %v13555_v55, %v10250_v53  ;;  %v10076_v53 = vld [vmem:[#allocation3 + $0x570] sm:$0xf0] }
  0xfe   : > { %1558 = vmatpush.bf16.msra.mxu0 %v9399_v61  ;;  %1572 = vmatpush.bf16.msra.mxu1 %v9527_v62  ;;  %v13503_v61 = vld [vmem:[#allocation3 + $0x52c] sm:$0xf0]  ;;  %v10234_v62 = vld [vmem:[#allocation3 + $0x6a0] sm:$0xf]  ;;  %v10268_v55 = vld [vmem:[#allocation3 + $0x6f0] sm:$0xf0] }
  0xff   : > { %v10043_v63 = vor.u32 %v13503_v61, %v10042_v60  ;;  %v13587_v60 = vld [vmem:[#allocation3 + $0x7cc] sm:$0xf0] }
 0x100   : > { %1585 = vmatpush.bf16.msra.mxu2 %v9671_v3  ;;  %1599 = vmatpush.bf16.msra.mxu3 %v9799_v4 }
 0x101   : > { %1559 = vmatmul.bf16.vlgmr.msra.gmra.mxu0 %v14774_v48  ;;  %1573 = vmatmul.bf16.vlgmr.msra.gmra.mxu1 %v14776_v49  ;;  %v9946_v48 = vld [vmem:[#allocation3 + $0x460] sm:$0xf]  ;;  %v13479_v49 = vld [vmem:[#allocation3 + $0x46c] sm:$0xf0] }
 0x102   : > { %2407 = vmatpush.bf16.msrb.mxu0 %v10011_v0  ;;  %2421 = vmatpush.bf16.msrb.mxu1 %v10139_v2  ;;  %v9947_v26 = vor.u32 %v13479_v49, %v9946_v48  ;;  %v13551_v0 = vld [vmem:[#allocation3 + $0x6ac] sm:$0xf0]  ;;  %v9964_v2 = vld [vmem:[#allocation3 + $0x490] sm:$0xf0] }
 0x103   : > { %v10235_v3 = vor.u32 %v13551_v0, %v10234_v62  ;;  %v9967_v4 = vor.u32 %v13481_v1, %v9964_v2  ;;  %v10124_v48 = vld [vmem:[#allocation3 + $0x5d0] sm:$0xf0]  ;;  %v13505_v62 = vld [vmem:[#allocation3 + $0x544] sm:$0xf]  ;;  %v735_v1 = vperm.slane %v14798_v56, 0 }
 0x104   : > { %1586 = vmatpush.bf16.msra.mxu2 %v9655_v13  ;;  %1600 = vmatpush.bf16.msra.mxu3 %v9783_v14  ;;  %v13525_v13 = vld [vmem:[#allocation3 + $0x5e4] sm:$0xf]  ;;  %v10140_v14 = vld [vmem:[#allocation3 + $0x5f0] sm:$0xf0]  ;;  %v10127_v49 = vor.u32 %v13521_v24, %v10124_v48 }
 0x105   : > { %v10143_v18 = vor.u32 %v13525_v13, %v10140_v14  ;;  %v13553_v0 = vld [vmem:[#allocation3 + $0x6c4] sm:$0xf]  ;;  %v10236_v14 = vld [vmem:[#allocation3 + $0x6b0] sm:$0xf0] }
 0x106   : > { %2408 = vmatpush.bf16.msrb.mxu0 %v9995_v11  ;;  %2422 = vmatpush.bf16.msrb.mxu1 %v10123_v12  ;;  %v10219_v11 = vor.u32 %v13547_v9, %v10218_v7  ;;  %v9948_v12 = vld [vmem:[#allocation3 + $0x470] sm:$0xf0]  ;;  %v13583_v7 = vld [vmem:[#allocation3 + $0x7ac] sm:$0xf0]  ;;  %v13501_v9 = vld [vmem:[#allocation3 + $0x524] sm:$0xf] }
 0x107   : > { %1587 = vmatmul.bf16.vlgmr.msra.gmra.mxu2 %v14780_v16  ;;  %1601 = vmatmul.bf16.vlgmr.msra.gmra.mxu3 %v14782_v17  ;;  %v13467_v16 = vld [vmem:[#allocation3 + $0x40c] sm:$0xf0]  ;;  %v9951_v15 = vor.u32 %v13477_v10, %v9948_v12  ;;  %v10044_v10 = vld [vmem:[#allocation3 + $0x530] sm:$0xf0]  ;;  %v13497_v24 = vld [vmem:[#allocation3 + $0x504] sm:$0xf] }
 0x108   : > { %v9899_v17 = vor.u32 %v13467_v16, %v9898_v33  ;;  %2435 = vmatpush.bf16.msrb.mxu2 %v10267_v47  ;;  %v10108_v33 = vld [vmem:[#allocation3 + $0x5b0] sm:$0xf0]  ;;  %v13591_v47 = vld [vmem:[#allocation3 + $0x7ec] sm:$0xf0]  ;;  %v10047_v13 = vor.u32 %v13501_v9, %v10044_v10  ;;  %v13545_v48 = vld [vmem:[#allocation3 + $0x684] sm:$0xf] }
 0x109   : > { %v10111_v16 = vor.u32 %v13517_v31, %v10108_v33  ;;  %v10395_v52 = vor.u32 %v13591_v47, %v10394_v45  ;;  %v10330_v31 = vld [vmem:[#allocation3 + $0x760] sm:$0xf]  ;;  %v736_v45 = vperm.slane %v14798_v56, 1  ;;  %v13529_v10 = vld [vmem:[#allocation3 + $0x604] sm:$0xf] }
 0x10a   : > { %2409 = vmatpush.bf16.msrb.mxu0 %v9979_v21  ;;  %2423 = vmatpush.bf16.msrb.mxu1 %v10107_v22  ;;  %v10203_v21 = vor.u32 %v13543_v20, %v10202_v19  ;;  %v13473_v22 = vld [vmem:[#allocation3 + $0x444] sm:$0xf]  ;;  %v10346_v19 = vld [vmem:[#allocation3 + $0x780] sm:$0xf]  ;;  %v13579_v20 = vld [vmem:[#allocation3 + $0x78c] sm:$0xf0] }
 0x10b   : > { %2449 = vmatpush.bf16.msrb.mxu3 %v10395_v52 }
 0x10c   : > { %2436 = vmatpush.bf16.msrb.mxu2 %v10251_v58 }
 0x10e   : > { %2410 = vmatpush.bf16.msrb.mxu0 %v9963_v25  ;;  %2424 = vmatpush.bf16.msrb.mxu1 %v10091_v38  ;;  %v9935_v25 = vor.u32 %v13473_v22, %v9932_v23  ;;  %v13513_v38 = vld [vmem:[#allocation3 + $0x584] sm:$0xf]  ;;  %v10347_v23 = vor.u32 %v13579_v20, %v10346_v19  ;;  %v10396_v19 = vld [vmem:[#allocation3 + $0x7f0] sm:$0xf0] }
 0x10f   : > { %v10095_v41 = vor.u32 %v13513_v38, %v10092_v40  ;;  %v10314_v38 = vld [vmem:[#allocation3 + $0x740] sm:$0xf] }
 0x110   : > { %2437 = vmatpush.bf16.msrb.mxu2 %v10235_v3  ;;  %v10252_v3 = vld [vmem:[#allocation3 + $0x6d0] sm:$0xf0] }
 0x112   : > { %2411 = vmatpush.bf16.msrb.mxu0 %v9947_v26  ;;  %2425 = vmatpush.bf16.msrb.mxu1 %v10075_v43  ;;  %v10186_v26 = vld [vmem:[#allocation3 + $0x640] sm:$0xf] }
 0x113   : > { %v10187_v28 = vor.u32 %v13539_v27, %v10186_v26  ;;  %v10154_v43 = vld [vmem:[#allocation3 + $0x600] sm:$0xf]  ;;  %v10220_v27 = vld [vmem:[#allocation3 + $0x690] sm:$0xf0] }
 0x114   : > { %2438 = vmatpush.bf16.msrb.mxu2 %v10219_v11  ;;  %v10155_v46 = vor.u32 %v13531_v44, %v10154_v43  ;;  %v13549_v11 = vld [vmem:[#allocation3 + $0x6a4] sm:$0xf]  ;;  %v10188_v44 = vld [vmem:[#allocation3 + $0x650] sm:$0xf0] }
 0x115   : > { %v13537_v43 = vld [vmem:[#allocation3 + $0x644] sm:$0xf] }
 0x116   : > { %2412 = vmatpush.bf16.msrb.mxu0 %v9931_v29  ;;  %2426 = vmatpush.bf16.msrb.mxu1 %v10059_v54  ;;  %v13469_v29 = vld [vmem:[#allocation3 + $0x424] sm:$0xf] }
 0x117   : > { %v13557_v54 = vld [vmem:[#allocation3 + $0x6e4] sm:$0xf] }
 0x118   : > { %2439 = vmatpush.bf16.msrb.mxu2 %v10203_v21  ;;  %v10271_v58 = vor.u32 %v13557_v54, %v10268_v55  ;;  %v13567_v54 = vld [vmem:[#allocation3 + $0x72c] sm:$0xf0] }
 0x11a   : > { %2413 = vmatpush.bf16.msrb.mxu0 %v9915_v32  ;;  %2427 = vmatpush.bf16.msrb.mxu1 %v10043_v63  ;;  %v9919_v32 = vor.u32 %v13469_v29, %v9916_v30  ;;  %v10060_v63 = vld [vmem:[#allocation3 + $0x550] sm:$0xf0] }
 0x11b   : > { %v10063_v2 = vor.u32 %v13505_v62, %v10060_v63  ;;  %v10018_v62 = vld [vmem:[#allocation3 + $0x4e8] sm:$0xf]  ;;  %v13496_v63 = vld [vmem:[#allocation3 + $0x4f4] sm:$0xf0] }
 0x11c   : > { %2440 = vmatpush.bf16.msrb.mxu2 %v10187_v28  ;;  %v10223_v28 = vor.u32 %v13545_v48, %v10220_v27  ;;  %v13488_v48 = vld [vmem:[#allocation3 + $0x4b4] sm:$0xf0] }
 0x11e   : > { %2414 = vmatpush.bf16.msrb.mxu0 %v9899_v17  ;;  %2428 = vmatpush.bf16.msrb.mxu1 %v10027_v8  ;;  %v13535_v17 = vld [vmem:[#allocation3 + $0x62c] sm:$0xf0]  ;;  %v10363_v8 = vor.u32 %v13583_v7, %v10362_v6  ;;  %v10019_v7 = vor.u32 %v13496_v63, %v10018_v62  ;;  %v10130_v62 = vld [vmem:[#allocation3 + $0x5c8] sm:$0xf] }
 0x11f   : > { %v10171_v35 = vor.u32 %v13535_v17, %v10170_v34  ;;  %v13541_v34 = vld [vmem:[#allocation3 + $0x664] sm:$0xf]  ;;  %v10204_v17 = vld [vmem:[#allocation3 + $0x670] sm:$0xf0] }
 0x121   : > { %2441 = vmatpush.bf16.msrb.mxu2 %v10171_v35  ;;  %v10207_v35 = vor.u32 %v13541_v34, %v10204_v17  ;;  %v13484_v17 = vld [vmem:[#allocation3 + $0x494] sm:$0xf0] }
 0x122   : > { %2463 = vmatpush.bf16.msra.mxu0 %v10015_v39  ;;  %2477 = vmatpush.bf16.msra.mxu1 %v10143_v18  ;;  %v9903_v39 = vor.u32 %v13465_v36, %v9900_v37 }
 0x125   : > { %2442 = vmatpush.bf16.msrb.mxu2 %v10155_v46 }
 0x126   : > { %2464 = vmatpush.bf16.msra.mxu0 %v9999_v50  ;;  %2478 = vmatpush.bf16.msra.mxu1 %v10127_v49  ;;  %v13509_v50 = vld [vmem:[#allocation3 + $0x564] sm:$0xf] }
 0x127   : > { %v10079_v57 = vor.u32 %v13509_v50, %v10076_v53  ;;  %v10191_v50 = vor.u32 %v13537_v43, %v10188_v44  ;;  %v10298_v53 = vld [vmem:[#allocation3 + $0x720] sm:$0xf]  ;;  %v13480_v43 = vld [vmem:[#allocation3 + $0x474] sm:$0xf0]  ;;  %v10146_v44 = vld [vmem:[#allocation3 + $0x5e8] sm:$0xf] }
 0x129   : > { %2491 = vmatpush.bf16.msra.mxu2 %v10271_v58  ;;  %v13533_v58 = vld [vmem:[#allocation3 + $0x624] sm:$0xf] }
 0x12a   : > { %2465 = vmatpush.bf16.msra.mxu0 %v9983_v59  ;;  %2479 = vmatpush.bf16.msra.mxu1 %v10111_v16  ;;  %v10378_v59 = vld [vmem:[#allocation3 + $0x7c0] sm:$0xf] }
 0x12b   : > { %v10379_v61 = vor.u32 %v13587_v60, %v10378_v59  ;;  %v10172_v59 = vld [vmem:[#allocation3 + $0x630] sm:$0xf0] }
 0x12d   : > { %2450 = vmatpush.bf16.msrb.mxu3 %v10379_v61 }
 0x12e   : > { %2466 = vmatpush.bf16.msra.mxu0 %v9967_v4  ;;  %2480 = vmatpush.bf16.msra.mxu1 %v10095_v41  ;;  %v10255_v4 = vor.u32 %v13553_v0, %v10252_v3  ;;  %v10175_v0 = vor.u32 %v13533_v58, %v10172_v59  ;;  %v10282_v3 = vld [vmem:[#allocation3 + $0x700] sm:$0xf] }
 0x130   : > { %2492 = vmatpush.bf16.msra.mxu2 %v10255_v4  ;;  %v13563_v4 = vld [vmem:[#allocation3 + $0x70c] sm:$0xf0] }
 0x131   : > { %2451 = vmatpush.bf16.msrb.mxu3 %v10363_v8  ;;  %v10002_v8 = vld [vmem:[#allocation3 + $0x4c8] sm:$0xf]  ;;  %v10283_v9 = vor.u32 %v13563_v4, %v10282_v3  ;;  %v13573_v3 = vld [vmem:[#allocation3 + $0x764] sm:$0xf]  ;;  %v10332_v4 = vld [vmem:[#allocation3 + $0x770] sm:$0xf0] }
 0x132   : > { %2467 = vmatpush.bf16.msra.mxu0 %v9951_v15  ;;  %2481 = vmatpush.bf16.msra.mxu1 %v10079_v57  ;;  %v10239_v15 = vor.u32 %v13549_v11, %v10236_v14  ;;  %v10299_v57 = vor.u32 %v13567_v54, %v10298_v53  ;;  %v10156_v11 = vld [vmem:[#allocation3 + $0x610] sm:$0xf0]  ;;  %v13492_v14 = vld [vmem:[#allocation3 + $0x4d4] sm:$0xf0] }
 0x134   : > { %2493 = vmatpush.bf16.msra.mxu2 %v10239_v15  ;;  %v10159_v15 = vor.u32 %v13529_v10, %v10156_v11  ;;  %v9922_v11 = vld [vmem:[#allocation3 + $0x428] sm:$0xf] }
 0x135   : > { %2452 = vmatpush.bf16.msrb.mxu3 %v10347_v23 }
 0x136   : > { %2468 = vmatpush.bf16.msra.mxu0 %v9935_v25  ;;  %2482 = vmatpush.bf16.msra.mxu1 %v10063_v2  ;;  %v10028_v25 = vld [vmem:[#allocation3 + $0x510] sm:$0xf0] }
 0x137   : > { %v10031_v26 = vor.u32 %v13497_v24, %v10028_v25  ;;  %v10003_v24 = vor.u32 %v13492_v14, %v10002_v8  ;;  %v9986_v25 = vld [vmem:[#allocation3 + $0x4a8] sm:$0xf] }
 0x138   : > { %2494 = vmatpush.bf16.msra.mxu2 %v10223_v28  ;;  %v10114_v14 = vld [vmem:[#allocation3 + $0x5a8] sm:$0xf] }
 0x13a   : > { %2469 = vmatpush.bf16.msra.mxu0 %v9919_v32  ;;  %2483 = vmatpush.bf16.msra.mxu1 %v10047_v13  ;;  %v13575_v32 = vld [vmem:[#allocation3 + $0x76c] sm:$0xf0] }
 0x13b   : > { %v10331_v16 = vor.u32 %v13575_v32, %v10330_v31 }
 0x13c   : > { %2495 = vmatpush.bf16.msra.mxu2 %v10207_v35  ;;  %v13581_v35 = vld [vmem:[#allocation3 + $0x7a4] sm:$0xf] }
 0x13d   : > { %v1392_v42 = vpop.f32.mrf.mxu0  ;;  %v1406_v51 = vpop.f32.mrf.mxu1  ;;  %2453 = vmatpush.bf16.msrb.mxu3 %v10331_v16  ;;  %v9970_v16 = vld [vmem:[#allocation3 + $0x488] sm:$0xf] }
 0x13e   : > { %2470 = vmatpush.bf16.msra.mxu0 %v9903_v39  ;;  %v1393_v12 = vadd.f32 %v1392_v42, %v735_v1  ;;  %2484 = vmatpush.bf16.msra.mxu1 %v10031_v26  ;;  %v13571_v39 = vld [vmem:[#allocation3 + $0x74c] sm:$0xf0]  ;;  %v10380_v26 = vld [vmem:[#allocation3 + $0x7d0] sm:$0xf0] }
 0x13f   : > { %v10315_v42 = vor.u32 %v13571_v39, %v10314_v38 }
 0x140   : > { %v1407_v49 = vadd.f32 %v1406_v51, %v1393_v12  ;;  %2496 = vmatpush.bf16.msra.mxu2 %v10191_v50  ;;  %v13577_v50 = vld [vmem:[#allocation3 + $0x784] sm:$0xf] }
 0x141   : > { %2454 = vmatpush.bf16.msrb.mxu3 %v10315_v42  ;;  %v9971_v42 = vor.u32 %v13484_v17, %v9970_v16  ;;  %v10082_v17 = vld [vmem:[#allocation3 + $0x568] sm:$0xf] }
 0x144   : > { %2497 = vmatpush.bf16.msra.mxu2 %v10175_v0 }
 0x145   : > { %v1394_v5 = vpop.f32.mrf.mxu0  ;;  %v1408_v18 = vpop.f32.mrf.mxu1  ;;  %2455 = vmatpush.bf16.msrb.mxu3 %v10299_v57 }
 0x146   : > { %v1395_v29 = vadd.f32 %v1394_v5, %v735_v1 }
 0x148   : > { %v1409_v36 = vadd.f32 %v1408_v18, %v1395_v29  ;;  %v13589_v18 = vld [vmem:[#allocation3 + $0x7e4] sm:$0xf]  ;;  %2498 = vmatpush.bf16.msra.mxu2 %v10159_v15  ;;  %v13520_v15 = vld [vmem:[#allocation3 + $0x5b4] sm:$0xf0] }
 0x149   : > { %v10399_v20 = vor.u32 %v13589_v18, %v10396_v19  ;;  %2456 = vmatpush.bf16.msrb.mxu3 %v10283_v9  ;;  %v13569_v18 = vld [vmem:[#allocation3 + $0x744] sm:$0xf]  ;;  %v10316_v19 = vld [vmem:[#allocation3 + $0x750] sm:$0xf0] }
 0x14a   : > { %v1420_v21 = vpop.f32.mrf.mxu2  ;;  %v1434_v22 = vpop.f32.mrf.mxu3 }
 0x14b   : > { %v1421_v30 = vadd.f32 %v1420_v21, %v1407_v49  ;;  %v13585_v49 = vld [vmem:[#allocation3 + $0x7c4] sm:$0xf] }
 0x14c   : > { %v10383_v28 = vor.u32 %v13585_v49, %v10380_v26  ;;  %v13468_v49 = vld [vmem:[#allocation3 + $0x414] sm:$0xf0]  ;;  %v10098_v26 = vld [vmem:[#allocation3 + $0x588] sm:$0xf] }
 0x14d   : > { %v1435_v37 = vadd.f32 %v1434_v22, %v1421_v30  ;;  %2505 = vmatpush.bf16.msra.mxu3 %v10399_v20  ;;  %v10319_v20 = vor.u32 %v13569_v18, %v10316_v19  ;;  %v10034_v18 = vld [vmem:[#allocation3 + $0x508] sm:$0xf]  ;;  %v13500_v19 = vld [vmem:[#allocation3 + $0x514] sm:$0xf0] }
 0x14e   : > { %v1448_v33 = vpop.f32.mrf.mxu0  ;;  %v1462_v46 = vpop.f32.mrf.mxu1 }
 0x14f   : > { %v1607_v51 = vmul.f32 0.01, %v1435_v37  ;;  %v1449_v60 = vadd.f32 %v1448_v33, %v736_v45  ;;  %v9987_v33 = vor.u32 %v13488_v48, %v9986_v25  ;;  %v10115_v25 = vor.u32 %v13520_v15, %v10114_v14  ;;  %v9906_v48 = vld [vmem:[#allocation3 + $0x408] sm:$0xf] }
 0x151   : > { %v1615_v1 = vmax.f32 %v1435_v37, %v1607_v51  ;;  %v1463_v12 = vadd.f32 %v1462_v46, %v1449_v60  ;;  %2506 = vmatpush.bf16.msra.mxu3 %v10383_v28  ;;  %v737_v37 = vperm.slane %v14798_v56, 2  ;;  %v10348_v51 = vld [vmem:[#allocation3 + $0x790] sm:$0xf0]  ;;  %v9938_v60 = vld [vmem:[#allocation3 + $0x448] sm:$0xf] }
 0x152   : > { %v1422_v40 = vpop.f32.mrf.mxu2  ;;  %v1436_v41 = vpop.f32.mrf.mxu3  ;;  %v10351_v53 = vor.u32 %v13577_v50, %v10348_v51  ;;  %v13516_v28 = vld [vmem:[#allocation3 + $0x594] sm:$0xf0] }
 0x153   : > { %v1423_v47 = vadd.f32 %v1422_v40, %v1409_v36  ;;  %v10364_v36 = vld [vmem:[#allocation3 + $0x7b0] sm:$0xf0] }
 0x154   : > { %v10367_v38 = vor.u32 %v13581_v35, %v10364_v36 }
 0x155   : > { %v1437_v52 = vadd.f32 %v1436_v41, %v1423_v47  ;;  %v9954_v41 = vld [vmem:[#allocation3 + $0x468] sm:$0xf] }
 0x156   : > { %v1450_v55 = vpop.f32.mrf.mxu0  ;;  %v1464_v22 = vpop.f32.mrf.mxu1  ;;  %2507 = vmatpush.bf16.msra.mxu3 %v10367_v38  ;;  %v9955_v58 = vor.u32 %v13480_v43, %v9954_v41  ;;  %v10099_v38 = vor.u32 %v13516_v28, %v10098_v26  ;;  %v13561_v43 = vld [vmem:[#allocation3 + $0x704] sm:$0xf]  ;;  %v10035_v26 = vor.u32 %v13500_v19, %v10034_v18  ;;  %v13558_v18 = vld [vmem:[#allocation3 + $0x6ec] sm:$0xf]  ;;  %v10276_v19 = vld [vmem:[#allocation3 + $0x6f8] sm:$0xf0] }
 0x157   : > { %v1611_v61 = vmul.f32 0.01, %v1437_v52  ;;  %v1451_v21 = vadd.f32 %v1450_v55, %v736_v45  ;;  %v13528_v45 = vld [vmem:[#allocation3 + $0x5f4] sm:$0xf0] }
 0x158   : > { %v10147_v59 = vor.u32 %v13528_v45, %v10146_v44  ;;  %v10284_v44 = vld [vmem:[#allocation3 + $0x710] sm:$0xf0] }
 0x159   : > { %v1619_v2 = vmax.f32 %v1437_v52, %v1611_v61  ;;  %v1465_v29 = vadd.f32 %v1464_v22, %v1451_v21  ;;  %v13476_v61 = vld [vmem:[#allocation3 + $0x454] sm:$0xf0]  ;;  %v10287_v50 = vor.u32 %v13561_v43, %v10284_v44  ;;  %v13470_v44 = vld [vmem:[#allocation3 + $0x42c] sm:$0xf] }
 0x15a   : > { %v1476_v5 = vpop.f32.mrf.mxu2  ;;  %v1490_v6 = vpop.f32.mrf.mxu3  ;;  %2508 = vmatpush.bf16.msra.mxu3 %v10351_v53  ;;  %v13540_v43 = vld [vmem:[#allocation3 + $0x654] sm:$0xf0] }
 0x15b   : > { %v14802_v13 = vpack.c.bf16 %v1619_v2, %v1615_v1  ;;  %v1477_v23 = vadd.f32 %v1476_v5, %v1463_v12  ;;  %v13524_v2 = vld [vmem:[#allocation3 + $0x5d4] sm:$0xf0] }
 0x15c   : > { %v10131_v10 = vor.u32 %v13524_v2, %v10130_v62  ;;  %v13472_v12 = vld [vmem:[#allocation3 + $0x434] sm:$0xf0]  ;;  %v738_v2 = vperm.slane %v14798_v56, 3 }
 0x15d   : > { %2415 = vmatmul.bf16.vlgmr.msrb.gmra.mxu0 %v14802_v13  ;;  %v1491_v30 = vadd.f32 %v1490_v6, %v1477_v23  ;;  %v10335_v6 = vor.u32 %v13573_v3, %v10332_v4  ;;  %v9923_v22 = vor.u32 %v13472_v12, %v9922_v11  ;;  %v13556_v62 = vld [vmem:[#allocation3 + $0x6d4] sm:$0xf0]  ;;  %v9972_v11 = vld [vmem:[#allocation3 + $0x498] sm:$0xf0] }
 0x15e   : > { %2519 = vmatpush.bf16.msrb.mxu0 %v10019_v7  ;;  %v1504_v27 = vpop.f32.mrf.mxu0  ;;  %v1518_v46 = vpop.f32.mrf.mxu1  ;;  %v9939_v7 = vor.u32 %v13476_v61, %v9938_v60 }
 0x15f   : > { %v1608_v39 = vmul.f32 0.01, %v1491_v30  ;;  %v1505_v52 = vadd.f32 %v1504_v27, %v737_v37  ;;  %2509 = vmatpush.bf16.msra.mxu3 %v10335_v6  ;;  %v10050_v6 = vld [vmem:[#allocation3 + $0x528] sm:$0xf] }
 0x161   : > { %v1616_v54 = vmax.f32 %v1491_v30, %v1608_v39  ;;  %v1519_v5 = vadd.f32 %v1518_v46, %v1505_v52  ;;  %v10300_v30 = vld [vmem:[#allocation3 + $0x730] sm:$0xf0]  ;;  %v13512_v39 = vld [vmem:[#allocation3 + $0x574] sm:$0xf0]  ;;  %v13490_v46 = vld [vmem:[#allocation3 + $0x4cc] sm:$0xf] }
 0x162   : > { %2520 = vmatpush.bf16.msrb.mxu0 %v10003_v24  ;;  %v1478_v31 = vpop.f32.mrf.mxu2  ;;  %v1492_v32 = vpop.f32.mrf.mxu3  ;;  %v10083_v53 = vor.u32 %v13512_v39, %v10082_v17  ;;  %v9940_v17 = vld [vmem:[#allocation3 + $0x458] sm:$0xf0] }
 0x163   : > { %v1479_v34 = vadd.f32 %v1478_v31, %v1465_v29  ;;  %2510 = vmatpush.bf16.msra.mxu3 %v10319_v20  ;;  %v13565_v29 = vld [vmem:[#allocation3 + $0x724] sm:$0xf]  ;;  %v10226_v20 = vld [vmem:[#allocation3 + $0x688] sm:$0xf] }
 0x164   : > { %v10303_v16 = vor.u32 %v13565_v29, %v10300_v30 }
 0x165   : > { %v1493_v40 = vadd.f32 %v1492_v32, %v1479_v34  ;;  %v13494_v32 = vld [vmem:[#allocation3 + $0x4ec] sm:$0xf] }
 0x166   : > { %2521 = vmatpush.bf16.msrb.mxu0 %v9987_v33  ;;  %v1506_v57 = vpop.f32.mrf.mxu0  ;;  %v1520_v21 = vpop.f32.mrf.mxu1  ;;  %v10020_v33 = vld [vmem:[#allocation3 + $0x4f8] sm:$0xf0] }
 0x167   : > { %v1612_v47 = vmul.f32 0.01, %v1493_v40  ;;  %v1507_v8 = vadd.f32 %v1506_v57, %v737_v37  ;;  %v9907_v37 = vor.u32 %v13468_v49, %v9906_v48  ;;  %v10023_v41 = vor.u32 %v13494_v32, %v10020_v33  ;;  %2511 = vmatpush.bf16.msra.mxu3 %v10303_v16  ;;  %v10066_v57 = vld [vmem:[#allocation3 + $0x548] sm:$0xf]  ;;  %v10148_v48 = vld [vmem:[#allocation3 + $0x5f8] sm:$0xf0] }
 0x168   : > { %v13544_v16 = vld [vmem:[#allocation3 + $0x674] sm:$0xf0] }
 0x169   : > { %v1620_v55 = vmax.f32 %v1493_v40, %v1612_v47  ;;  %v1521_v23 = vadd.f32 %v1520_v21, %v1507_v8  ;;  %v10274_v40 = vld [vmem:[#allocation3 + $0x6e8] sm:$0xf]  ;;  %v10004_v47 = vld [vmem:[#allocation3 + $0x4d8] sm:$0xf0] }
 0x16a   : > { %2522 = vmatpush.bf16.msrb.mxu0 %v9971_v42  ;;  %v1532_v0 = vpop.f32.mrf.mxu2  ;;  %v1546_v1 = vpop.f32.mrf.mxu3  ;;  %v13560_v42 = vld [vmem:[#allocation3 + $0x6f4] sm:$0xf0]  ;;  %v10242_v8 = vld [vmem:[#allocation3 + $0x6a8] sm:$0xf] }
 0x16b   : > { %v14806_v63 = vpack.c.bf16 %v1620_v55, %v1616_v54  ;;  %v1533_v9 = vadd.f32 %v1532_v0, %v1519_v5  ;;  %v10275_v54 = vor.u32 %v13560_v42, %v10274_v40  ;;  %v10007_v55 = vor.u32 %v13490_v46, %v10004_v47  ;;  %2512 = vmatpush.bf16.msra.mxu3 %v10287_v50  ;;  %v13486_v0 = vld [vmem:[#allocation3 + $0x4ac] sm:$0xf]  ;;  %v10116_v50 = vld [vmem:[#allocation3 + $0x5b8] sm:$0xf0] }
 0x16c   : > { %v13518_v47 = vld [vmem:[#allocation3 + $0x5ac] sm:$0xf] }
 0x16d   : > { %2429 = vmatmul.bf16.vlgmr.msrb.gmra.mxu1 %v14806_v63  ;;  %2471 = vmatmul.bf16.vlgmr.msra.gmra.mxu0 %v14802_v13  ;;  %v1547_v24 = vadd.f32 %v1546_v1, %v1533_v9  ;;  %v9988_v1 = vld [vmem:[#allocation3 + $0x4b8] sm:$0xf0]  ;;  %v13552_v9 = vld [vmem:[#allocation3 + $0x6b4] sm:$0xf0] }
 0x16e   : > { %2523 = vmatpush.bf16.msrb.mxu0 %v9955_v58  ;;  %2533 = vmatpush.bf16.msrb.mxu1 %v10147_v59  ;;  %v13508_v58 = vld [vmem:[#allocation3 + $0x554] sm:$0xf0]  ;;  %v10258_v59 = vld [vmem:[#allocation3 + $0x6c8] sm:$0xf]  ;;  %v9991_v5 = vor.u32 %v13486_v0, %v9988_v1  ;;  %v10243_v56 = vor.u32 %v13552_v9, %v10242_v8  ;;  %v9908_v0 = vld [vmem:[#allocation3 + $0x418] sm:$0xf0] }
 0x16f   : > { %v1609_v35 = vmul.f32 0.01, %v1547_v24  ;;  %v10067_v3 = vor.u32 %v13508_v58, %v10066_v57  ;;  %v10259_v4 = vor.u32 %v13556_v62, %v10258_v59  ;;  %v10178_v57 = vld [vmem:[#allocation3 + $0x628] sm:$0xf]  ;;  %v10119_v59 = vor.u32 %v13518_v47, %v10116_v50  ;;  %v13466_v62 = vld [vmem:[#allocation3 + $0x40c] sm:$0xf] }
 0x170   : > { %v10162_v8 = vld [vmem:[#allocation3 + $0x608] sm:$0xf]  ;;  %v13532_v9 = vld [vmem:[#allocation3 + $0x614] sm:$0xf0] }
 0x171   : > { %v1617_v51 = vmax.f32 %v1547_v24, %v1609_v35  ;;  %v9956_v24 = vld [vmem:[#allocation3 + $0x478] sm:$0xf0]  ;;  %v13522_v35 = vld [vmem:[#allocation3 + $0x5cc] sm:$0xf] }
 0x172   : > { %2524 = vmatpush.bf16.msrb.mxu0 %v9939_v7  ;;  %2534 = vmatpush.bf16.msrb.mxu1 %v10131_v10  ;;  %v1534_v27 = vpop.f32.mrf.mxu2  ;;  %v1548_v34 = vpop.f32.mrf.mxu3  ;;  %v13504_v7 = vld [vmem:[#allocation3 + $0x534] sm:$0xf0]  ;;  %v13482_v10 = vld [vmem:[#allocation3 + $0x48c] sm:$0xf] }
 0x173   : > { %v1535_v31 = vadd.f32 %v1534_v27, %v1521_v23  ;;  %v10051_v12 = vor.u32 %v13504_v7, %v10050_v6  ;;  %v9975_v15 = vor.u32 %v13482_v10, %v9972_v11  ;;  %v13478_v23 = vld [vmem:[#allocation3 + $0x46c] sm:$0xf]  ;;  %v9911_v7 = vor.u32 %v13466_v62, %v9908_v0  ;;  %v10402_v10 = vld [vmem:[#allocation3 + $0x7e8] sm:$0xf]  ;;  %v10196_v62 = vld [vmem:[#allocation3 + $0x658] sm:$0xf0] }
 0x174   : > { %v9959_v30 = vor.u32 %v13478_v23, %v9956_v24 }
 0x175   : > { %v1549_v36 = vadd.f32 %v1548_v34, %v1535_v31  ;;  %v10210_v31 = vld [vmem:[#allocation3 + $0x668] sm:$0xf]  ;;  %v13474_v34 = vld [vmem:[#allocation3 + $0x44c] sm:$0xf] }
 0x176   : > { %2525 = vmatpush.bf16.msrb.mxu0 %v9923_v22  ;;  %2535 = vmatpush.bf16.msrb.mxu1 %v10115_v25  ;;  %v13548_v22 = vld [vmem:[#allocation3 + $0x694] sm:$0xf0]  ;;  %v13526_v25 = vld [vmem:[#allocation3 + $0x5ec] sm:$0xf]  ;;  %v10211_v39 = vor.u32 %v13544_v16, %v10210_v31  ;;  %v9943_v40 = vor.u32 %v13474_v34, %v9940_v17  ;;  %v10370_v16 = vld [vmem:[#allocation3 + $0x7a8] sm:$0xf] }
 0x177   : > { %v1613_v45 = vmul.f32 0.01, %v1549_v36  ;;  %v10227_v29 = vor.u32 %v13548_v22, %v10226_v20  ;;  %v10151_v33 = vor.u32 %v13526_v25, %v10148_v48  ;;  %v10163_v22 = vor.u32 %v13532_v9, %v10162_v8  ;;  %v13584_v34 = vld [vmem:[#allocation3 + $0x7b4] sm:$0xf0]  ;;  %v13502_v17 = vld [vmem:[#allocation3 + $0x52c] sm:$0xf] }
 0x178   : > { %v10279_v48 = vor.u32 %v13558_v18, %v10276_v19  ;;  %v10290_v8 = vld [vmem:[#allocation3 + $0x708] sm:$0xf]  ;;  %v13564_v9 = vld [vmem:[#allocation3 + $0x714] sm:$0xf0]  ;;  %v13586_v18 = vld [vmem:[#allocation3 + $0x7cc] sm:$0xf] }
 0x179   : > { %v1621_v52 = vmax.f32 %v1549_v36, %v1613_v45  ;;  %v10132_v36 = vld [vmem:[#allocation3 + $0x5d8] sm:$0xf0] }
 0x17a   : > { %2526 = vmatpush.bf16.msrb.mxu0 %v9907_v37  ;;  %2536 = vmatpush.bf16.msrb.mxu1 %v10099_v38  ;;  %v10135_v42 = vor.u32 %v13522_v35, %v10132_v36  ;;  %v9924_v45 = vld [vmem:[#allocation3 + $0x438] sm:$0xf0]  ;;  %v13550_v36 = vld [vmem:[#allocation3 + $0x6ac] sm:$0xf] }
 0x17b   : > { %v14810_v60 = vpack.c.bf16 %v1621_v52, %v1617_v51  ;;  %v10052_v35 = vld [vmem:[#allocation3 + $0x538] sm:$0xf0] }
 0x17c   : > { %v10388_v19 = vld [vmem:[#allocation3 + $0x7d8] sm:$0xf0] }
 0x17d   : > { %2485 = vmatmul.bf16.vlgmr.msra.gmra.mxu1 %v14806_v63  ;;  %2527 = vmatmul.bf16.vlgmr.msrb.gmra.mxu0 %v14802_v13 }
 0x17e   : > { %2575 = vmatpush.bf16.msra.mxu0 %v10023_v41  ;;  %v1560_v61 = vpop.f32.mrf.mxu0  ;;  %2443 = vmatmul.bf16.vlgmr.msrb.gmra.mxu2 %v14810_v60  ;;  %v1574_v14 = vpop.f32.mrf.mxu1  ;;  %v10194_v41 = vld [vmem:[#allocation3 + $0x648] sm:$0xf] }
 0x17f   : > { %2537 = vmatpush.bf16.msrb.mxu1 %v10083_v53  ;;  %2547 = vmatpush.bf16.msrb.mxu2 %v10275_v54  ;;  %v1561_v21 = vadd.f32 %v1560_v61, %v738_v2  ;;  %v10195_v54 = vor.u32 %v13540_v43, %v10194_v41  ;;  %v13536_v61 = vld [vmem:[#allocation3 + $0x634] sm:$0xf0]  ;;  %v10036_v43 = vld [vmem:[#allocation3 + $0x518] sm:$0xf0] }
 0x180   : > { %v10179_v6 = vor.u32 %v13536_v61, %v10178_v57  ;;  %v13580_v41 = vld [vmem:[#allocation3 + $0x794] sm:$0xf0]  ;;  %v13538_v61 = vld [vmem:[#allocation3 + $0x64c] sm:$0xf] }
 0x181   : > { %v1575_v32 = vadd.f32 %v1574_v14, %v1561_v21  ;;  %v13592_v14 = vld [vmem:[#allocation3 + $0x7f4] sm:$0xf0] }
 0x182   : > { %2576 = vmatpush.bf16.msra.mxu0 %v10007_v55  ;;  %v9927_v55 = vor.u32 %v13470_v44, %v9924_v45  ;;  %v10403_v23 = vor.u32 %v13592_v14, %v10402_v10  ;;  %v13546_v44 = vld [vmem:[#allocation3 + $0x68c] sm:$0xf]  ;;  %v10228_v45 = vld [vmem:[#allocation3 + $0x698] sm:$0xf0] }
 0x183   : > { %2538 = vmatpush.bf16.msrb.mxu1 %v10067_v3  ;;  %2548 = vmatpush.bf16.msrb.mxu2 %v10259_v4  ;;  %v10100_v3 = vld [vmem:[#allocation3 + $0x598] sm:$0xf0]  ;;  %v10231_v50 = vor.u32 %v13546_v44, %v10228_v45  ;;  %v13530_v10 = vld [vmem:[#allocation3 + $0x60c] sm:$0xf]  ;;  %v13611_v44 = vld [vmem:[#allocation3 + $0x88c] sm:$0xf0] }
 0x184   : > { %v10404_v14 = vld [vmem:[#allocation3 + $0x7f8] sm:$0xf0] }
 0x186   : > { %2577 = vmatpush.bf16.msra.mxu0 %v9991_v5  ;;  %v1562_v49 = vpop.f32.mrf.mxu0  ;;  %v1576_v46 = vpop.f32.mrf.mxu1 }
 0x187   : > { %2539 = vmatpush.bf16.msrb.mxu1 %v10051_v12  ;;  %2549 = vmatpush.bf16.msrb.mxu2 %v10243_v56  ;;  %v1563_v37 = vadd.f32 %v1562_v49, %v738_v2  ;;  %v13514_v2 = vld [vmem:[#allocation3 + $0x58c] sm:$0xf]  ;;  %v10386_v49 = vld [vmem:[#allocation3 + $0x7c8] sm:$0xf] }
 0x188   : > { %v10103_v12 = vor.u32 %v13514_v2, %v10100_v3  ;;  %v13510_v56 = vld [vmem:[#allocation3 + $0x56c] sm:$0xf]  ;;  %v10306_v2 = vld [vmem:[#allocation3 + $0x728] sm:$0xf]  ;;  %v13568_v3 = vld [vmem:[#allocation3 + $0x734] sm:$0xf0] }
 0x189   : > { %v1577_v51 = vadd.f32 %v1576_v46, %v1563_v37  ;;  %v10244_v37 = vld [vmem:[#allocation3 + $0x6b8] sm:$0xf0] }
 0x18a   : > { %v1588_v27 = vpop.f32.mrf.mxu2  ;;  %v1602_v28 = vpop.f32.mrf.mxu3  ;;  %2578 = vmatpush.bf16.msra.mxu0 %v9975_v15  ;;  %v10084_v15 = vld [vmem:[#allocation3 + $0x578] sm:$0xf0] }
 0x18b   : > { %v1589_v38 = vadd.f32 %v1588_v27, %v1575_v32  ;;  %2540 = vmatpush.bf16.msrb.mxu1 %v10035_v26  ;;  %2550 = vmatpush.bf16.msrb.mxu2 %v10227_v29  ;;  %v10087_v25 = vor.u32 %v13510_v56, %v10084_v15  ;;  %v13588_v26 = vld [vmem:[#allocation3 + $0x7d4] sm:$0xf0]  ;;  %v13506_v27 = vld [vmem:[#allocation3 + $0x54c] sm:$0xf]  ;;  %v10291_v56 = vor.u32 %v13564_v9, %v10290_v8  ;;  %v13643_v8 = vld [vmem:[#allocation3 + $0x98c] sm:$0xf0] }
 0x18c   : > { %v13554_v29 = vld [vmem:[#allocation3 + $0x6cc] sm:$0xf]  ;;  %v10387_v31 = vor.u32 %v13588_v26, %v10386_v49  ;;  %v13621_v9 = vld [vmem:[#allocation3 + $0x8e4] sm:$0xf] }
 0x18d   : > { %v1603_v52 = vadd.f32 %v1602_v28, %v1589_v38  ;;  %v10068_v28 = vld [vmem:[#allocation3 + $0x558] sm:$0xf0]  ;;  %v10371_v38 = vor.u32 %v13584_v34, %v10370_v16  ;;  %v13574_v26 = vld [vmem:[#allocation3 + $0x76c] sm:$0xf] }
 0x18e   : > { %2579 = vmatpush.bf16.msra.mxu0 %v9959_v30  ;;  %2541 = vmatmul.bf16.vlgmr.msrb.gmra.mxu1 %v14806_v63  ;;  %v10260_v30 = vld [vmem:[#allocation3 + $0x6d8] sm:$0xf0]  ;;  %v10071_v32 = vor.u32 %v13506_v27, %v10068_v28  ;;  %v13562_v34 = vld [vmem:[#allocation3 + $0x70c] sm:$0xf] }
 0x18f   : > { %2589 = vmatpush.bf16.msra.mxu1 %v10151_v33  ;;  %2499 = vmatmul.bf16.vlgmr.msra.gmra.mxu2 %v14810_v60  ;;  %v1610_v4 = vmul.f32 0.01, %v1603_v52  ;;  %v10263_v33 = vor.u32 %v13554_v29, %v10260_v30  ;;  %v10340_v27 = vld [vmem:[#allocation3 + $0x778] sm:$0xf0]  ;;  %v13570_v29 = vld [vmem:[#allocation3 + $0x74c] sm:$0xf] }
 0x190   : > { %2551 = vmatpush.bf16.msrb.mxu2 %v10211_v39  ;;  %v10247_v39 = vor.u32 %v13550_v36, %v10244_v37  ;;  %v10343_v28 = vor.u32 %v13574_v26, %v10340_v27  ;;  %v10324_v30 = vld [vmem:[#allocation3 + $0x758] sm:$0xf0]  ;;  %v13623_v36 = vld [vmem:[#allocation3 + $0x8ec] sm:$0xf0]  ;;  %v13613_v27 = vld [vmem:[#allocation3 + $0x8a4] sm:$0xf] }
 0x191   : > { %v1618_v20 = vmax.f32 %v1603_v52, %v1610_v4  ;;  %v13576_v52 = vld [vmem:[#allocation3 + $0x774] sm:$0xf0]  ;;  %v13534_v4 = vld [vmem:[#allocation3 + $0x62c] sm:$0xf]  ;;  %v13683_v26 = vld [vmem:[#allocation3 + $0xacc] sm:$0xf0] }
 0x192   : > { %v1590_v53 = vpop.f32.mrf.mxu2  ;;  %2580 = vmatpush.bf16.msra.mxu0 %v9943_v40  ;;  %v1604_v1 = vpop.f32.mrf.mxu3  ;;  %v10354_v40 = vld [vmem:[#allocation3 + $0x788] sm:$0xf] }
 0x193   : > { %v1591_v58 = vadd.f32 %v1590_v53, %v1577_v51  ;;  %2590 = vmatpush.bf16.msra.mxu1 %v10135_v42  ;;  %v13498_v42 = vld [vmem:[#allocation3 + $0x50c] sm:$0xf]  ;;  %v10355_v46 = vor.u32 %v13580_v41, %v10354_v40  ;;  %v10338_v51 = vld [vmem:[#allocation3 + $0x768] sm:$0xf]  ;;  %v10490_v40 = vld [vmem:[#allocation3 + $0x8a0] sm:$0xf] }
 0x194   : > { %2552 = vmatpush.bf16.msrb.mxu2 %v10195_v54  ;;  %v10039_v47 = vor.u32 %v13498_v42, %v10036_v43  ;;  %v13542_v53 = vld [vmem:[#allocation3 + $0x66c] sm:$0xf]  ;;  %v10212_v54 = vld [vmem:[#allocation3 + $0x678] sm:$0xf0]  ;;  %v13615_v41 = vld [vmem:[#allocation3 + $0x8ac] sm:$0xf0] }
 0x195   : > { %v1605_v5 = vadd.f32 %v1604_v1, %v1591_v58  ;;  %v10215_v57 = vor.u32 %v13542_v53, %v10212_v54  ;;  %v10322_v58 = vld [vmem:[#allocation3 + $0x748] sm:$0xf]  ;;  %v10199_v1 = vor.u32 %v13538_v61, %v10196_v62  ;;  %v10491_v42 = vor.u32 %v13615_v41, %v10490_v40  ;;  %v10474_v43 = vld [vmem:[#allocation3 + $0x880] sm:$0xf]  ;;  %v13603_v54 = vld [vmem:[#allocation3 + $0x84c] sm:$0xf0] }
 0x196   : > { %2581 = vmatpush.bf16.msra.mxu0 %v9927_v55  ;;  %v10339_v55 = vor.u32 %v13576_v52, %v10338_v51  ;;  %v10475_v45 = vor.u32 %v13611_v44, %v10474_v43  ;;  %v13655_v51 = vld [vmem:[#allocation3 + $0x9ec] sm:$0xf0]  ;;  %v10442_v53 = vld [vmem:[#allocation3 + $0x840] sm:$0xf] }
 0x197   : > { %v1614_v11 = vmul.f32 0.01, %v1605_v5  ;;  %2591 = vmatpush.bf16.msra.mxu1 %v10119_v59  ;;  %v13572_v59 = vld [vmem:[#allocation3 + $0x754] sm:$0xf0]  ;;  %v10426_v61 = vld [vmem:[#allocation3 + $0x820] sm:$0xf] }
 0x198   : > { %2553 = vmatpush.bf16.msrb.mxu2 %v10179_v6  ;;  %v10323_v0 = vor.u32 %v13572_v59, %v10322_v58  ;;  %v10307_v6 = vor.u32 %v13568_v3, %v10306_v2  ;;  %v13651_v58 = vld [vmem:[#allocation3 + $0x9cc] sm:$0xf0]  ;;  %v10538_v40 = vld [vmem:[#allocation3 + $0x900] sm:$0xf] }
 0x199   : > { %v1622_v21 = vmax.f32 %v1605_v5, %v1614_v11  ;;  %v10180_v5 = vld [vmem:[#allocation3 + $0x638] sm:$0xf0]  ;;  %v13599_v62 = vld [vmem:[#allocation3 + $0x82c] sm:$0xf0] }
 0x19a   : > { %2582 = vmatpush.bf16.msra.mxu0 %v9911_v7  ;;  %v10183_v7 = vor.u32 %v13534_v4, %v10180_v5  ;;  %v10164_v11 = vld [vmem:[#allocation3 + $0x618] sm:$0xf0]  ;;  %v13647_v2 = vld [vmem:[#allocation3 + $0x9ac] sm:$0xf0]  ;;  %v10410_v4 = vld [vmem:[#allocation3 + $0x800] sm:$0xf] }
 0x19b   : > { %v14818_v24 = vpack.c.bf16 %v1622_v21, %v1618_v20  ;;  %2592 = vmatpush.bf16.msra.mxu1 %v10103_v12  ;;  %v13590_v12 = vld [vmem:[#allocation3 + $0x7ec] sm:$0xf]  ;;  %v10391_v20 = vor.u32 %v13586_v18, %v10388_v19  ;;  %v13595_v5 = vld [vmem:[#allocation3 + $0x80c] sm:$0xf0]  ;;  %v13617_v19 = vld [vmem:[#allocation3 + $0x8c4] sm:$0xf] }
 0x19c   : > { %2554 = vmatpush.bf16.msrb.mxu2 %v10163_v22  ;;  %v10407_v15 = vor.u32 %v13590_v12, %v10404_v14  ;;  %v13582_v21 = vld [vmem:[#allocation3 + $0x7ac] sm:$0xf]  ;;  %v10372_v22 = vld [vmem:[#allocation3 + $0x7b8] sm:$0xf0]  ;;  %v10586_v14 = vld [vmem:[#allocation3 + $0x960] sm:$0xf] }
 0x19d   : > { %2457 = vmatmul.bf16.vlgmr.msrb.gmra.mxu3 %v14818_v24  ;;  %2583 = vmatmul.bf16.vlgmr.msra.gmra.mxu0 %v14802_v13  ;;  %v10055_v13 = vor.u32 %v13502_v17, %v10052_v35  ;;  %v10522_v35 = vld [vmem:[#allocation3 + $0x8e0] sm:$0xf]  ;;  %v13687_v18 = vld [vmem:[#allocation3 + $0xaec] sm:$0xf0] }
 0x19e   : > { %2561 = vmatpush.bf16.msrb.mxu3 %v10403_v23  ;;  %v10375_v23 = vor.u32 %v13582_v21, %v10372_v22  ;;  %v10523_v37 = vor.u32 %v13623_v36, %v10522_v35  ;;  %v10476_v35 = vld [vmem:[#allocation3 + $0x890] sm:$0xf0]  ;;  %v13627_v41 = vld [vmem:[#allocation3 + $0x90c] sm:$0xf0] }
 0x19f   : > { %2593 = vmatpush.bf16.msra.mxu1 %v10087_v25  ;;  %2555 = vmatmul.bf16.vlgmr.msrb.gmra.mxu2 %v14810_v60  ;;  %v13578_v25 = vld [vmem:[#allocation3 + $0x78c] sm:$0xf]  ;;  %v10539_v43 = vor.u32 %v13627_v41, %v10538_v40  ;;  %v13675_v44 = vld [vmem:[#allocation3 + $0xa8c] sm:$0xf0]  ;;  %v10780_v40 = vld [vmem:[#allocation3 + $0xaf0] sm:$0xf0] }
 0x1a0   : > { %2603 = vmatpush.bf16.msra.mxu2 %v10279_v48  ;;  %v10356_v48 = vld [vmem:[#allocation3 + $0x798] sm:$0xf0]  ;;  %3509 = vmatpush.bf16.msrb.mxu0 %v10523_v37 }
 0x1a1   : > { %v10359_v49 = vor.u32 %v13578_v25, %v10356_v48  ;;  %v13635_v25 = vld [vmem:[#allocation3 + $0x94c] sm:$0xf0]  ;;  %v10762_v48 = vld [vmem:[#allocation3 + $0xac0] sm:$0xf] }
 0x1a2   : > { %2562 = vmatpush.bf16.msrb.mxu3 %v10387_v31  ;;  %v10327_v31 = vor.u32 %v13570_v29, %v10324_v30  ;;  %v10492_v29 = vld [vmem:[#allocation3 + $0x8b0] sm:$0xf0] }
 0x1a3   : > { %2594 = vmatpush.bf16.msra.mxu1 %v10071_v32  ;;  %v13566_v32 = vld [vmem:[#allocation3 + $0x72c] sm:$0xf]  ;;  %v10495_v30 = vor.u32 %v13613_v27, %v10492_v29 }
 0x1a4   : > { %2604 = vmatpush.bf16.msra.mxu2 %v10263_v33  ;;  %v10308_v33 = vld [vmem:[#allocation3 + $0x738] sm:$0xf0] }
 0x1a5   : > { %v10311_v16 = vor.u32 %v13566_v32, %v10308_v33  ;;  %v10554_v32 = vld [vmem:[#allocation3 + $0x920] sm:$0xf]  ;;  %v13631_v33 = vld [vmem:[#allocation3 + $0x92c] sm:$0xf0] }
 0x1a6   : > { %2563 = vmatpush.bf16.msrb.mxu3 %v10371_v38  ;;  %v10506_v38 = vld [vmem:[#allocation3 + $0x8c0] sm:$0xf] }
 0x1a7   : > { %2595 = vmatpush.bf16.msra.mxu1 %v10055_v13  ;;  %v13619_v13 = vld [vmem:[#allocation3 + $0x8cc] sm:$0xf0] }
 0x1a8   : > { %2605 = vmatpush.bf16.msra.mxu2 %v10247_v39  ;;  %v10507_v39 = vor.u32 %v13619_v13, %v10506_v38  ;;  %v14828_v13 = vld [vmem:[#allocation5 + $0x2] ss:$8 sm:$0xf] }
 0x1aa   : > { %2564 = vmatpush.bf16.msrb.mxu3 %v10355_v46  ;;  %3510 = vmatpush.bf16.msrb.mxu0 %v10507_v39  ;;  %v10458_v46 = vld [vmem:[#allocation3 + $0x860] sm:$0xf] }
 0x1ab   : > { %2596 = vmatpush.bf16.msra.mxu1 %v10039_v47  ;;  %v13607_v47 = vld [vmem:[#allocation3 + $0x86c] sm:$0xf0] }
 0x1ac   : > { %2606 = vmatpush.bf16.msra.mxu2 %v10231_v50  ;;  %v10650_v50 = vld [vmem:[#allocation3 + $0x9e0] sm:$0xf] }
 0x1ad   : > { %2513 = vmatmul.bf16.vlgmr.msra.gmra.mxu3 %v14818_v24  ;;  %v10651_v52 = vor.u32 %v13655_v51, %v10650_v50  ;;  %v10652_v51 = vld [vmem:[#allocation3 + $0x9f0] sm:$0xf0] }
 0x1ae   : > { %2565 = vmatpush.bf16.msrb.mxu3 %v10339_v55  ;;  %2597 = vmatmul.bf16.vlgmr.msra.gmra.mxu1 %v14806_v63  ;;  %v10167_v63 = vor.u32 %v13530_v10, %v10164_v11  ;;  %v10634_v55 = vld [vmem:[#allocation3 + $0x9c0] sm:$0xf]  ;;  %v10524_v11 = vld [vmem:[#allocation3 + $0x8f0] sm:$0xf0] }
 0x1af   : > { %3511 = vmatpush.bf16.msrb.mxu0 %v10491_v42  ;;  %3522 = vmatpush.bf16.msrb.mxu1 %v10651_v52  ;;  %v10635_v59 = vor.u32 %v13651_v58, %v10634_v55  ;;  %v10527_v12 = vor.u32 %v13621_v9, %v10524_v11  ;;  %v10730_v42 = vld [vmem:[#allocation3 + $0xa80] sm:$0xf]  ;;  %v1759_v55 = vperm.slane %v14828_v13, 0  ;;  %v13601_v58 = vld [vmem:[#allocation3 + $0x844] sm:$0xf] }
 0x1b0   : > { %2607 = vmatpush.bf16.msra.mxu2 %v10215_v57  ;;  %v10443_v57 = vor.u32 %v13603_v54, %v10442_v53  ;;  %v10714_v53 = vld [vmem:[#allocation3 + $0xa60] sm:$0xf]  ;;  %v13671_v54 = vld [vmem:[#allocation3 + $0xa6c] sm:$0xf0]  ;;  %v10428_v9 = vld [vmem:[#allocation3 + $0x830] sm:$0xf0] }
 0x1b2   : > { %2566 = vmatpush.bf16.msrb.mxu3 %v10323_v0  ;;  %v10618_v0 = vld [vmem:[#allocation3 + $0x9a0] sm:$0xf] }
 0x1b3   : > { %3512 = vmatpush.bf16.msrb.mxu0 %v10475_v45  ;;  %3523 = vmatpush.bf16.msrb.mxu1 %v10635_v59  ;;  %v10619_v3 = vor.u32 %v13647_v2, %v10618_v0  ;;  %v13605_v45 = vld [vmem:[#allocation3 + $0x864] sm:$0xf]  ;;  %v10444_v59 = vld [vmem:[#allocation3 + $0x850] sm:$0xf0] }
 0x1b4   : > { %2608 = vmatpush.bf16.msra.mxu2 %v10199_v1  ;;  %v10427_v1 = vor.u32 %v13599_v62, %v10426_v61  ;;  %v10447_v62 = vor.u32 %v13601_v58, %v10444_v59  ;;  %v13649_v0 = vld [vmem:[#allocation3 + $0x9c4] sm:$0xf] }
 0x1b6   : > { %2567 = vmatpush.bf16.msrb.mxu3 %v10307_v6  ;;  %v10602_v6 = vld [vmem:[#allocation3 + $0x980] sm:$0xf] }
 0x1b7   : > { %3524 = vmatpush.bf16.msrb.mxu1 %v10619_v3  ;;  %v10603_v10 = vor.u32 %v13643_v8, %v10602_v6  ;;  %v13597_v8 = vld [vmem:[#allocation3 + $0x824] sm:$0xf] }
 0x1b8   : > { %2609 = vmatpush.bf16.msra.mxu2 %v10183_v7  ;;  %v10411_v7 = vor.u32 %v13595_v5, %v10410_v4  ;;  %v10698_v4 = vld [vmem:[#allocation3 + $0xa40] sm:$0xf]  ;;  %v13667_v5 = vld [vmem:[#allocation3 + $0xa4c] sm:$0xf0] }
 0x1ba   : > { %2568 = vmatpush.bf16.msrb.mxu3 %v10291_v56  ;;  %v13639_v56 = vld [vmem:[#allocation3 + $0x96c] sm:$0xf0] }
 0x1bb   : > { %3525 = vmatpush.bf16.msrb.mxu1 %v10603_v10  ;;  %v13645_v10 = vld [vmem:[#allocation3 + $0x9a4] sm:$0xf] }
 0x1bc   : > { %2610 = vmatpush.bf16.msra.mxu2 %v10167_v63  ;;  %v10778_v63 = vld [vmem:[#allocation3 + $0xae0] sm:$0xf] }
 0x1bd   : > { %2569 = vmatmul.bf16.vlgmr.msrb.gmra.mxu3 %v14818_v24  ;;  %v10779_v21 = vor.u32 %v13687_v18, %v10778_v63  ;;  %v13663_v18 = vld [vmem:[#allocation3 + $0xa2c] sm:$0xf0] }
 0x1be   : > { %2617 = vmatpush.bf16.msra.mxu3 %v10407_v15  ;;  %v10587_v15 = vor.u32 %v13639_v56, %v10586_v14  ;;  %v10620_v14 = vld [vmem:[#allocation3 + $0x9b0] sm:$0xf0] }
 0x1bf   : > { %2611 = vmatmul.bf16.vlgmr.msra.gmra.mxu2 %v14810_v60  ;;  %v10292_v60 = vld [vmem:[#allocation3 + $0x718] sm:$0xf0]  ;;  %v10623_v63 = vor.u32 %v13645_v10, %v10620_v14  ;;  %v13629_v10 = vld [vmem:[#allocation3 + $0x924] sm:$0xf] }
 0x1c0   : > { %v10295_v17 = vor.u32 %v13562_v34, %v10292_v60  ;;  %3526 = vmatpush.bf16.msrb.mxu1 %v10587_v15  ;;  %3535 = vmatpush.bf16.msrb.mxu2 %v10779_v21  ;;  %v10555_v34 = vor.u32 %v13631_v33, %v10554_v32  ;;  %v13679_v60 = vld [vmem:[#allocation3 + $0xaac] sm:$0xf0]  ;;  %v10682_v15 = vld [vmem:[#allocation3 + $0xa20] sm:$0xf]  ;;  %v13593_v21 = vld [vmem:[#allocation3 + $0x804] sm:$0xf] }
 0x1c1   : > { %v13659_v32 = vld [vmem:[#allocation3 + $0xa0c] sm:$0xf0]  ;;  %v10906_v33 = vld [vmem:[#allocation3 + $0xbe0] sm:$0xf]  ;;  %v13677_v14 = vld [vmem:[#allocation3 + $0xaa4] sm:$0xf] }
 0x1c2   : > { %2618 = vmatpush.bf16.msra.mxu3 %v10391_v20  ;;  %v10508_v20 = vld [vmem:[#allocation3 + $0x8d0] sm:$0xf0] }
 0x1c3   : > { %v10511_v22 = vor.u32 %v13617_v19, %v10508_v20  ;;  %v10683_v20 = vor.u32 %v13663_v18, %v10682_v15 }
 0x1c6   : > { %2619 = vmatpush.bf16.msra.mxu3 %v10375_v23  ;;  %v10570_v23 = vld [vmem:[#allocation3 + $0x940] sm:$0xf] }
 0x1ca   : > { %2620 = vmatpush.bf16.msra.mxu3 %v10359_v49  ;;  %v10571_v49 = vor.u32 %v13635_v25, %v10570_v23  ;;  %v13641_v23 = vld [vmem:[#allocation3 + $0x984] sm:$0xf] }
 0x1cc   : > { %3527 = vmatpush.bf16.msrb.mxu1 %v10571_v49 }
 0x1ce   : > { %2621 = vmatpush.bf16.msra.mxu3 %v10343_v28  ;;  %v10763_v28 = vor.u32 %v13683_v26, %v10762_v48  ;;  %v14630_v48 = vmov 8.0   ;;  %v10604_v26 = vld [vmem:[#allocation3 + $0x990] sm:$0xf0] }
 0x1cf   : > { %14389 = vrcp.f32 %v14630_v48  ;;  %v10607_v29 = vor.u32 %v13641_v23, %v10604_v26  ;;  %v13707_v48 = vld [vmem:[#allocation3 + $0xb8c] sm:$0xf0] }
 0x1d0   : > { %3536 = vmatpush.bf16.msrb.mxu2 %v10763_v28  ;;  %3528 = vmatpush.bf16.msrb.mxu1 %v10555_v34  ;;  %v14631_v28 = vmov 16.0  }
 0x1d1   : > { %14391 = vrcp.f32 %v14631_v28  ;;  %v13625_v28 = vld [vmem:[#allocation3 + $0x904] sm:$0xf] }
 0x1d2   : > { %2622 = vmatpush.bf16.msra.mxu3 %v10327_v31 }
 0x1d4   : > { %3529 = vmatpush.bf16.msrb.mxu1 %v10539_v43 }
 0x1d6   : > { %2623 = vmatpush.bf16.msra.mxu3 %v10311_v16  ;;  %v10746_v16 = vld [vmem:[#allocation3 + $0xaa0] sm:$0xf] }
 0x1d7   : > { %v10747_v37 = vor.u32 %v13679_v60, %v10746_v16 }
 0x1d9   : > { %3537 = vmatpush.bf16.msrb.mxu2 %v10747_v37 }
 0x1da   : > { %2624 = vmatpush.bf16.msra.mxu3 %v10295_v17  ;;  %v2416_v31 = vpop.f32.mrf.mxu0  ;;  %v13609_v17 = vld [vmem:[#allocation3 + $0x884] sm:$0xf] }
 0x1db   : > { %v10479_v38 = vor.u32 %v13609_v17, %v10476_v35  ;;  %v2417_v6 = vadd.f32 %v2416_v31, %v1759_v55  ;;  %v10666_v31 = vld [vmem:[#allocation3 + $0xa00] sm:$0xf]  ;;  %v13719_v17 = vld [vmem:[#allocation3 + $0xbec] sm:$0xf0]  ;;  %v13637_v35 = vld [vmem:[#allocation3 + $0x964] sm:$0xf] }
 0x1dc   : > { %v10667_v60 = vor.u32 %v13659_v32, %v10666_v31  ;;  %v10907_v37 = vor.u32 %v13719_v17, %v10906_v33  ;;  %v13673_v33 = vld [vmem:[#allocation3 + $0xa84] sm:$0xf] }
 0x1dd   : > { %2625 = vmatmul.bf16.vlgmr.msra.gmra.mxu3 %v14818_v24  ;;  %v10459_v24 = vor.u32 %v13607_v47, %v10458_v46  ;;  %v10460_v46 = vld [vmem:[#allocation3 + $0x870] sm:$0xf0]  ;;  %v10731_v47 = vor.u32 %v13675_v44, %v10730_v42 }
 0x1de   : > { %v10463_v50 = vor.u32 %v13605_v45, %v10460_v46  ;;  %v14831_v45 = vpop.eup %14389  ;;  %3548 = vmatpush.bf16.msrb.mxu3 %v10907_v37 }
 0x1df   : > { %3513 = vmatpush.bf16.msrb.mxu0 %v10459_v24  ;;  %v13653_v24 = vld [vmem:[#allocation3 + $0x9e4] sm:$0xf]  ;;  %3538 = vmatpush.bf16.msrb.mxu2 %v10731_v47  ;;  %v10890_v47 = vld [vmem:[#allocation3 + $0xbc0] sm:$0xf]  ;;  %vm2676_vm3 = vweird.f32 %v14831_v45 }
 0x1e0   : > { %v10655_v52 = vor.u32 %v13653_v24, %v10652_v51  ;;  %v14833_v24 = vpop.eup %14391  ;;  %v1760_v51 = vperm.slane %v14828_v13, 1 }
 0x1e1   : > { %vm2715_vm4 = vweird.f32 %v14833_v24 }
 0x1e2   : > { %3574 = vmatpush.bf16.msra.mxu1 %v10655_v52  ;;  %v2418_v61 = vpop.f32.mrf.mxu0 }
 0x1e3   : > { %3514 = vmatpush.bf16.msrb.mxu0 %v10443_v57  ;;  %v10715_v57 = vor.u32 %v13671_v54, %v10714_v53  ;;  %v2419_v16 = vadd.f32 %v2418_v61, %v1759_v55  ;;  %v13633_v55 = vld [vmem:[#allocation3 + $0x944] sm:$0xf] }
 0x1e4   : > { %v13681_v61 = vld [vmem:[#allocation3 + $0xac4] sm:$0xf] }
 0x1e5   : > { %3539 = vmatpush.bf16.msrb.mxu2 %v10715_v57  ;;  %v10572_v57 = vld [vmem:[#allocation3 + $0x950] sm:$0xf0] }
 0x1e6   : > { %v10575_v59 = vor.u32 %v13633_v55, %v10572_v57 }
 0x1e7   : > { %3515 = vmatpush.bf16.msrb.mxu0 %v10427_v1  ;;  %v10636_v1 = vld [vmem:[#allocation3 + $0x9d0] sm:$0xf0] }
 0x1e8   : > { %v10639_v2 = vor.u32 %v13649_v0, %v10636_v1 }
 0x1ea   : > { %v2430_v36 = vpop.f32.mrf.mxu1  ;;  %3575 = vmatpush.bf16.msra.mxu1 %v10639_v2 }
 0x1eb   : > { %3516 = vmatpush.bf16.msrb.mxu0 %v10411_v7  ;;  %v10699_v7 = vor.u32 %v13667_v5, %v10698_v4  ;;  %v2431_v56 = vadd.f32 %v2430_v36, %v2417_v6  ;;  %v2711_v4 = vmul.f32 16.0, %v14833_v24  ;;  %v10874_v5 = vld [vmem:[#allocation3 + $0xba0] sm:$0xf]  ;;  %v13711_v6 = vld [vmem:[#allocation3 + $0xbac] sm:$0xf0] }
 0x1ed   : > { %3540 = vmatpush.bf16.msrb.mxu2 %v10699_v7 }
 0x1ee   : > { %3576 = vmatpush.bf16.msra.mxu1 %v10623_v63 }
 0x1ef   : > { %3561 = vmatpush.bf16.msra.mxu0 %v10527_v12  ;;  %v10431_v12 = vor.u32 %v13597_v8, %v10428_v9  ;;  %v10875_v9 = vor.u32 %v13711_v6, %v10874_v5 }
 0x1f1   : > { %3541 = vmatpush.bf16.msrb.mxu2 %v10683_v20 }
 0x1f2   : > { %v2432_v3 = vpop.f32.mrf.mxu1  ;;  %3577 = vmatpush.bf16.msra.mxu1 %v10607_v29  ;;  %v10540_v29 = vld [vmem:[#allocation3 + $0x910] sm:$0xf0] }
 0x1f3   : > { %3562 = vmatpush.bf16.msra.mxu0 %v10511_v22  ;;  %v10412_v22 = vld [vmem:[#allocation3 + $0x810] sm:$0xf0]  ;;  %v2433_v41 = vadd.f32 %v2432_v3, %v2419_v16  ;;  %v2672_v3 = vmul.f32 8.0, %v14831_v45  ;;  %v10543_v32 = vor.u32 %v13625_v28, %v10540_v29  ;;  %v10794_v29 = vld [vmem:[#allocation3 + $0xb00] sm:$0xf] }
 0x1f4   : > { %v10415_v49 = vor.u32 %v13593_v21, %v10412_v22  ;;  %v2712_v22 = vsub.f32 1.0, %v2711_v4  ;;  %v10732_v16 = vld [vmem:[#allocation3 + $0xa90] sm:$0xf0] }
 0x1f5   : > { %3542 = vmatpush.bf16.msrb.mxu2 %v10667_v60  ;;  %v2673_v21 = vsub.f32 1.0, %v2672_v3  ;;  %v13665_v3 = vld [vmem:[#allocation3 + $0xa44] sm:$0xf]  ;;  %v10700_v4 = vld [vmem:[#allocation3 + $0xa50] sm:$0xf0] }
 0x1f6   : > { %v2713_v37 = vmul.f32 %v14833_v24, %v2712_v22 }
 0x1f7   : > { %3563 = vmatpush.bf16.msra.mxu0 %v10495_v30  ;;  %v2472_v30 = vpop.f32.mrf.mxu0 }
 0x1f8   : > { %v2473_v7 = vadd.f32 %v2472_v30, %v1760_v51 }
 0x1fa   : > { %v2486_v36 = vpop.f32.mrf.mxu1 }
 0x1fb   : > { %3564 = vmatpush.bf16.msra.mxu0 %v10479_v38  ;;  %v10588_v38 = vld [vmem:[#allocation3 + $0x970] sm:$0xf0]  ;;  %v2487_v63 = vadd.f32 %v2486_v36, %v2473_v7  ;;  %v2674_v36 = vmul.f32 %v14831_v45, %v2673_v21  ;;  %v10703_v7 = vor.u32 %v13665_v3, %v10700_v4  ;;  %v10530_v21 = vld [vmem:[#allocation3 + $0x8e8] sm:$0xf] }
 0x1fc   : > { %v10591_v43 = vor.u32 %v13637_v35, %v10588_v38  ;;  %v10735_v35 = vor.u32 %v13673_v33, %v10732_v16  ;;  %v10842_v38 = vld [vmem:[#allocation3 + $0xb60] sm:$0xf] }
 0x1fe   : > { %3578 = vmatpush.bf16.msra.mxu1 %v10591_v43  ;;  %v13669_v43 = vld [vmem:[#allocation3 + $0xa64] sm:$0xf] }
 0x1ff   : > { %3565 = vmatpush.bf16.msra.mxu0 %v10463_v50  ;;  %v13715_v50 = vld [vmem:[#allocation3 + $0xbcc] sm:$0xf0] }
 0x200   : > { %v10891_v54 = vor.u32 %v13715_v50, %v10890_v47 }
 0x201   : > { %v2444_v39 = vpop.f32.mrf.mxu2 }
 0x202   : > { %v2445_v19 = vadd.f32 %v2444_v39, %v2431_v56  ;;  %v13685_v39 = vld [vmem:[#allocation3 + $0xae4] sm:$0xf]  ;;  %3549 = vmatpush.bf16.msrb.mxu3 %v10891_v54  ;;  %3579 = vmatpush.bf16.msra.mxu1 %v10575_v59  ;;  %v10748_v56 = vld [vmem:[#allocation3 + $0xab0] sm:$0xf0]  ;;  %v2488_v20 = vpop.f32.mrf.mxu1  ;;  %v10826_v59 = vld [vmem:[#allocation3 + $0xb40] sm:$0xf] }
 0x203   : > { %3566 = vmatpush.bf16.msra.mxu0 %v10447_v62  ;;  %v10783_v44 = vor.u32 %v13685_v39, %v10780_v40  ;;  %v10764_v62 = vld [vmem:[#allocation3 + $0xad0] sm:$0xf0]  ;;  %v10751_v23 = vor.u32 %v13677_v14, %v10748_v56  ;;  %v13703_v39 = vld [vmem:[#allocation3 + $0xb6c] sm:$0xf0] }
 0x204   : > { %v10767_v2 = vor.u32 %v13681_v61, %v10764_v62  ;;  %v10843_v47 = vor.u32 %v13703_v39, %v10842_v38  ;;  %v13699_v61 = vld [vmem:[#allocation3 + $0xb4c] sm:$0xf0]  ;;  %v13620_v39 = vld [vmem:[#allocation3 + $0x8d4] sm:$0xf0] }
 0x205   : > { %3587 = vmatpush.bf16.msra.mxu2 %v10783_v44  ;;  %v10716_v44 = vld [vmem:[#allocation3 + $0xa70] sm:$0xf0] }
 0x206   : > { %3550 = vmatpush.bf16.msrb.mxu3 %v10875_v9  ;;  %v10719_v50 = vor.u32 %v13669_v43, %v10716_v44  ;;  %v10908_v43 = vld [vmem:[#allocation3 + $0xbf0] sm:$0xf0] }
 0x207   : > { %3567 = vmatpush.bf16.msra.mxu0 %v10431_v12  ;;  %v10556_v12 = vld [vmem:[#allocation3 + $0x930] sm:$0xf0] }
 0x209   : > { %v2446_v11 = vpop.f32.mrf.mxu2  ;;  %3588 = vmatpush.bf16.msra.mxu2 %v10767_v2  ;;  %v10827_v2 = vor.u32 %v13699_v61, %v10826_v59 }
 0x20a   : > { %v2447_v52 = vadd.f32 %v2446_v11, %v2433_v41  ;;  %v2474_v11 = vpop.f32.mrf.mxu0 }
 0x20b   : > { %3568 = vmatpush.bf16.msra.mxu0 %v10415_v49  ;;  %v2475_v40 = vadd.f32 %v2474_v11, %v1760_v51  ;;  %v2714_v51 = vadd.f32 %v14833_v24, %v2713_v37  ;;  %v2542_v5 = vpop.f32.mrf.mxu1 }
 0x20d   : > { %3589 = vmatpush.bf16.msra.mxu2 %v10751_v23  ;;  %v13661_v23 = vld [vmem:[#allocation3 + $0xa24] sm:$0xf] }
 0x211   : > { %3590 = vmatpush.bf16.msra.mxu2 %v10735_v35 }
 0x212   : > { %v2500_v46 = vpop.f32.mrf.mxu2  ;;  %v2528_v57 = vpop.f32.mrf.mxu0 }
 0x213   : > { %v2501_v49 = vadd.f32 %v2500_v46, %v2487_v63  ;;  %v1761_v46 = vperm.slane %v14828_v13, 2  ;;  %v14855_v63 = vsel %vm2715_vm4, %v14833_v24, %v2714_v51  ;;  %v13616_v51 = vld [vmem:[#allocation3 + $0x8b4] sm:$0xf0] }
 0x215   : > { %3591 = vmatpush.bf16.msra.mxu2 %v10719_v50 }
 0x219   : > { %3592 = vmatpush.bf16.msra.mxu2 %v10703_v7 }
 0x21a   : > { %v2502_v30 = vpop.f32.mrf.mxu2  ;;  %v2530_v35 = vpop.f32.mrf.mxu0 }
 0x220   : > { %v2458_v25 = vpop.f32.mrf.mxu3 }
 0x221   : > { %v2459_v27 = vadd.f32 %v2458_v25, %v2445_v19  ;;  %v10559_v19 = vor.u32 %v13629_v10, %v10556_v12  ;;  %v10858_v25 = vld [vmem:[#allocation3 + $0xb80] sm:$0xf]  ;;  %v2529_v12 = vadd.f32 %v2528_v57, %v1761_v46 }
 0x222   : > { %v2556_v56 = vpop.f32.mrf.mxu2 }
 0x223   : > { %v2631_v34 = vmul.f32 0.01, %v2459_v27  ;;  %3580 = vmatpush.bf16.msra.mxu1 %v10559_v19 }
 0x225   : > { %v2639_v42 = vmax.f32 %v2459_v27, %v2631_v34  ;;  %v10859_v27 = vor.u32 %v13707_v48, %v10858_v25  ;;  %v2543_v25 = vadd.f32 %v2542_v5, %v2529_v12  ;;  %v13709_v12 = vld [vmem:[#allocation3 + $0xba4] sm:$0xf] }
 0x227   : > { %v2647_v53 = vrot.slane %v2639_v42, 4  ;;  %3551 = vmatpush.bf16.msrb.mxu3 %v10859_v27  ;;  %3581 = vmatpush.bf16.msra.mxu1 %v10543_v32 }
 0x228   : > { %v2460_v58 = vpop.f32.mrf.mxu3 }
 0x229   : > { %v2648_v0 = vadd.f32 %v2647_v53, %v2639_v42  ;;  %v2461_v1 = vadd.f32 %v2460_v58, %v2447_v52  ;;  %v2489_v52 = vadd.f32 %v2488_v20, %v2475_v40  ;;  %v2675_v58 = vadd.f32 %v14831_v45, %v2674_v36 }
 0x22a   : > { %v2558_v59 = vpop.f32.mrf.mxu2 }
 0x22b   : > { %v2635_v8 = vmul.f32 0.01, %v2461_v1  ;;  %v2649_v15 = vrot.slane %v2648_v0, 2  ;;  %3552 = vmatpush.bf16.msrb.mxu3 %v10843_v47  ;;  %v2503_v62 = vadd.f32 %v2502_v30, %v2489_v52  ;;  %v14850_v14 = vsel %vm2676_vm3, %v14831_v45, %v2675_v58  ;;  %v10684_v45 = vld [vmem:[#allocation3 + $0xa30] sm:$0xf0]  ;;  %v2544_v52 = vpop.f32.mrf.mxu1 }
 0x22c   : > { %v10687_v24 = vor.u32 %v13661_v23, %v10684_v45  ;;  %v13691_v30 = vld [vmem:[#allocation3 + $0xb0c] sm:$0xf0]  ;;  %v10498_v58 = vld [vmem:[#allocation3 + $0x8a8] sm:$0xf] }
 0x22d   : > { %v2643_v18 = vmax.f32 %v2461_v1, %v2635_v8  ;;  %v2650_v34 = vadd.f32 %v2649_v15, %v2648_v0  ;;  %v10810_v15 = vld [vmem:[#allocation3 + $0xb20] sm:$0xf]  ;;  %v10795_v40 = vor.u32 %v13691_v30, %v10794_v29 }
 0x22e   : > { %3593 = vmatpush.bf16.msra.mxu2 %v10687_v24 }
 0x22f   : > { %v2682_v26 = vadd.f32 %v2643_v18, %v2639_v42  ;;  %v2651_v53 = vrot.slane %v2650_v34, 1  ;;  %3553 = vmatpush.bf16.msrb.mxu3 %v10827_v2  ;;  %v13695_v18 = vld [vmem:[#allocation3 + $0xb2c] sm:$0xf0] }
 0x230   : > { %v2514_v31 = vpop.f32.mrf.mxu3  ;;  %v10811_v22 = vor.u32 %v13695_v18, %v10810_v15 }
 0x231   : > { %v2683_v60 = vrot.slane %v2682_v26, 4  ;;  %v2515_v17 = vadd.f32 %v2514_v31, %v2501_v49  ;;  %v2652_v8 = vadd.f32 %v2651_v53, %v2650_v34  ;;  %v13624_v49 = vld [vmem:[#allocation3 + $0x8f4] sm:$0xf0]  ;;  %v2557_v31 = vadd.f32 %v2556_v56, %v2543_v25  ;;  %v10514_v34 = vld [vmem:[#allocation3 + $0x8c8] sm:$0xf] }
 0x232   : > { %v10531_v16 = vor.u32 %v13624_v49, %v10530_v21  ;;  %v2531_v53 = vadd.f32 %v2530_v35, %v1761_v46  ;;  %v10515_v57 = vor.u32 %v13620_v39, %v10514_v34  ;;  %v10499_v46 = vor.u32 %v13616_v51, %v10498_v58  ;;  %v10876_v56 = vld [vmem:[#allocation3 + $0xbb0] sm:$0xf0]  ;;  %v10466_v21 = vld [vmem:[#allocation3 + $0x868] sm:$0xf]  ;;  %v13701_v39 = vld [vmem:[#allocation3 + $0xb64] sm:$0xf] }
 0x233   : > { %v2684_v41 = vadd.f32 %v2683_v60, %v2682_v26  ;;  %v2632_v42 = vmul.f32 0.01, %v2515_v17  ;;  %v2678_v26 = vmul.f32 %v14850_v14, %v2652_v8  ;;  %3554 = vmatpush.bf16.msrb.mxu3 %v10811_v22  ;;  %v13657_v60 = vld [vmem:[#allocation3 + $0xa04] sm:$0xf]  ;;  %v10482_v8 = vld [vmem:[#allocation3 + $0x888] sm:$0xf] }
 0x234   : > { %v10658_v49 = vld [vmem:[#allocation3 + $0x9e8] sm:$0xf]  ;;  %v13648_v58 = vld [vmem:[#allocation3 + $0x9b4] sm:$0xf0]  ;;  %v13697_v51 = vld [vmem:[#allocation3 + $0xb44] sm:$0xf] }
 0x235   : > { %v2685_v54 = vrot.slane %v2684_v41, 2  ;;  %v2640_v55 = vmax.f32 %v2515_v17, %v2632_v42  ;;  %v10668_v17 = vld [vmem:[#allocation3 + $0xa10] sm:$0xf0]  ;;  %v13717_v42 = vld [vmem:[#allocation3 + $0xbe4] sm:$0xf] }
 0x236   : > { %v10911_v50 = vor.u32 %v13717_v42, %v10908_v43  ;;  %v10642_v35 = vld [vmem:[#allocation3 + $0x9c8] sm:$0xf] }
 0x237   : > { %v2686_v0 = vadd.f32 %v2685_v54, %v2684_v41  ;;  %v2653_v1 = vrot.slane %v2640_v55, 4  ;;  %v10671_v41 = vor.u32 %v13657_v60, %v10668_v17  ;;  %3555 = vmatpush.bf16.msrb.mxu3 %v10795_v40  ;;  %v10450_v60 = vld [vmem:[#allocation3 + $0x848] sm:$0xf]  ;;  %v13604_v17 = vld [vmem:[#allocation3 + $0x854] sm:$0xf0] }
 0x238   : > { %v2516_v6 = vpop.f32.mrf.mxu3  ;;  %v10844_v40 = vld [vmem:[#allocation3 + $0xb70] sm:$0xf0] }
 0x239   : > { %v2687_v9 = vrot.slane %v2686_v0, 1  ;;  %v2654_v10 = vadd.f32 %v2653_v1, %v2640_v55  ;;  %v2517_v11 = vadd.f32 %v2516_v6, %v2503_v62  ;;  %3594 = vmatpush.bf16.msra.mxu2 %v10671_v41  ;;  %v13713_v62 = vld [vmem:[#allocation3 + $0xbc4] sm:$0xf]  ;;  %v2545_v1 = vadd.f32 %v2544_v52, %v2531_v53 }
 0x23a   : > { %v10847_v43 = vor.u32 %v13701_v39, %v10844_v40  ;;  %v10451_v52 = vor.u32 %v13604_v17, %v10450_v60  ;;  %v10578_v39 = vld [vmem:[#allocation3 + $0x948] sm:$0xf] }
 0x23b   : > { %v2688_v19 = vadd.f32 %v2687_v9, %v2686_v0  ;;  %v2636_v20 = vmul.f32 0.01, %v2517_v11  ;;  %v2655_v48 = vrot.slane %v2654_v10, 2  ;;  %3600 = vmatpush.bf16.msra.mxu3 %v10911_v50  ;;  %v10892_v0 = vld [vmem:[#allocation3 + $0xbd0] sm:$0xf0]  ;;  %v2559_v5 = vadd.f32 %v2558_v59, %v2545_v1 }
 0x23c   : > { %v10895_v4 = vor.u32 %v13713_v62, %v10892_v0  ;;  %v10828_v59 = vld [vmem:[#allocation3 + $0xb50] sm:$0xf0] }
 0x23d   : > { %v2717_v27 = vmul.f32 %v14855_v63, %v2688_v19  ;;  %v2644_v28 = vmax.f32 %v2517_v11, %v2636_v20  ;;  %v2656_v37 = vadd.f32 %v2655_v48, %v2654_v10  ;;  %v13612_v11 = vld [vmem:[#allocation3 + $0x894] sm:$0xf0]  ;;  %v10879_v20 = vor.u32 %v13709_v12, %v10876_v56  ;;  %v13622_v56 = vld [vmem:[#allocation3 + $0x8ec] sm:$0xf] }
 0x23e   : > { %v10483_v25 = vor.u32 %v13612_v11, %v10482_v8  ;;  %v13608_v48 = vld [vmem:[#allocation3 + $0x874] sm:$0xf0]  ;;  %v10831_v0 = vor.u32 %v13697_v51, %v10828_v59  ;;  %v10562_v51 = vld [vmem:[#allocation3 + $0x928] sm:$0xf] }
 0x23f   : > { %v2721_v32 = vsel %vm516_vm0, %v2678_v26, %v2717_v27  ;;  %v2689_v33 = vadd.f32 %v2644_v28, %v2640_v55  ;;  %v2657_v61 = vrot.slane %v2656_v37, 1  ;;  %3601 = vmatpush.bf16.msra.mxu3 %v10895_v4  ;;  %v13656_v26 = vld [vmem:[#allocation3 + $0x9f4] sm:$0xf0]  ;;  %v13705_v27 = vld [vmem:[#allocation3 + $0xb84] sm:$0xf] }
 0x240   : > { %v14860_v36 = vpack.c.bf16 %v2721_v32, %v2721_v32  ;;  %v2570_v38 = vpop.f32.mrf.mxu3  ;;  %v10860_v28 = vld [vmem:[#allocation3 + $0xb90] sm:$0xf0]  ;;  %v10467_v32 = vor.u32 %v13608_v48, %v10466_v21  ;;  %v10659_v34 = vor.u32 %v13656_v26, %v10658_v49  ;;  %v13644_v8 = vld [vmem:[#allocation3 + $0x994] sm:$0xf0]  ;;  %v10786_v26 = vld [vmem:[#allocation3 + $0xae8] sm:$0xf] }
 0x241   : > { %v2690_v44 = vrot.slane %v2689_v33, 4  ;;  %v2571_v47 = vadd.f32 %v2570_v38, %v2557_v31  ;;  %v2658_v9 = vadd.f32 %v2657_v61, %v2656_v37  ;;  %v10863_v31 = vor.u32 %v13705_v27, %v10860_v28  ;;  %v13652_v38 = vld [vmem:[#allocation3 + $0x9d4] sm:$0xf0]  ;;  %v2598_v61 = vpop.f32.mrf.mxu1  ;;  %v13689_v27 = vld [vmem:[#allocation3 + $0xb04] sm:$0xf] }
 0x242   : > { %3517 = vmatmul.bf16.vlgmr.msrb.gmra.mxu0 %v14860_v36  ;;  %v10643_v53 = vor.u32 %v13652_v38, %v10642_v35  ;;  %v2612_v1 = vpop.f32.mrf.mxu2  ;;  %v10796_v28 = vld [vmem:[#allocation3 + $0xb10] sm:$0xf0] }
 0x243   : > { %v2691_v54 = vadd.f32 %v2690_v44, %v2689_v33  ;;  %v2633_v55 = vmul.f32 0.01, %v2571_v47  ;;  %3613 = vmatpush.bf16.msrb.mxu0 %v10531_v16  ;;  %3602 = vmatpush.bf16.msra.mxu3 %v10879_v20  ;;  %v2679_v45 = vmul.f32 %v14850_v14, %v2658_v9  ;;  %v1762_v44 = vperm.slane %v14828_v13, 3  ;;  %v13693_v9 = vld [vmem:[#allocation3 + $0xb24] sm:$0xf] }
 0x245   : > { %v2692_v2 = vrot.slane %v2691_v54, 2  ;;  %v2641_v3 = vmax.f32 %v2571_v47, %v2633_v55  ;;  %v2584_v47 = vpop.f32.mrf.mxu0  ;;  %v13600_v55 = vld [vmem:[#allocation3 + $0x834] sm:$0xf0] }
 0x247   : > { %v2693_v6 = vadd.f32 %v2692_v2, %v2691_v54  ;;  %v2659_v7 = vrot.slane %v2641_v3, 4  ;;  %3614 = vmatpush.bf16.msrb.mxu0 %v10515_v57  ;;  %3603 = vmatpush.bf16.msra.mxu3 %v10863_v31  ;;  %v10434_v54 = vld [vmem:[#allocation3 + $0x828] sm:$0xf]  ;;  %v13688_v31 = vld [vmem:[#allocation3 + $0xaf4] sm:$0xf0] }
 0x248   : > { %v2572_v10 = vpop.f32.mrf.mxu3  ;;  %v10626_v57 = vld [vmem:[#allocation3 + $0x9a8] sm:$0xf] }
 0x249   : > { %v2694_v15 = vrot.slane %v2693_v6, 1  ;;  %v2660_v18 = vadd.f32 %v2659_v7, %v2641_v3  ;;  %v2573_v19 = vadd.f32 %v2572_v10, %v2559_v5  ;;  %v10627_v4 = vor.u32 %v13648_v58, %v10626_v57  ;;  %v10418_v5 = vld [vmem:[#allocation3 + $0x808] sm:$0xf]  ;;  %v10812_v10 = vld [vmem:[#allocation3 + $0xb30] sm:$0xf0]  ;;  %v2600_v17 = vpop.f32.mrf.mxu1 }
 0x24a   : > { %v10610_v7 = vld [vmem:[#allocation3 + $0x988] sm:$0xf] }
 0x24b   : > { %v2695_v22 = vadd.f32 %v2694_v15, %v2693_v6  ;;  %v2637_v23 = vmul.f32 0.01, %v2573_v19  ;;  %3615 = vmatpush.bf16.msrb.mxu0 %v10499_v46  ;;  %v2661_v29 = vrot.slane %v2660_v18, 2  ;;  %3604 = vmatpush.bf16.msra.mxu3 %v10847_v43  ;;  %v13596_v6 = vld [vmem:[#allocation3 + $0x814] sm:$0xf0]  ;;  %v2585_v46 = vadd.f32 %v2584_v47, %v1762_v44 }
 0x24c   : > { %v10532_v15 = vld [vmem:[#allocation3 + $0x8f8] sm:$0xf0]  ;;  %v10419_v21 = vor.u32 %v13596_v6, %v10418_v5  ;;  %v13636_v47 = vld [vmem:[#allocation3 + $0x954] sm:$0xf0] }
 0x24d   : > { %v2718_v24 = vmul.f32 %v14855_v63, %v2695_v22  ;;  %v2645_v30 = vmax.f32 %v2573_v19, %v2637_v23  ;;  %v2662_v41 = vadd.f32 %v2661_v29, %v2660_v18  ;;  %v10815_v18 = vor.u32 %v13693_v9, %v10812_v10  ;;  %v10594_v23 = vld [vmem:[#allocation3 + $0x968] sm:$0xf]  ;;  %v2586_v48 = vpop.f32.mrf.mxu0  ;;  %v10484_v5 = vld [vmem:[#allocation3 + $0x898] sm:$0xf0] }
 0x24e   : > { %v2599_v19 = vadd.f32 %v2598_v61, %v2585_v46  ;;  %v10611_v22 = vor.u32 %v13644_v8, %v10610_v7  ;;  %v2587_v60 = vadd.f32 %v2586_v48, %v1762_v44  ;;  %v10500_v44 = vld [vmem:[#allocation3 + $0x8b8] sm:$0xf0]  ;;  %v10579_v58 = vor.u32 %v13636_v47, %v10578_v39  ;;  %v10546_v8 = vld [vmem:[#allocation3 + $0x908] sm:$0xf]  ;;  %v13598_v39 = vld [vmem:[#allocation3 + $0x82c] sm:$0xf] }
 0x24f   : > { %v2722_v33 = vsel %vm516_vm0, %v2679_v45, %v2718_v24  ;;  %v2696_v16 = vadd.f32 %v2645_v30, %v2641_v3  ;;  %3616 = vmatpush.bf16.msrb.mxu0 %v10483_v25  ;;  %v2663_v62 = vrot.slane %v2662_v41, 1  ;;  %v10435_v3 = vor.u32 %v13600_v55, %v10434_v54  ;;  %3605 = vmatpush.bf16.msra.mxu3 %v10831_v0  ;;  %v13640_v25 = vld [vmem:[#allocation3 + $0x974] sm:$0xf0]  ;;  %v13614_v54 = vld [vmem:[#allocation3 + $0x8ac] sm:$0xf] }
 0x250   : > { %v14868_v37 = vpack.c.bf16 %v2722_v33, %v2722_v33  ;;  %v2613_v49 = vadd.f32 %v2612_v1, %v2599_v19  ;;  %v10535_v45 = vor.u32 %v13622_v56, %v10532_v15  ;;  %v10516_v33 = vld [vmem:[#allocation3 + $0x8d8] sm:$0xf0]  ;;  %v10595_v38 = vor.u32 %v13640_v25, %v10594_v23  ;;  %v13632_v0 = vld [vmem:[#allocation3 + $0x934] sm:$0xf0]  ;;  %v10754_v1 = vld [vmem:[#allocation3 + $0xaa8] sm:$0xf] }
 0x251   : > { %v2697_v42 = vrot.slane %v2696_v16, 4  ;;  %v2664_v11 = vadd.f32 %v2663_v62, %v2662_v41  ;;  %v2601_v55 = vadd.f32 %v2600_v17, %v2587_v60  ;;  %v10563_v46 = vor.u32 %v13632_v0, %v10562_v51  ;;  %v10738_v56 = vld [vmem:[#allocation3 + $0xa88] sm:$0xf]  ;;  %v13676_v15 = vld [vmem:[#allocation3 + $0xa94] sm:$0xf0] }
 0x252   : > { %3530 = vmatmul.bf16.vlgmr.msrb.gmra.mxu1 %v14868_v37  ;;  %3569 = vmatmul.bf16.vlgmr.msra.gmra.mxu0 %v14860_v36  ;;  %v10468_v19 = vld [vmem:[#allocation3 + $0x878] sm:$0xf0]  ;;  %v10706_v17 = vld [vmem:[#allocation3 + $0xa48] sm:$0xf]  ;;  %v13646_v47 = vld [vmem:[#allocation3 + $0x9ac] sm:$0xf] }
 0x253   : > { %v2698_v50 = vadd.f32 %v2697_v42, %v2696_v16  ;;  %3617 = vmatpush.bf16.msrb.mxu0 %v10467_v32  ;;  %3626 = vmatpush.bf16.msrb.mxu1 %v10659_v34  ;;  %v2680_v24 = vmul.f32 %v14850_v14, %v2664_v11  ;;  %v13618_v32 = vld [vmem:[#allocation3 + $0x8cc] sm:$0xf]  ;;  %v10799_v16 = vor.u32 %v13689_v27, %v10796_v28  ;;  %v10660_v23 = vld [vmem:[#allocation3 + $0x9f8] sm:$0xf0]  ;;  %v13672_v28 = vld [vmem:[#allocation3 + $0xa74] sm:$0xf0] }
 0x254   : > { %3606 = vmatpush.bf16.msra.mxu3 %v10815_v18  ;;  %v10787_v42 = vor.u32 %v13688_v31, %v10786_v26  ;;  %v10519_v43 = vor.u32 %v13618_v32, %v10516_v33  ;;  %v13606_v18 = vld [vmem:[#allocation3 + $0x86c] sm:$0xf]  ;;  %v10722_v26 = vld [vmem:[#allocation3 + $0xa68] sm:$0xf]  ;;  %v10644_v33 = vld [vmem:[#allocation3 + $0x9d8] sm:$0xf0] }
 0x255   : > { %v2699_v13 = vrot.slane %v2698_v50, 2  ;;  %v13650_v32 = vld [vmem:[#allocation3 + $0x9cc] sm:$0xf]  ;;  %v10420_v51 = vld [vmem:[#allocation3 + $0x818] sm:$0xf0] }
 0x256   : > { %v11034_v0 = vld [vmem:[#allocation3 + $0xce0] sm:$0xf] }
 0x257   : > { %v2700_v2 = vadd.f32 %v2699_v13, %v2698_v50  ;;  %3618 = vmatpush.bf16.msrb.mxu0 %v10451_v52  ;;  %3627 = vmatpush.bf16.msrb.mxu1 %v10643_v53  ;;  %v10770_v50 = vld [vmem:[#allocation3 + $0xac8] sm:$0xf]  ;;  %v2614_v52 = vpop.f32.mrf.mxu2  ;;  %v13684_v53 = vld [vmem:[#allocation3 + $0xad4] sm:$0xf0]  ;;  %v10503_v13 = vor.u32 %v13614_v54, %v10500_v44 }
 0x258   : > { %3607 = vmatpush.bf16.msra.mxu3 %v10799_v16  ;;  %v2615_v59 = vadd.f32 %v2614_v52, %v2601_v55  ;;  %v10771_v62 = vor.u32 %v13684_v53, %v10770_v50  ;;  %v10628_v50 = vld [vmem:[#allocation3 + $0x9b8] sm:$0xf0]  ;;  %v10690_v44 = vld [vmem:[#allocation3 + $0xa28] sm:$0xf]  ;;  %v13664_v55 = vld [vmem:[#allocation3 + $0xa34] sm:$0xf0] }
 0x259   : > { %v2701_v12 = vrot.slane %v2700_v2, 1 }
 0x25b   : > { %v2702_v20 = vadd.f32 %v2701_v12, %v2700_v2  ;;  %3619 = vmatpush.bf16.msrb.mxu0 %v10435_v3  ;;  %3628 = vmatpush.bf16.msrb.mxu1 %v10627_v4  ;;  %v13680_v3 = vld [vmem:[#allocation3 + $0xab4] sm:$0xf0]  ;;  %v13610_v4 = vld [vmem:[#allocation3 + $0x88c] sm:$0xf] }
 0x25c   : > { %v10755_v10 = vor.u32 %v13680_v3, %v10754_v1  ;;  %v10487_v11 = vor.u32 %v13610_v4, %v10484_v5  ;;  %v13628_v12 = vld [vmem:[#allocation3 + $0x914] sm:$0xf0]  ;;  %v13751_v1 = vld [vmem:[#allocation3 + $0xcec] sm:$0xf0]  ;;  %v10691_v3 = vor.u32 %v13664_v55, %v10690_v44  ;;  %v10674_v5 = vld [vmem:[#allocation3 + $0xa08] sm:$0xf] }
 0x25d   : > { %v2719_v29 = vmul.f32 %v14855_v63, %v2702_v20  ;;  %v10547_v25 = vor.u32 %v13628_v12, %v10546_v8  ;;  %v10914_v8 = vld [vmem:[#allocation3 + $0xbe8] sm:$0xf]  ;;  %v10548_v44 = vld [vmem:[#allocation3 + $0x918] sm:$0xf0] }
 0x25f   : > { %v2723_v35 = vsel %vm516_vm0, %v2680_v24, %v2719_v29  ;;  %3620 = vmatpush.bf16.msrb.mxu0 %v10419_v21  ;;  %3629 = vmatpush.bf16.msrb.mxu1 %v10611_v22  ;;  %v13654_v22 = vld [vmem:[#allocation3 + $0x9ec] sm:$0xf]  ;;  %v10452_v29 = vld [vmem:[#allocation3 + $0x858] sm:$0xf0] }
 0x260   : > { %v2626_v30 = vpop.f32.mrf.mxu3  ;;  %v14876_v40 = vpack.c.bf16 %v2723_v35, %v2723_v35  ;;  %v10663_v27 = vor.u32 %v13654_v22, %v10660_v23  ;;  %v13602_v24 = vld [vmem:[#allocation3 + $0x84c] sm:$0xf]  ;;  %v10647_v35 = vor.u32 %v13650_v32, %v10644_v33 }
 0x261   : > { %v2627_v34 = vadd.f32 %v2626_v30, %v2613_v49  ;;  %v10739_v49 = vor.u32 %v13676_v15, %v10738_v56  ;;  %v10455_v60 = vor.u32 %v13602_v24, %v10452_v29  ;;  %v10596_v56 = vld [vmem:[#allocation3 + $0x978] sm:$0xf0]  ;;  %v13686_v15 = vld [vmem:[#allocation3 + $0xaec] sm:$0xf]  ;;  %v11002_v29 = vld [vmem:[#allocation3 + $0xca0] sm:$0xf] }
 0x262   : > { %3543 = vmatmul.bf16.vlgmr.msrb.gmra.mxu2 %v14876_v40  ;;  %3582 = vmatmul.bf16.vlgmr.msra.gmra.mxu1 %v14868_v37  ;;  %v10772_v24 = vld [vmem:[#allocation3 + $0xad8] sm:$0xf0] }
 0x263   : > { %v2634_v41 = vmul.f32 0.01, %v2627_v34  ;;  %3665 = vmatpush.bf16.msra.mxu0 %v10535_v45  ;;  %3630 = vmatpush.bf16.msrb.mxu1 %v10595_v38  ;;  %v10471_v45 = vor.u32 %v13606_v18, %v10468_v19  ;;  %v13668_v38 = vld [vmem:[#allocation3 + $0xa54] sm:$0xf0]  ;;  %v10788_v18 = vld [vmem:[#allocation3 + $0xaf8] sm:$0xf0] }
 0x264   : > { %3621 = vmatmul.bf16.vlgmr.msrb.gmra.mxu0 %v14860_v36  ;;  %3639 = vmatpush.bf16.msrb.mxu2 %v10787_v42  ;;  %v10707_v53 = vor.u32 %v13668_v38, %v10706_v17  ;;  %v11018_v19 = vld [vmem:[#allocation3 + $0xcc0] sm:$0xf]  ;;  %v13678_v38 = vld [vmem:[#allocation3 + $0xaac] sm:$0xf] }
 0x265   : > { %v2642_v57 = vmax.f32 %v2627_v34, %v2634_v41  ;;  %v10723_v34 = vor.u32 %v13672_v28, %v10722_v26  ;;  %v10436_v41 = vld [vmem:[#allocation3 + $0x838] sm:$0xf0]  ;;  %v13682_v28 = vld [vmem:[#allocation3 + $0xacc] sm:$0xf] }
 0x266   : > { %v10439_v54 = vor.u32 %v13598_v39, %v10436_v41  ;;  %v10775_v33 = vor.u32 %v13682_v28, %v10772_v24  ;;  %v10756_v39 = vld [vmem:[#allocation3 + $0xab8] sm:$0xf0]  ;;  %v10986_v41 = vld [vmem:[#allocation3 + $0xc80] sm:$0xf]  ;;  %v13662_v24 = vld [vmem:[#allocation3 + $0xa2c] sm:$0xf] }
 0x267   : > { %v2665_v61 = vrot.slane %v2642_v57, 4  ;;  %3666 = vmatpush.bf16.msra.mxu0 %v10519_v43  ;;  %3631 = vmatpush.bf16.msrb.mxu1 %v10579_v58  ;;  %v10631_v58 = vor.u32 %v13646_v47, %v10628_v50  ;;  %v10866_v47 = vld [vmem:[#allocation3 + $0xb88] sm:$0xf] }
 0x268   : > { %v2628_v2 = vpop.f32.mrf.mxu3  ;;  %3640 = vmatpush.bf16.msrb.mxu2 %v10771_v62 }
 0x269   : > { %v2666_v6 = vadd.f32 %v2665_v61, %v2642_v57  ;;  %v2629_v7 = vadd.f32 %v2628_v2, %v2615_v59  ;;  %v13642_v59 = vld [vmem:[#allocation3 + $0x98c] sm:$0xf]  ;;  %v10612_v61 = vld [vmem:[#allocation3 + $0x998] sm:$0xf0] }
 0x26b   : > { %v2638_v9 = vmul.f32 0.01, %v2629_v7  ;;  %3667 = vmatpush.bf16.msra.mxu0 %v10503_v13  ;;  %v2667_v20 = vrot.slane %v2666_v6, 2  ;;  %3632 = vmatpush.bf16.msrb.mxu1 %v10563_v46  ;;  %v11035_v46 = vor.u32 %v13751_v1, %v11034_v0 }
 0x26c   : > { %3641 = vmatpush.bf16.msrb.mxu2 %v10755_v10  ;;  %v13638_v10 = vld [vmem:[#allocation3 + $0x96c] sm:$0xf] }
 0x26d   : > { %v2646_v21 = vmax.f32 %v2629_v7, %v2638_v9  ;;  %v2668_v30 = vadd.f32 %v2667_v20, %v2666_v6  ;;  %v13660_v6 = vld [vmem:[#allocation3 + $0xa14] sm:$0xf0]  ;;  %v10615_v7 = vor.u32 %v13642_v59, %v10612_v61  ;;  %v13747_v20 = vld [vmem:[#allocation3 + $0xccc] sm:$0xf0]  ;;  %v11162_v61 = vld [vmem:[#allocation3 + $0xde0] sm:$0xf] }
 0x26e   : > { %v13720_v9 = vld [vmem:[#allocation3 + $0xbf4] sm:$0xf0]  ;;  %v10675_v22 = vor.u32 %v13660_v6, %v10674_v5  ;;  %v11019_v26 = vor.u32 %v13747_v20, %v11018_v19  ;;  %v13735_v59 = vld [vmem:[#allocation3 + $0xc6c] sm:$0xf0]  ;;  %v13670_v6 = vld [vmem:[#allocation3 + $0xa6c] sm:$0xf] }
 0x26f   : > { %v2703_v48 = vadd.f32 %v2646_v21, %v2642_v57  ;;  %3668 = vmatpush.bf16.msra.mxu0 %v10487_v11  ;;  %3633 = vmatpush.bf16.msrb.mxu1 %v10547_v25  ;;  %v2669_v42 = vrot.slane %v2668_v30, 1  ;;  %v13594_v57 = vld [vmem:[#allocation3 + $0x80c] sm:$0xf]  ;;  %v10915_v23 = vor.u32 %v13720_v9, %v10914_v8  ;;  %v13731_v8 = vld [vmem:[#allocation3 + $0xc4c] sm:$0xf0] }
 0x270   : > { %3642 = vmatpush.bf16.msrb.mxu2 %v10739_v49  ;;  %v10423_v4 = vor.u32 %v13594_v57, %v10420_v51  ;;  %v10791_v49 = vor.u32 %v13686_v15, %v10788_v18  ;;  %v13674_v57 = vld [vmem:[#allocation3 + $0xa8c] sm:$0xf]  ;;  %v10970_v51 = vld [vmem:[#allocation3 + $0xc60] sm:$0xf]  ;;  %v13700_v15 = vld [vmem:[#allocation3 + $0xb54] sm:$0xf0] }
 0x271   : > { %v2704_v31 = vrot.slane %v2703_v48, 4  ;;  %v2670_v62 = vadd.f32 %v2669_v42, %v2668_v30  ;;  %v13743_v30 = vld [vmem:[#allocation3 + $0xcac] sm:$0xf0]  ;;  %v11146_v9 = vld [vmem:[#allocation3 + $0xdc0] sm:$0xf] }
 0x272   : > { %3595 = vmatmul.bf16.vlgmr.msra.gmra.mxu2 %v14876_v40  ;;  %3634 = vmatmul.bf16.vlgmr.msrb.gmra.mxu1 %v14868_v37  ;;  %v11003_v17 = vor.u32 %v13743_v30, %v11002_v29  ;;  %v13739_v42 = vld [vmem:[#allocation3 + $0xc8c] sm:$0xf0]  ;;  %v13666_v20 = vld [vmem:[#allocation3 + $0xa4c] sm:$0xf]  ;;  %v10692_v29 = vld [vmem:[#allocation3 + $0xa38] sm:$0xf0] }
 0x273   : > { %v2705_v16 = vadd.f32 %v2704_v31, %v2703_v48  ;;  %3669 = vmatpush.bf16.msra.mxu0 %v10471_v45  ;;  %3678 = vmatpush.bf16.msra.mxu1 %v10663_v27  ;;  %v2681_v11 = vmul.f32 %v14850_v14, %v2670_v62  ;;  %v10599_v48 = vor.u32 %v13638_v10, %v10596_v56  ;;  %v10898_v14 = vld [vmem:[#allocation3 + $0xbc8] sm:$0xf]  ;;  %v13716_v45 = vld [vmem:[#allocation3 + $0xbd4] sm:$0xf0]  ;;  %v10580_v27 = vld [vmem:[#allocation3 + $0x958] sm:$0xf0] }
 0x274   : > { %3643 = vmatpush.bf16.msrb.mxu2 %v10723_v34  ;;  %v10899_v31 = vor.u32 %v13716_v45, %v10898_v14  ;;  %v13712_v34 = vld [vmem:[#allocation3 + $0xbb4] sm:$0xf0]  ;;  %v10987_v55 = vor.u32 %v13739_v42, %v10986_v41  ;;  %v13783_v62 = vld [vmem:[#allocation3 + $0xdec] sm:$0xf0]  ;;  %v10834_v56 = vld [vmem:[#allocation3 + $0xb48] sm:$0xf] }
 0x275   : > { %v2706_v43 = vrot.slane %v2705_v16, 2  ;;  %v11163_v5 = vor.u32 %v13783_v62, %v11162_v61  ;;  %v13779_v10 = vld [vmem:[#allocation3 + $0xdcc] sm:$0xf0]  ;;  %v10835_v14 = vor.u32 %v13700_v15, %v10834_v56  ;;  %v10922_v30 = vld [vmem:[#allocation3 + $0xc00] sm:$0xf] }
 0x276   : > { %v11147_v19 = vor.u32 %v13779_v10, %v11146_v9  ;;  %v13710_v10 = vld [vmem:[#allocation3 + $0xbac] sm:$0xf]  ;;  %v11066_v15 = vld [vmem:[#allocation3 + $0xd20] sm:$0xf] }
 0x277   : > { %v2707_v52 = vadd.f32 %v2706_v43, %v2705_v16  ;;  %3670 = vmatpush.bf16.msra.mxu0 %v10455_v60  ;;  %3679 = vmatpush.bf16.msra.mxu1 %v10647_v35  ;;  %v10882_v16 = vld [vmem:[#allocation3 + $0xba8] sm:$0xf]  ;;  %v13630_v60 = vld [vmem:[#allocation3 + $0x92c] sm:$0xf]  ;;  %v10564_v35 = vld [vmem:[#allocation3 + $0x938] sm:$0xf0] }
 0x278   : > { %3644 = vmatpush.bf16.msrb.mxu2 %v10707_v53  ;;  %v10883_v43 = vor.u32 %v13712_v34, %v10882_v16  ;;  %v10567_v50 = vor.u32 %v13630_v60, %v10564_v35  ;;  %v13708_v53 = vld [vmem:[#allocation3 + $0xb94] sm:$0xf0]  ;;  %v13749_v34 = vld [vmem:[#allocation3 + $0xce4] sm:$0xf]  ;;  %v11036_v60 = vld [vmem:[#allocation3 + $0xcf0] sm:$0xf0] }
 0x279   : > { %v2708_v13 = vrot.slane %v2707_v52, 1  ;;  %v10802_v35 = vld [vmem:[#allocation3 + $0xb08] sm:$0xf] }
 0x27b   : > { %v2709_v2 = vadd.f32 %v2708_v13, %v2707_v52  ;;  %3671 = vmatpush.bf16.msra.mxu0 %v10439_v54  ;;  %3680 = vmatpush.bf16.msra.mxu1 %v10631_v58  ;;  %v10759_v52 = vor.u32 %v13678_v38, %v10756_v39  ;;  %v13626_v54 = vld [vmem:[#allocation3 + $0x90c] sm:$0xf]  ;;  %v10740_v58 = vld [vmem:[#allocation3 + $0xa98] sm:$0xf0]  ;;  %v10867_v13 = vor.u32 %v13708_v53, %v10866_v47  ;;  %v13692_v38 = vld [vmem:[#allocation3 + $0xb14] sm:$0xf0] }
 0x27c   : > { %3645 = vmatpush.bf16.msrb.mxu2 %v10691_v3  ;;  %v10551_v0 = vor.u32 %v13626_v54, %v10548_v44  ;;  %v10743_v1 = vor.u32 %v13674_v57, %v10740_v58  ;;  %v13704_v3 = vld [vmem:[#allocation3 + $0xb74] sm:$0xf0]  ;;  %v13658_v39 = vld [vmem:[#allocation3 + $0xa0c] sm:$0xf]  ;;  %v11098_v53 = vld [vmem:[#allocation3 + $0xd60] sm:$0xf] }
 0x27d   : > { %v2720_v12 = vmul.f32 %v14855_v63, %v2709_v2  ;;  %v13634_v63 = vld [vmem:[#allocation3 + $0x94c] sm:$0xf]  ;;  %v10850_v2 = vld [vmem:[#allocation3 + $0xb68] sm:$0xf]  ;;  %v13767_v54 = vld [vmem:[#allocation3 + $0xd6c] sm:$0xf0] }
 0x27e   : > { %v10583_v32 = vor.u32 %v13634_v63, %v10580_v27  ;;  %v10818_v63 = vld [vmem:[#allocation3 + $0xb28] sm:$0xf]  ;;  %v13718_v47 = vld [vmem:[#allocation3 + $0xbec] sm:$0xf]  ;;  %v11290_v44 = vld [vmem:[#allocation3 + $0xee0] sm:$0xf]  ;;  %v11099_v62 = vor.u32 %v13767_v54, %v11098_v53 }
 0x27f   : > { %v2724_v21 = vsel %vm516_vm0, %v2681_v11, %v2720_v12  ;;  %3672 = vmatpush.bf16.msra.mxu0 %v10423_v4  ;;  %3681 = vmatpush.bf16.msra.mxu1 %v10615_v7  ;;  %v10971_v4 = vor.u32 %v13735_v59, %v10970_v51  ;;  %v10724_v7 = vld [vmem:[#allocation3 + $0xa78] sm:$0xf0]  ;;  %v10851_v11 = vor.u32 %v13704_v3, %v10850_v2  ;;  %v13815_v57 = vld [vmem:[#allocation3 + $0xeec] sm:$0xf0]  ;;  %v13745_v58 = vld [vmem:[#allocation3 + $0xcc4] sm:$0xf] }
 0x280   : > { %v14886_v25 = vpack.c.bf16 %v2724_v21, %v2724_v21  ;;  %3646 = vmatpush.bf16.msrb.mxu2 %v10675_v22  ;;  %v10727_v12 = vor.u32 %v13670_v6, %v10724_v7  ;;  %v10708_v21 = vld [vmem:[#allocation3 + $0xa58] sm:$0xf0]  ;;  %v10938_v22 = vld [vmem:[#allocation3 + $0xc20] sm:$0xf]  ;;  %v11020_v51 = vld [vmem:[#allocation3 + $0xcd0] sm:$0xf0] }
 0x281   : > { %v10711_v45 = vor.u32 %v13666_v20, %v10708_v21  ;;  %v11023_v2 = vor.u32 %v13745_v58, %v11020_v51  ;;  %v11082_v3 = vld [vmem:[#allocation3 + $0xd40] sm:$0xf]  ;;  %v13811_v6 = vld [vmem:[#allocation3 + $0xecc] sm:$0xf0]  ;;  %v13741_v7 = vld [vmem:[#allocation3 + $0xca4] sm:$0xf] }
 0x282   : > { %3556 = vmatmul.bf16.vlgmr.msrb.gmra.mxu3 %v14886_v25  ;;  %3673 = vmatmul.bf16.vlgmr.msra.gmra.mxu0 %v14860_v36  ;;  %v13807_v20 = vld [vmem:[#allocation3 + $0xeac] sm:$0xf0]  ;;  %v13737_v21 = vld [vmem:[#allocation3 + $0xc84] sm:$0xf]  ;;  %v13698_v53 = vld [vmem:[#allocation3 + $0xb4c] sm:$0xf] }
 0x283   : > { %4505 = vmatpush.bf16.msrb.mxu0 %v11035_v46  ;;  %3652 = vmatpush.bf16.msrb.mxu3 %v10915_v23  ;;  %v10954_v46 = vld [vmem:[#allocation3 + $0xc40] sm:$0xf]  ;;  %v13727_v23 = vld [vmem:[#allocation3 + $0xc2c] sm:$0xf0]  ;;  %v10836_v54 = vld [vmem:[#allocation3 + $0xb58] sm:$0xf0] }
 0x284   : > { %3682 = vmatpush.bf16.msra.mxu1 %v10599_v48  ;;  %3691 = vmatpush.bf16.msra.mxu2 %v10791_v49  ;;  %v10955_v18 = vor.u32 %v13731_v8, %v10954_v46  ;;  %v11130_v48 = vld [vmem:[#allocation3 + $0xda0] sm:$0xf]  ;;  %v13775_v49 = vld [vmem:[#allocation3 + $0xdac] sm:$0xf0]  ;;  %v10939_v27 = vor.u32 %v13727_v23, %v10938_v22  ;;  %v11004_v46 = vld [vmem:[#allocation3 + $0xcb0] sm:$0xf0] }
 0x285   : > { %3647 = vmatmul.bf16.vlgmr.msrb.gmra.mxu2 %v14876_v40  ;;  %v11131_v28 = vor.u32 %v13775_v49, %v11130_v48  ;;  %v11007_v56 = vor.u32 %v13741_v7, %v11004_v46  ;;  %v10988_v22 = vld [vmem:[#allocation3 + $0xc90] sm:$0xf0]  ;;  %v13706_v49 = vld [vmem:[#allocation3 + $0xb8c] sm:$0xf]  ;;  %v13795_v51 = vld [vmem:[#allocation3 + $0xe4c] sm:$0xf0] }
 0x286   : > { %v13721_v46 = vld [vmem:[#allocation3 + $0xc04] sm:$0xf] }
 0x287   : > { %4506 = vmatpush.bf16.msrb.mxu0 %v11019_v26  ;;  %3653 = vmatpush.bf16.msrb.mxu3 %v10899_v31  ;;  %v13696_v26 = vld [vmem:[#allocation3 + $0xb34] sm:$0xf0]  ;;  %v13723_v31 = vld [vmem:[#allocation3 + $0xc0c] sm:$0xf0] }
 0x288   : > { %3683 = vmatpush.bf16.msra.mxu1 %v10583_v32  ;;  %3692 = vmatpush.bf16.msra.mxu2 %v10775_v33  ;;  %v11114_v32 = vld [vmem:[#allocation3 + $0xd80] sm:$0xf]  ;;  %v13771_v33 = vld [vmem:[#allocation3 + $0xd8c] sm:$0xf0]  ;;  %v10819_v16 = vor.u32 %v13696_v26, %v10818_v63  ;;  %v10923_v41 = vor.u32 %v13723_v31, %v10922_v30  ;;  %v10991_v63 = vor.u32 %v13737_v21, %v10988_v22  ;;  %v10972_v30 = vld [vmem:[#allocation3 + $0xc70] sm:$0xf0] }
 0x289   : > { %v11115_v42 = vor.u32 %v13771_v33, %v11114_v32  ;;  %v11050_v26 = vld [vmem:[#allocation3 + $0xd00] sm:$0xf]  ;;  %v13781_v32 = vld [vmem:[#allocation3 + $0xde4] sm:$0xf]  ;;  %v11164_v33 = vld [vmem:[#allocation3 + $0xdf0] sm:$0xf0] }
 0x28a   : > { %v11418_v21 = vld [vmem:[#allocation3 + $0xfe0] sm:$0xf]  ;;  %v13847_v22 = vld [vmem:[#allocation3 + $0xfec] sm:$0xf0] }
 0x28b   : > { %4507 = vmatpush.bf16.msrb.mxu0 %v11003_v17  ;;  %3654 = vmatpush.bf16.msrb.mxu3 %v10883_v43  ;;  %v10695_v17 = vor.u32 %v13662_v24, %v10692_v29  ;;  %v10676_v43 = vld [vmem:[#allocation3 + $0xa18] sm:$0xf0]  ;;  %v13803_v24 = vld [vmem:[#allocation3 + $0xe8c] sm:$0xf0]  ;;  %v13733_v29 = vld [vmem:[#allocation3 + $0xc64] sm:$0xf] }
 0x28c   : > { %3684 = vmatpush.bf16.msra.mxu1 %v10567_v50  ;;  %3693 = vmatpush.bf16.msra.mxu2 %v10759_v52  ;;  %v10916_v50 = vld [vmem:[#allocation3 + $0xbf8] sm:$0xf0]  ;;  %v11039_v52 = vor.u32 %v13749_v34, %v11036_v60  ;;  %v10679_v59 = vor.u32 %v13658_v39, %v10676_v43  ;;  %v13702_v34 = vld [vmem:[#allocation3 + $0xb6c] sm:$0xf]  ;;  %v11167_v39 = vor.u32 %v13781_v32, %v11164_v33  ;;  %v10956_v43 = vld [vmem:[#allocation3 + $0xc50] sm:$0xf0] }
 0x28d   : > { %v10919_v61 = vor.u32 %v13718_v47, %v10916_v50  ;;  %v10852_v60 = vld [vmem:[#allocation3 + $0xb78] sm:$0xf0]  ;;  %v13777_v50 = vld [vmem:[#allocation3 + $0xdc4] sm:$0xf]  ;;  %v11402_v32 = vld [vmem:[#allocation3 + $0xfc0] sm:$0xf] }
 0x28e   : > { %v10855_v47 = vor.u32 %v13702_v34, %v10852_v60  ;;  %v13843_v33 = vld [vmem:[#allocation3 + $0xfcc] sm:$0xf0]  ;;  %v13761_v60 = vld [vmem:[#allocation3 + $0xd44] sm:$0xf] }
 0x28f   : > { %4508 = vmatpush.bf16.msrb.mxu0 %v10987_v55  ;;  %3655 = vmatpush.bf16.msrb.mxu3 %v10867_v13  ;;  %v10803_v55 = vor.u32 %v13692_v38, %v10802_v35  ;;  %v13714_v13 = vld [vmem:[#allocation3 + $0xbcc] sm:$0xf]  ;;  %v10975_v35 = vor.u32 %v13733_v29, %v10972_v30  ;;  %v11226_v38 = vld [vmem:[#allocation3 + $0xe60] sm:$0xf]  ;;  %v11026_v29 = vld [vmem:[#allocation3 + $0xcc8] sm:$0xf] }
 0x290   : > { %3685 = vmatpush.bf16.msra.mxu1 %v10551_v0  ;;  %3694 = vmatpush.bf16.msra.mxu2 %v10743_v1  ;;  %v10900_v0 = vld [vmem:[#allocation3 + $0xbd8] sm:$0xf0]  ;;  %v11291_v1 = vor.u32 %v13815_v57, %v11290_v44  ;;  %v11210_v57 = vld [vmem:[#allocation3 + $0xe40] sm:$0xf]  ;;  %v13748_v30 = vld [vmem:[#allocation3 + $0xcd4] sm:$0xf0] }
 0x291   : > { %v10903_v8 = vor.u32 %v13714_v13, %v10900_v0  ;;  %v13773_v13 = vld [vmem:[#allocation3 + $0xda4] sm:$0xf]  ;;  %v11132_v0 = vld [vmem:[#allocation3 + $0xdb0] sm:$0xf0] }
 0x292   : > { %3608 = vmatmul.bf16.vlgmr.msra.gmra.mxu3 %v14886_v25  ;;  %v11135_v7 = vor.u32 %v13773_v13, %v11132_v0  ;;  %v11370_v13 = vld [vmem:[#allocation3 + $0xf80] sm:$0xf]  ;;  %v13835_v0 = vld [vmem:[#allocation3 + $0xf8c] sm:$0xf0] }
 0x293   : > { %4509 = vmatpush.bf16.msrb.mxu0 %v10971_v4  ;;  %3656 = vmatpush.bf16.msrb.mxu3 %v10851_v11  ;;  %v13763_v4 = vld [vmem:[#allocation3 + $0xd4c] sm:$0xf0]  ;;  %v10884_v11 = vld [vmem:[#allocation3 + $0xbb8] sm:$0xf0] }
 0x294   : > { %4518 = vmatpush.bf16.msrb.mxu1 %v11163_v5  ;;  %3695 = vmatpush.bf16.msra.mxu2 %v10727_v12  ;;  %v11274_v5 = vld [vmem:[#allocation3 + $0xec0] sm:$0xf]  ;;  %v11083_v9 = vor.u32 %v13763_v4, %v11082_v3  ;;  %v10887_v23 = vor.u32 %v13710_v10, %v10884_v11  ;;  %v11211_v3 = vor.u32 %v13795_v51, %v11210_v57  ;;  %v11116_v11 = vld [vmem:[#allocation3 + $0xd90] sm:$0xf0]  ;;  %v13805_v57 = vld [vmem:[#allocation3 + $0xea4] sm:$0xf] }
 0x295   : > { %3686 = vmatmul.bf16.vlgmr.msra.gmra.mxu1 %v14868_v37  ;;  %v11275_v12 = vor.u32 %v13811_v6, %v11274_v5  ;;  %v11194_v5 = vld [vmem:[#allocation3 + $0xe20] sm:$0xf]  ;;  %v13791_v6 = vld [vmem:[#allocation3 + $0xe2c] sm:$0xf0] }
 0x297   : > { %4510 = vmatpush.bf16.msrb.mxu0 %v10955_v18  ;;  %3657 = vmatpush.bf16.msrb.mxu3 %v10835_v14  ;;  %v13759_v18 = vld [vmem:[#allocation3 + $0xd2c] sm:$0xf0]  ;;  %v10868_v14 = vld [vmem:[#allocation3 + $0xb98] sm:$0xf0] }
 0x298   : > { %4519 = vmatpush.bf16.msrb.mxu1 %v11147_v19  ;;  %3696 = vmatpush.bf16.msra.mxu2 %v10711_v45  ;;  %v11258_v19 = vld [vmem:[#allocation3 + $0xea0] sm:$0xf]  ;;  %v11067_v48 = vor.u32 %v13759_v18, %v11066_v15  ;;  %v10871_v31 = vor.u32 %v13706_v49, %v10868_v14  ;;  %v13690_v15 = vld [vmem:[#allocation3 + $0xb0c] sm:$0xf]  ;;  %v10804_v18 = vld [vmem:[#allocation3 + $0xb18] sm:$0xf0] }
 0x299   : > { %v11259_v45 = vor.u32 %v13807_v20, %v11258_v19  ;;  %v11195_v19 = vor.u32 %v13791_v6, %v11194_v5  ;;  %v11178_v49 = vld [vmem:[#allocation3 + $0xe00] sm:$0xf]  ;;  %v13787_v14 = vld [vmem:[#allocation3 + $0xe0c] sm:$0xf0]  ;;  %v13801_v6 = vld [vmem:[#allocation3 + $0xe84] sm:$0xf] }
 0x29b   : > { %4511 = vmatpush.bf16.msrb.mxu0 %v10939_v27  ;;  %3658 = vmatpush.bf16.msrb.mxu3 %v10819_v16  ;;  %v13755_v27 = vld [vmem:[#allocation3 + $0xd0c] sm:$0xf0] }
 0x29c   : > { %4520 = vmatpush.bf16.msrb.mxu1 %v11131_v28  ;;  %3697 = vmatpush.bf16.msra.mxu2 %v10695_v17  ;;  %v11242_v28 = vld [vmem:[#allocation3 + $0xe80] sm:$0xf]  ;;  %v11051_v16 = vor.u32 %v13755_v27, %v11050_v26  ;;  %v11100_v26 = vld [vmem:[#allocation3 + $0xd70] sm:$0xf0]  ;;  %v13813_v27 = vld [vmem:[#allocation3 + $0xee4] sm:$0xf] }
 0x29d   : > { %v11243_v17 = vor.u32 %v13803_v24, %v11242_v28  ;;  %v11292_v28 = vld [vmem:[#allocation3 + $0xef0] sm:$0xf0]  ;;  %v11419_v24 = vor.u32 %v13847_v22, %v11418_v21  ;;  %v13797_v21 = vld [vmem:[#allocation3 + $0xe64] sm:$0xf] }
 0x29e   : > { %v11295_v34 = vor.u32 %v13813_v27, %v11292_v28  ;;  %v11228_v22 = vld [vmem:[#allocation3 + $0xe70] sm:$0xf0]  ;;  %v13827_v27 = vld [vmem:[#allocation3 + $0xf4c] sm:$0xf0] }
 0x29f   : > { %4512 = vmatpush.bf16.msrb.mxu0 %v10923_v41  ;;  %3659 = vmatpush.bf16.msrb.mxu3 %v10803_v55  ;;  %v13799_v41 = vld [vmem:[#allocation3 + $0xe6c] sm:$0xf0]  ;;  %v11231_v28 = vor.u32 %v13797_v21, %v11228_v22  ;;  %v11090_v21 = vld [vmem:[#allocation3 + $0xd48] sm:$0xf] }
 0x2a0   : > { %4521 = vmatpush.bf16.msrb.mxu1 %v11115_v42  ;;  %3698 = vmatpush.bf16.msra.mxu2 %v10679_v59  ;;  %v13729_v42 = vld [vmem:[#allocation3 + $0xc44] sm:$0xf]  ;;  %v11227_v44 = vor.u32 %v13799_v41, %v11226_v38  ;;  %v11403_v41 = vor.u32 %v13843_v33, %v11402_v32  ;;  %v10946_v32 = vld [vmem:[#allocation3 + $0xc28] sm:$0xf] }
 0x2a1   : > { %v10959_v55 = vor.u32 %v13729_v42, %v10956_v43  ;;  %v13725_v59 = vld [vmem:[#allocation3 + $0xc24] sm:$0xf]  ;;  %v11010_v42 = vld [vmem:[#allocation3 + $0xca8] sm:$0xf]  ;;  %v13744_v43 = vld [vmem:[#allocation3 + $0xcb4] sm:$0xf0] }
 0x2a2   : > { %4513 = vmatmul.bf16.vlgmr.msrb.gmra.mxu0 %v14860_v36  ;;  %3660 = vmatmul.bf16.vlgmr.msrb.gmra.mxu3 %v14886_v25  ;;  %v13809_v38 = vld [vmem:[#allocation3 + $0xec4] sm:$0xf] }
 0x2a3   : > { %4557 = vmatpush.bf16.msra.mxu0 %v11039_v52  ;;  %3704 = vmatpush.bf16.msra.mxu3 %v10919_v61  ;;  %v11148_v52 = vld [vmem:[#allocation3 + $0xdd0] sm:$0xf0] }
 0x2a4   : > { %4522 = vmatpush.bf16.msrb.mxu1 %v11099_v62  ;;  %4531 = vmatpush.bf16.msrb.mxu2 %v11291_v1  ;;  %v11151_v58 = vor.u32 %v13777_v50, %v11148_v52  ;;  %v10940_v61 = vld [vmem:[#allocation3 + $0xc30] sm:$0xf0]  ;;  %v10839_v62 = vor.u32 %v13698_v53, %v10836_v54  ;;  %v13694_v1 = vld [vmem:[#allocation3 + $0xb2c] sm:$0xf]  ;;  %v13839_v50 = vld [vmem:[#allocation3 + $0xfac] sm:$0xf0] }
 0x2a5   : > { %3699 = vmatmul.bf16.vlgmr.msra.gmra.mxu2 %v14876_v40  ;;  %v10943_v4 = vor.u32 %v13725_v59, %v10940_v61  ;;  %v13757_v54 = vld [vmem:[#allocation3 + $0xd24] sm:$0xf]  ;;  %v10994_v59 = vld [vmem:[#allocation3 + $0xc88] sm:$0xf]  ;;  %v13740_v61 = vld [vmem:[#allocation3 + $0xc94] sm:$0xf0] }
 0x2a6   : > { %v10995_v5 = vor.u32 %v13740_v61, %v10994_v59  ;;  %v13819_v59 = vld [vmem:[#allocation3 + $0xf0c] sm:$0xf0] }
 0x2a7   : > { %4558 = vmatpush.bf16.msra.mxu0 %v11023_v2  ;;  %3705 = vmatpush.bf16.msra.mxu3 %v10903_v8  ;;  %v10820_v2 = vld [vmem:[#allocation3 + $0xb38] sm:$0xf0]  ;;  %v10924_v8 = vld [vmem:[#allocation3 + $0xc10] sm:$0xf0] }
 0x2a8   : > { %4523 = vmatpush.bf16.msrb.mxu1 %v11083_v9  ;;  %4532 = vmatpush.bf16.msrb.mxu2 %v11275_v12  ;;  %v13769_v9 = vld [vmem:[#allocation3 + $0xd84] sm:$0xf]  ;;  %v10823_v10 = vor.u32 %v13694_v1, %v10820_v2  ;;  %v11042_v12 = vld [vmem:[#allocation3 + $0xce8] sm:$0xf]  ;;  %v10927_v20 = vor.u32 %v13721_v46, %v10924_v8  ;;  %v11371_v8 = vor.u32 %v13835_v0, %v11370_v13  ;;  %v11420_v0 = vld [vmem:[#allocation3 + $0xff0] sm:$0xf0] }
 0x2a9   : > { %v10978_v46 = vld [vmem:[#allocation3 + $0xc68] sm:$0xf]  ;;  %v13845_v13 = vld [vmem:[#allocation3 + $0xfe4] sm:$0xf] }
 0x2ab   : > { %4559 = vmatpush.bf16.msra.mxu0 %v11007_v56  ;;  %3706 = vmatpush.bf16.msra.mxu3 %v10887_v23  ;;  %v13752_v56 = vld [vmem:[#allocation3 + $0xcf4] sm:$0xf0]  ;;  %v11119_v23 = vor.u32 %v13769_v9, %v11116_v11 }
 0x2ac   : > { %4524 = vmatpush.bf16.msrb.mxu1 %v11067_v48  ;;  %4533 = vmatpush.bf16.msrb.mxu2 %v11259_v45  ;;  %v11043_v48 = vor.u32 %v13752_v56, %v11042_v12  ;;  %v13765_v45 = vld [vmem:[#allocation3 + $0xd64] sm:$0xf]  ;;  %v13736_v9 = vld [vmem:[#allocation3 + $0xc74] sm:$0xf0]  ;;  %v11354_v12 = vld [vmem:[#allocation3 + $0xf60] sm:$0xf] }
 0x2ad   : > { %v13784_v11 = vld [vmem:[#allocation3 + $0xdf4] sm:$0xf0]  ;;  %v13831_v56 = vld [vmem:[#allocation3 + $0xf6c] sm:$0xf0] }
 0x2af   : > { %4560 = vmatpush.bf16.msra.mxu0 %v10991_v63  ;;  %3707 = vmatpush.bf16.msra.mxu3 %v10871_v31  ;;  %v10807_v63 = vor.u32 %v13690_v15, %v10804_v18  ;;  %v11179_v31 = vor.u32 %v13787_v14, %v11178_v49  ;;  %v13732_v49 = vld [vmem:[#allocation3 + $0xc54] sm:$0xf0]  ;;  %v11154_v14 = vld [vmem:[#allocation3 + $0xdc8] sm:$0xf] }
 0x2b0   : > { %4525 = vmatpush.bf16.msrb.mxu1 %v11051_v16  ;;  %4534 = vmatpush.bf16.msrb.mxu2 %v11243_v17  ;;  %v11103_v16 = vor.u32 %v13765_v45, %v11100_v26  ;;  %v11027_v17 = vor.u32 %v13748_v30, %v11026_v29  ;;  %v13780_v45 = vld [vmem:[#allocation3 + $0xdd4] sm:$0xf0]  ;;  %v11338_v26 = vld [vmem:[#allocation3 + $0xf40] sm:$0xf]  ;;  %v13793_v30 = vld [vmem:[#allocation3 + $0xe44] sm:$0xf] }
 0x2b1   : > { %v11155_v29 = vor.u32 %v13780_v45, %v11154_v14  ;;  %v11339_v33 = vor.u32 %v13827_v27, %v11338_v26  ;;  %v13742_v26 = vld [vmem:[#allocation3 + $0xcac] sm:$0xf]  ;;  %v11012_v27 = vld [vmem:[#allocation3 + $0xcb8] sm:$0xf0] }
 0x2b3   : > { %4561 = vmatpush.bf16.msra.mxu0 %v10975_v35  ;;  %3708 = vmatpush.bf16.msra.mxu3 %v10855_v47  ;;  %v11084_v35 = vld [vmem:[#allocation3 + $0xd50] sm:$0xf0]  ;;  %v11386_v47 = vld [vmem:[#allocation3 + $0xfa0] sm:$0xf] }
 0x2b4   : > { %4570 = vmatpush.bf16.msra.mxu1 %v11167_v39  ;;  %4535 = vmatpush.bf16.msrb.mxu2 %v11227_v44  ;;  %v11276_v39 = vld [vmem:[#allocation3 + $0xed0] sm:$0xf0]  ;;  %v11087_v52 = vor.u32 %v13761_v60, %v11084_v35  ;;  %v11011_v44 = vor.u32 %v13744_v43, %v11010_v42  ;;  %v11387_v51 = vor.u32 %v13839_v50, %v11386_v47  ;;  %v13776_v60 = vld [vmem:[#allocation3 + $0xdb4] sm:$0xf0]  ;;  %v13823_v35 = vld [vmem:[#allocation3 + $0xf2c] sm:$0xf0] }
 0x2b5   : > { %4526 = vmatmul.bf16.vlgmr.msrb.gmra.mxu1 %v14868_v37  ;;  %v11279_v53 = vor.u32 %v13809_v38, %v11276_v39  ;;  %v13789_v39 = vld [vmem:[#allocation3 + $0xe24] sm:$0xf]  ;;  %v11196_v43 = vld [vmem:[#allocation3 + $0xe30] sm:$0xf0]  ;;  %v10930_v47 = vld [vmem:[#allocation3 + $0xc08] sm:$0xf] }
 0x2b6   : > { %v13724_v50 = vld [vmem:[#allocation3 + $0xc14] sm:$0xf0]  ;;  %v11199_v61 = vor.u32 %v13789_v39, %v11196_v43  ;;  %v11372_v39 = vld [vmem:[#allocation3 + $0xf90] sm:$0xf0]  ;;  %v11058_v43 = vld [vmem:[#allocation3 + $0xd08] sm:$0xf] }
 0x2b7   : > { %4562 = vmatpush.bf16.msra.mxu0 %v10959_v55  ;;  %3709 = vmatpush.bf16.msra.mxu3 %v10839_v62  ;;  %v11068_v55 = vld [vmem:[#allocation3 + $0xd30] sm:$0xf0] }
 0x2b8   : > { %4571 = vmatpush.bf16.msra.mxu1 %v11151_v58  ;;  %4536 = vmatpush.bf16.msrb.mxu2 %v11211_v3  ;;  %v11260_v58 = vld [vmem:[#allocation3 + $0xeb0] sm:$0xf0]  ;;  %v11071_v1 = vor.u32 %v13757_v54, %v11068_v55  ;;  %v13753_v3 = vld [vmem:[#allocation3 + $0xd04] sm:$0xf]  ;;  %v13772_v54 = vld [vmem:[#allocation3 + $0xd94] sm:$0xf0] }
 0x2b9   : > { %v11263_v2 = vor.u32 %v13805_v57, %v11260_v58  ;;  %v11044_v58 = vld [vmem:[#allocation3 + $0xcf8] sm:$0xf0] }
 0x2bb   : > { %4563 = vmatpush.bf16.msra.mxu0 %v10943_v4  ;;  %3710 = vmatpush.bf16.msra.mxu3 %v10823_v10  ;;  %v11052_v4 = vld [vmem:[#allocation3 + $0xd10] sm:$0xf0]  ;;  %v11170_v10 = vld [vmem:[#allocation3 + $0xde8] sm:$0xf] }
 0x2bc   : > { %4572 = vmatpush.bf16.msra.mxu1 %v11135_v7  ;;  %4537 = vmatpush.bf16.msrb.mxu2 %v11195_v19  ;;  %v11244_v7 = vld [vmem:[#allocation3 + $0xe90] sm:$0xf0]  ;;  %v11055_v15 = vor.u32 %v13753_v3, %v11052_v4  ;;  %v10979_v19 = vor.u32 %v13736_v9, %v10978_v46  ;;  %v13785_v3 = vld [vmem:[#allocation3 + $0xe04] sm:$0xf]  ;;  %v13768_v46 = vld [vmem:[#allocation3 + $0xd74] sm:$0xf0] }
 0x2bd   : > { %v11247_v18 = vor.u32 %v13801_v6, %v11244_v7  ;;  %v11180_v4 = vld [vmem:[#allocation3 + $0xe10] sm:$0xf0]  ;;  %v13816_v9 = vld [vmem:[#allocation3 + $0xef4] sm:$0xf0] }
 0x2bf   : > { %4564 = vmatpush.bf16.msra.mxu0 %v10927_v20  ;;  %3711 = vmatpush.bf16.msra.mxu3 %v10807_v63  ;;  %v14900_v62 = vpop.f32.mrf.mxu0  ;;  %v11171_v20 = vor.u32 %v13784_v11, %v11170_v10  ;;  %v11423_v10 = vor.u32 %v13845_v13, %v11420_v0  ;;  %v13746_v11 = vld [vmem:[#allocation3 + $0xccc] sm:$0xf]  ;;  %v13829_v0 = vld [vmem:[#allocation3 + $0xf64] sm:$0xf] }
 0x2c0   : > { %4573 = vmatpush.bf16.msra.mxu1 %v11119_v23  ;;  %4538 = vmatpush.bf16.msrb.mxu2 %v11179_v31  ;;  %v10962_v23 = vld [vmem:[#allocation3 + $0xc48] sm:$0xf]  ;;  %v11212_v31 = vld [vmem:[#allocation3 + $0xe50] sm:$0xf0] }
 0x2c1   : > { %v11215_v38 = vor.u32 %v13793_v30, %v11212_v31  ;;  %v11074_v31 = vld [vmem:[#allocation3 + $0xd28] sm:$0xf] }
 0x2c2   : > { %4565 = vmatmul.bf16.vlgmr.msra.gmra.mxu0 %v14860_v36  ;;  %3712 = vmatmul.bf16.vlgmr.msra.gmra.mxu3 %v14886_v25 }
 0x2c3   : > { %4609 = vmatpush.bf16.msrb.mxu0 %v11043_v48  ;;  %4544 = vmatpush.bf16.msrb.mxu3 %v11419_v24  ;;  %v11355_v48 = vor.u32 %v13831_v56, %v11354_v12  ;;  %v10963_v24 = vor.u32 %v13732_v49, %v10962_v23  ;;  %v11028_v12 = vld [vmem:[#allocation3 + $0xcd8] sm:$0xf0]  ;;  %v11183_v56 = vor.u32 %v13785_v3, %v11180_v4  ;;  %v13764_v23 = vld [vmem:[#allocation3 + $0xd54] sm:$0xf0] }
 0x2c4   : > { %4574 = vmatpush.bf16.msra.mxu1 %v11103_v16  ;;  %4583 = vmatpush.bf16.msra.mxu2 %v11295_v34  ;;  %v13728_v16 = vld [vmem:[#allocation3 + $0xc34] sm:$0xf0]  ;;  %v11138_v34 = vld [vmem:[#allocation3 + $0xda8] sm:$0xf]  ;;  %v11031_v22 = vor.u32 %v13746_v11, %v11028_v12  ;;  %v11156_v11 = vld [vmem:[#allocation3 + $0xdd8] sm:$0xf0] }
 0x2c5   : > { %4539 = vmatmul.bf16.vlgmr.msrb.gmra.mxu2 %v14876_v40  ;;  %v11139_v42 = vor.u32 %v13776_v60, %v11138_v34  ;;  %v13812_v49 = vld [vmem:[#allocation3 + $0xed4] sm:$0xf0]  ;;  %v13825_v12 = vld [vmem:[#allocation3 + $0xf44] sm:$0xf] }
 0x2c6   : > { %v13808_v34 = vld [vmem:[#allocation3 + $0xeb4] sm:$0xf0] }
 0x2c7   : > { %4610 = vmatpush.bf16.msrb.mxu0 %v11027_v17  ;;  %4545 = vmatpush.bf16.msrb.mxu3 %v11403_v41  ;;  %v3520_v63 = vpop.f32.mrf.mxu0  ;;  %v11322_v17 = vld [vmem:[#allocation3 + $0xf20] sm:$0xf]  ;;  %v10947_v41 = vor.u32 %v13728_v16, %v10946_v32  ;;  %v11015_v32 = vor.u32 %v13742_v26, %v11012_v27  ;;  %v11266_v16 = vld [vmem:[#allocation3 + $0xea8] sm:$0xf]  ;;  %v13821_v27 = vld [vmem:[#allocation3 + $0xf24] sm:$0xf] }
 0x2c8   : > { %4575 = vmatpush.bf16.msra.mxu1 %v11087_v52  ;;  %4584 = vmatpush.bf16.msra.mxu2 %v11279_v53  ;;  %v11323_v52 = vor.u32 %v13823_v35, %v11322_v17  ;;  %v11122_v53 = vld [vmem:[#allocation3 + $0xd88] sm:$0xf]  ;;  %v13738_v17 = vld [vmem:[#allocation3 + $0xc8c] sm:$0xf]  ;;  %v10996_v35 = vld [vmem:[#allocation3 + $0xc98] sm:$0xf0] }
 0x2cb   : > { %4611 = vmatpush.bf16.msrb.mxu0 %v11011_v44  ;;  %4546 = vmatpush.bf16.msrb.mxu3 %v11387_v51  ;;  %v13750_v44 = vld [vmem:[#allocation3 + $0xcec] sm:$0xf]  ;;  %v11306_v51 = vld [vmem:[#allocation3 + $0xf00] sm:$0xf] }
 0x2cc   : > { %4576 = vmatpush.bf16.msra.mxu1 %v11071_v1  ;;  %4585 = vmatpush.bf16.msra.mxu2 %v11263_v2  ;;  %v10931_v1 = vor.u32 %v13724_v50, %v10930_v47  ;;  %v11123_v2 = vor.u32 %v13772_v54, %v11122_v53  ;;  %v11047_v6 = vor.u32 %v13750_v44, %v11044_v58  ;;  %v13756_v47 = vld [vmem:[#allocation3 + $0xd14] sm:$0xf0]  ;;  %v13734_v54 = vld [vmem:[#allocation3 + $0xc6c] sm:$0xf] }
 0x2cd   : > { %v11307_v7 = vor.u32 %v13819_v59, %v11306_v51  ;;  %v10999_v50 = vor.u32 %v13738_v17, %v10996_v35  ;;  %v13804_v53 = vld [vmem:[#allocation3 + $0xe94] sm:$0xf0]  ;;  %v10980_v51 = vld [vmem:[#allocation3 + $0xc78] sm:$0xf0]  ;;  %v13782_v59 = vld [vmem:[#allocation3 + $0xdec] sm:$0xf] }
 0x2ce   : > { %v10983_v4 = vor.u32 %v13734_v54, %v10980_v51  ;;  %v11124_v17 = vld [vmem:[#allocation3 + $0xd98] sm:$0xf0]  ;;  %v13817_v35 = vld [vmem:[#allocation3 + $0xf04] sm:$0xf]  ;;  %v13788_v54 = vld [vmem:[#allocation3 + $0xe14] sm:$0xf0] }
 0x2cf   : > { %4612 = vmatpush.bf16.msrb.mxu0 %v10995_v5  ;;  %4547 = vmatpush.bf16.msrb.mxu3 %v11371_v8  ;;  %v14903_v55 = vpop.f32.mrf.mxu1  ;;  %v14905_v57 = vpop.f32.mrf.mxu0  ;;  %v11106_v5 = vld [vmem:[#allocation3 + $0xd68] sm:$0xf] }
 0x2d0   : > { %4577 = vmatpush.bf16.msra.mxu1 %v11055_v15  ;;  %4586 = vmatpush.bf16.msra.mxu2 %v11247_v18  ;;  %v11298_v8 = vld [vmem:[#allocation3 + $0xee8] sm:$0xf]  ;;  %v13841_v15 = vld [vmem:[#allocation3 + $0xfc4] sm:$0xf]  ;;  %v11404_v18 = vld [vmem:[#allocation3 + $0xfd0] sm:$0xf0] }
 0x2d1   : > { %v11407_v63 = vor.u32 %v13841_v15, %v11404_v18 }
 0x2d3   : > { %4613 = vmatpush.bf16.msrb.mxu0 %v10979_v19  ;;  %4548 = vmatpush.bf16.msrb.mxu3 %v11355_v48  ;;  %v11107_v19 = vor.u32 %v13768_v46, %v11106_v5  ;;  %v11282_v48 = vld [vmem:[#allocation3 + $0xec8] sm:$0xf]  ;;  %v13730_v46 = vld [vmem:[#allocation3 + $0xc4c] sm:$0xf] }
 0x2d4   : > { %4622 = vmatpush.bf16.msrb.mxu1 %v11171_v20  ;;  %4587 = vmatpush.bf16.msra.mxu2 %v11231_v28  ;;  %v11299_v20 = vor.u32 %v13816_v9, %v11298_v8  ;;  %v13837_v28 = vld [vmem:[#allocation3 + $0xfa4] sm:$0xf]  ;;  %v11283_v30 = vor.u32 %v13812_v49, %v11282_v48  ;;  %v10964_v9 = vld [vmem:[#allocation3 + $0xc58] sm:$0xf0] }
 0x2d5   : > { %4578 = vmatmul.bf16.vlgmr.msra.gmra.mxu1 %v14868_v37 }
 0x2d7   : > { %4614 = vmatpush.bf16.msrb.mxu0 %v10963_v24  ;;  %4549 = vmatpush.bf16.msrb.mxu3 %v11339_v33  ;;  %v3533_v14 = vpop.f32.mrf.mxu1  ;;  %v3572_v45 = vpop.f32.mrf.mxu0  ;;  %v11388_v24 = vld [vmem:[#allocation3 + $0xfb0] sm:$0xf0]  ;;  %v13760_v33 = vld [vmem:[#allocation3 + $0xd34] sm:$0xf0] }
 0x2d8   : > { %4623 = vmatpush.bf16.msrb.mxu1 %v11155_v29  ;;  %4588 = vmatpush.bf16.msra.mxu2 %v11215_v38  ;;  %v11091_v29 = vor.u32 %v13764_v23, %v11090_v21  ;;  %v11391_v60 = vor.u32 %v13837_v28, %v11388_v24  ;;  %v13833_v38 = vld [vmem:[#allocation3 + $0xf84] sm:$0xf]  ;;  %v11218_v21 = vld [vmem:[#allocation3 + $0xe48] sm:$0xf]  ;;  %v13726_v23 = vld [vmem:[#allocation3 + $0xc2c] sm:$0xf] }
 0x2d9   : > { %v11375_v58 = vor.u32 %v13833_v38, %v11372_v39  ;;  %v10948_v14 = vld [vmem:[#allocation3 + $0xc38] sm:$0xf0]  ;;  %v13774_v45 = vld [vmem:[#allocation3 + $0xdac] sm:$0xf]  ;;  %v11324_v28 = vld [vmem:[#allocation3 + $0xf30] sm:$0xf0] }
 0x2da   : > { %v11308_v38 = vld [vmem:[#allocation3 + $0xf10] sm:$0xf0] }
 0x2db   : > { %4615 = vmatpush.bf16.msrb.mxu0 %v10947_v41  ;;  %4550 = vmatpush.bf16.msrb.mxu3 %v11323_v52  ;;  %v11075_v41 = vor.u32 %v13760_v33, %v11074_v31  ;;  %v11250_v52 = vld [vmem:[#allocation3 + $0xe88] sm:$0xf]  ;;  %v13722_v33 = vld [vmem:[#allocation3 + $0xc0c] sm:$0xf] }
 0x2dc   : > { %4624 = vmatpush.bf16.msrb.mxu1 %v11139_v42  ;;  %4589 = vmatpush.bf16.msra.mxu2 %v11199_v61  ;;  %v11267_v42 = vor.u32 %v13808_v34, %v11266_v16  ;;  %v11172_v61 = vld [vmem:[#allocation3 + $0xdf8] sm:$0xf0]  ;;  %v11251_v3 = vor.u32 %v13804_v53, %v11250_v52  ;;  %v11202_v31 = vld [vmem:[#allocation3 + $0xe28] sm:$0xf]  ;;  %v11327_v16 = vor.u32 %v13821_v27, %v11324_v28  ;;  %v13836_v27 = vld [vmem:[#allocation3 + $0xf94] sm:$0xf0] }
 0x2dd   : > { %v11175_v5 = vor.u32 %v13782_v59, %v11172_v61  ;;  %v10932_v34 = vld [vmem:[#allocation3 + $0xc18] sm:$0xf0]  ;;  %v11186_v53 = vld [vmem:[#allocation3 + $0xe08] sm:$0xf]  ;;  %v11311_v59 = vor.u32 %v13817_v35, %v11308_v38  ;;  %v13832_v38 = vld [vmem:[#allocation3 + $0xf74] sm:$0xf0] }
 0x2de   : > { %v11108_v61 = vld [vmem:[#allocation3 + $0xd78] sm:$0xf0]  ;;  %v11362_v35 = vld [vmem:[#allocation3 + $0xf68] sm:$0xf] }
 0x2df   : > { %4616 = vmatpush.bf16.msrb.mxu0 %v10931_v1  ;;  %4551 = vmatpush.bf16.msrb.mxu3 %v11307_v7  ;;  %v14910_v44 = vpop.f32.mrf.mxu1  ;;  %v11356_v1 = vld [vmem:[#allocation3 + $0xf70] sm:$0xf0]  ;;  %v13800_v7 = vld [vmem:[#allocation3 + $0xe74] sm:$0xf0] }
 0x2e0   : > { %4625 = vmatpush.bf16.msrb.mxu1 %v11123_v2  ;;  %4590 = vmatpush.bf16.msra.mxu2 %v11183_v56  ;;  %v11059_v2 = vor.u32 %v13756_v47, %v11058_v43  ;;  %v11359_v8 = vor.u32 %v13829_v0, %v11356_v1  ;;  %v11340_v56 = vld [vmem:[#allocation3 + $0xf50] sm:$0xf0]  ;;  %v11426_v43 = vld [vmem:[#allocation3 + $0xfe8] sm:$0xf]  ;;  %v13848_v47 = vld [vmem:[#allocation3 + $0xff4] sm:$0xf0] }
 0x2e1   : > { %v14912_v13 = vpop.f32.mrf.mxu0  ;;  %v11343_v49 = vor.u32 %v13825_v12, %v11340_v56  ;;  %v13814_v0 = vld [vmem:[#allocation3 + $0xeec] sm:$0xf]  ;;  %v11300_v1 = vld [vmem:[#allocation3 + $0xef8] sm:$0xf0] }
 0x2e2   : > { %4617 = vmatmul.bf16.vlgmr.msrb.gmra.mxu0 %v14860_v36  ;;  %4552 = vmatmul.bf16.vlgmr.msrb.gmra.mxu3 %v14886_v25 }
 0x2e3   : > { %4661 = vmatpush.bf16.msra.mxu0 %v11047_v6  ;;  %4596 = vmatpush.bf16.msra.mxu3 %v11423_v10  ;;  %v11234_v6 = vld [vmem:[#allocation3 + $0xe68] sm:$0xf]  ;;  %v13778_v10 = vld [vmem:[#allocation3 + $0xdcc] sm:$0xf] }
 0x2e4   : > { %4626 = vmatpush.bf16.msrb.mxu1 %v11107_v19  ;;  %4635 = vmatpush.bf16.msrb.mxu2 %v11299_v20  ;;  %v11235_v18 = vor.u32 %v13800_v7, %v11234_v6  ;;  %v10967_v19 = vor.u32 %v13730_v46, %v10964_v9  ;;  %v11159_v20 = vor.u32 %v13778_v10, %v11156_v11  ;;  %v13855_v46 = vld [vmem:[%s15727_s8 + $0x30] sm:$0xff]  ;;  %v11092_v9 = vld [vmem:[#allocation3 + $0xd58] sm:$0xf0] }
 0x2e5   : > { %4591 = vmatmul.bf16.vlgmr.msra.gmra.mxu2 %v14876_v40  ;;  %v14914_v15 = vpop.f32.mrf.mxu2  ;;  %v11303_v7 = vor.u32 %v13814_v0, %v11300_v1  ;;  %v13810_v10 = vld [vmem:[#allocation3 + $0xecc] sm:$0xf]  ;;  %v11284_v11 = vld [vmem:[#allocation3 + $0xed8] sm:$0xf0] }
 0x2e6   : > { %v13851_v1 = vld [vmem:[%s15727_s8 + $0x10] sm:$0xff] }
 0x2e7   : > { %4662 = vmatpush.bf16.msra.mxu0 %v11031_v22  ;;  %4597 = vmatpush.bf16.msra.mxu3 %v11407_v63  ;;  %v13796_v22 = vld [vmem:[#allocation3 + $0xe54] sm:$0xf0]  ;;  %v3585_v48 = vpop.f32.mrf.mxu1  ;;  %v11140_v63 = vld [vmem:[#allocation3 + $0xdb8] sm:$0xf0] }
 0x2e8   : > { %4627 = vmatpush.bf16.msrb.mxu1 %v11091_v29  ;;  %4636 = vmatpush.bf16.msrb.mxu2 %v11283_v30  ;;  %v11219_v24 = vor.u32 %v13796_v22, %v11218_v21  ;;  %v10951_v29 = vor.u32 %v13726_v23, %v10948_v14  ;;  %v11143_v30 = vor.u32 %v13774_v45, %v11140_v63  ;;  %v13854_v23 = vld [vmem:[%s15727_s8 + $0x28] sm:$0xff]  ;;  %v13758_v48 = vld [vmem:[#allocation3 + $0xd2c] sm:$0xf]  ;;  %v11268_v45 = vld [vmem:[#allocation3 + $0xeb8] sm:$0xf0] }
 0x2e9   : > { %v3624_v26 = vpop.f32.mrf.mxu0  ;;  %v11287_v22 = vor.u32 %v13810_v10, %v11284_v11  ;;  %v13806_v14 = vld [vmem:[#allocation3 + $0xeac] sm:$0xf]  ;;  %v13862_v10 = vld [vmem:[%s15727_s8 + $0x68] sm:$0xff] }
 0x2ea   : > { %v11378_v26 = vld [vmem:[#allocation3 + $0xf88] sm:$0xf]  ;;  %v13790_v11 = vld [vmem:[#allocation3 + $0xe2c] sm:$0xf] }
 0x2eb   : > { %4663 = vmatpush.bf16.msra.mxu0 %v11015_v32  ;;  %4598 = vmatpush.bf16.msra.mxu3 %v11391_v60  ;;  %v13792_v32 = vld [vmem:[#allocation3 + $0xe34] sm:$0xf0]  ;;  %v13770_v60 = vld [vmem:[#allocation3 + $0xd8c] sm:$0xf] }
 0x2ec   : > { %4628 = vmatpush.bf16.msrb.mxu1 %v11075_v41  ;;  %4637 = vmatpush.bf16.msrb.mxu2 %v11267_v42  ;;  %v11203_v41 = vor.u32 %v13792_v32, %v11202_v31  ;;  %v13856_v42 = vld [vmem:[%s15727_s8 + $0x38] sm:$0xff]  ;;  %v11127_v52 = vor.u32 %v13770_v60, %v11124_v17  ;;  %v13754_v31 = vld [vmem:[#allocation3 + $0xd0c] sm:$0xf]  ;;  %v11060_v32 = vld [vmem:[#allocation3 + $0xd18] sm:$0xf0]  ;;  %v11379_v60 = vor.u32 %v13836_v27, %v11378_v26 }
 0x2ed   : > { %v3546_v39 = vpop.f32.mrf.mxu2  ;;  %v11188_v26 = vld [vmem:[#allocation3 + $0xe18] sm:$0xf0] }
 0x2ef   : > { %4664 = vmatpush.bf16.msra.mxu0 %v10999_v50  ;;  %4599 = vmatpush.bf16.msra.mxu3 %v11375_v58  ;;  %v10935_v50 = vor.u32 %v13722_v33, %v10932_v34  ;;  %v13766_v58 = vld [vmem:[#allocation3 + $0xd6c] sm:$0xf]  ;;  %v14920_v51 = vpop.f32.mrf.mxu1 }
 0x2f0   : > { %4629 = vmatpush.bf16.msrb.mxu1 %v11059_v2  ;;  %4638 = vmatpush.bf16.msrb.mxu2 %v11251_v3  ;;  %v11427_v2 = vor.u32 %v13848_v47, %v11426_v43  ;;  %v11187_v3 = vor.u32 %v13788_v54, %v11186_v53  ;;  %v11111_v6 = vor.u32 %v13766_v58, %v11108_v61  ;;  %v13802_v33 = vld [vmem:[#allocation3 + $0xe8c] sm:$0xf]  ;;  %v13852_v43 = vld [vmem:[%s15727_s8 + $0x18] sm:$0xff]  ;;  %v13828_v58 = vld [vmem:[#allocation3 + $0xf54] sm:$0xf0] }
 0x2f1   : > { %v13864_v47 = vld [vmem:[%s15727_s8 + $0x78] sm:$0xff]  ;;  %v11363_v54 = vor.u32 %v13832_v38, %v11362_v35 }
 0x2f3   : > { %4665 = vmatpush.bf16.msra.mxu0 %v10983_v4  ;;  %4600 = vmatpush.bf16.msra.mxu3 %v11359_v8  ;;  %v11410_v4 = vld [vmem:[#allocation3 + $0xfc8] sm:$0xf]  ;;  %v13762_v8 = vld [vmem:[#allocation3 + $0xd4c] sm:$0xf] }
 0x2f4   : > { %4674 = vmatpush.bf16.msra.mxu1 %v11175_v5  ;;  %4639 = vmatpush.bf16.msrb.mxu2 %v11235_v18  ;;  %v13844_v5 = vld [vmem:[#allocation3 + $0xfd4] sm:$0xf0]  ;;  %v11394_v18 = vld [vmem:[#allocation3 + $0xfa8] sm:$0xf]  ;;  %v11095_v21 = vor.u32 %v13762_v8, %v11092_v9  ;;  %v13850_v9 = vld [vmem:[%s15727_s8 + $0x8] sm:$0xff] }
 0x2f5   : > { %4630 = vmatmul.bf16.vlgmr.msrb.gmra.mxu1 %v14868_v37  ;;  %v11411_v12 = vor.u32 %v13844_v5, %v11410_v4  ;;  %v14926_v56 = vpop.f32.mrf.mxu2 }
 0x2f7   : > { %4666 = vmatpush.bf16.msra.mxu0 %v10967_v19  ;;  %4601 = vmatpush.bf16.msra.mxu3 %v11343_v49  ;;  %v13840_v19 = vld [vmem:[#allocation3 + $0xfb4] sm:$0xf0]  ;;  %v3637_v49 = vpop.f32.mrf.mxu1 }
 0x2f8   : > { %4675 = vmatpush.bf16.msra.mxu1 %v11159_v20  ;;  %4640 = vmatpush.bf16.msrb.mxu2 %v11219_v24  ;;  %v14928_v20 = vld [vmem:[#allocation5 + $0x3] ss:$8 sm:$0xf]  ;;  %v11395_v63 = vor.u32 %v13840_v19, %v11394_v18 }
 0x2f9   : > { %v2861_v28 = vperm.slane %v14928_v20, 0  ;;  %v11314_v19 = vld [vmem:[#allocation3 + $0xf08] sm:$0xf]  ;;  %v13849_v49 = vld [vmem:[%s15727_s8] sm:$0xff] }
 0x2fb   : > { %4667 = vmatpush.bf16.msra.mxu0 %v10951_v29  ;;  %4602 = vmatpush.bf16.msra.mxu3 %v11327_v16  ;;  %v11271_v29 = vor.u32 %v13806_v14, %v11268_v45  ;;  %v11252_v16 = vld [vmem:[#allocation3 + $0xe98] sm:$0xf0]  ;;  %v3519_v39 = vadd.f32 %v14900_v62, %v2861_v28  ;;  %v11346_v62 = vld [vmem:[#allocation3 + $0xf48] sm:$0xf] }
 0x2fc   : > { %4676 = vmatpush.bf16.msra.mxu1 %v11143_v30  ;;  %4641 = vmatpush.bf16.msrb.mxu2 %v11203_v41  ;;  %v13853_v30 = vld [vmem:[%s15727_s8 + $0x20] sm:$0xff]  ;;  %v11063_v41 = vor.u32 %v13754_v31, %v11060_v32 }
 0x2fd   : > { %v3598_v17 = vpop.f32.mrf.mxu2  ;;  %v3532_v53 = vadd.f32 %v14903_v55, %v3519_v39  ;;  %v13863_v55 = vld [vmem:[%s15727_s8 + $0x70] sm:$0xff]  ;;  %v11428_v14 = vld [vmem:[#allocation3 + $0xff8] sm:$0xf0] }
 0x2fe   : > { %v13861_v45 = vld [vmem:[%s15727_s8 + $0x60] sm:$0xff]  ;;  %v13872_v17 = vld [vmem:[%s15727_s8 + $0xb8] sm:$0xff] }
 0x2ff   : > { %4668 = vmatpush.bf16.msra.mxu0 %v10935_v50  ;;  %4603 = vmatpush.bf16.msra.mxu3 %v11311_v59  ;;  %v14939_v34 = vpop.f32.mrf.mxu0  ;;  %v13798_v50 = vld [vmem:[#allocation3 + $0xe6c] sm:$0xf]  ;;  %v3545_v59 = vadd.f32 %v14914_v15, %v3532_v53  ;;  %v11347_v15 = vor.u32 %v13828_v58, %v11346_v62  ;;  %v13858_v62 = vld [vmem:[%s15727_s8 + $0x48] sm:$0xff] }
 0x300   : > { %4677 = vmatpush.bf16.msra.mxu1 %v11127_v52  ;;  %4642 = vmatpush.bf16.msrb.mxu2 %v11187_v3  ;;  %v11236_v52 = vld [vmem:[#allocation3 + $0xe78] sm:$0xf0]  ;;  %v13834_v53 = vld [vmem:[#allocation3 + $0xf8c] sm:$0xf]  ;;  %v13870_v58 = vld [vmem:[%s15727_s8 + $0xa8] sm:$0xff] }
 0x301   : > { %v11239_v0 = vor.u32 %v13798_v50, %v11236_v52  ;;  %v11220_v3 = vld [vmem:[#allocation3 + $0xe58] sm:$0xf0] }
 0x302   : > { %4669 = vmatmul.bf16.vlgmr.msra.gmra.mxu0 %v14860_v36  ;;  %4604 = vmatmul.bf16.vlgmr.msra.gmra.mxu3 %v14886_v25  ;;  %v11076_v36 = vld [vmem:[#allocation3 + $0xd38] sm:$0xf0] }
 0x303   : > { %4983 = vmatpush.bf16.msrb.mxu0 %v13856_v42  ;;  %4648 = vmatpush.bf16.msrb.mxu3 %v11427_v2  ;;  %v11079_v24 = vor.u32 %v13758_v48, %v11076_v36  ;;  %v11255_v42 = vor.u32 %v13802_v33, %v11252_v16  ;;  %v13794_v2 = vld [vmem:[#allocation3 + $0xe4c] sm:$0xf]  ;;  %v11412_v16 = vld [vmem:[#allocation3 + $0xfd8] sm:$0xf0] }
 0x304   : > { %4678 = vmatpush.bf16.msra.mxu1 %v11111_v6  ;;  %4687 = vmatpush.bf16.msra.mxu2 %v11303_v7  ;;  %v11330_v6 = vld [vmem:[#allocation3 + $0xf28] sm:$0xf]  ;;  %v13824_v7 = vld [vmem:[#allocation3 + $0xf34] sm:$0xf0]  ;;  %v11223_v8 = vor.u32 %v13794_v2, %v11220_v3  ;;  %v13846_v36 = vld [vmem:[#allocation3 + $0xfec] sm:$0xf] }
 0x305   : > { %4643 = vmatmul.bf16.vlgmr.msrb.gmra.mxu2 %v14876_v40  ;;  %v3557_v61 = vpop.f32.mrf.mxu3  ;;  %v13842_v33 = vld [vmem:[#allocation3 + $0xfcc] sm:$0xf]  ;;  %v13857_v3 = vld [vmem:[%s15727_s8 + $0x40] sm:$0xff] }
 0x306   : > { %v3558_v4 = vadd.f32 %v3557_v61, %v3545_v59 }
 0x307   : > { %4984 = vmatpush.bf16.msrb.mxu0 %v13855_v46  ;;  %4649 = vmatpush.bf16.msrb.mxu3 %v11411_v12  ;;  %v3676_v5 = vpop.f32.mrf.mxu0  ;;  %v11204_v12 = vld [vmem:[#allocation3 + $0xe38] sm:$0xf0] }
 0x308   : > { %4679 = vmatpush.bf16.msra.mxu1 %v11095_v21  ;;  %4688 = vmatpush.bf16.msra.mxu2 %v11287_v22  ;;  %v14957_v46 = vpop.f32.mrf.mxu2  ;;  %v3717_v18 = vmul.f32 0.01, %v3558_v4  ;;  %v13820_v21 = vld [vmem:[#allocation3 + $0xf14] sm:$0xf0]  ;;  %v2862_v22 = vperm.slane %v14928_v20, 1  ;;  %v11207_v48 = vor.u32 %v13790_v11, %v11204_v12 }
 0x309   : > { %v11315_v28 = vor.u32 %v13820_v21, %v11314_v19  ;;  %v11332_v19 = vld [vmem:[#allocation3 + $0xf38] sm:$0xf0] }
 0x30a   : > { %v3721_v27 = vmax.f32 %v3558_v4, %v3717_v18  ;;  %v13869_v4 = vld [vmem:[%s15727_s8 + $0xa0] sm:$0xff] }
 0x30b   : > { %4985 = vmatpush.bf16.msrb.mxu0 %v13854_v23  ;;  %4650 = vmatpush.bf16.msrb.mxu3 %v11395_v63  ;;  %v13786_v63 = vld [vmem:[#allocation3 + $0xe0c] sm:$0xf] }
 0x30c   : > { %4680 = vmatpush.bf16.msra.mxu1 %v11079_v24  ;;  %4689 = vmatpush.bf16.msra.mxu2 %v11271_v29  ;;  %v11431_v29 = vor.u32 %v13846_v36, %v11428_v14  ;;  %v11191_v32 = vor.u32 %v13786_v63, %v11188_v26  ;;  %v4785_v38 = vpack.c.bf16 %v3721_v27, %v3721_v27  ;;  %v13818_v36 = vld [vmem:[#allocation3 + $0xf0c] sm:$0xf]  ;;  %v13866_v14 = vld [vmem:[%s15727_s8 + $0x88] sm:$0xff] }
 0x30d   : > { %v3559_v23 = vpop.f32.mrf.mxu3  ;;  %v13887_v26 = vld [vmem:[%s15727_s8 + $0x130] sm:$0xff] }
 0x30f   : > { %4986 = vmatpush.bf16.msrb.mxu0 %v13853_v30  ;;  %4651 = vmatpush.bf16.msrb.mxu3 %v11379_v60  ;;  %v3571_v30 = vadd.f32 %v14905_v57, %v2862_v22  ;;  %v13860_v60 = vld [vmem:[%s15727_s8 + $0x58] sm:$0xff]  ;;  %v11415_v57 = vor.u32 %v13842_v33, %v11412_v16  ;;  %v13867_v22 = vld [vmem:[%s15727_s8 + $0x90] sm:$0xff]  ;;  %v13886_v33 = vld [vmem:[%s15727_s8 + $0x128] sm:$0xff] }
 0x310   : > { %4681 = vmatpush.bf16.msra.mxu1 %v11063_v41  ;;  %4690 = vmatpush.bf16.msra.mxu2 %v11255_v42  ;;  %v3650_v31 = vpop.f32.mrf.mxu2  ;;  %v13838_v42 = vld [vmem:[#allocation3 + $0xfac] sm:$0xf] }
 0x311   : > { %v3584_v35 = vadd.f32 %v14910_v44, %v3571_v30  ;;  %v13871_v44 = vld [vmem:[%s15727_s8 + $0xb0] sm:$0xff]  ;;  %v13865_v30 = vld [vmem:[%s15727_s8 + $0x80] sm:$0xff] }
 0x312   : > { %v14972_v24 = vpop.f32.mrf.mxu1  ;;  %v13879_v16 = vld [vmem:[%s15727_s8 + $0xf0] sm:$0xff] }
 0x313   : > { %4987 = vmatpush.bf16.msrb.mxu0 %v13852_v43  ;;  %4652 = vmatpush.bf16.msrb.mxu3 %v11363_v54  ;;  %v3597_v39 = vadd.f32 %v14926_v56, %v3584_v35  ;;  %v11396_v43 = vld [vmem:[#allocation3 + $0xfb8] sm:$0xf0] }
 0x314   : > { %4996 = vmatpush.bf16.msrb.mxu1 %v13864_v47  ;;  %4691 = vmatpush.bf16.msra.mxu2 %v11239_v0  ;;  %v13859_v47 = vld [vmem:[%s15727_s8 + $0x50] sm:$0xff]  ;;  %v11399_v52 = vor.u32 %v13838_v42, %v11396_v43  ;;  %v11380_v54 = vld [vmem:[#allocation3 + $0xf98] sm:$0xf0]  ;;  %v13876_v43 = vld [vmem:[%s15727_s8 + $0xd8] sm:$0xff] }
 0x315   : > { %4682 = vmatmul.bf16.vlgmr.msra.gmra.mxu1 %v14868_v37  ;;  %v11331_v37 = vor.u32 %v13824_v7, %v11330_v6  ;;  %v3609_v41 = vpop.f32.mrf.mxu3  ;;  %v11383_v61 = vor.u32 %v13834_v53, %v11380_v54  ;;  %v13826_v7 = vld [vmem:[#allocation3 + $0xf4c] sm:$0xf] }
 0x316   : > { %v3610_v50 = vadd.f32 %v3609_v41, %v3597_v39  ;;  %v2864_v39 = vperm.slane %v14928_v20, 3  ;;  %v13883_v42 = vld [vmem:[%s15727_s8 + $0x110] sm:$0xff] }
 0x317   : > { %4988 = vmatpush.bf16.msrb.mxu0 %v13851_v1  ;;  %4653 = vmatpush.bf16.msrb.mxu3 %v11347_v15  ;;  %v13830_v1 = vld [vmem:[#allocation3 + $0xf6c] sm:$0xf] }
 0x318   : > { %4997 = vmatpush.bf16.msrb.mxu1 %v13863_v55  ;;  %4692 = vmatpush.bf16.msra.mxu2 %v11223_v8  ;;  %v3718_v59 = vmul.f32 0.01, %v3610_v50  ;;  %v11364_v55 = vld [vmem:[#allocation3 + $0xf78] sm:$0xf0] }
 0x319   : > { %v11367_v15 = vor.u32 %v13830_v1, %v11364_v55  ;;  %v11348_v8 = vld [vmem:[#allocation3 + $0xf58] sm:$0xf0] }
 0x31a   : > { %v3689_v56 = vpop.f32.mrf.mxu1  ;;  %v3722_v5 = vmax.f32 %v3610_v50, %v3718_v59  ;;  %v11351_v12 = vor.u32 %v13826_v7, %v11348_v8  ;;  %v13875_v50 = vld [vmem:[%s15727_s8 + $0xd0] sm:$0xff]  ;;  %v13892_v8 = vld [vmem:[%s15727_s8 + $0x158] sm:$0xff] }
 0x31b   : > { %4989 = vmatpush.bf16.msrb.mxu0 %v13850_v9  ;;  %4654 = vmatpush.bf16.msrb.mxu3 %v11331_v37  ;;  %v13868_v9 = vld [vmem:[%s15727_s8 + $0x98] sm:$0xff]  ;;  %v13822_v37 = vld [vmem:[#allocation3 + $0xf2c] sm:$0xf] }
 0x31c   : > { %4998 = vmatpush.bf16.msrb.mxu1 %v13862_v10  ;;  %4693 = vmatpush.bf16.msra.mxu2 %v11207_v48  ;;  %v4786_v11 = vpack.c.bf16 %v3722_v5, %v3722_v5  ;;  %v15089_v7 = vld [vmem:[#allocation5 + $0x4] ss:$8 sm:$0xf] }
 0x31d   : > { %v3611_v0 = vpop.f32.mrf.mxu3 }
 0x31f   : > { %4990 = vmatpush.bf16.msrb.mxu0 %v13849_v49  ;;  %4655 = vmatpush.bf16.msrb.mxu3 %v11315_v28  ;;  %v14998_v2 = vpop.f32.mrf.mxu0  ;;  %v11335_v49 = vor.u32 %v13822_v37, %v11332_v19  ;;  %v13880_v28 = vld [vmem:[%s15727_s8 + $0xf8] sm:$0xff]  ;;  %v13890_v37 = vld [vmem:[%s15727_s8 + $0x148] sm:$0xff] }
 0x320   : > { %4999 = vmatpush.bf16.msrb.mxu1 %v13861_v45  ;;  %4694 = vmatpush.bf16.msra.mxu2 %v11191_v32 }
 0x322   : > { %4991 = vmatmul.bf16.vlgmr.msrb.gmra.mxu0 %v4785_v38  ;;  %4656 = vmatmul.bf16.vlgmr.msrb.gmra.mxu3 %v14886_v25  ;;  %v13878_v38 = vld [vmem:[%s15727_s8 + $0xe8] sm:$0xff] }
 0x323   : > { %4700 = vmatpush.bf16.msra.mxu3 %v11431_v29  ;;  %4695 = vmatmul.bf16.vlgmr.msra.gmra.mxu2 %v14876_v40  ;;  %v2863_v40 = vperm.slane %v14928_v20, 2  ;;  %v13882_v20 = vld [vmem:[%s15727_s8 + $0x108] sm:$0xff] }
 0x324   : > { %5000 = vmatpush.bf16.msrb.mxu1 %v13860_v60  ;;  %5009 = vmatpush.bf16.msrb.mxu2 %v13872_v17  ;;  %v13885_v17 = vld [vmem:[%s15727_s8 + $0x120] sm:$0xff] }
 0x325   : > { %v3623_v6 = vadd.f32 %v14912_v13, %v2863_v40  ;;  %v3661_v13 = vpop.f32.mrf.mxu3  ;;  %v13895_v40 = vld [vmem:[%s15727_s8 + $0x170] sm:$0xff] }
 0x327   : > { %4701 = vmatpush.bf16.msra.mxu3 %v11415_v57  ;;  %v3636_v10 = vadd.f32 %v14920_v51, %v3623_v6  ;;  %v4516_v21 = vpop.f32.mrf.mxu0  ;;  %v13888_v51 = vld [vmem:[%s15727_s8 + $0x138] sm:$0xff] }
 0x328   : > { %5001 = vmatpush.bf16.msrb.mxu1 %v13859_v47  ;;  %5010 = vmatpush.bf16.msrb.mxu2 %v13871_v44  ;;  %v3700_v48 = vpop.f32.mrf.mxu2  ;;  %v13884_v57 = vld [vmem:[%s15727_s8 + $0x118] sm:$0xff]  ;;  %v3675_v47 = vadd.f32 %v14939_v34, %v2864_v39  ;;  %v13881_v34 = vld [vmem:[%s15727_s8 + $0x100] sm:$0xff] }
 0x329   : > { %v3649_v18 = vadd.f32 %v14957_v46, %v3636_v10  ;;  %v11316_v46 = vld [vmem:[#allocation3 + $0xf18] sm:$0xf0]  ;;  %5298 = vmatpush.bf16.msra.mxu0 %v13888_v51  ;;  %v13891_v10 = vld [vmem:[%s15727_s8 + $0x150] sm:$0xff] }
 0x32a   : > { %v11319_v63 = vor.u32 %v13818_v36, %v11316_v46  ;;  %v3688_v44 = vadd.f32 %v14972_v24, %v3675_v47  ;;  %v13874_v24 = vld [vmem:[%s15727_s8 + $0xc8] sm:$0xff]  ;;  %v13903_v36 = vld [vmem:[%s15727_s8 + $0x1b0] sm:$0xff]  ;;  %v13897_v39 = vld [vmem:[%s15727_s8 + $0x180] sm:$0xff] }
 0x32b   : > { %4702 = vmatpush.bf16.msra.mxu3 %v11399_v52  ;;  %v3662_v23 = vadd.f32 %v3661_v13, %v3649_v18  ;;  %v13911_v47 = vld [vmem:[%s15727_s8 + $0x1f0] sm:$0xff] }
 0x32c   : > { %5002 = vmatpush.bf16.msrb.mxu1 %v13858_v62  ;;  %5011 = vmatpush.bf16.msrb.mxu2 %v13870_v58  ;;  %v3701_v56 = vadd.f32 %v3700_v48, %v3688_v44  ;;  %v13896_v58 = vld [vmem:[%s15727_s8 + $0x178] sm:$0xff]  ;;  %v13889_v48 = vld [vmem:[%s15727_s8 + $0x140] sm:$0xff] }
 0x32d   : > { %v3719_v45 = vmul.f32 0.01, %v3662_v23  ;;  %v3663_v29 = vpop.f32.mrf.mxu3  ;;  %5299 = vmatpush.bf16.msra.mxu0 %v13887_v26 }
 0x32e   : > { %v13900_v29 = vld [vmem:[%s15727_s8 + $0x198] sm:$0xff] }
 0x32f   : > { %4703 = vmatpush.bf16.msra.mxu3 %v11383_v61  ;;  %v3723_v31 = vmax.f32 %v3662_v23, %v3719_v45  ;;  %v13873_v61 = vld [vmem:[%s15727_s8 + $0xc0] sm:$0xff] }
 0x330   : > { %5003 = vmatpush.bf16.msrb.mxu1 %v13857_v3  ;;  %5012 = vmatpush.bf16.msrb.mxu2 %v13869_v4  ;;  %v3702_v32 = vpop.f32.mrf.mxu2  ;;  %v13894_v3 = vld [vmem:[%s15727_s8 + $0x168] sm:$0xff] }
 0x331   : > { %5300 = vmatpush.bf16.msra.mxu0 %v13886_v33  ;;  %v4787_v60 = vpack.c.bf16 %v3723_v31, %v3723_v31  ;;  %v13899_v31 = vld [vmem:[%s15727_s8 + $0x190] sm:$0xff] }
 0x332   : > { %v15024_v27 = vpop.f32.mrf.mxu1 }
 0x333   : > { %4704 = vmatpush.bf16.msra.mxu3 %v11367_v15  ;;  %5004 = vmatmul.bf16.vlgmr.msrb.gmra.mxu1 %v4786_v11  ;;  %v13893_v15 = vld [vmem:[%s15727_s8 + $0x160] sm:$0xff] }
 0x334   : > { %5013 = vmatpush.bf16.msrb.mxu2 %v13868_v9  ;;  %5311 = vmatpush.bf16.msra.mxu1 %v13896_v58  ;;  %v3857_v9 = vperm.slane %v15089_v7, 0 }
 0x335   : > { %5301 = vmatpush.bf16.msra.mxu0 %v13885_v17 }
 0x337   : > { %4705 = vmatpush.bf16.msra.mxu3 %v11351_v12  ;;  %v4515_v12 = vadd.f32 %v14998_v2, %v3857_v9  ;;  %v13904_v2 = vld [vmem:[%s15727_s8 + $0x1b8] sm:$0xff] }
 0x338   : > { %5014 = vmatpush.bf16.msrb.mxu2 %v13867_v22  ;;  %5312 = vmatpush.bf16.msra.mxu1 %v13895_v40  ;;  %v13906_v40 = vld [vmem:[%s15727_s8 + $0x1c8] sm:$0xff] }
 0x339   : > { %5302 = vmatpush.bf16.msra.mxu0 %v13884_v57  ;;  %v4528_v18 = vadd.f32 %v15024_v27, %v4515_v12  ;;  %v13901_v27 = vld [vmem:[%s15727_s8 + $0x1a0] sm:$0xff] }
 0x33a   : > { %v4529_v35 = vpop.f32.mrf.mxu1 }
 0x33b   : > { %4706 = vmatpush.bf16.msra.mxu3 %v11335_v49 }
 0x33c   : > { %5015 = vmatpush.bf16.msrb.mxu2 %v13866_v14  ;;  %5313 = vmatpush.bf16.msra.mxu1 %v13894_v3 }
 0x33d   : > { %5303 = vmatpush.bf16.msra.mxu0 %v13883_v42 }
 0x33f   : > { %4707 = vmatpush.bf16.msra.mxu3 %v11319_v63  ;;  %v15052_v41 = vpop.f32.mrf.mxu0  ;;  %v13902_v63 = vld [vmem:[%s15727_s8 + $0x1a8] sm:$0xff] }
 0x340   : > { %5016 = vmatpush.bf16.msrb.mxu2 %v13865_v30  ;;  %5314 = vmatpush.bf16.msra.mxu1 %v13893_v15  ;;  %v3858_v30 = vperm.slane %v15089_v7, 1  ;;  %v14386_v15 = vld [vmem:[#allocation11] ss:$0 sm:$0xff] }
 0x341   : > { %5304 = vmatpush.bf16.msra.mxu0 %v13882_v20 }
 0x342   : > { %4708 = vmatmul.bf16.vlgmr.msra.gmra.mxu3 %v14886_v25  ;;  %v13877_v25 = vld [vmem:[%s15727_s8 + $0xe0] sm:$0xff]  ;;  %v4567_v33 = vadd.f32 %v15052_v41, %v3858_v30  ;;  %v13912_v41 = vld [vmem:[%s15727_s8 + $0x1f8] sm:$0xff] }
 0x343   : > { %5022 = vmatpush.bf16.msrb.mxu3 %v13880_v28  ;;  %5017 = vmatmul.bf16.vlgmr.msrb.gmra.mxu2 %v4787_v60  ;;  %v13898_v60 = vld [vmem:[%s15727_s8 + $0x188] sm:$0xff] }
 0x344   : > { %5315 = vmatpush.bf16.msra.mxu1 %v13892_v8  ;;  %5324 = vmatpush.bf16.msra.mxu2 %v13904_v2 }
 0x345   : > { %v3713_v53 = vpop.f32.mrf.mxu3  ;;  %5305 = vmatpush.bf16.msra.mxu0 %v13881_v34  ;;  %v3859_v34 = vperm.slane %v15089_v7, 2 }
 0x346   : > { %v3714_v54 = vadd.f32 %v3713_v53, %v3701_v56  ;;  %v13910_v56 = vld [vmem:[%s15727_s8 + $0x1e8] sm:$0xff]  ;;  %v13909_v53 = vld [vmem:[%s15727_s8 + $0x1e0] sm:$0xff] }
 0x347   : > { %5023 = vmatpush.bf16.msrb.mxu3 %v13879_v16  ;;  %v4568_v52 = vpop.f32.mrf.mxu0 }
 0x348   : > { %v4540_v62 = vpop.f32.mrf.mxu2  ;;  %v3720_v59 = vmul.f32 0.01, %v3714_v54  ;;  %5316 = vmatpush.bf16.msra.mxu1 %v13891_v10  ;;  %5325 = vmatpush.bf16.msra.mxu2 %v13903_v36 }
 0x349   : > { %v4541_v19 = vadd.f32 %v4540_v62, %v4528_v18  ;;  %v13908_v62 = vld [vmem:[%s15727_s8 + $0x1d8] sm:$0xff] }
 0x34a   : > { %v3724_v0 = vmax.f32 %v3714_v54, %v3720_v59 }
 0x34b   : > { %5024 = vmatpush.bf16.msrb.mxu3 %v13878_v38 }
 0x34c   : > { %v4788_v5 = vpack.c.bf16 %v3724_v0, %v3724_v0  ;;  %5317 = vmatpush.bf16.msra.mxu1 %v13890_v37  ;;  %5326 = vmatpush.bf16.msra.mxu2 %v13902_v63 }
 0x34d   : > { %v3715_v1 = vpop.f32.mrf.mxu3 }
 0x34f   : > { %5025 = vmatpush.bf16.msrb.mxu3 %v13877_v25 }
 0x350   : > { %v4542_v4 = vpop.f32.mrf.mxu2  ;;  %5318 = vmatpush.bf16.msra.mxu1 %v13889_v48  ;;  %5327 = vmatpush.bf16.msra.mxu2 %v13901_v27 }
 0x352   : > { %v4579_v55 = vpop.f32.mrf.mxu1 }
 0x353   : > { %5026 = vmatpush.bf16.msrb.mxu3 %v13876_v43  ;;  %v4580_v16 = vadd.f32 %v4579_v55, %v4567_v33  ;;  %v11779_v33 = vld [vmem:[#allocation10 + $0x28] sm:$0xf] }
 0x354   : > { %5328 = vmatpush.bf16.msra.mxu2 %v13900_v29 }
 0x357   : > { %5027 = vmatpush.bf16.msrb.mxu3 %v13875_v50 }
 0x358   : > { %5329 = vmatpush.bf16.msra.mxu2 %v13899_v31 }
 0x35a   : > { %v4581_v6 = vpop.f32.mrf.mxu1 }
 0x35b   : > { %5028 = vmatpush.bf16.msrb.mxu3 %v13874_v24  ;;  %v13907_v24 = vld [vmem:[%s15727_s8 + $0x1d0] sm:$0xff] }
 0x35c   : > { %5330 = vmatpush.bf16.msra.mxu2 %v13898_v60  ;;  %v13918_v60 = vld [vmem:[#allocation10 + $0x2c] sm:$0xf] }
 0x35f   : > { %5029 = vmatpush.bf16.msrb.mxu3 %v13873_v61  ;;  %v15098_v11 = vpop.f32.mrf.mxu0 }
 0x360   : > { %5331 = vmatpush.bf16.msra.mxu2 %v13897_v39  ;;  %v4619_v59 = vadd.f32 %v15098_v11, %v3859_v34 }
 0x362   : > { %5030 = vmatmul.bf16.vlgmr.msrb.gmra.mxu3 %v4788_v5  ;;  %v13905_v5 = vld [vmem:[%s15727_s8 + $0x1c0] sm:$0xff] }
 0x363   : > { %5337 = vmatpush.bf16.msra.mxu3 %v13912_v41  ;;  %v11763_v41 = vld [vmem:[#allocation10 + $0x8] sm:$0xf] }
 0x365   : > { %v4553_v21 = vpop.f32.mrf.mxu3 }
 0x366   : > { %v4554_v22 = vadd.f32 %v4553_v21, %v4541_v19  ;;  %v3860_v21 = vperm.slane %v15089_v7, 3 }
 0x367   : > { %v4620_v13 = vpop.f32.mrf.mxu0  ;;  %5338 = vmatpush.bf16.msra.mxu3 %v13911_v47 }
 0x368   : > { %v4592_v23 = vpop.f32.mrf.mxu2  ;;  %v4713_v49 = vmul.f32 0.01, %v4554_v22 }
 0x369   : > { %v4593_v17 = vadd.f32 %v4592_v23, %v4580_v16  ;;  %v13920_v16 = vld [vmem:[#allocation10 + $0x34] sm:$0xf0] }
 0x36a   : > { %v4717_v51 = vmax.f32 %v4554_v22, %v4713_v49 }
 0x36b   : > { %5339 = vmatpush.bf16.msra.mxu3 %v13910_v56 }
 0x36c   : > { %v5100_v46 = vpack.c.bf16 %v4717_v51, %v4717_v51 }
 0x36d   : > { %v4555_v14 = vpop.f32.mrf.mxu3 }
 0x36e   : > { %5306 = vmatmul.bf16.vlgmr.msra.gmra.mxu0 %v5100_v46 }
 0x36f   : > { %5340 = vmatpush.bf16.msra.mxu3 %v13909_v53  ;;  %v11755_v53 = vld [vmem:[#allocation10] sm:$0xf] }
 0x370   : > { %v4594_v26 = vpop.f32.mrf.mxu2 }
 0x372   : > { %v4631_v45 = vpop.f32.mrf.mxu1 }
 0x373   : > { %5341 = vmatpush.bf16.msra.mxu3 %v13908_v62  ;;  %v4632_v61 = vadd.f32 %v4631_v45, %v4619_v59  ;;  %v13913_v62 = vld [vmem:[#allocation10 + $0x4] sm:$0xf] }
 0x377   : > { %5342 = vmatpush.bf16.msra.mxu3 %v13907_v24 }
 0x37a   : > { %v4633_v28 = vpop.f32.mrf.mxu1 }
 0x37b   : > { %5343 = vmatpush.bf16.msra.mxu3 %v13906_v40  ;;  %v5507_v40 = vld [vmem:[#allocation1 + $0x1b] sm:$0xff] }
 0x37f   : > { %v4670_v32 = vpop.f32.mrf.mxu0  ;;  %5344 = vmatpush.bf16.msra.mxu3 %v13905_v5  ;;  %v5505_v5 = vld [vmem:[#allocation1 + $0x9] sm:$0xff] }
 0x380   : > { %v4671_v13 = vadd.f32 %v4670_v32, %v3860_v21 }
 0x385   : > { %v4605_v35 = vpop.f32.mrf.mxu3 }
 0x386   : > { %v4606_v57 = vadd.f32 %v4605_v35, %v4593_v17  ;;  %v11780_v17 = vor.u32 %v13920_v16, %v11779_v33  ;;  %v11781_v35 = vld [vmem:[#allocation10 + $0x38] sm:$0xf0] }
 0x387   : > { %v4672_v38 = vpop.f32.mrf.mxu0 }
 0x388   : > { %v4644_v25 = vpop.f32.mrf.mxu2  ;;  %v4714_v42 = vmul.f32 0.01, %v4606_v57  ;;  %v11771_v38 = vld [vmem:[#allocation10 + $0x20] sm:$0xf]  ;;  %5478 = vmatpush.bf16.msrb.mxu2 %v11780_v17 }
 0x389   : > { %v4645_v0 = vadd.f32 %v4644_v25, %v4632_v61  ;;  %v11784_v25 = vor.u32 %v13918_v60, %v11781_v35  ;;  %v5506_v61 = vld [vmem:[#allocation1 + $0x12] sm:$0xff] }
 0x38a   : > { %v4718_v43 = vmax.f32 %v4606_v57, %v4714_v42  ;;  %v13919_v57 = vld [vmem:[#allocation10 + $0x2c] sm:$0xf0]  ;;  %v13916_v42 = vld [vmem:[#allocation10 + $0x14] sm:$0xf0] }
 0x38b   : > { %v11772_v39 = vor.u32 %v13919_v57, %v11771_v38  ;;  %v11764_v47 = vor.u32 %v13916_v42, %v11763_v41  ;;  %5491 = vmatpush.bf16.msrb.mxu3 %v11784_v25  ;;  %v5498_v57 = vld [vmem:[%s481_s15] sm:$0xff]  ;;  %v5499_v25 = vld [vmem:[%s481_s15 + $0x8] sm:$0xff]  ;;  %v13951_v42 = vld [vmem:[#allocation3 + $0x10ec] sm:$0xf0] }
 0x38c   : > { %v5101_v44 = vpack.c.bf16 %v4718_v43, %v4718_v43  ;;  %v13917_v43 = vld [vmem:[#allocation10 + $0x24] sm:$0xf]  ;;  %v11907_v41 = vld [vmem:[#allocation3 + $0x10e0] sm:$0xf] }
 0x38d   : > { %v4607_v20 = vpop.f32.mrf.mxu3  ;;  %5452 = vmatpush.bf16.msrb.mxu0 %v11772_v39  ;;  %5479 = vmatpush.bf16.msrb.mxu2 %v11764_v47  ;;  %v5501_v39 = vpack.c.bf16 %v5499_v25, %v5498_v57  ;;  %v11908_v47 = vor.u32 %v13951_v42, %v11907_v41  ;;  %v13999_v57 = vld [vmem:[#allocation3 + $0x126c] sm:$0xf0]  ;;  %v12227_v25 = vld [vmem:[#allocation3 + $0x1360] sm:$0xf] }
 0x38e   : > { %5319 = vmatmul.bf16.vlgmr.msra.gmra.mxu1 %v5101_v44  ;;  %v11773_v44 = vld [vmem:[#allocation10 + $0x30] sm:$0xf0]  ;;  %v13914_v20 = vld [vmem:[#allocation10 + $0xc] sm:$0xf]  ;;  %v14031_v41 = vld [vmem:[#allocation3 + $0x136c] sm:$0xf0] }
 0x38f   : > { %v11776_v56 = vor.u32 %v13917_v43, %v11773_v44  ;;  %v12035_v43 = vld [vmem:[#allocation3 + $0x11e0] sm:$0xf]  ;;  %v13983_v44 = vld [vmem:[#allocation3 + $0x11ec] sm:$0xf0]  ;;  %v12228_v42 = vor.u32 %v14031_v41, %v12227_v25  ;;  %v12005_v25 = vld [vmem:[#allocation3 + $0x11b0] sm:$0xf0] }
 0x390   : > { %v4646_v52 = vpop.f32.mrf.mxu2 }
 0x391   : > { %5465 = vmatpush.bf16.msrb.mxu1 %v11776_v56  ;;  %v13947_v56 = vld [vmem:[#allocation3 + $0x10cc] sm:$0xf0] }
 0x392   : > { %v4683_v50 = vpop.f32.mrf.mxu1 }
 0x393   : > { %v4684_v22 = vadd.f32 %v4683_v50, %v4671_v13  ;;  %v11765_v50 = vld [vmem:[#allocation10 + $0x18] sm:$0xf0] }
 0x394   : > { %v11768_v52 = vor.u32 %v13914_v20, %v11765_v50  ;;  %v12036_v20 = vor.u32 %v13983_v44, %v12035_v43  ;;  %v11891_v50 = vld [vmem:[#allocation3 + $0x10c0] sm:$0xf] }
 0x395   : > { %v11811_v43 = vld [vmem:[#allocation3 + $0x1020] sm:$0xf] }
 0x396   : > { %5492 = vmatpush.bf16.msrb.mxu3 %v11768_v52  ;;  %v12019_v52 = vld [vmem:[#allocation3 + $0x11c0] sm:$0xf] }
 0x397   : > { %v11939_v44 = vld [vmem:[#allocation3 + $0x1120] sm:$0xf] }
 0x39a   : > { %v4685_v54 = vpop.f32.mrf.mxu1 }
 0x39b   : > { %v13915_v54 = vld [vmem:[#allocation10 + $0xc] sm:$0xf0] }
 0x39c   : > { %v11756_v24 = vor.u32 %v13915_v54, %v11755_v53  ;;  %v11892_v53 = vor.u32 %v13947_v56, %v11891_v50  ;;  %v13979_v54 = vld [vmem:[#allocation3 + $0x11cc] sm:$0xf0] }
 0x39d   : > { %v13959_v50 = vld [vmem:[#allocation3 + $0x112c] sm:$0xf0] }
 0x39e   : > { %5453 = vmatpush.bf16.msrb.mxu0 %v11756_v24  ;;  %v14015_v24 = vld [vmem:[#allocation3 + $0x12ec] sm:$0xf0] }
 0x39f   : > { %v4992_v58 = vpop.f32.mrf.mxu0 }
 0x3a0   : > { %v4993_v9 = vadd.f32 %v14386_v15, %v4992_v58  ;;  %v11757_v58 = vld [vmem:[#allocation10 + $0x10] sm:$0xf0] }
 0x3a1   : > { %v11760_v59 = vor.u32 %v13913_v62, %v11757_v58  ;;  %v12020_v62 = vor.u32 %v13979_v54, %v12019_v52  ;;  %v12291_v58 = vld [vmem:[#allocation3 + $0x13e0] sm:$0xf]  ;;  %v11940_v52 = vor.u32 %v13959_v50, %v11939_v44  ;;  %v13995_v54 = vld [vmem:[#allocation3 + $0x124c] sm:$0xf0] }
 0x3a2   : > { %v15194_v44 = vld [vmem:[#allocation5 + $0x5] ss:$8 sm:$0xf] }
 0x3a3   : > { %5466 = vmatpush.bf16.msrb.mxu1 %v11760_v59 }
 0x3a5   : > { %v4657_v1 = vpop.f32.mrf.mxu3 }
 0x3a6   : > { %v4658_v3 = vadd.f32 %v4657_v1, %v4645_v0  ;;  %v4696_v4 = vpop.f32.mrf.mxu2  ;;  %v5516_v0 = vsel %vm516_vm0, %v5506_v61, 0  ;;  %v5518_v1 = vsel %vm516_vm0, %v5507_v40, 0  ;;  %v14047_v61 = vld [vmem:[#allocation3 + $0x13ec] sm:$0xf0]  ;;  %v11875_v40 = vld [vmem:[#allocation3 + $0x10a0] sm:$0xf] }
 0x3a7   : > { %v4994_v55 = vpop.f32.mrf.mxu0  ;;  %v4697_v23 = vadd.f32 %v4696_v4, %v4684_v22  ;;  %v5504_v4 = vld [vmem:[#allocation1] sm:$0xff] }
 0x3a8   : > { %v4715_v6 = vmul.f32 0.01, %v4658_v3  ;;  %v14387_v55 = vld [vmem:[#allocation11 + $0x1] ss:$0 sm:$0xff]  ;;  %v5512_v15 = vsel %vm516_vm0, %v5504_v4, 0 }
 0x3a9   : > { %5527 = vmatpush.bf16.msra.mxu0 %v5512_v15  ;;  %v13975_v4 = vld [vmem:[#allocation3 + $0x11ac] sm:$0xf0]  ;;  %v12147_v15 = vld [vmem:[#allocation3 + $0x12c0] sm:$0xf] }
 0x3aa   : > { %v4719_v8 = vmax.f32 %v4658_v3, %v4715_v6  ;;  %v5514_v6 = vsel %vm516_vm0, %v5505_v5, 0 }
 0x3ab   : > { %5541 = vmatpush.bf16.msra.mxu1 %v5514_v6  ;;  %v14011_v6 = vld [vmem:[#allocation3 + $0x12cc] sm:$0xf0] }
 0x3ac   : > { %v5102_v10 = vpack.c.bf16 %v4719_v8, %v4719_v8 }
 0x3ad   : > { %v4659_v11 = vpop.f32.mrf.mxu3 }
 0x3ae   : > { %v4698_v37 = vpop.f32.mrf.mxu2  ;;  %5332 = vmatmul.bf16.vlgmr.msra.gmra.mxu2 %v5102_v10 }
 0x3af   : > { %5555 = vmatpush.bf16.msra.mxu2 %v5516_v0  ;;  %v13943_v0 = vld [vmem:[#allocation3 + $0x10ac] sm:$0xf0] }
 0x3b0   : > { %v5005_v12 = vpop.f32.mrf.mxu1 }
 0x3b1   : > { %v5006_v18 = vadd.f32 %v5005_v12, %v4993_v9 }
 0x3b8   : > { %v5007_v19 = vpop.f32.mrf.mxu1 }
 0x3c5   : > { %v4709_v48 = vpop.f32.mrf.mxu3 }
 0x3c6   : > { %v4710_v2 = vadd.f32 %v4709_v48, %v4697_v23  ;;  %v5018_v49 = vpop.f32.mrf.mxu2 }
 0x3c7   : > { %v5019_v36 = vadd.f32 %v5018_v49, %v5006_v18 }
 0x3c8   : > { %v4716_v51 = vmul.f32 0.01, %v4710_v2 }
 0x3ca   : > { %v4720_v46 = vmax.f32 %v4710_v2, %v4716_v51  ;;  %v5350_v51 = vld [vmem:[%s485_s14] sm:$0x3] }
 0x3cc   : > { %v5103_v14 = vpack.c.bf16 %v4720_v46, %v4720_v46 }
 0x3cd   : > { %v4711_v45 = vpop.f32.mrf.mxu3 }
 0x3ce   : > { %5345 = vmatmul.bf16.vlgmr.msra.gmra.mxu3 %v5103_v14  ;;  %v5020_v63 = vpop.f32.mrf.mxu2 }
 0x3cf   : > { %5569 = vmatpush.bf16.msra.mxu3 %v5518_v1  ;;  %v12292_v1 = vor.u32 %v14047_v61, %v12291_v58  ;;  %v14027_v58 = vld [vmem:[#allocation3 + $0x134c] sm:$0xf0]  ;;  %v11795_v61 = vld [vmem:[#allocation3 + $0x1000] sm:$0xf] }
 0x3e5   : > { %v5031_v26 = vpop.f32.mrf.mxu3 }
 0x3e6   : > { %v15161_v27 = vadd.f32 %v5031_v26, %v5019_v36 }
 0x3e8   : > { %v5372_v12 = vrot.slane %v15161_v27, 7 }
 0x3ea   : > { %v5374_v23 = vsub.f32 %v15161_v27, %v5372_v12  ;;  %v11859_v12 = vld [vmem:[#allocation3 + $0x1080] sm:$0xf] }
 0x3eb   : > { %v5307_v29 = vpop.f32.mrf.mxu0 }
 0x3ec   : > { %v5308_v3 = vadd.f32 %v14387_v55, %v5307_v29  ;;  %v5375_v36 = vmul.f32 %v5374_v23, %v5374_v23  ;;  %v11876_v55 = vor.u32 %v13943_v0, %v11875_v40  ;;  %v14007_v23 = vld [vmem:[#allocation3 + $0x12ac] sm:$0xf0]  ;;  %v11923_v0 = vld [vmem:[#allocation3 + $0x1100] sm:$0xf] }
 0x3ed   : > { %v5033_v28 = vpop.f32.mrf.mxu3  ;;  %v13923_v40 = vld [vmem:[#allocation3 + $0x100c] sm:$0xf0] }
 0x3ee   : > { %v5376_v28 = vmul.f32 0.5, %v5375_v36 }
 0x3f3   : > { %v5309_v30 = vpop.f32.mrf.mxu0 }
 0x40b   : > { %v5320_v7 = vpop.f32.mrf.mxu1 }
 0x40c   : > { %v5321_v8 = vadd.f32 %v5320_v7, %v5308_v3  ;;  %v12003_v3 = vld [vmem:[#allocation3 + $0x11a0] sm:$0xf] }
 0x40d   : > { %v12004_v5 = vor.u32 %v13975_v4, %v12003_v3  ;;  %v11796_v3 = vor.u32 %v13923_v40, %v11795_v61  ;;  %v13955_v4 = vld [vmem:[#allocation3 + $0x110c] sm:$0xf0]  ;;  %v14037_v61 = vld [vmem:[#allocation3 + $0x13a4] sm:$0xf]  ;;  %v12261_v40 = vld [vmem:[#allocation3 + $0x13b0] sm:$0xf0] }
 0x413   : > { %v5322_v31 = vpop.f32.mrf.mxu1 }
 0x431   : > { %v5333_v32 = vpop.f32.mrf.mxu2 }
 0x432   : > { %v5334_v9 = vadd.f32 %v5333_v32, %v5321_v8  ;;  %v12275_v8 = vld [vmem:[#allocation3 + $0x13c0] sm:$0xf] }
 0x439   : > { %v5335_v34 = vpop.f32.mrf.mxu2 }
 0x43a   : > { %v12163_v34 = vld [vmem:[#allocation3 + $0x12e0] sm:$0xf] }
 0x43b   : > { %v12164_v59 = vor.u32 %v14015_v24, %v12163_v34 }
 0x451   : > { %v5346_v10 = vpop.f32.mrf.mxu3 }
 0x452   : > { %v5347_v11 = vadd.f32 %v5346_v10, %v5334_v9  ;;  %v12148_v9 = vor.u32 %v14011_v6, %v12147_v15  ;;  %v14043_v10 = vld [vmem:[#allocation3 + $0x13cc] sm:$0xf0]  ;;  %v11924_v15 = vor.u32 %v13955_v4, %v11923_v0 }
 0x453   : > { %v13991_v6 = vld [vmem:[#allocation3 + $0x122c] sm:$0xf0] }
 0x454   : > { %v5351_v18 = vmul.f32 0.5, %v5347_v11  ;;  %v5361_v37 = vrot.slane %v5347_v11, 7  ;;  %v5377_v19 = vsub.f32 0.0, %v5347_v11  ;;  %v5357_v49 = vrot.slane %v5347_v11, 1 }
 0x456   : > { %v5352_v21 = vmul.f32 1.442695, %v5351_v18  ;;  %v5363_v13 = vsub.f32 %v5347_v11, %v5361_v37  ;;  %v5378_v22 = vmul.f32 1.442695, %v5377_v19  ;;  %v5359_v63 = vsub.f32 %v5347_v11, %v5357_v49  ;;  %v13939_v18 = vld [vmem:[#allocation3 + $0x108c] sm:$0xf0] }
 0x457   : > { %v12276_v11 = vor.u32 %v14043_v10, %v12275_v8  ;;  %v11987_v37 = vld [vmem:[#allocation3 + $0x1180] sm:$0xf]  ;;  %v11860_v19 = vor.u32 %v13939_v18, %v11859_v12  ;;  %v14039_v49 = vld [vmem:[#allocation3 + $0x13ac] sm:$0xf0]  ;;  %v13949_v12 = vld [vmem:[#allocation3 + $0x10e4] sm:$0xf] }
 0x458   : > { %14393 = vpow2.f32 %v5352_v21  ;;  %v5364_v48 = vmul.f32 1.442695, %v5363_v13  ;;  %v5360_v33 = vmul.f32 0.5, %v5359_v63  ;;  %v13971_v21 = vld [vmem:[#allocation3 + $0x118c] sm:$0xf0] }
 0x459   : > { %v5348_v2 = vpop.f32.mrf.mxu3  ;;  %14395 = vpow2.f32 %v5378_v22  ;;  %v11988_v13 = vor.u32 %v13971_v21, %v11987_v37  ;;  %v12131_v22 = vld [vmem:[#allocation3 + $0x12a0] sm:$0xf]  ;;  %v11909_v18 = vld [vmem:[#allocation3 + $0x10f0] sm:$0xf0]  ;;  %v13981_v37 = vld [vmem:[#allocation3 + $0x11e4] sm:$0xf] }
 0x45a   : > { %14397 = vpow2.f32 %v5364_v48  ;;  %v12259_v48 = vld [vmem:[#allocation3 + $0x13a0] sm:$0xf]  ;;  %v12132_v2 = vor.u32 %v14007_v23, %v12131_v22  ;;  %v12037_v21 = vld [vmem:[#allocation3 + $0x11f0] sm:$0xf0]  ;;  %v13987_v23 = vld [vmem:[#allocation3 + $0x120c] sm:$0xf0] }
 0x45b   : > { %v12260_v36 = vor.u32 %v14039_v49, %v12259_v48  ;;  %v12195_v8 = vld [vmem:[#allocation3 + $0x1320] sm:$0xf]  ;;  %v14019_v49 = vld [vmem:[#allocation3 + $0x130c] sm:$0xf0] }
 0x45c   : > { %v12051_v22 = vld [vmem:[#allocation3 + $0x1200] sm:$0xf] }
 0x45d   : > { %v12179_v48 = vld [vmem:[#allocation3 + $0x1300] sm:$0xf] }
 0x45e   : > { %v14394_v46 = vpop.eup %14393 }
 0x45f   : > { %v14396_v14 = vpop.eup %14395  ;;  %v5354_v45 = vmul.f32 %v14394_v46, %v5350_v51  ;;  %v11843_v51 = vld [vmem:[#allocation3 + $0x1060] sm:$0xf]  ;;  %v13935_v46 = vld [vmem:[#allocation3 + $0x106c] sm:$0xf0] }
 0x460   : > { %v14398_v26 = vpop.eup %14397  ;;  %v5381_v29 = vrot.slane %v14396_v14, 7  ;;  %v11971_v14 = vld [vmem:[#allocation3 + $0x1160] sm:$0xf]  ;;  %v11844_v63 = vor.u32 %v13935_v46, %v11843_v51  ;;  %v12180_v46 = vor.u32 %v14019_v49, %v12179_v48  ;;  %v12117_v48 = vld [vmem:[#allocation3 + $0x1290] sm:$0xf0] }
 0x461   : > { %v5355_v30 = vadd.f32 %v5354_v45, %v15161_v27  ;;  %v5366_v7 = vmul.f32 0.5, %v14398_v26  ;;  %v13967_v45 = vld [vmem:[#allocation3 + $0x116c] sm:$0xf0] }
 0x462   : > { %v5383_v31 = vmul.f32 %v5381_v29, %v5376_v28  ;;  %v11972_v26 = vor.u32 %v13967_v45, %v11971_v14  ;;  %v12115_v28 = vld [vmem:[#allocation3 + $0x1280] sm:$0xf]  ;;  %v14003_v29 = vld [vmem:[#allocation3 + $0x128c] sm:$0xf0]  ;;  %v13945_v14 = vld [vmem:[#allocation3 + $0x10c4] sm:$0xf] }
 0x463   : > { %v5401_v32 = vpack.c.bf16 %v5355_v30, %v5355_v30  ;;  %v5368_v16 = vrot.slane %v5366_v7, 1  ;;  %v12243_v30 = vld [vmem:[#allocation3 + $0x1380] sm:$0xf]  ;;  %v12116_v7 = vor.u32 %v14003_v29, %v12115_v28  ;;  %v11893_v45 = vld [vmem:[#allocation3 + $0x10d0] sm:$0xf0] }
 0x464   : > { %v5385_v17 = vrot.slane %v5383_v31, 1  ;;  %v14035_v31 = vld [vmem:[#allocation3 + $0x138c] sm:$0xf0]  ;;  %v12021_v29 = vld [vmem:[#allocation3 + $0x11d0] sm:$0xf0] }
 0x465   : > { %11785 = vmatmul.msk.bf16.vlgmr.msrb.gmra.mxu0 %vm5442_vm5, %v5401_v32  ;;  %11786 = vmatmul.msk.bf16.vlgmr.msrb.gmra.mxu1 %vm5442_vm5, %v5401_v32  ;;  %v5370_v60 = vadd.f32 %v5368_v16, %v5360_v33  ;;  %v11827_v33 = vld [vmem:[#allocation3 + $0x1040] sm:$0xf]  ;;  %v13931_v16 = vld [vmem:[#allocation3 + $0x104c] sm:$0xf0] }
 0x466   : > { %11787 = vmatmul.msk.bf16.vlgmr.msrb.gmra.mxu2 %vm5442_vm5, %v5401_v32  ;;  %11788 = vmatmul.msk.bf16.vlgmr.msrb.gmra.mxu3 %vm5442_vm5, %v5401_v32  ;;  %v12244_v32 = vor.u32 %v14035_v31, %v12243_v30  ;;  %v11896_v30 = vor.u32 %v13945_v14, %v11893_v45  ;;  %v14013_v31 = vld [vmem:[#allocation3 + $0x12e4] sm:$0xf]  ;;  %v12245_v14 = vld [vmem:[#allocation3 + $0x1390] sm:$0xf0] }
 0x467   : > { %v5387_v35 = vadd.f32 %v5385_v17, %v5370_v60  ;;  %6479 = vmatpush.bf16.msrb.mxu0 %v11908_v47  ;;  %6498 = vmatpush.bf16.msrb.mxu1 %v12036_v20  ;;  %v11955_v60 = vld [vmem:[#allocation3 + $0x1140] sm:$0xf]  ;;  %v11828_v17 = vor.u32 %v13931_v16, %v11827_v33  ;;  %v13927_v47 = vld [vmem:[#allocation3 + $0x102c] sm:$0xf0]  ;;  %v14045_v33 = vld [vmem:[#allocation3 + $0x13e4] sm:$0xf] }
 0x468   : > { %6517 = vmatpush.bf16.msrb.mxu2 %v12164_v59  ;;  %6536 = vmatpush.bf16.msrb.mxu3 %v12292_v1  ;;  %v11812_v20 = vor.u32 %v13927_v47, %v11811_v43  ;;  %v14041_v43 = vld [vmem:[#allocation3 + $0x13c4] sm:$0xf]  ;;  %v12277_v47 = vld [vmem:[#allocation3 + $0x13d0] sm:$0xf0] }
 0x469   : > { %v11752_v38 = vadd.f32 -0.5, %v5387_v35  ;;  %v13963_v35 = vld [vmem:[#allocation3 + $0x114c] sm:$0xf0]  ;;  %v12280_v50 = vor.u32 %v14041_v43, %v12277_v47 }
 0x46b   : > { %v5390_v27 = vsel %vm5389_vm6, %v11752_v38, 0.0  ;;  %6480 = vmatpush.bf16.msrb.mxu0 %v11892_v53  ;;  %6499 = vmatpush.bf16.msrb.mxu1 %v12020_v62  ;;  %v11956_v38 = vor.u32 %v13963_v35, %v11955_v60  ;;  %v12083_v53 = vld [vmem:[#allocation3 + $0x1240] sm:$0xf]  ;;  %v12293_v60 = vld [vmem:[#allocation3 + $0x13f0] sm:$0xf0] }
 0x46c   : > { %5391 = vadd.xlane.f32.xlu2 %v5390_v27  ;;  %6518 = vmatpush.bf16.msrb.mxu2 %v12148_v9  ;;  %v12099_v27 = vld [vmem:[#allocation3 + $0x1260] sm:$0xf]  ;;  %v12084_v24 = vor.u32 %v13995_v54, %v12083_v53  ;;  %v14023_v9 = vld [vmem:[#allocation3 + $0x132c] sm:$0xf0]  ;;  %v11877_v35 = vld [vmem:[#allocation3 + $0x10b0] sm:$0xf0] }
 0x46d   : > { %6537 = vmatpush.bf16.msrb.mxu3 %v12276_v11  ;;  %v12211_v62 = vld [vmem:[#allocation3 + $0x1340] sm:$0xf]  ;;  %v12196_v11 = vor.u32 %v14023_v9, %v12195_v8  ;;  %v13969_v53 = vld [vmem:[#allocation3 + $0x1184] sm:$0xf]  ;;  %v11989_v54 = vld [vmem:[#allocation3 + $0x1190] sm:$0xf0]  ;;  %v12264_v8 = vor.u32 %v14037_v61, %v12261_v40 }
 0x46e   : > { %v12212_v59 = vor.u32 %v14027_v58, %v12211_v62  ;;  %v14005_v62 = vld [vmem:[#allocation3 + $0x12a4] sm:$0xf]  ;;  %v11992_v4 = vor.u32 %v13969_v53, %v11989_v54 }
 0x46f   : > { %6481 = vmatpush.bf16.msrb.mxu0 %v11876_v55  ;;  %6500 = vmatpush.bf16.msrb.mxu1 %v12004_v5  ;;  %v12067_v5 = vld [vmem:[#allocation3 + $0x1220] sm:$0xf] }
 0x470   : > { %6519 = vmatpush.bf16.msrb.mxu2 %v12132_v2  ;;  %v12068_v10 = vor.u32 %v13991_v6, %v12067_v5  ;;  %v12052_v2 = vor.u32 %v13987_v23, %v12051_v22  ;;  %v11973_v22 = vld [vmem:[#allocation3 + $0x1170] sm:$0xf0]  ;;  %v14001_v23 = vld [vmem:[#allocation3 + $0x1284] sm:$0xf] }
 0x471   : > { %6538 = vmatpush.bf16.msrb.mxu3 %v12260_v36  ;;  %v12120_v49 = vor.u32 %v14001_v23, %v12117_v48  ;;  %v13957_v23 = vld [vmem:[#allocation3 + $0x1124] sm:$0xf]  ;;  %v11941_v48 = vld [vmem:[#allocation3 + $0x1130] sm:$0xf0] }
 0x473   : > { %6482 = vmatpush.bf16.msrb.mxu0 %v11860_v19  ;;  %6501 = vmatpush.bf16.msrb.mxu1 %v11988_v13  ;;  %v11912_v19 = vor.u32 %v13949_v12, %v11909_v18  ;;  %v12040_v13 = vor.u32 %v13981_v37, %v12037_v21  ;;  %v13933_v37 = vld [vmem:[#allocation3 + $0x1064] sm:$0xf] }
 0x474   : > { %6520 = vmatpush.bf16.msrb.mxu2 %v12116_v7  ;;  %v13965_v21 = vld [vmem:[#allocation3 + $0x1164] sm:$0xf] }
 0x475   : > { %11789 = vmatmul.msk.bf16.vlgmr.msra.gmra.mxu0 %vm5508_vm7, %v5501_v39  ;;  %11790 = vmatmul.msk.bf16.vlgmr.msra.gmra.mxu1 %vm5508_vm7, %v5501_v39 }
 0x476   : > { %11791 = vmatmul.msk.bf16.vlgmr.msra.gmra.mxu2 %vm5508_vm7, %v5501_v39  ;;  %11792 = vmatmul.msk.bf16.vlgmr.msra.gmra.mxu3 %vm5508_vm7, %v5501_v39  ;;  %v12100_v39 = vor.u32 %v13999_v57, %v12099_v27  ;;  %v13973_v57 = vld [vmem:[#allocation3 + $0x11a4] sm:$0xf] }
 0x477   : > { %6483 = vmatpush.bf16.msrb.mxu0 %v11844_v63  ;;  %6502 = vmatpush.bf16.msrb.mxu1 %v11972_v26  ;;  %v13977_v63 = vld [vmem:[#allocation3 + $0x11c4] sm:$0xf]  ;;  %v12008_v41 = vor.u32 %v13973_v57, %v12005_v25  ;;  %v11829_v25 = vld [vmem:[#allocation3 + $0x1050] sm:$0xf0] }
 0x478   : > { %6539 = vmatpush.bf16.msrb.mxu3 %v12244_v32  ;;  %6521 = vmatpush.bf16.msrb.mxu2 %v12100_v39  ;;  %v12024_v7 = vor.u32 %v13977_v63, %v12021_v29  ;;  %v12165_v32 = vld [vmem:[#allocation3 + $0x12f0] sm:$0xf0]  ;;  %v14009_v39 = vld [vmem:[#allocation3 + $0x12c4] sm:$0xf] }
 0x479   : > { %v12168_v16 = vor.u32 %v14013_v31, %v12165_v32  ;;  %v15214_v31 = vperm.slane %v15194_v44, 2  ;;  %v13929_v57 = vld [vmem:[#allocation3 + $0x1044] sm:$0xf] }
 0x47a   : > { %v11832_v53 = vor.u32 %v13929_v57, %v11829_v25  ;;  %v11797_v57 = vld [vmem:[#allocation3 + $0x1010] sm:$0xf0]  ;;  %v11944_v25 = vor.u32 %v13957_v23, %v11941_v48  ;;  %v13980_v48 = vld [vmem:[#allocation3 + $0x11d4] sm:$0xf0] }
 0x47b   : > { %6484 = vmatpush.bf16.msrb.mxu0 %v11828_v17  ;;  %6503 = vmatpush.bf16.msrb.mxu1 %v11956_v38  ;;  %v13941_v17 = vld [vmem:[#allocation3 + $0x10a4] sm:$0xf]  ;;  %v12296_v38 = vor.u32 %v14045_v33, %v12293_v60 }
 0x47c   : > { %6540 = vmatpush.bf16.msrb.mxu3 %v12228_v42  ;;  %6522 = vmatpush.bf16.msrb.mxu2 %v12084_v24  ;;  %v11880_v27 = vor.u32 %v13941_v17, %v11877_v35  ;;  %v12149_v42 = vld [vmem:[#allocation3 + $0x12d0] sm:$0xf0] }
 0x47f   : > { %6485 = vmatpush.bf16.msrb.mxu0 %v11812_v20  ;;  %6504 = vmatpush.bf16.msrb.mxu1 %v11940_v52  ;;  %v12152_v20 = vor.u32 %v14009_v39, %v12149_v42  ;;  %v11861_v52 = vld [vmem:[#allocation3 + $0x1090] sm:$0xf0] }
 0x480   : > { %6541 = vmatpush.bf16.msrb.mxu3 %v12212_v59  ;;  %6523 = vmatpush.bf16.msrb.mxu2 %v12068_v10  ;;  %v15200_v10 = vperm.slane %v15194_v44, 0 }
 0x483   : > { %6486 = vmatpush.bf16.msrb.mxu0 %v11796_v3  ;;  %6505 = vmatpush.bf16.msrb.mxu1 %v11924_v15 }
 0x484   : > { %6542 = vmatpush.bf16.msrb.mxu3 %v12196_v11  ;;  %6524 = vmatpush.bf16.msrb.mxu2 %v12052_v2  ;;  %v15203_v11 = vperm.slane %v15194_v44, 1 }
 0x487   : > { %6555 = vmatpush.bf16.msra.mxu0 %v11912_v19  ;;  %6574 = vmatpush.bf16.msra.mxu1 %v12040_v13  ;;  %v11845_v19 = vld [vmem:[#allocation3 + $0x1070] sm:$0xf0] }
 0x488   : > { %6543 = vmatpush.bf16.msrb.mxu3 %v12180_v46  ;;  %6593 = vmatpush.bf16.msra.mxu2 %v12168_v16  ;;  %v11848_v13 = vor.u32 %v13933_v37, %v11845_v19  ;;  %v14033_v46 = vld [vmem:[#allocation3 + $0x1384] sm:$0xf]  ;;  %v12229_v37 = vld [vmem:[#allocation3 + $0x1370] sm:$0xf0] }
 0x489   : > { %v13925_v19 = vld [vmem:[#allocation3 + $0x1024] sm:$0xf] }
 0x48b   : > { %6556 = vmatpush.bf16.msra.mxu0 %v11896_v30  ;;  %6575 = vmatpush.bf16.msra.mxu1 %v12024_v7  ;;  %v12248_v30 = vor.u32 %v14033_v46, %v12245_v14  ;;  %v13993_v46 = vld [vmem:[#allocation3 + $0x1244] sm:$0xf]  ;;  %v12085_v14 = vld [vmem:[#allocation3 + $0x1250] sm:$0xf0] }
 0x48c   : > { %6612 = vmatpush.bf16.msra.mxu3 %v12296_v38  ;;  %6594 = vmatpush.bf16.msra.mxu2 %v12152_v20 }
 0x48f   : > { %6557 = vmatpush.bf16.msra.mxu0 %v11880_v27  ;;  %6576 = vmatpush.bf16.msra.mxu1 %v12008_v41  ;;  %v15222_v27 = vperm.slane %v15194_v44, 3 }
 0x490   : > { %6613 = vmatpush.bf16.msra.mxu3 %v12280_v50 }
 0x493   : > { %6577 = vmatpush.bf16.msra.mxu1 %v11992_v4 }
 0x494   : > { %6614 = vmatpush.bf16.msra.mxu3 %v12264_v8 }
 0x498   : > { %6615 = vmatpush.bf16.msra.mxu3 %v12248_v30 }
 0x4df   : > { %v5392_v56 = vpop.xlane.xlu2 %5391 }
 0x4e0   : > { %v9216_v34 = vperm.slane %v5392_v56, 0  ;;  %v13937_v56 = vld [vmem:[#allocation3 + $0x1084] sm:$0xf] }
 0x4e1   : > { %v11864_v59 = vor.u32 %v13937_v56, %v11861_v52 }
 0x4e2   : > { %9217 = vst [vmem:[%s15183_s22 + $0x20] sm:$0xff] %v9216_v34  ;;  %v15186_v1 = vpop.f32.mrf.mxu0  ;;  %v15188_v55 = vpop.f32.mrf.mxu1  ;;  %v12133_v34 = vld [vmem:[#allocation3 + $0x12b0] sm:$0xf0] }
 0x4e3   : > { %v12136_v5 = vor.u32 %v14005_v62, %v12133_v34  ;;  %v5578_v15 = vperm.slane %v15186_v1, 0  ;;  %v5579_v6 = vperm.slane %v15188_v55, 0  ;;  %v5631_v9 = vperm.slane %v15186_v1, 1  ;;  %6558 = vmatpush.bf16.msra.mxu0 %v11864_v59 }
 0x4e4   : > { %v11976_v1 = vor.u32 %v13965_v21, %v11973_v22  ;;  %v5632_v47 = vperm.slane %v15188_v55, 1  ;;  %v11813_v21 = vld [vmem:[#allocation3 + $0x1030] sm:$0xf0] }
 0x4e5   : > { %6595 = vmatpush.bf16.msra.mxu2 %v12136_v5  ;;  %v13997_v5 = vld [vmem:[#allocation3 + $0x1264] sm:$0xf] }
 0x4e6   : > { %6578 = vmatpush.bf16.msra.mxu1 %v11976_v1 }
 0x4e7   : > { %6559 = vmatpush.bf16.msra.mxu0 %v11848_v13 }
 0x4e9   : > { %v15190_v51 = vpop.f32.mrf.mxu2  ;;  %v15192_v36 = vpop.f32.mrf.mxu3  ;;  %6596 = vmatpush.bf16.msra.mxu2 %v12120_v49 }
 0x4ea   : > { %v5457_v26 = vpop.f32.mrf.mxu0  ;;  %v5470_v28 = vpop.f32.mrf.mxu1  ;;  %v5580_v45 = vperm.slane %v15190_v51, 0  ;;  %v5581_v7 = vperm.slane %v15192_v36, 0  ;;  %v5633_v20 = vperm.slane %v15190_v51, 1  ;;  %v5634_v50 = vperm.slane %v15192_v36, 1 }
 0x4eb   : > { %6560 = vmatpush.bf16.msra.mxu0 %v11832_v53 }
 0x4f1   : > { %v5483_v24 = vpop.f32.mrf.mxu2  ;;  %v5496_v58 = vpop.f32.mrf.mxu3 }
 0x4f2   : > { %v5529_v0 = vpop.f32.mrf.mxu0  ;;  %v5543_v3 = vpop.f32.mrf.mxu1  ;;  %v13961_v24 = vld [vmem:[#allocation3 + $0x1144] sm:$0xf]  ;;  %v11957_v58 = vld [vmem:[#allocation3 + $0x1150] sm:$0xf0] }
 0x4f3   : > { %v5582_v12 = vadd.f32 %v5578_v15, %v5529_v0  ;;  %v5583_v18 = vadd.f32 %v5579_v6, %v5543_v3  ;;  %v5635_v2 = vadd.f32 %v5631_v9, %v5529_v0  ;;  %v5636_v54 = vadd.f32 %v5632_v47, %v5543_v3 }
 0x4f5   : > { %v5599_v63 = vadd.f32 %v15200_v10, %v5582_v12  ;;  %v5600_v26 = vadd.f32 %v15203_v11, %v5583_v18  ;;  %v15217_v16 = vadd.f32 %v5635_v2, %v15200_v10 }
 0x4f7   : > { %v5607_v39 = vmul.f32 0.01, %v5599_v63  ;;  %v5608_v41 = vmul.f32 0.01, %v5600_v26  ;;  %v15230_v56 = vmul.f32 0.01, %v15217_v16 }
 0x4f9   : > { %v15208_v28 = vpop.f32.mrf.mxu2  ;;  %v15210_v29 = vpop.f32.mrf.mxu3  ;;  %v5615_v55 = vmax.f32 %v5599_v63, %v5607_v39  ;;  %v5616_v59 = vmax.f32 %v5600_v26, %v5608_v41  ;;  %v11960_v26 = vor.u32 %v13961_v24, %v11957_v58  ;;  %v12088_v39 = vor.u32 %v13993_v46, %v12085_v14  ;;  %v13953_v41 = vld [vmem:[#allocation3 + $0x1104] sm:$0xf]  ;;  %v13952_v24 = vld [vmem:[#allocation3 + $0x10f4] sm:$0xf0] }
 0x4fa   : > { %v5531_v32 = vpop.f32.mrf.mxu0  ;;  %v5545_v33 = vpop.f32.mrf.mxu1  ;;  %v5584_v60 = vadd.f32 %v5580_v45, %v15208_v28  ;;  %v5585_v38 = vadd.f32 %v5581_v7, %v15210_v29  ;;  %v5637_v58 = vadd.f32 %v5633_v20, %v15208_v28  ;;  %v12197_v28 = vld [vmem:[#allocation3 + $0x1330] sm:$0xf0]  ;;  %v5638_v51 = vadd.f32 %v5634_v50, %v15210_v29  ;;  %v14017_v29 = vld [vmem:[#allocation3 + $0x1304] sm:$0xf] }
 0x4fb   : > { %v5586_v17 = vadd.f32 %v5578_v15, %v5531_v32  ;;  %v5587_v35 = vadd.f32 %v5579_v6, %v5545_v33  ;;  %v5639_v40 = vadd.f32 %v5631_v9, %v5531_v32  ;;  %v12101_v15 = vld [vmem:[#allocation3 + $0x1270] sm:$0xf0]  ;;  %v14029_v6 = vld [vmem:[#allocation3 + $0x1364] sm:$0xf]  ;;  %v5640_v12 = vadd.f32 %v5632_v47, %v5545_v33  ;;  %6579 = vmatpush.bf16.msra.mxu1 %v11960_v26 }
 0x4fc   : > { %v15233_v44 = vadd.f32 %v15214_v31, %v5584_v60  ;;  %v15236_v62 = vadd.f32 %v15222_v27, %v5585_v38  ;;  %v12104_v30 = vor.u32 %v13997_v5, %v12101_v15  ;;  %v12213_v32 = vld [vmem:[#allocation3 + $0x1350] sm:$0xf0]  ;;  %v13921_v33 = vld [vmem:[#allocation3 + $0x1004] sm:$0xf]  ;;  %v12232_v38 = vor.u32 %v14029_v6, %v12229_v37 }
 0x4fd   : > { %v5603_v42 = vadd.f32 %v15200_v10, %v5586_v17  ;;  %v5604_v43 = vadd.f32 %v15203_v11, %v5587_v35  ;;  %v15250_v63 = vadd.f32 %v5639_v40, %v15200_v10  ;;  %v15254_v60 = vadd.f32 %v5640_v12, %v15203_v11  ;;  %v12043_v40 = vld [vmem:[#allocation3 + $0x11e8] sm:$0xf] }
 0x4fe   : > { %v5609_v13 = vmul.f32 0.01, %v15233_v44  ;;  %v5610_v9 = vmul.f32 0.01, %v15236_v62  ;;  %6597 = vmatpush.bf16.msra.mxu2 %v12104_v30  ;;  %v11816_v10 = vor.u32 %v13925_v19, %v11813_v21  ;;  %6616 = vmatpush.bf16.msra.mxu3 %v12232_v38  ;;  %v11899_v19 = vld [vmem:[#allocation3 + $0x10c8] sm:$0xf]  ;;  %v15287_v26 = vadd.f32 %v5637_v58, %v15214_v31 }
 0x4ff   : > { %v5611_v52 = vmul.f32 0.01, %v5603_v42  ;;  %v5612_v34 = vmul.f32 0.01, %v5604_v43  ;;  %v5656_v12 = vmul.f32 0.01, %v15254_v60  ;;  %6580 = vmatpush.bf16.msra.mxu1 %v11944_v25 }
 0x500   : > { %v5617_v47 = vmax.f32 %v15233_v44, %v5609_v13  ;;  %6561 = vmatpush.bf16.msra.mxu0 %v11816_v10  ;;  %v13984_v44 = vld [vmem:[#allocation3 + $0x11f4] sm:$0xf0]  ;;  %v12027_v13 = vld [vmem:[#allocation3 + $0x11c8] sm:$0xf] }
 0x501   : > { %v5619_v61 = vmax.f32 %v5603_v42, %v5611_v52  ;;  %v5559_v0 = vpop.f32.mrf.mxu2  ;;  %v5573_v4 = vpop.f32.mrf.mxu3  ;;  %v5620_v8 = vmax.f32 %v5604_v43, %v5612_v34  ;;  %v11925_v42 = vld [vmem:[#allocation3 + $0x1110] sm:$0xf0]  ;;  %v13989_v43 = vld [vmem:[#allocation3 + $0x1224] sm:$0xf]  ;;  %v5618_v52 = vmax.f32 %v15236_v62, %v5610_v9  ;;  %v11915_v34 = vld [vmem:[#allocation3 + $0x10e8] sm:$0xf]  ;;  %v12028_v38 = vor.u32 %v13980_v48, %v12027_v13 }
 0x502   : > { %v5588_v18 = vadd.f32 %v5580_v45, %v5559_v0  ;;  %v5589_v3 = vadd.f32 %v5581_v7, %v5573_v4  ;;  %v15247_v45 = vadd.f32 %v5636_v54, %v15203_v11  ;;  %v14025_v7 = vld [vmem:[#allocation3 + $0x1344] sm:$0xf]  ;;  %v12069_v54 = vld [vmem:[#allocation3 + $0x1230] sm:$0xf0]  ;;  %v5641_v62 = vadd.f32 %v5633_v20, %v5559_v0  ;;  %6598 = vmatpush.bf16.msra.mxu2 %v12088_v39  ;;  %v13948_v21 = vld [vmem:[#allocation3 + $0x10d4] sm:$0xf0] }
 0x503   : > { %v15239_v22 = vpack.c.bf16 %v5619_v61, %v5615_v55  ;;  %v15242_v2 = vpack.c.bf16 %v5620_v8, %v5616_v59  ;;  %v15263_v55 = vmul.f32 0.01, %v15250_v63  ;;  %v12216_v59 = vor.u32 %v14025_v7, %v12213_v32  ;;  %v14021_v8 = vld [vmem:[#allocation3 + $0x1324] sm:$0xf]  ;;  %v12171_v9 = vld [vmem:[#allocation3 + $0x12e8] sm:$0xf] }
 0x504   : > { %v5605_v1 = vadd.f32 %v15214_v31, %v5588_v18  ;;  %v5606_v49 = vadd.f32 %v15222_v27, %v5589_v3  ;;  %v11800_v61 = vor.u32 %v13921_v33, %v11797_v57  ;;  %v5642_v15 = vadd.f32 %v5634_v50, %v5573_v4  ;;  %v13985_v0 = vld [vmem:[#allocation3 + $0x1204] sm:$0xf]  ;;  %v12053_v4 = vld [vmem:[#allocation3 + $0x1210] sm:$0xf0]  ;;  %v12299_v32 = vld [vmem:[#allocation3 + $0x13e8] sm:$0xf] }
 0x505   : > { %6487 = vmatmul.bf16.vlgmr.msrb.gmra.mxu0 %v15239_v22  ;;  %6506 = vmatmul.bf16.vlgmr.msrb.gmra.mxu1 %v15242_v2  ;;  %v11928_v18 = vor.u32 %v13953_v41, %v11925_v42  ;;  %v12072_v3 = vor.u32 %v13989_v43, %v12069_v54  ;;  %v11916_v37 = vor.u32 %v13952_v24, %v11915_v34  ;;  %v12181_v50 = vld [vmem:[#allocation3 + $0x1310] sm:$0xf0]  ;;  %v14048_v33 = vld [vmem:[#allocation3 + $0x13f4] sm:$0xf0]  ;;  %v11883_v10 = vld [vmem:[#allocation3 + $0x10a8] sm:$0xf] }
 0x506   : > { %v5613_v17 = vmul.f32 0.01, %v5605_v1  ;;  %v5614_v35 = vmul.f32 0.01, %v5606_v49  ;;  %v12044_v20 = vor.u32 %v13984_v44, %v12043_v40  ;;  %6617 = vmatpush.bf16.msra.mxu3 %v12216_v59  ;;  %6562 = vmatpush.bf16.msra.mxu0 %v11800_v61  ;;  %v12200_v23 = vor.u32 %v14021_v8, %v12197_v28  ;;  %v13944_v25 = vld [vmem:[#allocation3 + $0x10b4] sm:$0xf0] }
 0x507   : > { %v15281_v46 = vadd.f32 %v5641_v62, %v15214_v31  ;;  %v15284_v36 = vadd.f32 %v5642_v15, %v15222_v27  ;;  %v11900_v14 = vor.u32 %v13948_v21, %v11899_v19  ;;  %v5663_v30 = vmax.f32 %v15250_v63, %v15263_v55  ;;  %6581 = vmatpush.bf16.msra.mxu1 %v11928_v18  ;;  %v12011_v39 = vld [vmem:[#allocation3 + $0x11a8] sm:$0xf]  ;;  %v13976_v41 = vld [vmem:[#allocation3 + $0x11b4] sm:$0xf0] }
 0x508   : > { %v5621_v11 = vmax.f32 %v5605_v1, %v5613_v17  ;;  %v5622_v53 = vmax.f32 %v5606_v49, %v5614_v35  ;;  %v14016_v1 = vld [vmem:[#allocation3 + $0x12f4] sm:$0xf0]  ;;  %v5652_v49 = vmul.f32 0.01, %v15247_v45  ;;  %6599 = vmatpush.bf16.msra.mxu2 %v12072_v3  ;;  %v12056_v7 = vor.u32 %v13985_v0, %v12053_v4  ;;  %v12155_v42 = vld [vmem:[#allocation3 + $0x12c8] sm:$0xf] }
 0x509   : > { %v5646_v17 = vadd.f32 %v5638_v51, %v15222_v27  ;;  %v5664_v35 = vmax.f32 %v15254_v60, %v5656_v12  ;;  %v12172_v57 = vor.u32 %v14016_v1, %v12171_v9  ;;  %v5659_v31 = vmax.f32 %v15217_v16, %v15230_v56  ;;  %v14012_v43 = vld [vmem:[#allocation3 + $0x12d4] sm:$0xf0]  ;;  %v12283_v16 = vld [vmem:[#allocation3 + $0x13c8] sm:$0xf] }
 0x50a   : > { %v15267_v5 = vpack.c.bf16 %v5621_v11, %v5617_v47  ;;  %v15271_v6 = vpack.c.bf16 %v5622_v53, %v5618_v52  ;;  %6631 = vmatpush.bf16.msrb.mxu0 %v11916_v37  ;;  %6618 = vmatpush.bf16.msra.mxu3 %v12200_v23  ;;  %v12184_v63 = vor.u32 %v14017_v29, %v12181_v50  ;;  %v5657_v27 = vmul.f32 0.01, %v15281_v46  ;;  %v14044_v56 = vld [vmem:[#allocation3 + $0x13d4] sm:$0xf0]  ;;  %v11867_v55 = vld [vmem:[#allocation3 + $0x1088] sm:$0xf] }
 0x50b   : > { %6650 = vmatpush.bf16.msrb.mxu1 %v12044_v20  ;;  %v5660_v47 = vmax.f32 %v15247_v45, %v5652_v49  ;;  %v5658_v60 = vmul.f32 0.01, %v15284_v36  ;;  %v12300_v52 = vor.u32 %v14048_v33, %v12299_v32  ;;  %v5653_v11 = vmul.f32 0.01, %v15287_v26  ;;  %v13940_v59 = vld [vmem:[#allocation3 + $0x1094] sm:$0xf0] }
 0x50c   : > { %6525 = vmatmul.bf16.vlgmr.msrb.gmra.mxu2 %v15267_v5  ;;  %6544 = vmatmul.bf16.vlgmr.msrb.gmra.mxu3 %v15271_v6  ;;  %v15299_v53 = vpack.c.bf16 %v5663_v30, %v5659_v31  ;;  %v11884_v54 = vor.u32 %v13944_v25, %v11883_v10  ;;  %v5654_v34 = vmul.f32 0.01, %v5646_v17  ;;  %v12012_v45 = vor.u32 %v13976_v41, %v12011_v39  ;;  %v11995_v61 = vld [vmem:[#allocation3 + $0x1188] sm:$0xf]  ;;  %v13972_v15 = vld [vmem:[#allocation3 + $0x1194] sm:$0xf0] }
 0x50d   : > { %6600 = vmatpush.bf16.msra.mxu2 %v12056_v7  ;;  %v15301_v24 = vpack.c.bf16 %v5664_v35, %v5660_v47  ;;  %v12156_v58 = vor.u32 %v14012_v43, %v12155_v42  ;;  %v5665_v40 = vmax.f32 %v15281_v46, %v5657_v27  ;;  %v5666_v44 = vmax.f32 %v15284_v36, %v5658_v60  ;;  %v12139_v8 = vld [vmem:[#allocation3 + $0x12a8] sm:$0xf]  ;;  %v14008_v28 = vld [vmem:[#allocation3 + $0x12b4] sm:$0xf0] }
 0x50e   : > { %6632 = vmatpush.bf16.msrb.mxu0 %v11900_v14  ;;  %6619 = vmatpush.bf16.msra.mxu3 %v12184_v63  ;;  %v12284_v62 = vor.u32 %v14044_v56, %v12283_v16  ;;  %v11868_v12 = vor.u32 %v13940_v59, %v11867_v55  ;;  %v12267_v18 = vld [vmem:[#allocation3 + $0x13a8] sm:$0xf]  ;;  %v14040_v3 = vld [vmem:[#allocation3 + $0x13b4] sm:$0xf0]  ;;  %v5661_v37 = vmax.f32 %v15287_v26, %v5653_v11  ;;  %v13950_v59 = vld [vmem:[#allocation3 + $0x10ec] sm:$0xf] }
 0x50f   : > { %6651 = vmatpush.bf16.msrb.mxu1 %v12028_v38  ;;  %v5662_v19 = vmax.f32 %v5646_v17, %v5654_v34  ;;  %v11851_v21 = vld [vmem:[#allocation3 + $0x1068] sm:$0xf]  ;;  %v13936_v51 = vld [vmem:[#allocation3 + $0x1074] sm:$0xf0]  ;;  %v11996_v20 = vor.u32 %v13972_v15, %v11995_v61  ;;  %v12140_v0 = vor.u32 %v14008_v28, %v12139_v8  ;;  %v12268_v48 = vor.u32 %v14040_v3, %v12267_v18  ;;  %v11917_v61 = vld [vmem:[#allocation3 + $0x10f8] sm:$0xf0] }
 0x510   : > { %v11979_v4 = vld [vmem:[#allocation3 + $0x1168] sm:$0xf]  ;;  %v15308_v13 = vpack.c.bf16 %v5665_v40, %v5661_v37  ;;  %v13968_v9 = vld [vmem:[#allocation3 + $0x1174] sm:$0xf0]  ;;  %v11852_v46 = vor.u32 %v13936_v51, %v11851_v21  ;;  %v13982_v15 = vld [vmem:[#allocation3 + $0x11ec] sm:$0xf]  ;;  %v11920_v3 = vor.u32 %v13950_v59, %v11917_v61 }
 0x511   : > { %6669 = vmatpush.bf16.msrb.mxu2 %v12172_v57  ;;  %v15310_v23 = vpack.c.bf16 %v5666_v44, %v5662_v19  ;;  %v12123_v1 = vld [vmem:[#allocation3 + $0x1288] sm:$0xf]  ;;  %v14004_v49 = vld [vmem:[#allocation3 + $0x1294] sm:$0xf0]  ;;  %v11980_v26 = vor.u32 %v13968_v9, %v11979_v4  ;;  %v12045_v8 = vld [vmem:[#allocation3 + $0x11f8] sm:$0xf0] }
 0x512   : > { %6688 = vmatpush.bf16.msrb.mxu3 %v12300_v52  ;;  %6633 = vmatpush.bf16.msrb.mxu0 %v11884_v54  ;;  %v12251_v36 = vld [vmem:[#allocation3 + $0x1388] sm:$0xf]  ;;  %v14036_v29 = vld [vmem:[#allocation3 + $0x1394] sm:$0xf0]  ;;  %v12124_v30 = vor.u32 %v14004_v49, %v12123_v1  ;;  %v12048_v21 = vor.u32 %v13982_v15, %v12045_v8  ;;  %v13978_v9 = vld [vmem:[#allocation3 + $0x11cc] sm:$0xf] }
 0x513   : > { %6652 = vmatpush.bf16.msrb.mxu1 %v12012_v45  ;;  %v11835_v50 = vld [vmem:[#allocation3 + $0x1048] sm:$0xf]  ;;  %v13932_v14 = vld [vmem:[#allocation3 + $0x1054] sm:$0xf0]  ;;  %v12252_v7 = vor.u32 %v14036_v29, %v12251_v36  ;;  %v12029_v1 = vld [vmem:[#allocation3 + $0x11d8] sm:$0xf0] }
 0x514   : > { %v11963_v32 = vld [vmem:[#allocation3 + $0x1148] sm:$0xf]  ;;  %v13964_v33 = vld [vmem:[#allocation3 + $0x1154] sm:$0xf0]  ;;  %v11836_v17 = vor.u32 %v13932_v14, %v11835_v50  ;;  %v12173_v36 = vld [vmem:[#allocation3 + $0x12f8] sm:$0xf0] }
 0x515   : > { %6492 = vmatmul.bf16.gmra.mxu0 %v15299_v53  ;;  %6511 = vmatmul.bf16.gmra.mxu1 %v15301_v24  ;;  %v12107_v35 = vld [vmem:[#allocation3 + $0x1268] sm:$0xf]  ;;  %v14000_v38 = vld [vmem:[#allocation3 + $0x1274] sm:$0xf0]  ;;  %v11964_v31 = vor.u32 %v13964_v33, %v11963_v32  ;;  %v14046_v50 = vld [vmem:[#allocation3 + $0x13ec] sm:$0xf] }
 0x516   : > { %6670 = vmatpush.bf16.msrb.mxu2 %v12156_v58  ;;  %6689 = vmatpush.bf16.msrb.mxu3 %v12284_v62  ;;  %v12235_v57 = vld [vmem:[#allocation3 + $0x1368] sm:$0xf]  ;;  %v14032_v10 = vld [vmem:[#allocation3 + $0x1374] sm:$0xf0]  ;;  %v12108_v63 = vor.u32 %v14000_v38, %v12107_v35  ;;  %v12301_v14 = vld [vmem:[#allocation3 + $0x13f8] sm:$0xf0] }
 0x517   : > { %6634 = vmatpush.bf16.msrb.mxu0 %v11868_v12  ;;  %6653 = vmatpush.bf16.msrb.mxu1 %v11996_v20  ;;  %v11819_v25 = vld [vmem:[#allocation3 + $0x1028] sm:$0xf]  ;;  %v13928_v39 = vld [vmem:[#allocation3 + $0x1034] sm:$0xf0]  ;;  %v12236_v43 = vor.u32 %v14032_v10, %v12235_v57  ;;  %v13946_v20 = vld [vmem:[#allocation3 + $0x10cc] sm:$0xf]  ;;  %v12304_v38 = vor.u32 %v14046_v50, %v12301_v14 }
 0x518   : > { %v11947_v41 = vld [vmem:[#allocation3 + $0x1128] sm:$0xf]  ;;  %v13960_v42 = vld [vmem:[#allocation3 + $0x1134] sm:$0xf0]  ;;  %v11820_v47 = vor.u32 %v13928_v39, %v11819_v25  ;;  %v13942_v33 = vld [vmem:[#allocation3 + $0x10ac] sm:$0xf] }
 0x519   : > { %v12091_v27 = vld [vmem:[#allocation3 + $0x1248] sm:$0xf]  ;;  %v13996_v60 = vld [vmem:[#allocation3 + $0x1254] sm:$0xf0]  ;;  %v11948_v56 = vor.u32 %v13960_v42, %v11947_v41  ;;  %v13974_v35 = vld [vmem:[#allocation3 + $0x11ac] sm:$0xf] }
 0x51a   : > { %6671 = vmatpush.bf16.msrb.mxu2 %v12140_v0  ;;  %6690 = vmatpush.bf16.msrb.mxu3 %v12268_v48  ;;  %v12219_v52 = vld [vmem:[#allocation3 + $0x1348] sm:$0xf]  ;;  %v14028_v11 = vld [vmem:[#allocation3 + $0x1354] sm:$0xf0]  ;;  %v12092_v58 = vor.u32 %v13996_v60, %v12091_v27  ;;  %v11901_v0 = vld [vmem:[#allocation3 + $0x10d8] sm:$0xf0] }
 0x51b   : > { %6635 = vmatpush.bf16.msrb.mxu0 %v11852_v46  ;;  %6654 = vmatpush.bf16.msrb.mxu1 %v11980_v26  ;;  %v11803_v54 = vld [vmem:[#allocation3 + $0x1008] sm:$0xf]  ;;  %v13924_v16 = vld [vmem:[#allocation3 + $0x1014] sm:$0xf0]  ;;  %v12220_v40 = vor.u32 %v14028_v11, %v12219_v52  ;;  %v14014_v46 = vld [vmem:[#allocation3 + $0x12ec] sm:$0xf]  ;;  %v11904_v29 = vor.u32 %v13946_v20, %v11901_v0 }
 0x51c   : > { %6530 = vmatmul.bf16.gmra.mxu2 %v15308_v13  ;;  %6549 = vmatmul.bf16.gmra.mxu3 %v15310_v23  ;;  %v11931_v34 = vld [vmem:[#allocation3 + $0x1108] sm:$0xf]  ;;  %v13956_v45 = vld [vmem:[#allocation3 + $0x1114] sm:$0xf0]  ;;  %v11804_v44 = vor.u32 %v13924_v16, %v11803_v54  ;;  %v12176_v32 = vor.u32 %v14014_v46, %v12173_v36  ;;  %v12013_v57 = vld [vmem:[#allocation3 + $0x11b8] sm:$0xf0] }
 0x51d   : > { %v12075_v55 = vld [vmem:[#allocation3 + $0x1228] sm:$0xf]  ;;  %v13992_v62 = vld [vmem:[#allocation3 + $0x1234] sm:$0xf0]  ;;  %v11932_v18 = vor.u32 %v13956_v45, %v11931_v34  ;;  %v14010_v10 = vld [vmem:[#allocation3 + $0x12cc] sm:$0xf]  ;;  %v12016_v41 = vor.u32 %v13974_v35, %v12013_v57 }
 0x51e   : > { %6672 = vmatpush.bf16.msrb.mxu2 %v12124_v30  ;;  %6691 = vmatpush.bf16.msrb.mxu3 %v12252_v7  ;;  %v12203_v28 = vld [vmem:[#allocation3 + $0x1328] sm:$0xf]  ;;  %v14024_v12 = vld [vmem:[#allocation3 + $0x1334] sm:$0xf0]  ;;  %v12076_v19 = vor.u32 %v13992_v62, %v12075_v55  ;;  %v12032_v30 = vor.u32 %v13978_v9, %v12029_v1  ;;  %v12157_v25 = vld [vmem:[#allocation3 + $0x12d8] sm:$0xf0] }
 0x51f   : > { %6636 = vmatpush.bf16.msrb.mxu0 %v11836_v17  ;;  %6655 = vmatpush.bf16.msrb.mxu1 %v11964_v31  ;;  %v12059_v37 = vld [vmem:[#allocation3 + $0x1208] sm:$0xf]  ;;  %v13988_v51 = vld [vmem:[#allocation3 + $0x1214] sm:$0xf0]  ;;  %v12204_v4 = vor.u32 %v14024_v12, %v12203_v28  ;;  %v11885_v17 = vld [vmem:[#allocation3 + $0x10b8] sm:$0xf0]  ;;  %v12160_v42 = vor.u32 %v14010_v10, %v12157_v25 }
 0x520   : > { %v12187_v48 = vld [vmem:[#allocation3 + $0x1308] sm:$0xf]  ;;  %v14020_v49 = vld [vmem:[#allocation3 + $0x1314] sm:$0xf0]  ;;  %v12060_v26 = vor.u32 %v13988_v51, %v12059_v37  ;;  %v14042_v39 = vld [vmem:[#allocation3 + $0x13cc] sm:$0xf] }
 0x521   : > { %v12188_v7 = vor.u32 %v14020_v49, %v12187_v48  ;;  %v12285_v31 = vld [vmem:[#allocation3 + $0x13d8] sm:$0xf0]  ;;  %v13970_v27 = vld [vmem:[#allocation3 + $0x118c] sm:$0xf] }
 0x522   : > { %6673 = vmatpush.bf16.msrb.mxu2 %v12108_v63  ;;  %6692 = vmatpush.bf16.msrb.mxu3 %v12236_v43  ;;  %v11888_v63 = vor.u32 %v13942_v33, %v11885_v17  ;;  %v13938_v43 = vld [vmem:[#allocation3 + $0x108c] sm:$0xf]  ;;  %v12288_v60 = vor.u32 %v14042_v39, %v12285_v31  ;;  %v11997_v52 = vld [vmem:[#allocation3 + $0x1198] sm:$0xf0] }
 0x523   : > { %6637 = vmatpush.bf16.msrb.mxu0 %v11820_v47  ;;  %6656 = vmatpush.bf16.msrb.mxu1 %v11948_v56  ;;  %v11869_v47 = vld [vmem:[#allocation3 + $0x1098] sm:$0xf0]  ;;  %v14006_v11 = vld [vmem:[#allocation3 + $0x12ac] sm:$0xf]  ;;  %v12000_v45 = vor.u32 %v13970_v27, %v11997_v52 }
 0x524   : > { %v12141_v54 = vld [vmem:[#allocation3 + $0x12b8] sm:$0xf0]  ;;  %v11872_v16 = vor.u32 %v13938_v43, %v11869_v47  ;;  %v14038_v56 = vld [vmem:[#allocation3 + $0x13ac] sm:$0xf] }
 0x525   : > { %6563 = vmatmul.bf16.vlgmr.msra.gmra.mxu0 %v15239_v22  ;;  %6582 = vmatmul.bf16.vlgmr.msra.gmra.mxu1 %v15242_v2  ;;  %v12269_v34 = vld [vmem:[#allocation3 + $0x13b8] sm:$0xf0]  ;;  %v13934_v55 = vld [vmem:[#allocation3 + $0x106c] sm:$0xf] }
 0x526   : > { %6674 = vmatpush.bf16.msrb.mxu2 %v12092_v58  ;;  %6693 = vmatpush.bf16.msrb.mxu3 %v12220_v40  ;;  %v12144_v58 = vor.u32 %v14006_v11, %v12141_v54  ;;  %v11853_v59 = vld [vmem:[#allocation3 + $0x1078] sm:$0xf0]  ;;  %v13966_v61 = vld [vmem:[#allocation3 + $0x116c] sm:$0xf]  ;;  %v12272_v15 = vor.u32 %v14038_v56, %v12269_v34 }
 0x527   : > { %6638 = vmatpush.bf16.msrb.mxu0 %v11804_v44  ;;  %6657 = vmatpush.bf16.msrb.mxu1 %v11932_v18  ;;  %v11981_v40 = vld [vmem:[#allocation3 + $0x1178] sm:$0xf0]  ;;  %v14002_v44 = vld [vmem:[#allocation3 + $0x128c] sm:$0xf]  ;;  %v11856_v8 = vor.u32 %v13934_v55, %v11853_v59  ;;  %v14079_v55 = vld [vmem:[#allocation3 + $0x14ec] sm:$0xf0] }
 0x528   : > { %v12125_v62 = vld [vmem:[#allocation3 + $0x1298] sm:$0xf0]  ;;  %v14034_v28 = vld [vmem:[#allocation3 + $0x138c] sm:$0xf]  ;;  %v11984_v18 = vor.u32 %v13966_v61, %v11981_v40  ;;  %v12403_v61 = vld [vmem:[#allocation3 + $0x14c0] sm:$0xf] }
 0x529   : > { %v12253_v12 = vld [vmem:[#allocation3 + $0x1398] sm:$0xf0]  ;;  %v13930_v37 = vld [vmem:[#allocation3 + $0x104c] sm:$0xf]  ;;  %v14075_v40 = vld [vmem:[#allocation3 + $0x14cc] sm:$0xf0] }
 0x52a   : > { %6675 = vmatpush.bf16.msrb.mxu2 %v12076_v19  ;;  %6694 = vmatpush.bf16.msrb.mxu3 %v12204_v4  ;;  %v11837_v19 = vld [vmem:[#allocation3 + $0x1058] sm:$0xf0]  ;;  %v13998_v20 = vld [vmem:[#allocation3 + $0x126c] sm:$0xf]  ;;  %v12256_v4 = vor.u32 %v14034_v28, %v12253_v12  ;;  %v12371_v28 = vld [vmem:[#allocation3 + $0x1480] sm:$0xf] }
 0x52b   : > { %6707 = vmatpush.bf16.msra.mxu0 %v11920_v3  ;;  %6726 = vmatpush.bf16.msra.mxu1 %v12048_v21  ;;  %v12128_v3 = vor.u32 %v14002_v44, %v12125_v62  ;;  %v13962_v21 = vld [vmem:[#allocation3 + $0x114c] sm:$0xf]  ;;  %v11965_v51 = vld [vmem:[#allocation3 + $0x1158] sm:$0xf0]  ;;  %v11840_v48 = vor.u32 %v13930_v37, %v11837_v19  ;;  %v12404_v44 = vor.u32 %v14075_v40, %v12403_v61  ;;  %v12387_v62 = vld [vmem:[#allocation3 + $0x14a0] sm:$0xf] }
 0x52c   : > { %6601 = vmatmul.bf16.vlgmr.msra.gmra.mxu2 %v15267_v5  ;;  %6620 = vmatmul.bf16.vlgmr.msra.gmra.mxu3 %v15271_v6  ;;  %v12109_v0 = vld [vmem:[#allocation3 + $0x1278] sm:$0xf0]  ;;  %v14030_v9 = vld [vmem:[#allocation3 + $0x136c] sm:$0xf]  ;;  %v11968_v49 = vor.u32 %v13962_v21, %v11965_v51  ;;  %v14067_v12 = vld [vmem:[#allocation3 + $0x148c] sm:$0xf0] }
 0x52d   : > { %v12237_v1 = vld [vmem:[#allocation3 + $0x1378] sm:$0xf0]  ;;  %v12112_v46 = vor.u32 %v13998_v20, %v12109_v0  ;;  %v13926_v36 = vld [vmem:[#allocation3 + $0x102c] sm:$0xf]  ;;  %v14059_v19 = vld [vmem:[#allocation3 + $0x144c] sm:$0xf0] }
 0x52e   : > { %6676 = vmatpush.bf16.msrb.mxu2 %v12060_v26  ;;  %6695 = vmatpush.bf16.msrb.mxu3 %v12188_v7  ;;  %v13958_v50 = vld [vmem:[#allocation3 + $0x112c] sm:$0xf]  ;;  %v11949_v14 = vld [vmem:[#allocation3 + $0x1138] sm:$0xf0]  ;;  %v12240_v7 = vor.u32 %v14030_v9, %v12237_v1  ;;  %v12323_v51 = vld [vmem:[#allocation3 + $0x1420] sm:$0xf] }
 0x52f   : > { %6708 = vmatpush.bf16.msra.mxu0 %v11904_v29  ;;  %6727 = vmatpush.bf16.msra.mxu1 %v12032_v30  ;;  %v11821_v29 = vld [vmem:[#allocation3 + $0x1038] sm:$0xf0]  ;;  %v13994_v26 = vld [vmem:[#allocation3 + $0x124c] sm:$0xf]  ;;  %v11952_v35 = vor.u32 %v13958_v50, %v11949_v14  ;;  %v12307_v20 = vld [vmem:[#allocation3 + $0x1400] sm:$0xf] }
 0x530   : > { %v12093_v30 = vld [vmem:[#allocation3 + $0x1258] sm:$0xf0]  ;;  %v14026_v33 = vld [vmem:[#allocation3 + $0x134c] sm:$0xf]  ;;  %v14051_v0 = vld [vmem:[#allocation3 + $0x140c] sm:$0xf0] }
 0x531   : > { %v12221_v17 = vld [vmem:[#allocation3 + $0x1358] sm:$0xf0]  ;;  %v13922_v57 = vld [vmem:[#allocation3 + $0x100c] sm:$0xf]  ;;  %v14077_v9 = vld [vmem:[#allocation3 + $0x14e4] sm:$0xf] }
 0x532   : > { %6745 = vmatpush.bf16.msra.mxu2 %v12176_v32  ;;  %6764 = vmatpush.bf16.msra.mxu3 %v12304_v38  ;;  %v11824_v32 = vor.u32 %v13926_v36, %v11821_v29  ;;  %v12096_v38 = vor.u32 %v13994_v26, %v12093_v30  ;;  %v11805_v10 = vld [vmem:[#allocation3 + $0x1018] sm:$0xf0]  ;;  %v13954_v25 = vld [vmem:[#allocation3 + $0x110c] sm:$0xf]  ;;  %v14107_v50 = vld [vmem:[#allocation3 + $0x15cc] sm:$0xf0] }
 0x533   : > { %6709 = vmatpush.bf16.msra.mxu0 %v11888_v63  ;;  %6728 = vmatpush.bf16.msra.mxu1 %v12016_v41  ;;  %v11933_v39 = vld [vmem:[#allocation3 + $0x1118] sm:$0xf0]  ;;  %v13990_v31 = vld [vmem:[#allocation3 + $0x122c] sm:$0xf]  ;;  %v12224_v41 = vor.u32 %v14026_v33, %v12221_v17  ;;  %v12405_v26 = vld [vmem:[#allocation3 + $0x14d0] sm:$0xf0] }
 0x534   : > { %v12077_v63 = vld [vmem:[#allocation3 + $0x1238] sm:$0xf0]  ;;  %v14022_v43 = vld [vmem:[#allocation3 + $0x132c] sm:$0xf]  ;;  %v11936_v27 = vor.u32 %v13954_v25, %v11933_v39  ;;  %v14103_v33 = vld [vmem:[#allocation3 + $0x15ac] sm:$0xf0] }
 0x535   : > { %6568 = vmatmul.bf16.gmra.mxu0 %v15299_v53  ;;  %6587 = vmatmul.bf16.gmra.mxu1 %v15301_v24  ;;  %v12205_v47 = vld [vmem:[#allocation3 + $0x1338] sm:$0xf0]  ;;  %v13986_v52 = vld [vmem:[#allocation3 + $0x120c] sm:$0xf]  ;;  %v14069_v17 = vld [vmem:[#allocation3 + $0x14a4] sm:$0xf] }
 0x536   : > { %6746 = vmatpush.bf16.msra.mxu2 %v12160_v42  ;;  %6765 = vmatpush.bf16.msra.mxu3 %v12288_v60  ;;  %v11808_v42 = vor.u32 %v13922_v57, %v11805_v10  ;;  %v12080_v60 = vor.u32 %v13990_v31, %v12077_v63  ;;  %v12061_v11 = vld [vmem:[#allocation3 + $0x1218] sm:$0xf0]  ;;  %v12208_v54 = vor.u32 %v14022_v43, %v12205_v47  ;;  %v12389_v57 = vld [vmem:[#allocation3 + $0x14b0] sm:$0xf0]  ;;  %v12499_v31 = vld [vmem:[#allocation3 + $0x1580] sm:$0xf] }
 0x537   : > { %6710 = vmatpush.bf16.msra.mxu0 %v11872_v16  ;;  %6729 = vmatpush.bf16.msra.mxu1 %v12000_v45  ;;  %v14018_v16 = vld [vmem:[#allocation3 + $0x130c] sm:$0xf]  ;;  %v12189_v56 = vld [vmem:[#allocation3 + $0x1318] sm:$0xf0]  ;;  %v12064_v34 = vor.u32 %v13986_v52, %v12061_v11  ;;  %v12392_v25 = vor.u32 %v14069_v17, %v12389_v57  ;;  %v14099_v63 = vld [vmem:[#allocation3 + $0x158c] sm:$0xf0] }
 0x538   : > { %v12192_v45 = vor.u32 %v14018_v16, %v12189_v56  ;;  %v15338_v29 = vld [vmem:[#allocation5 + $0x6] ss:$8 sm:$0xf]  ;;  %v12483_v11 = vld [vmem:[#allocation3 + $0x1560] sm:$0xf] }
 0x539   : > { %v12373_v43 = vld [vmem:[#allocation3 + $0x1490] sm:$0xf0]  ;;  %v14061_v16 = vld [vmem:[#allocation3 + $0x1464] sm:$0xf]  ;;  %v12467_v40 = vld [vmem:[#allocation3 + $0x1540] sm:$0xf] }
 0x53a   : > { %6747 = vmatpush.bf16.msra.mxu2 %v12144_v58  ;;  %6766 = vmatpush.bf16.msra.mxu3 %v12272_v15  ;;  %v12419_v58 = vld [vmem:[#allocation3 + $0x14e0] sm:$0xf]  ;;  %v14071_v15 = vld [vmem:[#allocation3 + $0x14ac] sm:$0xf0] }
 0x53b   : > { %6711 = vmatpush.bf16.msra.mxu0 %v11856_v8  ;;  %6730 = vmatpush.bf16.msra.mxu1 %v11984_v18  ;;  %v12420_v59 = vor.u32 %v14079_v55, %v12419_v58  ;;  %v12388_v8 = vor.u32 %v14071_v15, %v12387_v62  ;;  %v12372_v18 = vor.u32 %v14067_v12, %v12371_v28  ;;  %v12357_v55 = vld [vmem:[#allocation3 + $0x1470] sm:$0xf0]  ;;  %v14057_v62 = vld [vmem:[#allocation3 + $0x1444] sm:$0xf]  ;;  %v12675_v17 = vld [vmem:[#allocation3 + $0x16e0] sm:$0xf] }
 0x53c   : > { %6606 = vmatmul.bf16.gmra.mxu2 %v15308_v13  ;;  %6625 = vmatmul.bf16.gmra.mxu3 %v15310_v23  ;;  %v12360_v61 = vor.u32 %v14061_v16, %v12357_v55  ;;  %v12341_v12 = vld [vmem:[#allocation3 + $0x1450] sm:$0xf0] }
 0x53d   : > { %v12533_v16 = vld [vmem:[#allocation3 + $0x15d0] sm:$0xf0] }
 0x53e   : > { %6748 = vmatpush.bf16.msra.mxu2 %v12128_v3  ;;  %6767 = vmatpush.bf16.msra.mxu3 %v12256_v4  ;;  %v12355_v3 = vld [vmem:[#allocation3 + $0x1460] sm:$0xf]  ;;  %v12308_v4 = vor.u32 %v14051_v0, %v12307_v20 }
 0x53f   : > { %6712 = vmatpush.bf16.msra.mxu0 %v11840_v48  ;;  %6731 = vmatpush.bf16.msra.mxu1 %v11968_v49  ;;  %v12547_v48 = vld [vmem:[#allocation3 + $0x15e0] sm:$0xf]  ;;  %v12421_v49 = vld [vmem:[#allocation3 + $0x14f0] sm:$0xf0] }
 0x540   : > { %v12424_v36 = vor.u32 %v14077_v9, %v12421_v49  ;;  %v14049_v49 = vld [vmem:[#allocation3 + $0x1404] sm:$0xf] }
 0x542   : > { %6749 = vmatpush.bf16.msra.mxu2 %v12112_v46  ;;  %6768 = vmatpush.bf16.msra.mxu3 %v12240_v7  ;;  %v15341_v7 = vperm.slane %v15338_v29, 0 }
 0x543   : > { %6713 = vmatpush.bf16.msra.mxu0 %v11824_v32  ;;  %6732 = vmatpush.bf16.msra.mxu1 %v11952_v35  ;;  %v12515_v32 = vld [vmem:[#allocation3 + $0x15a0] sm:$0xf] }
 0x545   : > { %6639 = vmatmul.bf16.vlgmr.msrb.gmra.mxu0 %v15239_v22  ;;  %6658 = vmatmul.bf16.vlgmr.msrb.gmra.mxu1 %v15242_v2 }
 0x546   : > { %6750 = vmatpush.bf16.msra.mxu2 %v12096_v38  ;;  %6769 = vmatpush.bf16.msra.mxu3 %v12224_v41  ;;  %v12516_v38 = vor.u32 %v14103_v33, %v12515_v32  ;;  %v14065_v41 = vld [vmem:[#allocation3 + $0x1484] sm:$0xf] }
 0x547   : > { %6714 = vmatpush.bf16.msra.mxu0 %v11808_v42  ;;  %6733 = vmatpush.bf16.msra.mxu1 %v11936_v27  ;;  %v12500_v42 = vor.u32 %v14099_v63, %v12499_v31  ;;  %v12427_v31 = vld [vmem:[#allocation3 + $0x14e8] sm:$0xf]  ;;  %v14080_v63 = vld [vmem:[#allocation3 + $0x14f4] sm:$0xf0] }
 0x54a   : > { %6751 = vmatpush.bf16.msra.mxu2 %v12080_v60  ;;  %6770 = vmatpush.bf16.msra.mxu3 %v12208_v54  ;;  %v12376_v60 = vor.u32 %v14065_v41, %v12373_v43  ;;  %v14095_v54 = vld [vmem:[#allocation3 + $0x156c] sm:$0xf0]  ;;  %v12428_v43 = vor.u32 %v14080_v63, %v12427_v31 }
 0x54b   : > { %7603 = vmatpush.bf16.msrb.mxu0 %v12420_v59  ;;  %v12484_v58 = vor.u32 %v14095_v54, %v12483_v11 }
 0x54c   : > { %6677 = vmatmul.bf16.vlgmr.msrb.gmra.mxu2 %v15267_v5  ;;  %6696 = vmatmul.bf16.vlgmr.msrb.gmra.mxu3 %v15271_v6 }
 0x54e   : > { %6752 = vmatpush.bf16.msra.mxu2 %v12064_v34  ;;  %6771 = vmatpush.bf16.msra.mxu3 %v12192_v45 }
 0x54f   : > { %7604 = vmatpush.bf16.msrb.mxu0 %v12404_v44  ;;  %v14091_v44 = vld [vmem:[#allocation3 + $0x154c] sm:$0xf0] }
 0x550   : > { %v12468_v28 = vor.u32 %v14091_v44, %v12467_v40  ;;  %v12643_v44 = vld [vmem:[#allocation3 + $0x16a0] sm:$0xf] }
 0x553   : > { %7605 = vmatpush.bf16.msrb.mxu0 %v12388_v8 }
 0x555   : > { %6644 = vmatmul.bf16.gmra.mxu0 %v15299_v53  ;;  %6663 = vmatmul.bf16.gmra.mxu1 %v15301_v24 }
 0x557   : > { %7606 = vmatpush.bf16.msrb.mxu0 %v12372_v18 }
 0x55c   : > { %6682 = vmatmul.bf16.gmra.mxu2 %v15308_v13  ;;  %6701 = vmatmul.bf16.gmra.mxu3 %v15310_v23 }
 0x565   : > { %6715 = vmatmul.bf16.vlgmr.msra.gmra.mxu0 %v15239_v22  ;;  %6734 = vmatmul.bf16.vlgmr.msra.gmra.mxu1 %v15242_v2  ;;  %v14063_v22 = vld [vmem:[#allocation3 + $0x146c] sm:$0xf0]  ;;  %v12339_v2 = vld [vmem:[#allocation3 + $0x1440] sm:$0xf] }
 0x566   : > { %v12356_v37 = vor.u32 %v14063_v22, %v12355_v3  ;;  %v12340_v21 = vor.u32 %v14059_v19, %v12339_v2  ;;  %v12344_v22 = vor.u32 %v14057_v62, %v12341_v12  ;;  %v12451_v2 = vld [vmem:[#allocation3 + $0x1520] sm:$0xf]  ;;  %v14087_v19 = vld [vmem:[#allocation3 + $0x152c] sm:$0xf0] }
 0x567   : > { %v12452_v0 = vor.u32 %v14087_v19, %v12451_v2  ;;  %v14135_v62 = vld [vmem:[#allocation3 + $0x16ac] sm:$0xf0] }
 0x568   : > { %7607 = vmatpush.bf16.msrb.mxu0 %v12356_v37 }
 0x56c   : > { %6753 = vmatmul.bf16.vlgmr.msra.gmra.mxu2 %v15267_v5  ;;  %6772 = vmatmul.bf16.vlgmr.msra.gmra.mxu3 %v15271_v6  ;;  %v14055_v5 = vld [vmem:[#allocation3 + $0x142c] sm:$0xf0] }
 0x56d   : > { %7608 = vmatpush.bf16.msrb.mxu0 %v12340_v21  ;;  %v12324_v6 = vor.u32 %v14055_v5, %v12323_v51  ;;  %v14053_v21 = vld [vmem:[#allocation3 + $0x1424] sm:$0xf] }
 0x571   : > { %7609 = vmatpush.bf16.msrb.mxu0 %v12324_v6 }
 0x575   : > { %6720 = vmatmul.bf16.gmra.mxu0 %v15299_v53  ;;  %6739 = vmatmul.bf16.gmra.mxu1 %v15301_v24  ;;  %v14111_v53 = vld [vmem:[#allocation3 + $0x15ec] sm:$0xf0] }
 0x576   : > { %7610 = vmatpush.bf16.msrb.mxu0 %v12308_v4  ;;  %v12548_v24 = vor.u32 %v14111_v53, %v12547_v48  ;;  %v12325_v4 = vld [vmem:[#allocation3 + $0x1430] sm:$0xf0] }
 0x577   : > { %v12328_v53 = vor.u32 %v14053_v21, %v12325_v4 }
 0x578   : > { %7622 = vmatpush.bf16.msrb.mxu1 %v12548_v24  ;;  %v14083_v24 = vld [vmem:[#allocation3 + $0x150c] sm:$0xf0] }
 0x57a   : > { %7679 = vmatpush.bf16.msra.mxu0 %v12424_v36 }
 0x57c   : > { %6758 = vmatmul.bf16.gmra.mxu2 %v15308_v13  ;;  %6777 = vmatmul.bf16.gmra.mxu3 %v15310_v23  ;;  %v12531_v13 = vld [vmem:[#allocation3 + $0x15c0] sm:$0xf]  ;;  %v14073_v23 = vld [vmem:[#allocation3 + $0x14c4] sm:$0xf] }
 0x57d   : > { %v12532_v14 = vor.u32 %v14107_v50, %v12531_v13  ;;  %v12408_v30 = vor.u32 %v14073_v23, %v12405_v26  ;;  %v12309_v23 = vld [vmem:[#allocation3 + $0x1410] sm:$0xf0] }
 0x57f   : > { %7623 = vmatpush.bf16.msrb.mxu1 %v12532_v14  ;;  %7680 = vmatpush.bf16.msra.mxu0 %v12408_v30  ;;  %v12312_v30 = vor.u32 %v14049_v49, %v12309_v23 }
 0x582   : > { %v6488_v1 = vpop.f32.mrf.mxu0  ;;  %v6507_v46 = vpop.f32.mrf.mxu1 }
 0x583   : > { %v6489_v39 = vadd.f32 %v6488_v1, %v15341_v7  ;;  %7624 = vmatpush.bf16.msrb.mxu1 %v12516_v38  ;;  %7681 = vmatpush.bf16.msra.mxu0 %v12392_v25  ;;  %v12435_v1 = vld [vmem:[#allocation3 + $0x1500] sm:$0xf]  ;;  %v14109_v38 = vld [vmem:[#allocation3 + $0x15e4] sm:$0xf] }
 0x584   : > { %v12436_v50 = vor.u32 %v14083_v24, %v12435_v1  ;;  %v12379_v1 = vld [vmem:[#allocation3 + $0x1488] sm:$0xf]  ;;  %v14068_v24 = vld [vmem:[#allocation3 + $0x1494] sm:$0xf0] }
 0x585   : > { %v6508_v52 = vadd.f32 %v6507_v46, %v6489_v39  ;;  %v12549_v39 = vld [vmem:[#allocation3 + $0x15f0] sm:$0xf0] }
 0x587   : > { %7625 = vmatpush.bf16.msrb.mxu1 %v12500_v42  ;;  %7682 = vmatpush.bf16.msra.mxu0 %v12376_v60  ;;  %v12552_v42 = vor.u32 %v14109_v38, %v12549_v39  ;;  %v12659_v60 = vld [vmem:[#allocation3 + $0x16c0] sm:$0xf]  ;;  %v12485_v38 = vld [vmem:[#allocation3 + $0x1570] sm:$0xf0] }
 0x58a   : > { %v6490_v35 = vpop.f32.mrf.mxu0  ;;  %v6509_v10 = vpop.f32.mrf.mxu1 }
 0x58b   : > { %v6491_v56 = vadd.f32 %v6490_v35, %v15341_v7  ;;  %7626 = vmatpush.bf16.msrb.mxu1 %v12484_v58  ;;  %7683 = vmatpush.bf16.msra.mxu0 %v12360_v61  ;;  %v14143_v35 = vld [vmem:[#allocation3 + $0x16ec] sm:$0xf0] }
 0x58c   : > { %v12676_v25 = vor.u32 %v14143_v35, %v12675_v17 }
 0x58d   : > { %v6510_v15 = vadd.f32 %v6509_v10, %v6491_v56  ;;  %v12411_v56 = vld [vmem:[#allocation3 + $0x14c8] sm:$0xf] }
 0x58e   : > { %7641 = vmatpush.bf16.msrb.mxu2 %v12676_v25 }
 0x58f   : > { %v6526_v47 = vpop.f32.mrf.mxu2  ;;  %v6545_v27 = vpop.f32.mrf.mxu3  ;;  %7627 = vmatpush.bf16.msrb.mxu1 %v12468_v28  ;;  %7684 = vmatpush.bf16.msra.mxu0 %v12344_v22  ;;  %v12395_v22 = vld [vmem:[#allocation3 + $0x14a8] sm:$0xf] }
 0x590   : > { %v6527_v34 = vadd.f32 %v6526_v47, %v6508_v52  ;;  %v14139_v52 = vld [vmem:[#allocation3 + $0x16cc] sm:$0xf0] }
 0x591   : > { %v12660_v54 = vor.u32 %v14139_v52, %v12659_v60  ;;  %v12469_v52 = vld [vmem:[#allocation3 + $0x1550] sm:$0xf0] }
 0x592   : > { %v6493_v45 = vpop.f32.mrf.mxu0  ;;  %v6512_v59 = vpop.f32.mrf.mxu1  ;;  %v6546_v8 = vadd.f32 %v6545_v27, %v6527_v34  ;;  %v15351_v27 = vperm.slane %v15338_v29, 1  ;;  %v14076_v34 = vld [vmem:[#allocation3 + $0x14d4] sm:$0xf0] }
 0x593   : > { %v6494_v5 = vadd.f32 %v6493_v45, %v15341_v7  ;;  %7628 = vmatpush.bf16.msrb.mxu1 %v12452_v0  ;;  %7685 = vmatpush.bf16.msra.mxu0 %v12328_v53 }
 0x594   : > { %v6783_v51 = vmul.f32 0.01, %v6546_v8  ;;  %7642 = vmatpush.bf16.msrb.mxu2 %v12660_v54 }
 0x595   : > { %v6513_v36 = vadd.f32 %v6512_v59, %v6494_v5  ;;  %v12412_v59 = vor.u32 %v14076_v34, %v12411_v56  ;;  %v12627_v5 = vld [vmem:[#allocation3 + $0x1680] sm:$0xf] }
 0x596   : > { %v6799_v46 = vmax.f32 %v6546_v8, %v6783_v51 }
 0x597   : > { %v6528_v18 = vpop.f32.mrf.mxu2  ;;  %v6547_v3 = vpop.f32.mrf.mxu3  ;;  %7629 = vmatpush.bf16.msrb.mxu1 %v12436_v50  ;;  %7686 = vmatpush.bf16.msra.mxu0 %v12312_v30  ;;  %v14093_v30 = vld [vmem:[#allocation3 + $0x1564] sm:$0xf] }
 0x598   : > { %v6529_v37 = vadd.f32 %v6528_v18, %v6510_v15  ;;  %v14101_v15 = vld [vmem:[#allocation3 + $0x15a4] sm:$0xf]  ;;  %v12644_v18 = vor.u32 %v14135_v62, %v12643_v44  ;;  %v12488_v39 = vor.u32 %v14093_v30, %v12485_v38 }
 0x59a   : > { %v6548_v6 = vadd.f32 %v6547_v3, %v6529_v37  ;;  %v6495_v20 = vpop.f32.mrf.mxu0  ;;  %v6514_v48 = vpop.f32.mrf.mxu1  ;;  %v12517_v3 = vld [vmem:[#allocation3 + $0x15b0] sm:$0xf0]  ;;  %v14072_v37 = vld [vmem:[#allocation3 + $0x14b4] sm:$0xf0]  ;;  %7643 = vmatpush.bf16.msrb.mxu2 %v12644_v18 }
 0x59b   : > { %v6496_v57 = vadd.f32 %v6495_v20, %v15341_v7  ;;  %7698 = vmatpush.bf16.msra.mxu1 %v12552_v42  ;;  %v14105_v7 = vld [vmem:[#allocation3 + $0x15c4] sm:$0xf]  ;;  %v12520_v19 = vor.u32 %v14101_v15, %v12517_v3  ;;  %v12396_v21 = vor.u32 %v14072_v37, %v12395_v22  ;;  %v14123_v42 = vld [vmem:[#allocation3 + $0x164c] sm:$0xf0] }
 0x59c   : > { %v6787_v9 = vmul.f32 0.01, %v6548_v6  ;;  %v12536_v55 = vor.u32 %v14105_v7, %v12533_v16  ;;  %v14097_v20 = vld [vmem:[#allocation3 + $0x1584] sm:$0xf]  ;;  %v12347_v7 = vld [vmem:[#allocation3 + $0x1448] sm:$0xf] }
 0x59d   : > { %v6515_v11 = vadd.f32 %v6514_v48, %v6496_v57  ;;  %v12363_v57 = vld [vmem:[#allocation3 + $0x1468] sm:$0xf] }
 0x59e   : > { %v6803_v13 = vmax.f32 %v6548_v6, %v6787_v9  ;;  %v14131_v6 = vld [vmem:[#allocation3 + $0x168c] sm:$0xf0]  ;;  %v12501_v9 = vld [vmem:[#allocation3 + $0x1590] sm:$0xf0] }
 0x59f   : > { %v6531_v14 = vpop.f32.mrf.mxu2  ;;  %v6550_v26 = vpop.f32.mrf.mxu3  ;;  %7699 = vmatpush.bf16.msra.mxu1 %v12536_v55  ;;  %v12628_v53 = vor.u32 %v14131_v6, %v12627_v5  ;;  %v12579_v55 = vld [vmem:[#allocation3 + $0x1620] sm:$0xf] }
 0x5a0   : > { %v15346_v32 = vpack.c.bf16 %v6803_v13, %v6799_v46  ;;  %v6532_v33 = vadd.f32 %v6531_v14, %v6513_v36  ;;  %v12504_v36 = vor.u32 %v14097_v20, %v12501_v9  ;;  %v12380_v13 = vor.u32 %v14068_v24, %v12379_v1  ;;  %v12611_v14 = vld [vmem:[#allocation3 + $0x1660] sm:$0xf] }
 0x5a1   : > { %7644 = vmatpush.bf16.msrb.mxu2 %v12628_v53 }
 0x5a2   : > { %7611 = vmatmul.bf16.vlgmr.msrb.gmra.mxu0 %v15346_v32  ;;  %v6564_v10 = vpop.f32.mrf.mxu0  ;;  %v6583_v41 = vpop.f32.mrf.mxu1  ;;  %v6551_v47 = vadd.f32 %v6550_v26, %v6532_v33  ;;  %v14127_v26 = vld [vmem:[#allocation3 + $0x166c] sm:$0xf0] }
 0x5a3   : > { %7755 = vmatpush.bf16.msrb.mxu0 %v12428_v43  ;;  %v6565_v8 = vadd.f32 %v6564_v10, %v15351_v27  ;;  %7700 = vmatpush.bf16.msra.mxu1 %v12520_v19  ;;  %v12612_v35 = vor.u32 %v14127_v26, %v12611_v14  ;;  %v14064_v10 = vld [vmem:[#allocation3 + $0x1474] sm:$0xf0]  ;;  %v14089_v43 = vld [vmem:[#allocation3 + $0x1544] sm:$0xf]  ;;  %v14115_v19 = vld [vmem:[#allocation3 + $0x160c] sm:$0xf0] }
 0x5a4   : > { %v6791_v61 = vmul.f32 0.01, %v6551_v47  ;;  %v12364_v31 = vor.u32 %v14064_v10, %v12363_v57  ;;  %v12472_v56 = vor.u32 %v14089_v43, %v12469_v52  ;;  %v14137_v43 = vld [vmem:[#allocation3 + $0x16c4] sm:$0xf]  ;;  %v12661_v52 = vld [vmem:[#allocation3 + $0x16d0] sm:$0xf0] }
 0x5a5   : > { %v6584_v4 = vadd.f32 %v6583_v41, %v6565_v8  ;;  %7645 = vmatpush.bf16.msrb.mxu2 %v12612_v35  ;;  %v12595_v41 = vld [vmem:[#allocation3 + $0x1640] sm:$0xf]  ;;  %v12453_v8 = vld [vmem:[#allocation3 + $0x1530] sm:$0xf0]  ;;  %v14112_v35 = vld [vmem:[#allocation3 + $0x15f4] sm:$0xf0] }
 0x5a6   : > { %v6807_v0 = vmax.f32 %v6551_v47, %v6791_v61  ;;  %v12596_v60 = vor.u32 %v14123_v42, %v12595_v41  ;;  %v14085_v61 = vld [vmem:[#allocation3 + $0x1524] sm:$0xf]  ;;  %v12787_v41 = vld [vmem:[#allocation3 + $0x17c0] sm:$0xf]  ;;  %v14171_v42 = vld [vmem:[#allocation3 + $0x17cc] sm:$0xf0] }
 0x5a7   : > { %v6533_v45 = vpop.f32.mrf.mxu2  ;;  %v6552_v58 = vpop.f32.mrf.mxu3  ;;  %7756 = vmatpush.bf16.msrb.mxu0 %v12412_v59  ;;  %7701 = vmatpush.bf16.msra.mxu1 %v12504_v36  ;;  %v14119_v59 = vld [vmem:[#allocation3 + $0x162c] sm:$0xf0]  ;;  %v12456_v3 = vor.u32 %v14085_v61, %v12453_v8  ;;  %v12803_v36 = vld [vmem:[#allocation3 + $0x17e0] sm:$0xf] }
 0x5a8   : > { %v6534_v40 = vadd.f32 %v6533_v45, %v6515_v11  ;;  %v14060_v11 = vld [vmem:[#allocation3 + $0x1454] sm:$0xf0]  ;;  %v12580_v15 = vor.u32 %v14119_v59, %v12579_v55 }
 0x5a9   : > { %v12348_v34 = vor.u32 %v14060_v11, %v12347_v7  ;;  %7646 = vmatpush.bf16.msrb.mxu2 %v12596_v60  ;;  %v12788_v60 = vor.u32 %v14171_v42, %v12787_v41  ;;  %v12539_v7 = vld [vmem:[#allocation3 + $0x15c8] sm:$0xf]  ;;  %v14108_v11 = vld [vmem:[#allocation3 + $0x15d4] sm:$0xf0]  ;;  %v12613_v41 = vld [vmem:[#allocation3 + $0x1670] sm:$0xf0] }
 0x5aa   : > { %v6553_v28 = vadd.f32 %v6552_v58, %v6534_v40  ;;  %v6566_v12 = vpop.f32.mrf.mxu0  ;;  %v6585_v2 = vpop.f32.mrf.mxu1  ;;  %v12491_v42 = vld [vmem:[#allocation3 + $0x1568] sm:$0xf] }
 0x5ab   : > { %7757 = vmatpush.bf16.msrb.mxu0 %v12396_v21  ;;  %v6567_v33 = vadd.f32 %v6566_v12, %v15351_v27  ;;  %7702 = vmatpush.bf16.msra.mxu1 %v12488_v39  ;;  %v14056_v12 = vld [vmem:[#allocation3 + $0x1434] sm:$0xf0]  ;;  %v14081_v21 = vld [vmem:[#allocation3 + $0x1504] sm:$0xf]  ;;  %v12429_v39 = vld [vmem:[#allocation3 + $0x14f8] sm:$0xf0] }
 0x5ac   : > { %v6795_v51 = vmul.f32 0.01, %v6553_v28 }
 0x5ad   : > { %v6586_v47 = vadd.f32 %v6585_v2, %v6567_v33  ;;  %7647 = vmatpush.bf16.msrb.mxu2 %v12580_v15  ;;  %v12563_v2 = vld [vmem:[#allocation3 + $0x1600] sm:$0xf]  ;;  %v12677_v33 = vld [vmem:[#allocation3 + $0x16f0] sm:$0xf0] }
 0x5ae   : > { %v6811_v48 = vmax.f32 %v6553_v28, %v6795_v51  ;;  %v12331_v28 = vld [vmem:[#allocation3 + $0x1428] sm:$0xf]  ;;  %v12564_v20 = vor.u32 %v14115_v19, %v12563_v2 }
 0x5af   : > { %v6602_v49 = vpop.f32.mrf.mxu2  ;;  %v6621_v46 = vpop.f32.mrf.mxu3  ;;  %7758 = vmatpush.bf16.msrb.mxu0 %v12380_v13  ;;  %7703 = vmatpush.bf16.msra.mxu1 %v12472_v56  ;;  %v12332_v22 = vor.u32 %v14056_v12, %v12331_v28  ;;  %v14175_v13 = vld [vmem:[#allocation3 + $0x17ec] sm:$0xf0]  ;;  %v12664_v56 = vor.u32 %v14137_v43, %v12661_v52  ;;  %v14096_v43 = vld [vmem:[#allocation3 + $0x1574] sm:$0xf0] }
 0x5b0   : > { %v15354_v50 = vpack.c.bf16 %v6811_v48, %v6807_v0  ;;  %v6603_v23 = vadd.f32 %v6602_v49, %v6584_v4  ;;  %v12437_v0 = vld [vmem:[#allocation3 + $0x1510] sm:$0xf0]  ;;  %v12315_v4 = vld [vmem:[#allocation3 + $0x1408] sm:$0xf]  ;;  %v14052_v48 = vld [vmem:[#allocation3 + $0x1414] sm:$0xf0]  ;;  %v12804_v30 = vor.u32 %v14175_v13, %v12803_v36  ;;  %v12492_v52 = vor.u32 %v14096_v43, %v12491_v42 }
 0x5b1   : > { %v12440_v1 = vor.u32 %v14081_v21, %v12437_v0  ;;  %v12316_v24 = vor.u32 %v14052_v48, %v12315_v4  ;;  %7648 = vmatpush.bf16.msrb.mxu2 %v12564_v20  ;;  %v14070_v21 = vld [vmem:[#allocation3 + $0x14ac] sm:$0xf]  ;;  %v12755_v20 = vld [vmem:[#allocation3 + $0x1780] sm:$0xf]  ;;  %v14163_v0 = vld [vmem:[#allocation3 + $0x178c] sm:$0xf0] }
 0x5b2   : > { %7616 = vmatmul.bf16.gmra.mxu0 %v15354_v50  ;;  %v6569_v17 = vpop.f32.mrf.mxu0  ;;  %v6588_v25 = vpop.f32.mrf.mxu1  ;;  %v6622_v63 = vadd.f32 %v6621_v46, %v6603_v23  ;;  %v14141_v23 = vld [vmem:[#allocation3 + $0x16e4] sm:$0xf]  ;;  %7660 = vmatpush.bf16.msrb.mxu3 %v12804_v30  ;;  %v14100_v36 = vld [vmem:[#allocation3 + $0x1594] sm:$0xf0]  ;;  %v14066_v30 = vld [vmem:[#allocation3 + $0x148c] sm:$0xf] }
 0x5b3   : > { %7759 = vmatpush.bf16.msrb.mxu0 %v12364_v31  ;;  %v6570_v40 = vadd.f32 %v6569_v17, %v15351_v27  ;;  %7704 = vmatpush.bf16.msra.mxu1 %v12456_v3  ;;  %v12555_v17 = vld [vmem:[#allocation3 + $0x15e8] sm:$0xf]  ;;  %v12680_v57 = vor.u32 %v14141_v23, %v12677_v33  ;;  %v14129_v4 = vld [vmem:[#allocation3 + $0x1684] sm:$0xf]  ;;  %v12381_v33 = vld [vmem:[#allocation3 + $0x1498] sm:$0xf0] }
 0x5b4   : > { %v6784_v45 = vmul.f32 0.01, %v6622_v63  ;;  %v12556_v10 = vor.u32 %v14112_v35, %v12555_v17  ;;  %v12523_v3 = vld [vmem:[#allocation3 + $0x15a8] sm:$0xf]  ;;  %v12317_v42 = vld [vmem:[#allocation3 + $0x1418] sm:$0xf0] }
 0x5b5   : > { %v6589_v5 = vadd.f32 %v6588_v25, %v6570_v40  ;;  %v14078_v25 = vld [vmem:[#allocation3 + $0x14ec] sm:$0xf]  ;;  %7717 = vmatpush.bf16.msra.mxu2 %v12680_v57  ;;  %v12771_v40 = vld [vmem:[#allocation3 + $0x17a0] sm:$0xf]  ;;  %v12384_v57 = vor.u32 %v14066_v30, %v12381_v33 }
 0x5b6   : > { %v6800_v51 = vmax.f32 %v6622_v63, %v6784_v45  ;;  %v15367_v63 = vperm.slane %v15338_v29, 2  ;;  %v14074_v45 = vld [vmem:[#allocation3 + $0x14cc] sm:$0xf]  ;;  %7661 = vmatpush.bf16.msrb.mxu3 %v12788_v60 }
 0x5b7   : > { %v6604_v54 = vpop.f32.mrf.mxu2  ;;  %v6623_v16 = vpop.f32.mrf.mxu3  ;;  %7760 = vmatpush.bf16.msrb.mxu0 %v12348_v34  ;;  %7705 = vmatpush.bf16.msra.mxu1 %v12440_v1  ;;  %v12540_v34 = vor.u32 %v14108_v11, %v12539_v7  ;;  %v12756_v1 = vor.u32 %v14163_v0, %v12755_v20  ;;  %v14062_v7 = vld [vmem:[#allocation3 + $0x146c] sm:$0xf]  ;;  %v12365_v11 = vld [vmem:[#allocation3 + $0x1478] sm:$0xf0]  ;;  %v12581_v20 = vld [vmem:[#allocation3 + $0x1630] sm:$0xf0] }
 0x5b8   : > { %v6605_v58 = vadd.f32 %v6604_v54, %v6586_v47  ;;  %v12459_v0 = vld [vmem:[#allocation3 + $0x1528] sm:$0xf] }
 0x5b9   : > { %7718 = vmatpush.bf16.msra.mxu2 %v12664_v56  ;;  %v12723_v56 = vld [vmem:[#allocation3 + $0x1740] sm:$0xf] }
 0x5ba   : > { %v6624_v44 = vadd.f32 %v6623_v16, %v6605_v58  ;;  %v6571_v62 = vpop.f32.mrf.mxu0  ;;  %v6590_v18 = vpop.f32.mrf.mxu1  ;;  %v12413_v58 = vld [vmem:[#allocation3 + $0x14d8] sm:$0xf0] }
 0x5bb   : > { %7761 = vmatpush.bf16.msrb.mxu0 %v12332_v22  ;;  %v6572_v14 = vadd.f32 %v6571_v62, %v15351_v27  ;;  %v12432_v27 = vor.u32 %v14078_v25, %v12429_v39  ;;  %v12416_v61 = vor.u32 %v14074_v45, %v12413_v58  ;;  %v14133_v62 = vld [vmem:[#allocation3 + $0x16a4] sm:$0xf]  ;;  %v14104_v22 = vld [vmem:[#allocation3 + $0x15b4] sm:$0xf0] }
 0x5bc   : > { %v6788_v37 = vmul.f32 0.01, %v6624_v44  ;;  %v12524_v19 = vor.u32 %v14104_v22, %v12523_v3  ;;  %v14125_v25 = vld [vmem:[#allocation3 + $0x1664] sm:$0xf] }
 0x5bd   : > { %v6591_v47 = vadd.f32 %v6590_v18, %v6572_v14  ;;  %v12645_v18 = vld [vmem:[#allocation3 + $0x16b0] sm:$0xf0]  ;;  %v12616_v60 = vor.u32 %v14125_v25, %v12613_v41  ;;  %v14121_v45 = vld [vmem:[#allocation3 + $0x1644] sm:$0xf]  ;;  %v14050_v41 = vld [vmem:[#allocation3 + $0x140c] sm:$0xf] }
 0x5be   : > { %v6804_v6 = vmax.f32 %v6624_v44, %v6788_v37  ;;  %v14167_v44 = vld [vmem:[#allocation3 + $0x17ac] sm:$0xf0]  ;;  %v12648_v2 = vor.u32 %v14133_v62, %v12645_v18 }
 0x5bf   : > { %v6607_v53 = vpop.f32.mrf.mxu2  ;;  %v6626_v9 = vpop.f32.mrf.mxu3  ;;  %7762 = vmatpush.bf16.msrb.mxu0 %v12316_v24  ;;  %v12772_v12 = vor.u32 %v14167_v44, %v12771_v40  ;;  %v12629_v24 = vld [vmem:[#allocation3 + $0x1690] sm:$0xf0]  ;;  %v14092_v40 = vld [vmem:[#allocation3 + $0x1554] sm:$0xf0] }
 0x5c0   : > { %v15359_v49 = vpack.c.bf16 %v6804_v6, %v6800_v51  ;;  %v6608_v46 = vadd.f32 %v6607_v53, %v6589_v5  ;;  %v12397_v51 = vld [vmem:[#allocation3 + $0x14b8] sm:$0xf0]  ;;  %7719 = vmatpush.bf16.msra.mxu2 %v12648_v2  ;;  %v12632_v14 = vor.u32 %v14129_v4, %v12629_v24  ;;  %v12707_v2 = vld [vmem:[#allocation3 + $0x1720] sm:$0xf]  ;;  %v14088_v4 = vld [vmem:[#allocation3 + $0x1534] sm:$0xf0] }
 0x5c1   : > { %7662 = vmatpush.bf16.msrb.mxu3 %v12772_v12  ;;  %v12400_v6 = vor.u32 %v14070_v21, %v12397_v51  ;;  %v12349_v12 = vld [vmem:[#allocation3 + $0x1458] sm:$0xf0] }
 0x5c2   : > { %7630 = vmatmul.bf16.vlgmr.msrb.gmra.mxu1 %v15359_v49  ;;  %7687 = vmatmul.bf16.vlgmr.msra.gmra.mxu0 %v15346_v32  ;;  %v6640_v26 = vpop.f32.mrf.mxu0  ;;  %v6659_v38 = vpop.f32.mrf.mxu1  ;;  %v15364_v31 = vadd.f32 %v6626_v9, %v6608_v46  ;;  %v12507_v46 = vld [vmem:[#allocation3 + $0x1588] sm:$0xf] }
 0x5c3   : > { %7774 = vmatpush.bf16.msrb.mxu1 %v12556_v10  ;;  %7831 = vmatpush.bf16.msra.mxu0 %v12432_v27  ;;  %v6641_v15 = vadd.f32 %v6640_v26, %v15367_v63  ;;  %v12508_v26 = vor.u32 %v14100_v36, %v12507_v46  ;;  %v14159_v10 = vld [vmem:[#allocation3 + $0x176c] sm:$0xf0] }
 0x5c4   : > { %v6792_v55 = vmul.f32 0.01, %v15364_v31  ;;  %7720 = vmatpush.bf16.msra.mxu2 %v12632_v14  ;;  %v14113_v14 = vld [vmem:[#allocation3 + $0x1604] sm:$0xf] }
 0x5c5   : > { %v6660_v53 = vadd.f32 %v6659_v38, %v6641_v15  ;;  %7663 = vmatpush.bf16.msrb.mxu3 %v12756_v1  ;;  %v12739_v38 = vld [vmem:[#allocation3 + $0x1760] sm:$0xf]  ;;  %v12333_v1 = vld [vmem:[#allocation3 + $0x1438] sm:$0xf0] }
 0x5c6   : > { %v6808_v48 = vmax.f32 %v15364_v31, %v6792_v55  ;;  %v12740_v27 = vor.u32 %v14159_v10, %v12739_v38  ;;  %v12443_v38 = vld [vmem:[#allocation3 + $0x1508] sm:$0xf]  ;;  %v14084_v10 = vld [vmem:[#allocation3 + $0x1514] sm:$0xf0] }
 0x5c7   : > { %v6609_v54 = vpop.f32.mrf.mxu2  ;;  %v6628_v16 = vpop.f32.mrf.mxu3  ;;  %7775 = vmatpush.bf16.msrb.mxu1 %v12540_v34  ;;  %7832 = vmatpush.bf16.msra.mxu0 %v12416_v61  ;;  %v14155_v34 = vld [vmem:[#allocation3 + $0x174c] sm:$0xf0]  ;;  %v12475_v61 = vld [vmem:[#allocation3 + $0x1548] sm:$0xf] }
 0x5c8   : > { %v6610_v59 = vadd.f32 %v6609_v54, %v6591_v47  ;;  %7721 = vmatpush.bf16.msra.mxu2 %v12616_v60  ;;  %v12724_v55 = vor.u32 %v14155_v34, %v12723_v56  ;;  %v14144_v34 = vld [vmem:[#allocation3 + $0x16f4] sm:$0xf0] }
 0x5c9   : > { %7664 = vmatpush.bf16.msrb.mxu3 %v12740_v27  ;;  %v12444_v27 = vor.u32 %v14084_v10, %v12443_v38  ;;  %v12509_v38 = vld [vmem:[#allocation3 + $0x1598] sm:$0xf0] }
 0x5ca   : > { %v6629_v8 = vadd.f32 %v6628_v16, %v6610_v59  ;;  %v6642_v28 = vpop.f32.mrf.mxu0  ;;  %v6661_v37 = vpop.f32.mrf.mxu1  ;;  %v12368_v16 = vor.u32 %v14062_v7, %v12365_v11  ;;  %v12597_v59 = vld [vmem:[#allocation3 + $0x1650] sm:$0xf0]  ;;  %v12683_v11 = vld [vmem:[#allocation3 + $0x16e8] sm:$0xf] }
 0x5cb   : > { %7776 = vmatpush.bf16.msrb.mxu1 %v12524_v19  ;;  %7833 = vmatpush.bf16.msra.mxu0 %v12400_v6  ;;  %v6643_v39 = vadd.f32 %v6642_v28, %v15367_v63  ;;  %v12600_v15 = vor.u32 %v14121_v45, %v12597_v59  ;;  %v14058_v28 = vld [vmem:[#allocation3 + $0x144c] sm:$0xf]  ;;  %v14117_v19 = vld [vmem:[#allocation3 + $0x1624] sm:$0xf]  ;;  %v12805_v7 = vld [vmem:[#allocation3 + $0x17f0] sm:$0xf0] }
 0x5cc   : > { %v6796_v5 = vmul.f32 0.01, %v6629_v8  ;;  %v12352_v22 = vor.u32 %v14058_v28, %v12349_v12  ;;  %v14110_v45 = vld [vmem:[#allocation3 + $0x15ec] sm:$0xf]  ;;  %v14140_v28 = vld [vmem:[#allocation3 + $0x16d4] sm:$0xf0] }
 0x5cd   : > { %v6662_v58 = vadd.f32 %v6661_v37, %v6643_v39  ;;  %7665 = vmatpush.bf16.msrb.mxu3 %v12724_v55  ;;  %7722 = vmatpush.bf16.msra.mxu2 %v12600_v15  ;;  %v14151_v37 = vld [vmem:[#allocation3 + $0x172c] sm:$0xf0]  ;;  %v12684_v55 = vor.u32 %v14144_v34, %v12683_v11  ;;  %v14106_v12 = vld [vmem:[#allocation3 + $0x15cc] sm:$0xf]  ;;  %v12493_v34 = vld [vmem:[#allocation3 + $0x1578] sm:$0xf0] }
 0x5ce   : > { %v6812_v9 = vmax.f32 %v6629_v8, %v6796_v5  ;;  %v12476_v8 = vor.u32 %v14092_v40, %v12475_v61  ;;  %v12708_v6 = vor.u32 %v14151_v37, %v12707_v2  ;;  %v14169_v40 = vld [vmem:[#allocation3 + $0x17c4] sm:$0xf] }
 0x5cf   : > { %v6678_v13 = vpop.f32.mrf.mxu2  ;;  %v6697_v23 = vpop.f32.mrf.mxu3  ;;  %7777 = vmatpush.bf16.msrb.mxu1 %v12508_v26  ;;  %7834 = vmatpush.bf16.msra.mxu0 %v12384_v57  ;;  %v12565_v57 = vld [vmem:[#allocation3 + $0x1610] sm:$0xf0] }
 0x5d0   : > { %v15372_v17 = vpack.c.bf16 %v6812_v9, %v6808_v48  ;;  %v6679_v35 = vadd.f32 %v6678_v13, %v6660_v53  ;;  %v12584_v48 = vor.u32 %v14117_v19, %v12581_v20  ;;  %v12460_v53 = vor.u32 %v14088_v4, %v12459_v0  ;;  %v14054_v9 = vld [vmem:[#allocation3 + $0x142c] sm:$0xf]  ;;  %v12691_v13 = vld [vmem:[#allocation3 + $0x1700] sm:$0xf]  ;;  %v12651_v20 = vld [vmem:[#allocation3 + $0x16a8] sm:$0xf] }
 0x5d1   : > { %7666 = vmatpush.bf16.msrb.mxu3 %v12708_v6  ;;  %v12336_v36 = vor.u32 %v14054_v9, %v12333_v1  ;;  %v12773_v6 = vld [vmem:[#allocation3 + $0x17b0] sm:$0xf0]  ;;  %v14102_v9 = vld [vmem:[#allocation3 + $0x15ac] sm:$0xf]  ;;  %v12525_v1 = vld [vmem:[#allocation3 + $0x15b8] sm:$0xf0] }
 0x5d2   : > { %7635 = vmatmul.bf16.gmra.mxu1 %v15372_v17  ;;  %7692 = vmatmul.bf16.gmra.mxu0 %v15354_v50  ;;  %v6645_v31 = vpop.f32.mrf.mxu0  ;;  %v6664_v47 = vpop.f32.mrf.mxu1  ;;  %v15377_v54 = vadd.f32 %v6697_v23, %v6679_v35  ;;  %v14147_v23 = vld [vmem:[#allocation3 + $0x170c] sm:$0xf0] }
 0x5d3   : > { %7778 = vmatpush.bf16.msrb.mxu1 %v12492_v52  ;;  %7835 = vmatpush.bf16.msra.mxu0 %v12368_v16  ;;  %v6646_v21 = vadd.f32 %v6645_v31, %v15367_v63  ;;  %v12692_v35 = vor.u32 %v14147_v23, %v12691_v13  ;;  %v12568_v31 = vor.u32 %v14113_v14, %v12565_v57  ;;  %v12757_v23 = vld [vmem:[#allocation3 + $0x1790] sm:$0xf0]  ;;  %v12635_v14 = vld [vmem:[#allocation3 + $0x1688] sm:$0xf]  ;;  %v14098_v57 = vld [vmem:[#allocation3 + $0x158c] sm:$0xf] }
 0x5d4   : > { %v6785_v18 = vmul.f32 0.01, %v15377_v54  ;;  %7723 = vmatpush.bf16.msra.mxu2 %v12584_v48  ;;  %v12320_v52 = vor.u32 %v14050_v41, %v12317_v42 }
 0x5d5   : > { %v6665_v30 = vadd.f32 %v6664_v47, %v6646_v21  ;;  %7667 = vmatpush.bf16.msrb.mxu3 %v12692_v35  ;;  %v14173_v47 = vld [vmem:[#allocation3 + $0x17e4] sm:$0xf]  ;;  %v15389_v21 = vperm.slane %v15338_v29, 3  ;;  %v14132_v35 = vld [vmem:[#allocation3 + $0x1694] sm:$0xf0] }
 0x5d6   : > { %v6801_v26 = vmax.f32 %v15377_v54, %v6785_v18  ;;  %v12808_v56 = vor.u32 %v14173_v47, %v12805_v7  ;;  %v12541_v18 = vld [vmem:[#allocation3 + $0x15d8] sm:$0xf0]  ;;  %v14161_v29 = vld [vmem:[#allocation3 + $0x1784] sm:$0xf]  ;;  %v12619_v47 = vld [vmem:[#allocation3 + $0x1668] sm:$0xf] }
 0x5d7   : > { %v6680_v44 = vpop.f32.mrf.mxu2  ;;  %v6699_v62 = vpop.f32.mrf.mxu3  ;;  %7779 = vmatpush.bf16.msrb.mxu1 %v12476_v8  ;;  %7836 = vmatpush.bf16.msra.mxu0 %v12352_v22  ;;  %v12544_v37 = vor.u32 %v14106_v12, %v12541_v18  ;;  %v12709_v12 = vld [vmem:[#allocation3 + $0x1730] sm:$0xf0] }
 0x5d8   : > { %v6681_v3 = vadd.f32 %v6680_v44, %v6662_v58  ;;  %7724 = vmatpush.bf16.msra.mxu2 %v12568_v31  ;;  %v12557_v58 = vld [vmem:[#allocation3 + $0x15f8] sm:$0xf0]  ;;  %v12667_v44 = vld [vmem:[#allocation3 + $0x16c8] sm:$0xf]  ;;  %v12512_v31 = vor.u32 %v14098_v57, %v12509_v38 }
 0x5d9   : > { %v12560_v59 = vor.u32 %v14110_v45, %v12557_v58  ;;  %7736 = vmatpush.bf16.msra.mxu3 %v12808_v56  ;;  %v12668_v2 = vor.u32 %v14140_v28, %v12667_v44  ;;  %v14094_v56 = vld [vmem:[#allocation3 + $0x156c] sm:$0xf]  ;;  %v14124_v44 = vld [vmem:[#allocation3 + $0x1654] sm:$0xf0]  ;;  %v14149_v28 = vld [vmem:[#allocation3 + $0x1724] sm:$0xf] }
 0x5da   : > { %v6700_v51 = vadd.f32 %v6699_v62, %v6681_v3  ;;  %v6647_v5 = vpop.f32.mrf.mxu0  ;;  %v6666_v46 = vpop.f32.mrf.mxu1  ;;  %v12496_v58 = vor.u32 %v14094_v56, %v12493_v34  ;;  %v12445_v38 = vld [vmem:[#allocation3 + $0x1518] sm:$0xf0]  ;;  %v12795_v56 = vld [vmem:[#allocation3 + $0x17c8] sm:$0xf]  ;;  %v14172_v34 = vld [vmem:[#allocation3 + $0x17d4] sm:$0xf0] }
 0x5db   : > { %7780 = vmatpush.bf16.msrb.mxu1 %v12460_v53  ;;  %7837 = vmatpush.bf16.msra.mxu0 %v12336_v36  ;;  %v6648_v54 = vadd.f32 %v6647_v5, %v15367_v63  ;;  %v12789_v63 = vld [vmem:[#allocation3 + $0x17d0] sm:$0xf0]  ;;  %v14165_v5 = vld [vmem:[#allocation3 + $0x17a4] sm:$0xf]  ;;  %v14136_v53 = vld [vmem:[#allocation3 + $0x16b4] sm:$0xf0] }
 0x5dc   : > { %v6789_v24 = vmul.f32 0.01, %v6700_v51  ;;  %v12792_v8 = vor.u32 %v14169_v40, %v12789_v63  ;;  %v12776_v48 = vor.u32 %v14165_v5, %v12773_v6  ;;  %v12461_v6 = vld [vmem:[#allocation3 + $0x1538] sm:$0xf0] }
 0x5dd   : > { %v6667_v62 = vadd.f32 %v6666_v46, %v6648_v54  ;;  %v12528_v46 = vor.u32 %v14102_v9, %v12525_v1  ;;  %v12693_v9 = vld [vmem:[#allocation3 + $0x1710] sm:$0xf0] }
 0x5de   : > { %v6805_v33 = vmax.f32 %v6700_v51, %v6789_v24  ;;  %7737 = vmatpush.bf16.msra.mxu3 %v12792_v8  ;;  %v12652_v24 = vor.u32 %v14136_v53, %v12651_v20  ;;  %v12477_v8 = vld [vmem:[#allocation3 + $0x1558] sm:$0xf0]  ;;  %v14145_v53 = vld [vmem:[#allocation3 + $0x1704] sm:$0xf] }
 0x5df   : > { %v6683_v25 = vpop.f32.mrf.mxu2  ;;  %v6702_v39 = vpop.f32.mrf.mxu3  ;;  %7781 = vmatpush.bf16.msrb.mxu1 %v12444_v27  ;;  %7838 = vmatpush.bf16.msra.mxu0 %v12320_v52  ;;  %v12741_v52 = vld [vmem:[#allocation3 + $0x1770] sm:$0xf0] }
 0x5e0   : > { %v15382_v43 = vpack.c.bf16 %v6805_v33, %v6801_v26  ;;  %v6684_v60 = vadd.f32 %v6683_v25, %v6665_v30  ;;  %v12760_v33 = vor.u32 %v14161_v29, %v12757_v23  ;;  %v12696_v29 = vor.u32 %v14145_v53, %v12693_v9  ;;  %v12571_v23 = vld [vmem:[#allocation3 + $0x1608] sm:$0xf]  ;;  %v14160_v9 = vld [vmem:[#allocation3 + $0x1774] sm:$0xf0] }
 0x5e1   : > { %v12747_v53 = vld [vmem:[#allocation3 + $0x1768] sm:$0xf] }
 0x5e2   : > { %7649 = vmatmul.bf16.vlgmr.msrb.gmra.mxu2 %v15382_v43  ;;  %7706 = vmatmul.bf16.vlgmr.msra.gmra.mxu1 %v15359_v49  ;;  %v6716_v16 = vpop.f32.mrf.mxu0  ;;  %v6703_v61 = vadd.f32 %v6702_v39, %v6684_v60  ;;  %v6735_v15 = vpop.f32.mrf.mxu1  ;;  %v12636_v39 = vor.u32 %v14132_v35, %v12635_v14  ;;  %v14157_v60 = vld [vmem:[#allocation3 + $0x1764] sm:$0xf]  ;;  %v14116_v14 = vld [vmem:[#allocation3 + $0x1614] sm:$0xf0] }
 0x5e3   : > { %7763 = vmatmul.bf16.vlgmr.msrb.gmra.mxu0 %v15346_v32  ;;  %7793 = vmatpush.bf16.msrb.mxu2 %v12684_v55  ;;  %v6717_v36 = vadd.f32 %v6716_v16, %v15389_v21  ;;  %v12744_v54 = vor.u32 %v14157_v60, %v12741_v52  ;;  %v14128_v16 = vld [vmem:[#allocation3 + $0x1674] sm:$0xf0]  ;;  %v14153_v55 = vld [vmem:[#allocation3 + $0x1744] sm:$0xf]  ;;  %v12572_v57 = vor.u32 %v14116_v14, %v12571_v23  ;;  %v14142_v52 = vld [vmem:[#allocation3 + $0x16ec] sm:$0xf] }
 0x5e4   : > { %7850 = vmatpush.bf16.msra.mxu1 %v12560_v59  ;;  %v6793_v19 = vmul.f32 0.01, %v6703_v61  ;;  %7738 = vmatpush.bf16.msra.mxu3 %v12776_v48  ;;  %v12620_v45 = vor.u32 %v14128_v16, %v12619_v47  ;;  %v12725_v59 = vld [vmem:[#allocation3 + $0x1750] sm:$0xf0]  ;;  %v14176_v60 = vld [vmem:[#allocation3 + $0x17f4] sm:$0xf0] }
 0x5e5   : > { %v6736_v27 = vadd.f32 %v6735_v15, %v6717_v36  ;;  %v12728_v63 = vor.u32 %v14153_v55, %v12725_v59  ;;  %v14138_v55 = vld [vmem:[#allocation3 + $0x16cc] sm:$0xf] }
 0x5e6   : > { %v6809_v26 = vmax.f32 %v6703_v61, %v6793_v19  ;;  %v12603_v61 = vld [vmem:[#allocation3 + $0x1648] sm:$0xf]  ;;  %v14086_v19 = vld [vmem:[#allocation3 + $0x152c] sm:$0xf] }
 0x5e7   : > { %v6685_v3 = vpop.f32.mrf.mxu2  ;;  %v6704_v22 = vpop.f32.mrf.mxu3  ;;  %7794 = vmatpush.bf16.msrb.mxu2 %v12668_v2  ;;  %v12604_v15 = vor.u32 %v14124_v44, %v12603_v61  ;;  %v12587_v2 = vld [vmem:[#allocation3 + $0x1628] sm:$0xf]  ;;  %v12464_v48 = vor.u32 %v14086_v19, %v12461_v6  ;;  %v12637_v6 = vld [vmem:[#allocation3 + $0x1698] sm:$0xf0]  ;;  %v14122_v14 = vld [vmem:[#allocation3 + $0x164c] sm:$0xf] }
 0x5e8   : > { %v6686_v51 = vadd.f32 %v6685_v3, %v6667_v62  ;;  %7851 = vmatpush.bf16.msra.mxu1 %v12544_v37  ;;  %7739 = vmatpush.bf16.msra.mxu3 %v12760_v33  ;;  %v14090_v62 = vld [vmem:[#allocation3 + $0x154c] sm:$0xf]  ;;  %v14120_v37 = vld [vmem:[#allocation3 + $0x1634] sm:$0xf0] }
 0x5ea   : > { %v6705_v0 = vadd.f32 %v6704_v22, %v6686_v51  ;;  %v6718_v4 = vpop.f32.mrf.mxu0  ;;  %v6737_v42 = vpop.f32.mrf.mxu1  ;;  %v12480_v22 = vor.u32 %v14090_v62, %v12477_v8  ;;  %v12779_v62 = vld [vmem:[#allocation3 + $0x17a8] sm:$0xf]  ;;  %v14134_v8 = vld [vmem:[#allocation3 + $0x16ac] sm:$0xf] }
 0x5eb   : > { %7795 = vmatpush.bf16.msrb.mxu2 %v12652_v24  ;;  %v6719_v7 = vadd.f32 %v6718_v4, %v15389_v21  ;;  %v12588_v4 = vor.u32 %v14120_v37, %v12587_v2 }
 0x5ec   : > { %v6797_v13 = vmul.f32 0.01, %v6705_v0  ;;  %7852 = vmatpush.bf16.msra.mxu1 %v12528_v46  ;;  %7740 = vmatpush.bf16.msra.mxu3 %v12744_v54  ;;  %v12685_v54 = vld [vmem:[#allocation3 + $0x16f8] sm:$0xf0] }
 0x5ed   : > { %v6738_v18 = vadd.f32 %v6737_v42, %v6719_v7  ;;  %v12811_v42 = vld [vmem:[#allocation3 + $0x17e8] sm:$0xf]  ;;  %v12688_v16 = vor.u32 %v14142_v52, %v12685_v54  ;;  %v14170_v54 = vld [vmem:[#allocation3 + $0x17cc] sm:$0xf] }
 0x5ee   : > { %v6813_v30 = vmax.f32 %v6705_v0, %v6797_v13  ;;  %v12712_v0 = vor.u32 %v14149_v28, %v12709_v12  ;;  %v12653_v12 = vld [vmem:[#allocation3 + $0x16b8] sm:$0xf0] }
 0x5ef   : > { %v6754_v10 = vpop.f32.mrf.mxu2  ;;  %v6773_v25 = vpop.f32.mrf.mxu3  ;;  %7796 = vmatpush.bf16.msrb.mxu2 %v12636_v39  ;;  %v12656_v37 = vor.u32 %v14134_v8, %v12653_v12  ;;  %v12717_v8 = vld [vmem:[#allocation3 + $0x1738] sm:$0xf0] }
 0x5f0   : > { %v15392_v41 = vpack.c.bf16 %v6813_v30, %v6809_v26  ;;  %7853 = vmatpush.bf16.msra.mxu1 %v12512_v31  ;;  %v6755_v11 = vadd.f32 %v6754_v10, %v6736_v27  ;;  %7741 = vmatpush.bf16.msra.mxu3 %v12728_v63  ;;  %v14082_v26 = vld [vmem:[#allocation3 + $0x150c] sm:$0xf]  ;;  %v12701_v12 = vld [vmem:[#allocation3 + $0x1718] sm:$0xf0] }
 0x5f1   : > { %v12448_v39 = vor.u32 %v14082_v26, %v12445_v38  ;;  %v12605_v26 = vld [vmem:[#allocation3 + $0x1658] sm:$0xf0] }
 0x5f2   : > { %7654 = vmatmul.bf16.gmra.mxu2 %v15392_v41  ;;  %7711 = vmatmul.bf16.gmra.mxu1 %v15372_v17  ;;  %v6721_v40 = vpop.f32.mrf.mxu0  ;;  %v6774_v3 = vadd.f32 %v6773_v25, %v6755_v11  ;;  %v6740_v46 = vpop.f32.mrf.mxu1  ;;  %v12812_v11 = vor.u32 %v14176_v60, %v12811_v42  ;;  %v14114_v42 = vld [vmem:[#allocation3 + $0x160c] sm:$0xf]  ;;  %v12573_v60 = vld [vmem:[#allocation3 + $0x1618] sm:$0xf0] }
 0x5f3   : > { %7768 = vmatmul.bf16.gmra.mxu0 %v15354_v50  ;;  %7797 = vmatpush.bf16.msrb.mxu2 %v12620_v45  ;;  %v6722_v36 = vadd.f32 %v6721_v40, %v15389_v21  ;;  %v12796_v45 = vor.u32 %v14172_v34, %v12795_v56  ;;  %v12576_v52 = vor.u32 %v14114_v42, %v12573_v60  ;;  %v14166_v34 = vld [vmem:[#allocation3 + $0x17ac] sm:$0xf]  ;;  %v12933_v42 = vld [vmem:[#allocation3 + $0x18f0] sm:$0xf0] }
 0x5f4   : > { %7854 = vmatpush.bf16.msra.mxu1 %v12496_v58  ;;  %v6786_v1 = vmul.f32 0.01, %v6774_v3  ;;  %7742 = vmatpush.bf16.msra.mxu3 %v12712_v0 }
 0x5f5   : > { %v6741_v31 = vadd.f32 %v6740_v46, %v6722_v36  ;;  %v12621_v46 = vld [vmem:[#allocation3 + $0x1678] sm:$0xf0] }
 0x5f6   : > { %v6802_v30 = vmax.f32 %v6774_v3, %v6786_v1  ;;  %v14164_v3 = vld [vmem:[#allocation3 + $0x1794] sm:$0xf0]  ;;  %v14126_v1 = vld [vmem:[#allocation3 + $0x166c] sm:$0xf] }
 0x5f7   : > { %v6756_v51 = vpop.f32.mrf.mxu2  ;;  %v6775_v5 = vpop.f32.mrf.mxu3  ;;  %7798 = vmatpush.bf16.msrb.mxu2 %v12604_v15  ;;  %v14168_v15 = vld [vmem:[#allocation3 + $0x17b4] sm:$0xf0]  ;;  %v12624_v36 = vor.u32 %v14126_v1, %v12621_v46  ;;  %v14191_v1 = vld [vmem:[#allocation3 + $0x186c] sm:$0xf0] }
 0x5f8   : > { %v6757_v20 = vadd.f32 %v6756_v51, %v6738_v18  ;;  %7855 = vmatpush.bf16.msra.mxu1 %v12480_v22  ;;  %7743 = vmatpush.bf16.msra.mxu3 %v12696_v29  ;;  %v12763_v18 = vld [vmem:[#allocation3 + $0x1788] sm:$0xf]  ;;  %v14156_v29 = vld [vmem:[#allocation3 + $0x1754] sm:$0xf0] }
 0x5f9   : > { %v12764_v51 = vor.u32 %v14164_v3, %v12763_v18  ;;  %v14207_v3 = vld [vmem:[#allocation3 + $0x18ec] sm:$0xf0] }
 0x5fa   : > { %v6776_v24 = vadd.f32 %v6775_v5, %v6757_v20  ;;  %v6723_v35 = vpop.f32.mrf.mxu0  ;;  %v6742_v58 = vpop.f32.mrf.mxu1  ;;  %v14130_v5 = vld [vmem:[#allocation3 + $0x168c] sm:$0xf] }
 0x5fb   : > { %7799 = vmatpush.bf16.msrb.mxu2 %v12588_v4  ;;  %v6724_v47 = vadd.f32 %v6723_v35, %v15389_v21  ;;  %v12669_v21 = vld [vmem:[#allocation3 + $0x16d8] sm:$0xf0]  ;;  %v12640_v4 = vor.u32 %v14130_v5, %v12637_v6  ;;  %v14152_v35 = vld [vmem:[#allocation3 + $0x1734] sm:$0xf0]  ;;  %v14199_v5 = vld [vmem:[#allocation3 + $0x18ac] sm:$0xf0] }
 0x5fc   : > { %v6790_v13 = vmul.f32 0.01, %v6776_v24  ;;  %7856 = vmatpush.bf16.msra.mxu1 %v12464_v48  ;;  %v12672_v40 = vor.u32 %v14138_v55, %v12669_v21  ;;  %v14162_v55 = vld [vmem:[#allocation3 + $0x178c] sm:$0xf]  ;;  %v12765_v21 = vld [vmem:[#allocation3 + $0x1798] sm:$0xf0] }
 0x5fd   : > { %v6743_v59 = vadd.f32 %v6742_v58, %v6724_v47  ;;  %v14174_v47 = vld [vmem:[#allocation3 + $0x17ec] sm:$0xf] }
 0x5fe   : > { %v6806_v33 = vmax.f32 %v6776_v24, %v6790_v13  ;;  %v12748_v24 = vor.u32 %v14160_v9, %v12747_v53  ;;  %v12731_v13 = vld [vmem:[#allocation3 + $0x1748] sm:$0xf]  ;;  %v12867_v9 = vld [vmem:[#allocation3 + $0x1860] sm:$0xf] }
 0x5ff   : > { %v6759_v10 = vpop.f32.mrf.mxu2  ;;  %v6778_v25 = vpop.f32.mrf.mxu3  ;;  %7800 = vmatpush.bf16.msrb.mxu2 %v12572_v57  ;;  %v12732_v23 = vor.u32 %v14156_v29, %v12731_v13  ;;  %v14118_v57 = vld [vmem:[#allocation3 + $0x162c] sm:$0xf]  ;;  %v14187_v13 = vld [vmem:[#allocation3 + $0x184c] sm:$0xf0] }
 0x600   : > { %v15399_v27 = vpack.c.bf16 %v6806_v33, %v6802_v30  ;;  %7857 = vmatpush.bf16.msra.mxu1 %v12448_v39  ;;  %v6760_v7 = vadd.f32 %v6759_v10, %v6741_v31  ;;  %v12608_v30 = vor.u32 %v14122_v14, %v12605_v26  ;;  %v12715_v33 = vld [vmem:[#allocation3 + $0x1728] sm:$0xf]  ;;  %v12589_v10 = vld [vmem:[#allocation3 + $0x1638] sm:$0xf0]  ;;  %v14148_v39 = vld [vmem:[#allocation3 + $0x1714] sm:$0xf0] }
 0x601   : > { %v12716_v38 = vor.u32 %v14152_v35, %v12715_v33  ;;  %v12592_v31 = vor.u32 %v14118_v57, %v12589_v10  ;;  %v12835_v26 = vld [vmem:[#allocation3 + $0x1820] sm:$0xf]  ;;  %v14179_v35 = vld [vmem:[#allocation3 + $0x180c] sm:$0xf0] }
 0x602   : > { %7668 = vmatmul.bf16.vlgmr.msrb.gmra.mxu3 %v15399_v27  ;;  %7725 = vmatmul.bf16.vlgmr.msra.gmra.mxu2 %v15382_v43  ;;  %v6779_v61 = vadd.f32 %v6778_v25, %v6760_v7  ;;  %v12699_v25 = vld [vmem:[#allocation3 + $0x1708] sm:$0xf]  ;;  %v12813_v7 = vld [vmem:[#allocation3 + $0x17f8] sm:$0xf0]  ;;  %v12819_v33 = vld [vmem:[#allocation3 + $0x1800] sm:$0xf] }
 0x603   : > { %7782 = vmatmul.bf16.vlgmr.msrb.gmra.mxu1 %v15359_v49  ;;  %7839 = vmatmul.bf16.vlgmr.msra.gmra.mxu0 %v15346_v32  ;;  %v12780_v32 = vor.u32 %v14168_v15, %v12779_v62  ;;  %v14150_v15 = vld [vmem:[#allocation3 + $0x172c] sm:$0xf]  ;;  %v12820_v57 = vor.u32 %v14179_v35, %v12819_v33 }
 0x604   : > { %7812 = vmatpush.bf16.msrb.mxu3 %v12812_v11  ;;  %7869 = vmatpush.bf16.msra.mxu2 %v12688_v16  ;;  %v6794_v22 = vmul.f32 0.01, %v6779_v61  ;;  %v12816_v11 = vor.u32 %v14174_v47, %v12813_v7  ;;  %v12797_v16 = vld [vmem:[#allocation3 + $0x17d8] sm:$0xf0]  ;;  %v13043_v47 = vld [vmem:[#allocation3 + $0x19c0] sm:$0xf] }
 0x605   : > { %v12800_v56 = vor.u32 %v14170_v54, %v12797_v16  ;;  %v14235_v7 = vld [vmem:[#allocation3 + $0x19cc] sm:$0xf0]  ;;  %v12917_v54 = vld [vmem:[#allocation3 + $0x18d0] sm:$0xf0] }
 0x606   : > { %v6810_v20 = vmax.f32 %v6779_v61, %v6794_v22  ;;  %v14158_v61 = vld [vmem:[#allocation3 + $0x176c] sm:$0xf] }
 0x607   : > { %v6761_v63 = vpop.f32.mrf.mxu2  ;;  %v6780_v28 = vpop.f32.mrf.mxu3 }
 0x608   : > { %v6762_v44 = vadd.f32 %v6761_v63, %v6743_v59  ;;  %7813 = vmatpush.bf16.msrb.mxu3 %v12796_v45  ;;  %7870 = vmatpush.bf16.msra.mxu2 %v12672_v40  ;;  %v12781_v45 = vld [vmem:[#allocation3 + $0x17b8] sm:$0xf0]  ;;  %v12768_v59 = vor.u32 %v14162_v55, %v12765_v21  ;;  %v14197_v55 = vld [vmem:[#allocation3 + $0x18a4] sm:$0xf] }
 0x609   : > { %v12784_v58 = vor.u32 %v14166_v34, %v12781_v45  ;;  %v12749_v40 = vld [vmem:[#allocation3 + $0x1778] sm:$0xf0]  ;;  %v13027_v45 = vld [vmem:[#allocation3 + $0x19a0] sm:$0xf] }
 0x60a   : > { %v6781_v2 = vadd.f32 %v6780_v28, %v6762_v44  ;;  %v12752_v63 = vor.u32 %v14158_v61, %v12749_v40  ;;  %v14154_v44 = vld [vmem:[#allocation3 + $0x174c] sm:$0xf]  ;;  %v12720_v28 = vor.u32 %v14150_v15, %v12717_v8  ;;  %v14193_v15 = vld [vmem:[#allocation3 + $0x1884] sm:$0xf] }
 0x60c   : > { %v6798_v19 = vmul.f32 0.01, %v6781_v2  ;;  %7814 = vmatpush.bf16.msrb.mxu3 %v12780_v32  ;;  %7871 = vmatpush.bf16.msra.mxu2 %v12656_v37  ;;  %v14146_v32 = vld [vmem:[#allocation3 + $0x170c] sm:$0xf]  ;;  %v14203_v37 = vld [vmem:[#allocation3 + $0x18cc] sm:$0xf0] }
 0x60d   : > { %v12704_v18 = vor.u32 %v14146_v32, %v12701_v12 }
 0x60e   : > { %v6814_v0 = vmax.f32 %v6781_v2, %v6798_v19  ;;  %v12915_v2 = vld [vmem:[#allocation3 + $0x18c0] sm:$0xf] }
 0x60f   : > { %v12916_v19 = vor.u32 %v14203_v37, %v12915_v2 }
 0x610   : > { %v15406_v48 = vpack.c.bf16 %v6814_v0, %v6810_v20  ;;  %7815 = vmatpush.bf16.msrb.mxu3 %v12764_v51  ;;  %7872 = vmatpush.bf16.msra.mxu2 %v12640_v4  ;;  %v12899_v51 = vld [vmem:[#allocation3 + $0x18a0] sm:$0xf]  ;;  %v14195_v4 = vld [vmem:[#allocation3 + $0x188c] sm:$0xf0] }
 0x611   : > { %v12900_v6 = vor.u32 %v14199_v5, %v12899_v51 }
 0x612   : > { %7673 = vmatmul.bf16.gmra.mxu3 %v15406_v48  ;;  %7730 = vmatmul.bf16.gmra.mxu2 %v15392_v41 }
 0x613   : > { %7787 = vmatmul.bf16.gmra.mxu1 %v15372_v17  ;;  %7844 = vmatmul.bf16.gmra.mxu0 %v15354_v50  ;;  %v12700_v50 = vor.u32 %v14148_v39, %v12699_v25  ;;  %v13059_v25 = vld [vmem:[#allocation3 + $0x19e0] sm:$0xf]  ;;  %v14239_v39 = vld [vmem:[#allocation3 + $0x19ec] sm:$0xf0] }
 0x614   : > { %7816 = vmatpush.bf16.msrb.mxu3 %v12748_v24  ;;  %7873 = vmatpush.bf16.msra.mxu2 %v12624_v36  ;;  %v12868_v24 = vor.u32 %v14191_v1, %v12867_v9  ;;  %v12851_v36 = vld [vmem:[#allocation3 + $0x1840] sm:$0xf]  ;;  %v14185_v9 = vld [vmem:[#allocation3 + $0x1844] sm:$0xf] }
 0x615   : > { %v12852_v29 = vor.u32 %v14187_v13, %v12851_v36  ;;  %v12853_v36 = vld [vmem:[#allocation3 + $0x1850] sm:$0xf0] }
 0x618   : > { %7817 = vmatpush.bf16.msrb.mxu3 %v12732_v23  ;;  %7874 = vmatpush.bf16.msra.mxu2 %v12608_v30 }
 0x61c   : > { %7818 = vmatpush.bf16.msrb.mxu3 %v12716_v38  ;;  %7875 = vmatpush.bf16.msra.mxu2 %v12592_v31  ;;  %v14205_v31 = vld [vmem:[#allocation3 + $0x18e4] sm:$0xf] }
 0x61f   : > { %v15422_v20 = vpop.f32.mrf.mxu0 }
 0x620   : > { %7819 = vmatpush.bf16.msrb.mxu3 %v12700_v50  ;;  %7876 = vmatpush.bf16.msra.mxu2 %v12576_v52  ;;  %v13060_v50 = vor.u32 %v14239_v39, %v13059_v25  ;;  %v12936_v52 = vor.u32 %v14205_v31, %v12933_v42  ;;  %v12837_v25 = vld [vmem:[#allocation3 + $0x1830] sm:$0xf0]  ;;  %v14211_v42 = vld [vmem:[#allocation3 + $0x190c] sm:$0xf0] }
 0x622   : > { %7744 = vmatmul.bf16.vlgmr.msra.gmra.mxu3 %v15399_v27  ;;  %7801 = vmatmul.bf16.vlgmr.msrb.gmra.mxu2 %v15382_v43 }
 0x623   : > { %7858 = vmatmul.bf16.vlgmr.msra.gmra.mxu1 %v15359_v49  ;;  %v12733_v49 = vld [vmem:[#allocation3 + $0x1758] sm:$0xf0] }
 0x624   : > { %7888 = vmatpush.bf16.msra.mxu3 %v12816_v11  ;;  %v12736_v62 = vor.u32 %v14154_v44, %v12733_v49  ;;  %8746 = vmatpush.bf16.msrb.mxu1 %v13060_v50  ;;  %v14201_v11 = vld [vmem:[#allocation3 + $0x18c4] sm:$0xf]  ;;  %v13011_v49 = vld [vmem:[#allocation3 + $0x1980] sm:$0xf] }
 0x625   : > { %v12920_v16 = vor.u32 %v14201_v11, %v12917_v54  ;;  %v12947_v50 = vld [vmem:[#allocation3 + $0x1900] sm:$0xf] }
 0x626   : > { %v12948_v11 = vor.u32 %v14211_v42, %v12947_v50 }
 0x627   : > { %v15429_v46 = vpop.f32.mrf.mxu0 }
 0x628   : > { %7889 = vmatpush.bf16.msra.mxu3 %v12800_v56  ;;  %v15442_v56 = vld [vmem:[#allocation5 + $0x7] ss:$8 sm:$0xf] }
 0x62c   : > { %7890 = vmatpush.bf16.msra.mxu3 %v12784_v58  ;;  %v14231_v58 = vld [vmem:[#allocation3 + $0x19ac] sm:$0xf0] }
 0x62d   : > { %v13028_v21 = vor.u32 %v14231_v58, %v13027_v45 }
 0x62f   : > { %v15436_v38 = vpop.f32.mrf.mxu0 }
 0x630   : > { %7891 = vmatpush.bf16.msra.mxu3 %v12768_v59  ;;  %v12901_v59 = vld [vmem:[#allocation3 + $0x18b0] sm:$0xf0] }
 0x631   : > { %v12904_v40 = vor.u32 %v14197_v55, %v12901_v59  ;;  %v13187_v59 = vld [vmem:[#allocation3 + $0x1ae0] sm:$0xf] }
 0x632   : > { %7749 = vmatmul.bf16.gmra.mxu3 %v15406_v48  ;;  %7806 = vmatmul.bf16.gmra.mxu2 %v15392_v41 }
 0x633   : > { %7863 = vmatmul.bf16.gmra.mxu1 %v15372_v17  ;;  %v12931_v17 = vld [vmem:[#allocation3 + $0x18e0] sm:$0xf] }
 0x634   : > { %7892 = vmatpush.bf16.msra.mxu3 %v12752_v63  ;;  %v12932_v22 = vor.u32 %v14207_v3, %v12931_v17  ;;  %v15449_v63 = vperm.slane %v15442_v56, 0  ;;  %v12995_v17 = vld [vmem:[#allocation3 + $0x1960] sm:$0xf]  ;;  %v14223_v3 = vld [vmem:[#allocation3 + $0x196c] sm:$0xf0] }
 0x635   : > { %v12996_v37 = vor.u32 %v14223_v3, %v12995_v17  ;;  %v13171_v17 = vld [vmem:[#allocation3 + $0x1ac0] sm:$0xf]  ;;  %v14267_v3 = vld [vmem:[#allocation3 + $0x1acc] sm:$0xf0] }
 0x636   : > { %8727 = vmatpush.bf16.msrb.mxu0 %v12932_v22  ;;  %v7613_v12 = vadd.f32 %v15422_v20, %v15449_v63  ;;  %v14189_v22 = vld [vmem:[#allocation3 + $0x1864] sm:$0xf] }
 0x637   : > { %v15444_v34 = vpop.f32.mrf.mxu0 }
 0x638   : > { %7893 = vmatpush.bf16.msra.mxu3 %v12736_v62  ;;  %v14227_v62 = vld [vmem:[#allocation3 + $0x198c] sm:$0xf0] }
 0x639   : > { %v13012_v8 = vor.u32 %v14227_v62, %v13011_v49  ;;  %v14237_v49 = vld [vmem:[#allocation3 + $0x19e4] sm:$0xf] }
 0x63a   : > { %8728 = vmatpush.bf16.msrb.mxu0 %v12916_v19  ;;  %v12869_v19 = vld [vmem:[#allocation3 + $0x1870] sm:$0xf0] }
 0x63b   : > { %v12872_v5 = vor.u32 %v14189_v22, %v12869_v19  ;;  %v14233_v22 = vld [vmem:[#allocation3 + $0x19c4] sm:$0xf]  ;;  %v12923_v19 = vld [vmem:[#allocation3 + $0x18c8] sm:$0xf] }
 0x63c   : > { %7894 = vmatpush.bf16.msra.mxu3 %v12720_v28  ;;  %v12885_v28 = vld [vmem:[#allocation3 + $0x1890] sm:$0xf0] }
 0x63d   : > { %v12888_v32 = vor.u32 %v14193_v15, %v12885_v28  ;;  %v13061_v15 = vld [vmem:[#allocation3 + $0x19f0] sm:$0xf0]  ;;  %v14208_v28 = vld [vmem:[#allocation3 + $0x18f4] sm:$0xf0] }
 0x63e   : > { %8729 = vmatpush.bf16.msrb.mxu0 %v12900_v6  ;;  %v7615_v6 = vadd.f32 %v15429_v46, %v15449_v63 }
 0x63f   : > { %v15424_v0 = vpop.f32.mrf.mxu1  ;;  %v15456_v51 = vpop.f32.mrf.mxu0 }
 0x640   : > { %7895 = vmatpush.bf16.msra.mxu3 %v12704_v18  ;;  %v7632_v2 = vadd.f32 %v15424_v0, %v7613_v12  ;;  %v7620_v12 = vadd.f32 %v15444_v34, %v15449_v63 }
 0x642   : > { %7820 = vmatmul.bf16.vlgmr.msrb.gmra.mxu3 %v15399_v27  ;;  %7877 = vmatmul.bf16.vlgmr.msra.gmra.mxu2 %v15382_v43  ;;  %v12883_v43 = vld [vmem:[#allocation3 + $0x1880] sm:$0xf] }
 0x647   : > { %v15431_v23 = vpop.f32.mrf.mxu1  ;;  %v15467_v31 = vpop.f32.mrf.mxu0 }
 0x648   : > { %v7634_v1 = vadd.f32 %v15431_v23, %v7615_v6 }
 0x64f   : > { %v15438_v10 = vpop.f32.mrf.mxu1  ;;  %v15483_v6 = vpop.f32.mrf.mxu0 }
 0x652   : > { %7825 = vmatmul.bf16.gmra.mxu3 %v15406_v48  ;;  %7882 = vmatmul.bf16.gmra.mxu2 %v15392_v41  ;;  %v12884_v41 = vor.u32 %v14195_v4, %v12883_v43  ;;  %v12979_v4 = vld [vmem:[#allocation3 + $0x1940] sm:$0xf] }
 0x654   : > { %8730 = vmatpush.bf16.msrb.mxu0 %v12884_v41  ;;  %v14219_v41 = vld [vmem:[#allocation3 + $0x194c] sm:$0xf0] }
 0x657   : > { %v15446_v61 = vpop.f32.mrf.mxu1 }
 0x658   : > { %8731 = vmatpush.bf16.msrb.mxu0 %v12868_v24  ;;  %v12980_v24 = vor.u32 %v14219_v41, %v12979_v4  ;;  %v15486_v41 = vperm.slane %v15442_v56, 1 }
 0x65c   : > { %8732 = vmatpush.bf16.msrb.mxu0 %v12852_v29  ;;  %v12856_v29 = vor.u32 %v14185_v9, %v12853_v36 }
 0x65f   : > { %v15461_v20 = vpop.f32.mrf.mxu1 }
 0x662   : > { %7896 = vmatmul.bf16.vlgmr.msra.gmra.mxu3 %v15399_v27  ;;  %v14183_v27 = vld [vmem:[#allocation3 + $0x182c] sm:$0xf0] }
 0x663   : > { %v12836_v30 = vor.u32 %v14183_v27, %v12835_v26  ;;  %v14215_v27 = vld [vmem:[#allocation3 + $0x192c] sm:$0xf0] }
 0x665   : > { %v15427_v53 = vpop.f32.mrf.mxu2  ;;  %8733 = vmatpush.bf16.msrb.mxu0 %v12836_v30  ;;  %v14181_v30 = vld [vmem:[#allocation3 + $0x1824] sm:$0xf] }
 0x666   : > { %v7651_v43 = vadd.f32 %v15427_v53, %v7632_v2  ;;  %v12963_v53 = vld [vmem:[#allocation3 + $0x1920] sm:$0xf]  ;;  %v12840_v39 = vor.u32 %v14181_v30, %v12837_v25  ;;  %v13172_v2 = vor.u32 %v14267_v3, %v13171_v17  ;;  %v14225_v25 = vld [vmem:[#allocation3 + $0x1984] sm:$0xf]  ;;  %v14251_v17 = vld [vmem:[#allocation3 + $0x1a4c] sm:$0xf0] }
 0x667   : > { %v15471_v54 = vpop.f32.mrf.mxu1  ;;  %v14217_v3 = vld [vmem:[#allocation3 + $0x1944] sm:$0xf] }
 0x669   : > { %8734 = vmatpush.bf16.msrb.mxu0 %v12820_v57  ;;  %v12964_v57 = vor.u32 %v14215_v27, %v12963_v53  ;;  %v14200_v53 = vld [vmem:[#allocation3 + $0x18b4] sm:$0xf0] }
 0x66d   : > { %v15433_v14 = vpop.f32.mrf.mxu2  ;;  %8803 = vmatpush.bf16.msra.mxu0 %v12936_v52  ;;  %v14177_v52 = vld [vmem:[#allocation3 + $0x1804] sm:$0xf] }
 0x66e   : > { %v7653_v26 = vadd.f32 %v15433_v14, %v7634_v1  ;;  %v7618_v14 = vadd.f32 %v15436_v38, %v15449_v63 }
 0x66f   : > { %v15489_v9 = vpop.f32.mrf.mxu1 }
 0x670   : > { %v7637_v45 = vadd.f32 %v15438_v10, %v7618_v14  ;;  %v12891_v14 = vld [vmem:[#allocation3 + $0x1888] sm:$0xf] }
 0x671   : > { %8804 = vmatpush.bf16.msra.mxu0 %v12920_v16 }
 0x672   : > { %7901 = vmatmul.bf16.gmra.mxu3 %v15406_v48  ;;  %v13044_v48 = vor.u32 %v14235_v7, %v13043_v47 }
 0x674   : > { %8747 = vmatpush.bf16.msrb.mxu1 %v13044_v48  ;;  %v12821_v48 = vld [vmem:[#allocation3 + $0x1810] sm:$0xf0] }
 0x675   : > { %v15440_v60 = vpop.f32.mrf.mxu2  ;;  %8805 = vmatpush.bf16.msra.mxu0 %v12904_v40  ;;  %v12824_v16 = vor.u32 %v14177_v52, %v12821_v48  ;;  %v14271_v40 = vld [vmem:[#allocation3 + $0x1aec] sm:$0xf0]  ;;  %v13013_v52 = vld [vmem:[#allocation3 + $0x1990] sm:$0xf0] }
 0x676   : > { %v7656_v38 = vadd.f32 %v15440_v60, %v7637_v45  ;;  %v13188_v62 = vor.u32 %v14271_v40, %v13187_v59  ;;  %v7639_v60 = vadd.f32 %v15446_v61, %v7620_v12  ;;  %v13155_v61 = vld [vmem:[#allocation3 + $0x1aa0] sm:$0xf]  ;;  %v15498_v45 = vpop.f32.mrf.mxu0  ;;  %v14221_v40 = vld [vmem:[#allocation3 + $0x1964] sm:$0xf] }
 0x677   : > { %v13123_v59 = vld [vmem:[#allocation3 + $0x1a60] sm:$0xf] }
 0x678   : > { %8748 = vmatpush.bf16.msrb.mxu1 %v13028_v21  ;;  %8765 = vmatpush.bf16.msrb.mxu2 %v13188_v62  ;;  %v12997_v62 = vld [vmem:[#allocation3 + $0x1970] sm:$0xf0] }
 0x679   : > { %8806 = vmatpush.bf16.msra.mxu0 %v12888_v32  ;;  %v13064_v32 = vor.u32 %v14237_v49, %v13061_v15  ;;  %v12875_v15 = vld [vmem:[#allocation3 + $0x1868] sm:$0xf] }
 0x67c   : > { %8749 = vmatpush.bf16.msrb.mxu1 %v13012_v8  ;;  %v12939_v8 = vld [vmem:[#allocation3 + $0x18e8] sm:$0xf]  ;;  %8766 = vmatpush.bf16.msrb.mxu2 %v13172_v2  ;;  %v12981_v2 = vld [vmem:[#allocation3 + $0x1950] sm:$0xf0] }
 0x67d   : > { %v15451_v44 = vpop.f32.mrf.mxu2  ;;  %8807 = vmatpush.bf16.msra.mxu0 %v12872_v5  ;;  %v12940_v10 = vor.u32 %v14208_v28, %v12939_v8  ;;  %v14204_v5 = vld [vmem:[#allocation3 + $0x18d4] sm:$0xf0]  ;;  %v13000_v28 = vor.u32 %v14221_v40, %v12997_v62  ;;  %v13067_v62 = vld [vmem:[#allocation3 + $0x19e8] sm:$0xf] }
 0x67e   : > { %v12924_v4 = vor.u32 %v14204_v5, %v12923_v19  ;;  %v7658_v34 = vadd.f32 %v15451_v44, %v7639_v60  ;;  %v14192_v8 = vld [vmem:[#allocation3 + $0x1874] sm:$0xf0]  ;;  %v12984_v5 = vor.u32 %v14217_v3, %v12981_v2  ;;  %v14299_v3 = vld [vmem:[#allocation3 + $0x1bcc] sm:$0xf0] }
 0x67f   : > { %v14188_v19 = vld [vmem:[#allocation3 + $0x1854] sm:$0xf0] }
 0x680   : > { %8750 = vmatpush.bf16.msrb.mxu1 %v12996_v37  ;;  %v13045_v37 = vld [vmem:[#allocation3 + $0x19d0] sm:$0xf0] }
 0x681   : > { %8808 = vmatpush.bf16.msra.mxu0 %v12856_v29 }
 0x684   : > { %8751 = vmatpush.bf16.msrb.mxu1 %v12980_v24  ;;  %v14229_v24 = vld [vmem:[#allocation3 + $0x19a4] sm:$0xf] }
 0x685   : > { %v7669_v18 = vpop.f32.mrf.mxu3  ;;  %v15464_v13 = vpop.f32.mrf.mxu2  ;;  %8809 = vmatpush.bf16.msra.mxu0 %v12840_v39  ;;  %v7689_v39 = vadd.f32 %v15456_v51, %v15486_v41  ;;  %v14255_v51 = vld [vmem:[#allocation3 + $0x1a6c] sm:$0xf0] }
 0x686   : > { %v7670_v0 = vadd.f32 %v7669_v18, %v7651_v43  ;;  %v13048_v43 = vor.u32 %v14233_v22, %v13045_v37  ;;  %v12859_v37 = vld [vmem:[#allocation3 + $0x1848] sm:$0xf] }
 0x687   : > { %v7708_v48 = vadd.f32 %v15461_v20, %v7689_v39  ;;  %v15502_v20 = vpop.f32.mrf.mxu1 }
 0x688   : > { %v7907_v33 = vmul.f32 0.01, %v7670_v0  ;;  %8752 = vmatpush.bf16.msrb.mxu1 %v12964_v57  ;;  %v14259_v57 = vld [vmem:[#allocation3 + $0x1a8c] sm:$0xf0] }
 0x689   : > { %8810 = vmatpush.bf16.msra.mxu0 %v12824_v16  ;;  %v7727_v49 = vadd.f32 %v15464_v13, %v7708_v48  ;;  %v13107_v13 = vld [vmem:[#allocation3 + $0x1a40] sm:$0xf] }
 0x68a   : > { %v7923_v47 = vmax.f32 %v7670_v0, %v7907_v33  ;;  %v14263_v0 = vld [vmem:[#allocation3 + $0x1aac] sm:$0xf0]  ;;  %v13108_v60 = vor.u32 %v14251_v17, %v13107_v13  ;;  %v13299_v17 = vld [vmem:[#allocation3 + $0x1bc0] sm:$0xf] }
 0x68b   : > { %v13156_v29 = vor.u32 %v14263_v0, %v13155_v61  ;;  %v14213_v61 = vld [vmem:[#allocation3 + $0x1924] sm:$0xf]  ;;  %v13300_v2 = vor.u32 %v14299_v3, %v13299_v17  ;;  %v13003_v3 = vld [vmem:[#allocation3 + $0x1968] sm:$0xf] }
 0x68c   : > { %8753 = vmatpush.bf16.msrb.mxu1 %v12948_v11 }
 0x68d   : > { %v7671_v46 = vpop.f32.mrf.mxu3  ;;  %v15476_v55 = vpop.f32.mrf.mxu2  ;;  %8767 = vmatpush.bf16.msrb.mxu2 %v13156_v29  ;;  %v14184_v29 = vld [vmem:[#allocation3 + $0x1834] sm:$0xf0] }
 0x68e   : > { %v7672_v35 = vadd.f32 %v7671_v46, %v7653_v26  ;;  %v13029_v26 = vld [vmem:[#allocation3 + $0x19b0] sm:$0xf0]  ;;  %v12907_v46 = vld [vmem:[#allocation3 + $0x18a8] sm:$0xf] }
 0x68f   : > { %v13032_v30 = vor.u32 %v14229_v24, %v13029_v26  ;;  %v12908_v33 = vor.u32 %v14200_v53, %v12907_v46  ;;  %v15510_v26 = vpop.f32.mrf.mxu0 }
 0x690   : > { %v7911_v23 = vmul.f32 0.01, %v7672_v35  ;;  %8822 = vmatpush.bf16.msra.mxu1 %v13064_v32  ;;  %v12876_v32 = vor.u32 %v14192_v8, %v12875_v15  ;;  %v14240_v15 = vld [vmem:[#allocation3 + $0x19f4] sm:$0xf0] }
 0x691   : > { %v13068_v8 = vor.u32 %v14240_v15, %v13067_v62  ;;  %v12893_v62 = vld [vmem:[#allocation3 + $0x1898] sm:$0xf0] }
 0x692   : > { %v7927_v7 = vmax.f32 %v7672_v35, %v7911_v23  ;;  %v13139_v35 = vld [vmem:[#allocation3 + $0x1a80] sm:$0xf] }
 0x693   : > { %v13140_v42 = vor.u32 %v14259_v57, %v13139_v35  ;;  %v14209_v35 = vld [vmem:[#allocation3 + $0x1904] sm:$0xf]  ;;  %v7694_v57 = vadd.f32 %v15483_v6, %v15486_v41  ;;  %v14303_v6 = vld [vmem:[#allocation3 + $0x1bec] sm:$0xf0] }
 0x694   : > { %v15474_v58 = vpack.c.bf16 %v7927_v7, %v7923_v47  ;;  %8823 = vmatpush.bf16.msra.mxu1 %v13048_v43  ;;  %v14196_v47 = vld [vmem:[#allocation3 + $0x1894] sm:$0xf0]  ;;  %v13016_v7 = vor.u32 %v14225_v25, %v13013_v52  ;;  %v12860_v43 = vor.u32 %v14188_v19, %v12859_v37  ;;  %v13173_v37 = vld [vmem:[#allocation3 + $0x1ad0] sm:$0xf0]  ;;  %v13051_v19 = vld [vmem:[#allocation3 + $0x19c8] sm:$0xf] }
 0x695   : > { %v7674_v21 = vpop.f32.mrf.mxu3  ;;  %v15491_v27 = vpop.f32.mrf.mxu2  ;;  %v12892_v11 = vor.u32 %v14196_v47, %v12891_v14  ;;  %8768 = vmatpush.bf16.msrb.mxu2 %v13140_v42  ;;  %v12827_v42 = vld [vmem:[#allocation3 + $0x1808] sm:$0xf]  ;;  %v14180_v52 = vld [vmem:[#allocation3 + $0x1814] sm:$0xf0] }
 0x696   : > { %8735 = vmatmul.bf16.vlgmr.msrb.gmra.mxu0 %v15474_v58  ;;  %v7675_v18 = vadd.f32 %v7674_v21, %v7656_v38  ;;  %v13124_v38 = vor.u32 %v14255_v51, %v13123_v59  ;;  %v13315_v59 = vld [vmem:[#allocation3 + $0x1be0] sm:$0xf]  ;;  %v14269_v51 = vld [vmem:[#allocation3 + $0x1ae4] sm:$0xf] }
 0x697   : > { %8879 = vmatpush.bf16.msrb.mxu0 %v12940_v10  ;;  %v7691_v10 = vadd.f32 %v15467_v31, %v15486_v41 }
 0x698   : > { %v7915_v63 = vmul.f32 0.01, %v7675_v18  ;;  %8824 = vmatpush.bf16.msra.mxu1 %v13032_v30 }
 0x699   : > { %8769 = vmatpush.bf16.msrb.mxu2 %v13124_v38  ;;  %v7710_v22 = vadd.f32 %v15471_v54, %v7691_v10  ;;  %v12843_v54 = vld [vmem:[#allocation3 + $0x1828] sm:$0xf]  ;;  %v13189_v38 = vld [vmem:[#allocation3 + $0x1af0] sm:$0xf0]  ;;  %v7696_v10 = vadd.f32 %v15498_v45, %v15486_v41 }
 0x69a   : > { %v7931_v23 = vmax.f32 %v7675_v18, %v7915_v63  ;;  %v13091_v63 = vld [vmem:[#allocation3 + $0x1a20] sm:$0xf]  ;;  %v12844_v53 = vor.u32 %v14184_v29, %v12843_v54  ;;  %v14261_v54 = vld [vmem:[#allocation3 + $0x1aa4] sm:$0xf] }
 0x69b   : > { %8880 = vmatpush.bf16.msrb.mxu0 %v12924_v4  ;;  %v7729_v4 = vadd.f32 %v15476_v55, %v7710_v22  ;;  %v15512_v55 = vpop.f32.mrf.mxu1  ;;  %v14265_v22 = vld [vmem:[#allocation3 + $0x1ac4] sm:$0xf] }
 0x69c   : > { %8825 = vmatpush.bf16.msra.mxu1 %v13016_v7  ;;  %v12828_v7 = vor.u32 %v14180_v52, %v12827_v42  ;;  %v13176_v41 = vor.u32 %v14265_v22, %v13173_v37  ;;  %v14257_v42 = vld [vmem:[#allocation3 + $0x1a84] sm:$0xf]  ;;  %v14224_v22 = vld [vmem:[#allocation3 + $0x1974] sm:$0xf0] }
 0x69d   : > { %v7676_v1 = vpop.f32.mrf.mxu3  ;;  %v15506_v18 = vpop.f32.mrf.mxu2  ;;  %8770 = vmatpush.bf16.msrb.mxu2 %v13108_v60  ;;  %v7715_v60 = vadd.f32 %v15502_v20, %v7696_v10  ;;  %v14287_v10 = vld [vmem:[#allocation3 + $0x1b6c] sm:$0xf0]  ;;  %v13004_v37 = vor.u32 %v14224_v22, %v13003_v3  ;;  %v12829_v3 = vld [vmem:[#allocation3 + $0x1818] sm:$0xf0] }
 0x69e   : > { %v7677_v36 = vadd.f32 %v7676_v1, %v7658_v34  ;;  %v14247_v1 = vld [vmem:[#allocation3 + $0x1a2c] sm:$0xf0] }
 0x69f   : > { %8881 = vmatpush.bf16.msrb.mxu0 %v12908_v33  ;;  %v13092_v24 = vor.u32 %v14247_v1, %v13091_v63  ;;  %v13075_v33 = vld [vmem:[#allocation3 + $0x1a00] sm:$0xf]  ;;  %v7734_v63 = vadd.f32 %v15506_v18, %v7715_v60 }
 0x6a0   : > { %v7919_v44 = vmul.f32 0.01, %v7677_v36  ;;  %8826 = vmatpush.bf16.msra.mxu1 %v13000_v28  ;;  %v14206_v28 = vld [vmem:[#allocation3 + $0x18ec] sm:$0xf] }
 0x6a1   : > { %8771 = vmatpush.bf16.msrb.mxu2 %v13092_v24  ;;  %v13283_v24 = vld [vmem:[#allocation3 + $0x1ba0] sm:$0xf] }
 0x6a2   : > { %v7935_v50 = vmax.f32 %v7677_v36, %v7919_v44  ;;  %v12965_v36 = vld [vmem:[#allocation3 + $0x1930] sm:$0xf0]  ;;  %v14243_v44 = vld [vmem:[#allocation3 + $0x1a0c] sm:$0xf0] }
 0x6a3   : > { %8882 = vmatpush.bf16.msrb.mxu0 %v12892_v11  ;;  %v12968_v46 = vor.u32 %v14213_v61, %v12965_v36  ;;  %v7713_v11 = vadd.f32 %v15489_v9, %v7694_v57  ;;  %v13192_v9 = vor.u32 %v14269_v51, %v13189_v38  ;;  %v14295_v36 = vld [vmem:[#allocation3 + $0x1bac] sm:$0xf0]  ;;  %v12909_v57 = vld [vmem:[#allocation3 + $0x18b8] sm:$0xf0]  ;;  %v14194_v38 = vld [vmem:[#allocation3 + $0x188c] sm:$0xf] }
 0x6a4   : > { %v15496_v16 = vpack.c.bf16 %v7935_v50, %v7931_v23  ;;  %8827 = vmatpush.bf16.msra.mxu1 %v12984_v5  ;;  %v13076_v23 = vor.u32 %v14243_v44, %v13075_v33  ;;  %v12949_v50 = vld [vmem:[#allocation3 + $0x1910] sm:$0xf0]  ;;  %v14236_v5 = vld [vmem:[#allocation3 + $0x19d4] sm:$0xf0] }
 0x6a5   : > { %v7745_v21 = vpop.f32.mrf.mxu3  ;;  %v15516_v14 = vpop.f32.mrf.mxu2  ;;  %v12952_v47 = vor.u32 %v14209_v35, %v12949_v50  ;;  %v7732_v40 = vadd.f32 %v15491_v27, %v7713_v11  ;;  %v13052_v45 = vor.u32 %v14236_v5, %v13051_v19  ;;  %v14232_v33 = vld [vmem:[#allocation3 + $0x19b4] sm:$0xf0]  ;;  %v14198_v35 = vld [vmem:[#allocation3 + $0x18ac] sm:$0xf]  ;;  %v14291_v50 = vld [vmem:[#allocation3 + $0x1b8c] sm:$0xf0] }
 0x6a6   : > { %8740 = vmatmul.bf16.gmra.mxu0 %v15496_v16  ;;  %v7746_v12 = vadd.f32 %v7745_v21, %v7727_v49  ;;  %8772 = vmatpush.bf16.msrb.mxu2 %v13076_v23  ;;  %v13316_v49 = vor.u32 %v14303_v6, %v13315_v59  ;;  %v15528_v27 = vpop.f32.mrf.mxu0  ;;  %v13267_v23 = vld [vmem:[#allocation3 + $0x1b80] sm:$0xf]  ;;  %v13019_v59 = vld [vmem:[#allocation3 + $0x1988] sm:$0xf]  ;;  %v14228_v6 = vld [vmem:[#allocation3 + $0x1994] sm:$0xf0] }
 0x6a7   : > { %8883 = vmatpush.bf16.msrb.mxu0 %v12876_v32  ;;  %v12941_v32 = vld [vmem:[#allocation3 + $0x18f8] sm:$0xf0]  ;;  %v13268_v11 = vor.u32 %v14291_v50, %v13267_v23  ;;  %v14190_v19 = vld [vmem:[#allocation3 + $0x186c] sm:$0xf]  ;;  %v13093_v23 = vld [vmem:[#allocation3 + $0x1a30] sm:$0xf0] }
 0x6a8   : > { %v7908_v31 = vmul.f32 0.01, %v7746_v12  ;;  %8828 = vmatpush.bf16.msra.mxu1 %v12968_v46  ;;  %8784 = vmatpush.bf16.msrb.mxu3 %v13316_v49  ;;  %v12944_v13 = vor.u32 %v14206_v28, %v12941_v32  ;;  %v13284_v46 = vor.u32 %v14295_v36, %v13283_v24  ;;  %v13020_v49 = vor.u32 %v14228_v6, %v13019_v59  ;;  %v13251_v32 = vld [vmem:[#allocation3 + $0x1b60] sm:$0xf]  ;;  %v12877_v5 = vld [vmem:[#allocation3 + $0x1878] sm:$0xf0] }
 0x6a9   : > { %v13252_v17 = vor.u32 %v14287_v10, %v13251_v32  ;;  %v12987_v24 = vld [vmem:[#allocation3 + $0x1948] sm:$0xf]  ;;  %v14220_v36 = vld [vmem:[#allocation3 + $0x1954] sm:$0xf0]  ;;  %v13077_v32 = vld [vmem:[#allocation3 + $0x1a10] sm:$0xf0] }
 0x6aa   : > { %v7924_v25 = vmax.f32 %v7746_v12, %v7908_v31  ;;  %8841 = vmatpush.bf16.msra.mxu2 %v13192_v9  ;;  %v12925_v31 = vld [vmem:[#allocation3 + $0x18d8] sm:$0xf0]  ;;  %v12971_v50 = vld [vmem:[#allocation3 + $0x1928] sm:$0xf] }
 0x6ab   : > { %8884 = vmatpush.bf16.msrb.mxu0 %v12860_v43  ;;  %v15531_v43 = vpop.f32.mrf.mxu1  ;;  %v12955_v10 = vld [vmem:[#allocation3 + $0x1908] sm:$0xf] }
 0x6ac   : > { %8829 = vmatpush.bf16.msra.mxu1 %v12952_v47  ;;  %8785 = vmatpush.bf16.msrb.mxu3 %v13300_v2 }
 0x6ad   : > { %v7747_v34 = vpop.f32.mrf.mxu3  ;;  %v15538_v61 = vpop.f32.mrf.mxu2 }
 0x6ae   : > { %v7748_v0 = vadd.f32 %v7747_v34, %v7729_v4  ;;  %v14202_v4 = vld [vmem:[#allocation3 + $0x18cc] sm:$0xf]  ;;  %v15534_v34 = vperm.slane %v15442_v56, 2  ;;  %8842 = vmatpush.bf16.msra.mxu2 %v13176_v41  ;;  %v15543_v51 = vpop.f32.mrf.mxu0 }
 0x6af   : > { %8885 = vmatpush.bf16.msrb.mxu0 %v12844_v53  ;;  %v12928_v20 = vor.u32 %v14202_v4, %v12925_v31  ;;  %v13157_v53 = vld [vmem:[#allocation3 + $0x1ab0] sm:$0xf0]  ;;  %v13235_v4 = vld [vmem:[#allocation3 + $0x1b40] sm:$0xf]  ;;  %v14283_v31 = vld [vmem:[#allocation3 + $0x1b4c] sm:$0xf0] }
 0x6b0   : > { %v7912_v30 = vmul.f32 0.01, %v7748_v0  ;;  %v13160_v44 = vor.u32 %v14261_v54, %v13157_v53  ;;  %8786 = vmatpush.bf16.msrb.mxu3 %v13284_v46  ;;  %v7765_v52 = vadd.f32 %v15510_v26, %v15534_v34  ;;  %v12896_v26 = vor.u32 %v14194_v38, %v12893_v62  ;;  %v14186_v46 = vld [vmem:[#allocation3 + $0x184c] sm:$0xf]  ;;  %v14241_v38 = vld [vmem:[#allocation3 + $0x1a04] sm:$0xf] }
 0x6b1   : > { %v7767_v41 = vadd.f32 %v15528_v27, %v15534_v34  ;;  %v12861_v27 = vld [vmem:[#allocation3 + $0x1858] sm:$0xf0]  ;;  %v7770_v62 = vadd.f32 %v15543_v51, %v15534_v34  ;;  %v14301_v51 = vld [vmem:[#allocation3 + $0x1be4] sm:$0xf] }
 0x6b2   : > { %v7928_v39 = vmax.f32 %v7748_v0, %v7912_v30  ;;  %v13035_v30 = vld [vmem:[#allocation3 + $0x19a8] sm:$0xf]  ;;  %8843 = vmatpush.bf16.msra.mxu2 %v13160_v44  ;;  %v7784_v15 = vadd.f32 %v15512_v55, %v7765_v52  ;;  %v13125_v55 = vld [vmem:[#allocation3 + $0x1a70] sm:$0xf0] }
 0x6b3   : > { %8886 = vmatpush.bf16.msrb.mxu0 %v12828_v7  ;;  %v13036_v18 = vor.u32 %v14232_v33, %v13035_v30  ;;  %v12864_v33 = vor.u32 %v14186_v46, %v12861_v27 }
 0x6b4   : > { %v15519_v48 = vpack.c.bf16 %v7928_v39, %v7924_v25  ;;  %v12912_v39 = vor.u32 %v14198_v35, %v12909_v57  ;;  %8787 = vmatpush.bf16.msrb.mxu3 %v13268_v11  ;;  %v14279_v35 = vld [vmem:[#allocation3 + $0x1b2c] sm:$0xf0]  ;;  %v14245_v57 = vld [vmem:[#allocation3 + $0x1a24] sm:$0xf]  ;;  %v12845_v11 = vld [vmem:[#allocation3 + $0x1838] sm:$0xf0] }
 0x6b5   : > { %v7750_v21 = vpop.f32.mrf.mxu3  ;;  %v15553_v60 = vpop.f32.mrf.mxu2 }
 0x6b6   : > { %8754 = vmatmul.bf16.vlgmr.msrb.gmra.mxu1 %v15519_v48  ;;  %8811 = vmatmul.bf16.vlgmr.msra.gmra.mxu0 %v15474_v58  ;;  %v15526_v12 = vadd.f32 %v7750_v21, %v7732_v40  ;;  %v13141_v21 = vld [vmem:[#allocation3 + $0x1a90] sm:$0xf0]  ;;  %v7771_v44 = vpop.f32.mrf.mxu0 }
 0x6b7   : > { %8898 = vmatpush.bf16.msrb.mxu1 %v13068_v8  ;;  %8955 = vmatpush.bf16.msra.mxu0 %v12944_v13  ;;  %v13144_v40 = vor.u32 %v14257_v42, %v13141_v21  ;;  %v15548_v8 = vpop.f32.mrf.mxu1  ;;  %v7803_v13 = vadd.f32 %v15516_v14, %v7784_v15  ;;  %v12880_v14 = vor.u32 %v14190_v19, %v12877_v5  ;;  %v14216_v42 = vld [vmem:[#allocation3 + $0x1934] sm:$0xf0]  ;;  %v13317_v5 = vld [vmem:[#allocation3 + $0x1bf0] sm:$0xf0] }
 0x6b8   : > { %v7916_v1 = vmul.f32 0.01, %v15526_v12  ;;  %8788 = vmatpush.bf16.msrb.mxu3 %v13252_v17  ;;  %v7789_v22 = vadd.f32 %v15548_v8, %v7770_v62  ;;  %v13069_v8 = vld [vmem:[#allocation3 + $0x19f8] sm:$0xf0] }
 0x6b9   : > { %8844 = vmatpush.bf16.msra.mxu2 %v13144_v40  ;;  %v13203_v40 = vld [vmem:[#allocation3 + $0x1b00] sm:$0xf] }
 0x6ba   : > { %v7932_v47 = vmax.f32 %v15526_v12, %v7916_v1  ;;  %v14253_v12 = vld [vmem:[#allocation3 + $0x1a64] sm:$0xf]  ;;  %v7786_v1 = vadd.f32 %v15531_v43, %v7767_v41  ;;  %v13219_v43 = vld [vmem:[#allocation3 + $0x1b20] sm:$0xf]  ;;  %v13195_v41 = vld [vmem:[#allocation3 + $0x1ae8] sm:$0xf] }
 0x6bb   : > { %8899 = vmatpush.bf16.msrb.mxu1 %v13052_v45  ;;  %8956 = vmatpush.bf16.msra.mxu0 %v12928_v20  ;;  %v13128_v2 = vor.u32 %v14253_v12, %v13125_v55  ;;  %v13236_v20 = vor.u32 %v14283_v31, %v13235_v4  ;;  %v14212_v12 = vld [vmem:[#allocation3 + $0x1914] sm:$0xf0]  ;;  %v14178_v55 = vld [vmem:[#allocation3 + $0x180c] sm:$0xf] }
 0x6bc   : > { %v7805_v53 = vadd.f32 %v15538_v61, %v7786_v1  ;;  %v12972_v61 = vor.u32 %v14216_v42, %v12971_v50  ;;  %v12956_v17 = vor.u32 %v14212_v12, %v12955_v10  ;;  %v14272_v4 = vld [vmem:[#allocation3 + $0x1af4] sm:$0xf0]  ;;  %v14238_v31 = vld [vmem:[#allocation3 + $0x19ec] sm:$0xf]  ;;  %v13021_v10 = vld [vmem:[#allocation3 + $0x1998] sm:$0xf0] }
 0x6bd   : > { %v7752_v0 = vpop.f32.mrf.mxu3  ;;  %8845 = vmatpush.bf16.msra.mxu2 %v13128_v2  ;;  %8789 = vmatpush.bf16.msrb.mxu3 %v13236_v20  ;;  %v7809_v6 = vpop.f32.mrf.mxu2  ;;  %v13196_v1 = vor.u32 %v14272_v4, %v13195_v41  ;;  %v13072_v20 = vor.u32 %v14238_v31, %v13069_v8  ;;  %v13005_v4 = vld [vmem:[#allocation3 + $0x1978] sm:$0xf0] }
 0x6be   : > { %v7753_v29 = vadd.f32 %v7752_v0, %v7734_v63  ;;  %v14249_v63 = vld [vmem:[#allocation3 + $0x1a44] sm:$0xf]  ;;  %v13109_v0 = vld [vmem:[#allocation3 + $0x1a50] sm:$0xf0] }
 0x6bf   : > { %8900 = vmatpush.bf16.msrb.mxu1 %v13036_v18  ;;  %8957 = vmatpush.bf16.msra.mxu0 %v12912_v39  ;;  %v13112_v54 = vor.u32 %v14249_v63, %v13109_v0  ;;  %v13220_v39 = vor.u32 %v14279_v35, %v13219_v43  ;;  %v7790_v52 = vpop.f32.mrf.mxu1  ;;  %v7840_v63 = vpop.f32.mrf.mxu0  ;;  %v7772_v0 = vadd.f32 %v7771_v44, %v15534_v34  ;;  %v14293_v44 = vld [vmem:[#allocation3 + $0x1ba4] sm:$0xf] }
 0x6c0   : > { %v7920_v25 = vmul.f32 0.01, %v7753_v29 }
 0x6c1   : > { %8846 = vmatpush.bf16.msra.mxu2 %v13112_v54  ;;  %8790 = vmatpush.bf16.msrb.mxu3 %v13220_v39  ;;  %v13301_v54 = vld [vmem:[#allocation3 + $0x1bd0] sm:$0xf0]  ;;  %v7791_v46 = vadd.f32 %v7790_v52, %v7772_v0  ;;  %v14230_v52 = vld [vmem:[#allocation3 + $0x19ac] sm:$0xf] }
 0x6c2   : > { %v7936_v7 = vmax.f32 %v7753_v29, %v7920_v25  ;;  %v12988_v29 = vor.u32 %v14220_v36, %v12987_v24  ;;  %v13285_v39 = vld [vmem:[#allocation3 + $0x1bb0] sm:$0xf0] }
 0x6c3   : > { %8901 = vmatpush.bf16.msrb.mxu1 %v13020_v49  ;;  %8958 = vmatpush.bf16.msra.mxu0 %v12896_v26  ;;  %v14275_v49 = vld [vmem:[#allocation3 + $0x1b0c] sm:$0xf0]  ;;  %v13288_v42 = vor.u32 %v14293_v44, %v13285_v39  ;;  %v12973_v44 = vld [vmem:[#allocation3 + $0x1938] sm:$0xf0] }
 0x6c4   : > { %v15546_v9 = vpack.c.bf16 %v7936_v7, %v7932_v47  ;;  %v13096_v47 = vor.u32 %v14245_v57, %v13093_v23  ;;  %v14182_v7 = vld [vmem:[#allocation3 + $0x182c] sm:$0xf]  ;;  %v7810_v57 = vadd.f32 %v7809_v6, %v7791_v46  ;;  %v13163_v23 = vld [vmem:[#allocation3 + $0x1aa8] sm:$0xf]  ;;  %v12989_v46 = vld [vmem:[#allocation3 + $0x1958] sm:$0xf0] }
 0x6c5   : > { %v7821_v28 = vpop.f32.mrf.mxu3  ;;  %v12848_v59 = vor.u32 %v14182_v7, %v12845_v11 }
 0x6c6   : > { %8759 = vmatmul.bf16.gmra.mxu1 %v15546_v9  ;;  %8816 = vmatmul.bf16.gmra.mxu0 %v15496_v16  ;;  %v15557_v45 = vadd.f32 %v7821_v28, %v7803_v13  ;;  %v13204_v28 = vor.u32 %v14275_v49, %v13203_v40  ;;  %v13080_v13 = vor.u32 %v14241_v38, %v13077_v32  ;;  %v14289_v40 = vld [vmem:[#allocation3 + $0x1b84] sm:$0xf]  ;;  %v13269_v49 = vld [vmem:[#allocation3 + $0x1b90] sm:$0xf0]  ;;  %v13147_v38 = vld [vmem:[#allocation3 + $0x1a88] sm:$0xf] }
 0x6c7   : > { %8902 = vmatpush.bf16.msrb.mxu1 %v13004_v37  ;;  %8959 = vmatpush.bf16.msra.mxu0 %v12880_v14  ;;  %v12832_v37 = vor.u32 %v14178_v55, %v12829_v3  ;;  %v13320_v14 = vor.u32 %v14301_v51, %v13317_v5  ;;  %v7859_v36 = vpop.f32.mrf.mxu1  ;;  %v7842_v6 = vpop.f32.mrf.mxu0  ;;  %v14226_v32 = vld [vmem:[#allocation3 + $0x198c] sm:$0xf]  ;;  %v13131_v51 = vld [vmem:[#allocation3 + $0x1a68] sm:$0xf] }
 0x6c8   : > { %v7909_v30 = vmul.f32 0.01, %v15557_v45  ;;  %8847 = vmatpush.bf16.msra.mxu2 %v13096_v47  ;;  %8791 = vmatpush.bf16.msrb.mxu3 %v13204_v28  ;;  %v14264_v47 = vld [vmem:[#allocation3 + $0x1ab4] sm:$0xf0] }
 0x6c9   : > { %v13164_v7 = vor.u32 %v14264_v47, %v13163_v23  ;;  %v14260_v28 = vld [vmem:[#allocation3 + $0x1a94] sm:$0xf0] }
 0x6ca   : > { %v7925_v15 = vmax.f32 %v15557_v45, %v7909_v30  ;;  %v7808_v45 = vadd.f32 %v15553_v60, %v7789_v22  ;;  %v14297_v60 = vld [vmem:[#allocation3 + $0x1bc4] sm:$0xf]  ;;  %v14234_v30 = vld [vmem:[#allocation3 + $0x19cc] sm:$0xf] }
 0x6cb   : > { %8903 = vmatpush.bf16.msrb.mxu1 %v12988_v29  ;;  %8960 = vmatpush.bf16.msra.mxu0 %v12864_v33  ;;  %v13179_v29 = vld [vmem:[#allocation3 + $0x1ac8] sm:$0xf]  ;;  %v13304_v27 = vor.u32 %v14297_v60, %v13301_v54  ;;  %v13053_v33 = vld [vmem:[#allocation3 + $0x19d8] sm:$0xf0]  ;;  %v14252_v60 = vld [vmem:[#allocation3 + $0x1a54] sm:$0xf0] }
 0x6cc   : > { %8848 = vmatpush.bf16.msra.mxu2 %v13080_v13  ;;  %8860 = vmatpush.bf16.msra.mxu3 %v13320_v14  ;;  %v13056_v35 = vor.u32 %v14234_v30, %v13053_v33  ;;  %v13148_v13 = vor.u32 %v14260_v28, %v13147_v38  ;;  %v14222_v14 = vld [vmem:[#allocation3 + $0x196c] sm:$0xf]  ;;  %v14244_v38 = vld [vmem:[#allocation3 + $0x1a14] sm:$0xf0] }
 0x6cd   : > { %v7823_v18 = vpop.f32.mrf.mxu3  ;;  %v13008_v8 = vor.u32 %v14222_v14, %v13005_v4  ;;  %v14218_v54 = vld [vmem:[#allocation3 + $0x194c] sm:$0xf]  ;;  %v13307_v14 = vld [vmem:[#allocation3 + $0x1bc8] sm:$0xf]  ;;  %v14300_v4 = vld [vmem:[#allocation3 + $0x1bd4] sm:$0xf0] }
 0x6ce   : > { %v7824_v25 = vadd.f32 %v7823_v18, %v7805_v53  ;;  %v14268_v53 = vld [vmem:[#allocation3 + $0x1ad4] sm:$0xf0]  ;;  %v7878_v18 = vpop.f32.mrf.mxu2 }
 0x6cf   : > { %8904 = vmatpush.bf16.msrb.mxu1 %v12972_v61  ;;  %8961 = vmatpush.bf16.msra.mxu0 %v12848_v59  ;;  %v13180_v43 = vor.u32 %v14268_v53, %v13179_v29  ;;  %v13037_v61 = vld [vmem:[#allocation3 + $0x19b8] sm:$0xf0]  ;;  %v7861_v12 = vpop.f32.mrf.mxu1  ;;  %v13221_v53 = vld [vmem:[#allocation3 + $0x1b30] sm:$0xf0] }
 0x6d0   : > { %v7913_v21 = vmul.f32 0.01, %v7824_v25  ;;  %8861 = vmatpush.bf16.msra.mxu3 %v13304_v27  ;;  %v13040_v11 = vor.u32 %v14230_v52, %v13037_v61  ;;  %v14277_v27 = vld [vmem:[#allocation3 + $0x1b24] sm:$0xf]  ;;  %v13205_v61 = vld [vmem:[#allocation3 + $0x1b10] sm:$0xf0] }
 0x6d1   : > { %v14273_v52 = vld [vmem:[#allocation3 + $0x1b04] sm:$0xf] }
 0x6d2   : > { %v7929_v26 = vmax.f32 %v7824_v25, %v7913_v21  ;;  %v15574_v21 = vperm.slane %v15442_v56, 3 }
 0x6d3   : > { %8905 = vmatpush.bf16.msrb.mxu1 %v12956_v17  ;;  %8962 = vmatpush.bf16.msra.mxu0 %v12832_v37  ;;  %v13024_v17 = vor.u32 %v14226_v32, %v13021_v10  ;;  %v14285_v37 = vld [vmem:[#allocation3 + $0x1b64] sm:$0xf]  ;;  %v12957_v32 = vld [vmem:[#allocation3 + $0x1918] sm:$0xf0] }
 0x6d4   : > { %v15566_v2 = vpack.c.bf16 %v7929_v26, %v7925_v15  ;;  %8862 = vmatpush.bf16.msra.mxu3 %v13288_v42  ;;  %v13272_v26 = vor.u32 %v14289_v40, %v13269_v49  ;;  %v7841_v56 = vadd.f32 %v7840_v63, %v15574_v21  ;;  %v14281_v63 = vld [vmem:[#allocation3 + $0x1b44] sm:$0xf]  ;;  %v7843_v0 = vadd.f32 %v7842_v6, %v15574_v21  ;;  %v13083_v49 = vld [vmem:[#allocation3 + $0x1a08] sm:$0xf] }
 0x6d5   : > { %v7826_v19 = vpop.f32.mrf.mxu3  ;;  %v13208_v40 = vor.u32 %v14273_v52, %v13205_v61  ;;  %v13084_v28 = vor.u32 %v14244_v38, %v13083_v49  ;;  %v14288_v52 = vld [vmem:[#allocation3 + $0x1b74] sm:$0xf0]  ;;  %v14254_v61 = vld [vmem:[#allocation3 + $0x1a6c] sm:$0xf] }
 0x6d6   : > { %8773 = vmatmul.bf16.vlgmr.msrb.gmra.mxu2 %v15566_v2  ;;  %8830 = vmatmul.bf16.vlgmr.msra.gmra.mxu1 %v15519_v48  ;;  %v7827_v24 = vadd.f32 %v7826_v19, %v7808_v45  ;;  %v7880_v3 = vpop.f32.mrf.mxu2  ;;  %v13253_v19 = vld [vmem:[#allocation3 + $0x1b70] sm:$0xf0]  ;;  %v7860_v5 = vadd.f32 %v7859_v36, %v7841_v56  ;;  %v14256_v45 = vld [vmem:[#allocation3 + $0x1a74] sm:$0xf0]  ;;  %v7862_v30 = vadd.f32 %v7861_v12, %v7843_v0  ;;  %v13181_v0 = vld [vmem:[#allocation3 + $0x1ad8] sm:$0xf0] }
 0x6d7   : > { %8887 = vmatmul.bf16.vlgmr.msrb.gmra.mxu0 %v15474_v58  ;;  %8917 = vmatpush.bf16.msrb.mxu2 %v13196_v1  ;;  %v13256_v41 = vor.u32 %v14285_v37, %v13253_v19  ;;  %v13132_v31 = vor.u32 %v14256_v45, %v13131_v51  ;;  %v13237_v1 = vld [vmem:[#allocation3 + $0x1b50] sm:$0xf0]  ;;  %v7864_v23 = vpop.f32.mrf.mxu1  ;;  %v14270_v37 = vld [vmem:[#allocation3 + $0x1aec] sm:$0xf] }
 0x6d8   : > { %8974 = vmatpush.bf16.msra.mxu1 %v13072_v20  ;;  %v7917_v25 = vmul.f32 0.01, %v7827_v24  ;;  %8863 = vmatpush.bf16.msra.mxu3 %v13272_v26  ;;  %v13115_v20 = vld [vmem:[#allocation3 + $0x1a48] sm:$0xf]  ;;  %v13240_v36 = vor.u32 %v14281_v63, %v13237_v1  ;;  %v7881_v39 = vadd.f32 %v7880_v3, %v7862_v30  ;;  %v13308_v63 = vor.u32 %v14300_v4, %v13307_v14  ;;  %v13165_v30 = vld [vmem:[#allocation3 + $0x1ab8] sm:$0xf0] }
 0x6d9   : > { %v13116_v29 = vor.u32 %v14252_v60, %v13115_v20  ;;  %v13323_v3 = vld [vmem:[#allocation3 + $0x1be8] sm:$0xf]  ;;  %v14266_v20 = vld [vmem:[#allocation3 + $0x1acc] sm:$0xf]  ;;  %v13309_v14 = vld [vmem:[#allocation3 + $0x1bd8] sm:$0xf0] }
 0x6da   : > { %v7933_v62 = vmax.f32 %v7827_v24, %v7917_v25  ;;  %v7879_v24 = vadd.f32 %v7878_v18, %v7860_v5  ;;  %v14214_v25 = vld [vmem:[#allocation3 + $0x192c] sm:$0xf]  ;;  %v13224_v18 = vor.u32 %v14277_v27, %v13221_v53  ;;  %v13197_v5 = vld [vmem:[#allocation3 + $0x1af8] sm:$0xf0]  ;;  %v13184_v60 = vor.u32 %v14266_v20, %v13181_v0 }
 0x6db   : > { %8918 = vmatpush.bf16.msrb.mxu2 %v13180_v43  ;;  %v12992_v43 = vor.u32 %v14218_v54, %v12989_v46  ;;  %v12976_v47 = vor.u32 %v14214_v25, %v12973_v44  ;;  %v13200_v45 = vor.u32 %v14270_v37, %v13197_v5  ;;  %v14296_v46 = vld [vmem:[#allocation3 + $0x1bb4] sm:$0xf0]  ;;  %v14258_v44 = vld [vmem:[#allocation3 + $0x1a8c] sm:$0xf]  ;;  %v13085_v37 = vld [vmem:[#allocation3 + $0x1a18] sm:$0xf0] }
 0x6dc   : > { %8975 = vmatpush.bf16.msra.mxu1 %v13056_v35  ;;  %8864 = vmatpush.bf16.msra.mxu3 %v13256_v41  ;;  %v13099_v35 = vld [vmem:[#allocation3 + $0x1a28] sm:$0xf]  ;;  %v14250_v38 = vld [vmem:[#allocation3 + $0x1a4c] sm:$0xf]  ;;  %v13325_v5 = vld [vmem:[#allocation3 + $0x1bf8] sm:$0xf0] }
 0x6dd   : > { %v7828_v34 = vpop.f32.mrf.mxu3  ;;  %v13277_v20 = vld [vmem:[#allocation3 + $0x1b98] sm:$0xf0] }
 0x6de   : > { %v7829_v50 = vadd.f32 %v7828_v34, %v7810_v57  ;;  %v14248_v57 = vld [vmem:[#allocation3 + $0x1a34] sm:$0xf0]  ;;  %v7845_v34 = vpop.f32.mrf.mxu0 }
 0x6df   : > { %8919 = vmatpush.bf16.msrb.mxu2 %v13164_v7  ;;  %v13100_v42 = vor.u32 %v14248_v57, %v13099_v35  ;;  %v7846_v12 = vadd.f32 %v7845_v34, %v15574_v21  ;;  %v7866_v41 = vpop.f32.mrf.mxu1 }
 0x6e0   : > { %v7921_v59 = vmul.f32 0.01, %v7829_v50  ;;  %8976 = vmatpush.bf16.msra.mxu1 %v13040_v11  ;;  %8865 = vmatpush.bf16.msra.mxu3 %v13240_v36 }
 0x6e1   : > { %v7865_v19 = vadd.f32 %v7864_v23, %v7846_v12  ;;  %v13101_v12 = vld [vmem:[#allocation3 + $0x1a38] sm:$0xf0] }
 0x6e2   : > { %v7937_v15 = vmax.f32 %v7829_v50, %v7921_v59  ;;  %v7883_v59 = vpop.f32.mrf.mxu2 }
 0x6e3   : > { %8920 = vmatpush.bf16.msrb.mxu2 %v13148_v13 }
 0x6e4   : > { %v15577_v55 = vpack.c.bf16 %v7937_v15, %v7933_v62  ;;  %8977 = vmatpush.bf16.msra.mxu1 %v13024_v17  ;;  %8866 = vmatpush.bf16.msra.mxu3 %v13224_v18  ;;  %v14210_v62 = vld [vmem:[#allocation3 + $0x190c] sm:$0xf] }
 0x6e5   : > { %v7897_v22 = vpop.f32.mrf.mxu3  ;;  %v12960_v10 = vor.u32 %v14210_v62, %v12957_v32  ;;  %v13117_v62 = vld [vmem:[#allocation3 + $0x1a58] sm:$0xf0]  ;;  %v14246_v32 = vld [vmem:[#allocation3 + $0x1a2c] sm:$0xf] }
 0x6e6   : > { %8778 = vmatmul.bf16.gmra.mxu2 %v15577_v55  ;;  %8835 = vmatmul.bf16.gmra.mxu1 %v15546_v9  ;;  %v7898_v33 = vadd.f32 %v7897_v22, %v7879_v24  ;;  %v7847_v17 = vpop.f32.mrf.mxu0  ;;  %v14304_v22 = vld [vmem:[#allocation3 + $0x1bf4] sm:$0xf0] }
 0x6e7   : > { %8892 = vmatmul.bf16.gmra.mxu0 %v15496_v16  ;;  %8921 = vmatpush.bf16.msrb.mxu2 %v13132_v31  ;;  %v13324_v51 = vor.u32 %v14304_v22, %v13323_v3  ;;  %v7848_v31 = vadd.f32 %v7847_v17, %v15574_v21  ;;  %v13275_v21 = vld [vmem:[#allocation3 + $0x1b88] sm:$0xf]  ;;  %v13104_v3 = vor.u32 %v14246_v32, %v13101_v12  ;;  %v14242_v22 = vld [vmem:[#allocation3 + $0x1a0c] sm:$0xf] }
 0x6e8   : > { %8978 = vmatpush.bf16.msra.mxu1 %v13008_v8  ;;  %v7910_v7 = vmul.f32 0.01, %v7898_v33  ;;  %8867 = vmatpush.bf16.msra.mxu3 %v13208_v40  ;;  %v7884_v8 = vadd.f32 %v7883_v59, %v7865_v19  ;;  %v14284_v40 = vld [vmem:[#allocation3 + $0x1b54] sm:$0xf0]  ;;  %v13211_v17 = vld [vmem:[#allocation3 + $0x1b08] sm:$0xf]  ;;  %v13088_v19 = vor.u32 %v14242_v22, %v13085_v37 }
 0x6e9   : > { %v7867_v24 = vadd.f32 %v7866_v41, %v7848_v31  ;;  %v14294_v31 = vld [vmem:[#allocation3 + $0x1bac] sm:$0xf] }
 0x6ea   : > { %v7926_v15 = vmax.f32 %v7898_v33, %v7910_v7  ;;  %v7885_v1 = vpop.f32.mrf.mxu2  ;;  %v14292_v33 = vld [vmem:[#allocation3 + $0x1b94] sm:$0xf0] }
 0x6eb   : > { %8922 = vmatpush.bf16.msrb.mxu2 %v13116_v29  ;;  %v7886_v54 = vadd.f32 %v7885_v1, %v7867_v24  ;;  %v13291_v29 = vld [vmem:[#allocation3 + $0x1ba8] sm:$0xf]  ;;  %v13276_v34 = vor.u32 %v14292_v33, %v13275_v21  ;;  %v14290_v1 = vld [vmem:[#allocation3 + $0x1b8c] sm:$0xf]  ;;  %v13213_v33 = vld [vmem:[#allocation3 + $0x1b18] sm:$0xf0] }
 0x6ec   : > { %8979 = vmatpush.bf16.msra.mxu1 %v12992_v43  ;;  %v13292_v53 = vor.u32 %v14296_v46, %v13291_v29  ;;  %v13280_v0 = vor.u32 %v14290_v1, %v13277_v20  ;;  %v14286_v24 = vld [vmem:[#allocation3 + $0x1b6c] sm:$0xf] }
 0x6ed   : > { %v7899_v50 = vpop.f32.mrf.mxu3  ;;  %v14274_v21 = vld [vmem:[#allocation3 + $0x1b0c] sm:$0xf] }
 0x6ee   : > { %v7900_v11 = vadd.f32 %v7899_v50, %v7881_v39  ;;  %v13149_v39 = vld [vmem:[#allocation3 + $0x1a98] sm:$0xf0] }
 0x6ef   : > { %8923 = vmatpush.bf16.msrb.mxu2 %v13100_v42  ;;  %v13152_v50 = vor.u32 %v14258_v44, %v13149_v39 }
 0x6f0   : > { %v7914_v6 = vmul.f32 0.01, %v7900_v11  ;;  %8980 = vmatpush.bf16.msra.mxu1 %v12976_v47  ;;  %v13259_v47 = vld [vmem:[#allocation3 + $0x1b68] sm:$0xf] }
 0x6f1   : > { %v13260_v7 = vor.u32 %v14288_v52, %v13259_v47 }
 0x6f2   : > { %v7930_v26 = vmax.f32 %v7900_v11, %v7914_v6  ;;  %v13133_v11 = vld [vmem:[#allocation3 + $0x1a78] sm:$0xf0]  ;;  %v13243_v6 = vld [vmem:[#allocation3 + $0x1b48] sm:$0xf] }
 0x6f3   : > { %8924 = vmatpush.bf16.msrb.mxu2 %v13084_v28  ;;  %v13136_v59 = vor.u32 %v14254_v61, %v13133_v11  ;;  %v13244_v49 = vor.u32 %v14284_v40, %v13243_v6  ;;  %v14280_v28 = vld [vmem:[#allocation3 + $0x1b34] sm:$0xf0] }
 0x6f4   : > { %v15584_v13 = vpack.c.bf16 %v7930_v26, %v7926_v15  ;;  %8981 = vmatpush.bf16.msra.mxu1 %v12960_v10  ;;  %v13120_v15 = vor.u32 %v14250_v38, %v13117_v62  ;;  %v13227_v26 = vld [vmem:[#allocation3 + $0x1b28] sm:$0xf] }
 0x6f5   : > { %v7902_v56 = vpop.f32.mrf.mxu3  ;;  %v13228_v10 = vor.u32 %v14280_v28, %v13227_v26 }
 0x6f6   : > { %8792 = vmatmul.bf16.vlgmr.msrb.gmra.mxu3 %v15584_v13  ;;  %8849 = vmatmul.bf16.vlgmr.msra.gmra.mxu2 %v15566_v2  ;;  %v7903_v36 = vadd.f32 %v7902_v56, %v7884_v8  ;;  %v14276_v56 = vld [vmem:[#allocation3 + $0x1b14] sm:$0xf0]  ;;  %v13293_v8 = vld [vmem:[#allocation3 + $0x1bb8] sm:$0xf0] }
 0x6f7   : > { %8906 = vmatmul.bf16.vlgmr.msrb.gmra.mxu1 %v15519_v48  ;;  %8963 = vmatmul.bf16.vlgmr.msra.gmra.mxu0 %v15474_v58  ;;  %v14262_v58 = vld [vmem:[#allocation3 + $0x1aac] sm:$0xf] }
 0x6f8   : > { %8936 = vmatpush.bf16.msrb.mxu3 %v13324_v51  ;;  %8993 = vmatpush.bf16.msra.mxu2 %v13200_v45  ;;  %v7918_v43 = vmul.f32 0.01, %v7903_v36  ;;  %v13168_v57 = vor.u32 %v14262_v58, %v13165_v30  ;;  %v14302_v51 = vld [vmem:[#allocation3 + $0x1bec] sm:$0xf] }
 0x6f9   : > { %v13328_v41 = vor.u32 %v14302_v51, %v13325_v5  ;;  %v14298_v45 = vld [vmem:[#allocation3 + $0x1bcc] sm:$0xf]  ;;  %v15603_v58 = vld [vmem:[#allocation5 + $0x20] ss:$8 sm:$0xf] }
 0x6fa   : > { %v7934_v18 = vmax.f32 %v7903_v36, %v7918_v43  ;;  %v13312_v4 = vor.u32 %v14298_v45, %v13309_v14  ;;  %v13261_v36 = vld [vmem:[#allocation3 + $0x1b78] sm:$0xf0]  ;;  %v8079_v43 = vperm.slane %v15603_v58, 0 }
 0x6fc   : > { %8937 = vmatpush.bf16.msrb.mxu3 %v13308_v63  ;;  %8994 = vmatpush.bf16.msra.mxu2 %v13184_v60  ;;  %v13296_v63 = vor.u32 %v14294_v31, %v13293_v8  ;;  %v13264_v60 = vor.u32 %v14286_v24, %v13261_v36 }
 0x6fd   : > { %v7904_v27 = vpop.f32.mrf.mxu3 }
 0x6fe   : > { %v7905_v35 = vadd.f32 %v7904_v27, %v7886_v54  ;;  %v14282_v54 = vld [vmem:[#allocation3 + $0x1b4c] sm:$0xf] }
 0x6ff   : > { %v14278_v27 = vld [vmem:[#allocation3 + $0x1b2c] sm:$0xf] }
 0x700   : > { %v7922_v25 = vmul.f32 0.01, %v7905_v35  ;;  %8938 = vmatpush.bf16.msrb.mxu3 %v13292_v53  ;;  %8995 = vmatpush.bf16.msra.mxu2 %v13168_v57  ;;  %v13229_v53 = vld [vmem:[#allocation3 + $0x1b38] sm:$0xf0] }
 0x701   : > { %v13232_v30 = vor.u32 %v14278_v27, %v13229_v53 }
 0x702   : > { %v7938_v23 = vmax.f32 %v7905_v35, %v7922_v25  ;;  %v13216_v35 = vor.u32 %v14274_v21, %v13213_v33  ;;  %v15641_v33 = vperm.slane %v15603_v58, 1 }
 0x704   : > { %v15591_v42 = vpack.c.bf16 %v7938_v23, %v7934_v18  ;;  %8939 = vmatpush.bf16.msrb.mxu3 %v13276_v34  ;;  %8996 = vmatpush.bf16.msra.mxu2 %v13152_v50 }
 0x706   : > { %8797 = vmatmul.bf16.gmra.mxu3 %v15591_v42  ;;  %8854 = vmatmul.bf16.gmra.mxu2 %v15577_v55 }
 0x707   : > { %8911 = vmatmul.bf16.gmra.mxu1 %v15546_v9  ;;  %8968 = vmatmul.bf16.gmra.mxu0 %v15496_v16  ;;  %v13212_v16 = vor.u32 %v14276_v56, %v13211_v17 }
 0x708   : > { %8940 = vmatpush.bf16.msrb.mxu3 %v13260_v7  ;;  %8997 = vmatpush.bf16.msra.mxu2 %v13136_v59 }
 0x70c   : > { %8941 = vmatpush.bf16.msrb.mxu3 %v13244_v49  ;;  %8998 = vmatpush.bf16.msra.mxu2 %v13120_v15 }
 0x710   : > { %8942 = vmatpush.bf16.msrb.mxu3 %v13228_v10  ;;  %8999 = vmatpush.bf16.msra.mxu2 %v13104_v3 }
 0x713   : > { %v8736_v46 = vpop.f32.mrf.mxu0 }
 0x714   : > { %8943 = vmatpush.bf16.msrb.mxu3 %v13212_v16  ;;  %9000 = vmatpush.bf16.msra.mxu2 %v13088_v19  ;;  %v8737_v57 = vadd.f32 %v8736_v46, %v8079_v43 }
 0x716   : > { %8868 = vmatmul.bf16.vlgmr.msra.gmra.mxu3 %v15584_v13  ;;  %8925 = vmatmul.bf16.vlgmr.msrb.gmra.mxu2 %v15566_v2 }
 0x717   : > { %8982 = vmatmul.bf16.vlgmr.msra.gmra.mxu1 %v15519_v48  ;;  %v13245_v48 = vld [vmem:[#allocation3 + $0x1b58] sm:$0xf0] }
 0x718   : > { %9012 = vmatpush.bf16.msra.mxu3 %v13328_v41  ;;  %v13248_v29 = vor.u32 %v14282_v54, %v13245_v48 }
 0x71b   : > { %v8738_v25 = vpop.f32.mrf.mxu0 }
 0x71c   : > { %9013 = vmatpush.bf16.msra.mxu3 %v13312_v4 }
 0x720   : > { %9014 = vmatpush.bf16.msra.mxu3 %v13296_v63 }
 0x723   : > { %v8741_v23 = vpop.f32.mrf.mxu0 }
 0x724   : > { %9015 = vmatpush.bf16.msra.mxu3 %v13280_v0  ;;  %v8742_v50 = vadd.f32 %v8741_v23, %v8079_v43 }
 0x726   : > { %8873 = vmatmul.bf16.gmra.mxu3 %v15591_v42  ;;  %8930 = vmatmul.bf16.gmra.mxu2 %v15577_v55 }
 0x727   : > { %8987 = vmatmul.bf16.gmra.mxu1 %v15546_v9  ;;  %v8739_v9 = vadd.f32 %v8738_v25, %v8079_v43 }
 0x728   : > { %9016 = vmatpush.bf16.msra.mxu3 %v13264_v60 }
 0x72b   : > { %v8743_v61 = vpop.f32.mrf.mxu0 }
 0x72c   : > { %9017 = vmatpush.bf16.msra.mxu3 %v13248_v29  ;;  %v8744_v7 = vadd.f32 %v8743_v61, %v8079_v43 }
 0x730   : > { %9018 = vmatpush.bf16.msra.mxu3 %v13232_v30 }
 0x733   : > { %v8755_v34 = vpop.f32.mrf.mxu1  ;;  %v8812_v32 = vpop.f32.mrf.mxu0 }
 0x734   : > { %v8756_v44 = vadd.f32 %v8755_v34, %v8737_v57  ;;  %9019 = vmatpush.bf16.msra.mxu3 %v13216_v35  ;;  %v15646_v35 = vperm.slane %v15603_v58, 2  ;;  %v8813_v57 = vadd.f32 %v8812_v32, %v15641_v33 }
 0x736   : > { %8944 = vmatmul.bf16.vlgmr.msrb.gmra.mxu3 %v15584_v13  ;;  %9001 = vmatmul.bf16.vlgmr.msra.gmra.mxu2 %v15566_v2 }
 0x73b   : > { %v8757_v39 = vpop.f32.mrf.mxu1 }
 0x73c   : > { %v8758_v18 = vadd.f32 %v8757_v39, %v8739_v9 }
 0x743   : > { %v8760_v47 = vpop.f32.mrf.mxu1 }
 0x744   : > { %v8761_v52 = vadd.f32 %v8760_v47, %v8742_v50 }
 0x746   : > { %8949 = vmatmul.bf16.gmra.mxu3 %v15591_v42  ;;  %9006 = vmatmul.bf16.gmra.mxu2 %v15577_v55 }
 0x74b   : > { %v8762_v11 = vpop.f32.mrf.mxu1 }
 0x74c   : > { %v8763_v59 = vadd.f32 %v8762_v11, %v8744_v7  ;;  %v15654_v7 = vperm.slane %v15603_v58, 3 }
 0x753   : > { %v8831_v55 = vpop.f32.mrf.mxu1 }
 0x754   : > { %v8832_v34 = vadd.f32 %v8831_v55, %v8813_v57 }
 0x756   : > { %9020 = vmatmul.bf16.vlgmr.msra.gmra.mxu3 %v15584_v13  ;;  %v8814_v13 = vpop.f32.mrf.mxu0 }
 0x759   : > { %v8774_v6 = vpop.f32.mrf.mxu2 }
 0x75a   : > { %v8775_v40 = vadd.f32 %v8774_v6, %v8756_v44 }
 0x75b   : > { %v8833_v3 = vpop.f32.mrf.mxu1 }
 0x761   : > { %v8776_v2 = vpop.f32.mrf.mxu2 }
 0x762   : > { %v8777_v49 = vadd.f32 %v8776_v2, %v8758_v18 }
 0x763   : > { %v15618_v19 = vpop.f32.mrf.mxu1 }
 0x766   : > { %9025 = vmatmul.bf16.gmra.mxu3 %v15591_v42  ;;  %v8817_v42 = vpop.f32.mrf.mxu0 }
 0x769   : > { %v8779_v38 = vpop.f32.mrf.mxu2 }
 0x76a   : > { %v8780_v62 = vadd.f32 %v8779_v38, %v8761_v52  ;;  %v8815_v52 = vadd.f32 %v8814_v13, %v15641_v33 }
 0x76b   : > { %v15626_v4 = vpop.f32.mrf.mxu1 }
 0x76e   : > { %v15624_v45 = vpop.f32.mrf.mxu0 }
 0x771   : > { %v8781_v15 = vpop.f32.mrf.mxu2 }
 0x772   : > { %v8782_v26 = vadd.f32 %v8781_v15, %v8763_v59  ;;  %v8834_v59 = vadd.f32 %v8833_v3, %v8815_v52  ;;  %v9064_v15 = vld [vmem:[#allocation5 + $0x21] ss:$8 sm:$0xf]  ;;  %v8818_v3 = vadd.f32 %v8817_v42, %v15641_v33 }
 0x774   : > { %v8907_v1 = vpop.f32.mrf.mxu1 }
 0x776   : > { %v8888_v63 = vpop.f32.mrf.mxu0 }
 0x777   : > { %v8889_v44 = vadd.f32 %v8888_v63, %v15646_v35 }
 0x779   : > { %v8793_v28 = vpop.f32.mrf.mxu3  ;;  %v8850_v12 = vpop.f32.mrf.mxu2  ;;  %v8908_v39 = vadd.f32 %v8907_v1, %v8889_v44 }
 0x77a   : > { %v15612_v10 = vadd.f32 %v8793_v28, %v8775_v40  ;;  %v8851_v18 = vadd.f32 %v8850_v12, %v8832_v34 }
 0x77c   : > { %v8909_v36 = vpop.f32.mrf.mxu1 }
 0x77e   : > { %v8890_v24 = vpop.f32.mrf.mxu0 }
 0x77f   : > { %v8891_v40 = vadd.f32 %v8890_v24, %v15646_v35  ;;  %v8837_v24 = vadd.f32 %v15618_v19, %v8818_v3  ;;  %v15676_v19 = vperm.slane %v9064_v15, 3 }
 0x781   : > { %v8795_v17 = vpop.f32.mrf.mxu3  ;;  %v8852_v16 = vpop.f32.mrf.mxu2 }
 0x782   : > { %v15614_v56 = vadd.f32 %v8795_v17, %v8777_v49  ;;  %v9031_v49 = vmul.f32 0.01, %v15612_v10  ;;  %v8853_v38 = vadd.f32 %v8852_v16, %v8834_v59  ;;  %v15661_v17 = vperm.slane %v9064_v15, 1 }
 0x784   : > { %v8912_v29 = vpop.f32.mrf.mxu1  ;;  %v9035_v44 = vmul.f32 0.01, %v15614_v56 }
 0x786   : > { %v8893_v48 = vpop.f32.mrf.mxu0 }
 0x789   : > { %v8798_v22 = vpop.f32.mrf.mxu3  ;;  %v15622_v41 = vpop.f32.mrf.mxu2 }
 0x78a   : > { %v15616_v37 = vadd.f32 %v8798_v22, %v8780_v62  ;;  %v9047_v22 = vmax.f32 %v15612_v10, %v9031_v49 }
 0x78c   : > { %v15638_v21 = vpop.f32.mrf.mxu1 }
 0x78e   : > { %v15636_v53 = vpop.f32.mrf.mxu0 }
 0x791   : > { %v8800_v51 = vpop.f32.mrf.mxu3  ;;  %v15628_v31 = vpop.f32.mrf.mxu2 }
 0x792   : > { %v15620_v5 = vadd.f32 %v8800_v51, %v8782_v26  ;;  %v8910_v26 = vadd.f32 %v8909_v36, %v8891_v40  ;;  %v15665_v51 = vperm.slane %v9064_v15, 0 }
 0x794   : > { %v8983_v23 = vpop.f32.mrf.mxu1  ;;  %v9074_v34 = vmul.f32 %v15665_v51, %v9047_v22 }
 0x796   : > { %v8964_v9 = vpop.f32.mrf.mxu0 }
 0x797   : > { %v8965_v62 = vadd.f32 %v8964_v9, %v15654_v7 }
 0x799   : > { %v8869_v14 = vpop.f32.mrf.mxu3  ;;  %v8926_v20 = vpop.f32.mrf.mxu2  ;;  %v8984_v12 = vadd.f32 %v8983_v23, %v8965_v62 }
 0x79a   : > { %v8870_v50 = vadd.f32 %v8869_v14, %v8851_v18  ;;  %v8927_v47 = vadd.f32 %v8926_v20, %v8908_v39  ;;  %v15667_v20 = vperm.slane %v9064_v15, 2  ;;  %v8896_v15 = vadd.f32 %v15636_v53, %v15646_v35 }
 0x79c   : > { %v9032_v2 = vmul.f32 0.01, %v8870_v50  ;;  %v8985_v14 = vpop.f32.mrf.mxu1 }
 0x79e   : > { %v8966_v28 = vpop.f32.mrf.mxu0  ;;  %v9048_v58 = vmax.f32 %v8870_v50, %v9032_v2 }
 0x7a0   : > { %v9075_v42 = vmul.f32 %v15661_v17, %v9048_v58 }
 0x7a1   : > { %v8871_v8 = vpop.f32.mrf.mxu3  ;;  %v8928_v60 = vpop.f32.mrf.mxu2 }
 0x7a2   : > { %v8872_v55 = vadd.f32 %v8871_v8, %v8853_v38  ;;  %v8929_v13 = vadd.f32 %v8928_v60, %v8910_v26  ;;  %v8894_v8 = vadd.f32 %v8893_v48, %v15646_v35  ;;  %v8967_v60 = vadd.f32 %v8966_v28, %v15654_v7 }
 0x7a3   : > { %v9090_v59 = vadd.f32 %v9075_v42, %v9074_v34 }
 0x7a4   : > { %v9036_v36 = vmul.f32 0.01, %v8872_v55  ;;  %v8913_v9 = vadd.f32 %v8912_v29, %v8894_v8  ;;  %v8986_v23 = vadd.f32 %v8985_v14, %v8967_v60  ;;  %v8820_v29 = vadd.f32 %v15624_v45, %v15641_v33 }
 0x7a6   : > { %v9052_v50 = vmax.f32 %v8872_v55, %v9036_v36  ;;  %v8839_v28 = vadd.f32 %v15626_v4, %v8820_v29 }
 0x7a8   : > { %v8858_v53 = vadd.f32 %v15628_v31, %v8839_v28  ;;  %v14388_v28 = vld [vmem:[#allocation11 + $0x2] ss:$0 sm:$0xff] }
 0x7a9   : > { %v15630_v0 = vpop.f32.mrf.mxu3  ;;  %v15634_v27 = vpop.f32.mrf.mxu2 }
 0x7b1   : > { %v15632_v54 = vpop.f32.mrf.mxu3  ;;  %v15643_v43 = vpop.f32.mrf.mxu2 }
 0x7b9   : > { %v8945_v46 = vpop.f32.mrf.mxu3  ;;  %v9002_v61 = vpop.f32.mrf.mxu2 }
 0x7ba   : > { %v8946_v11 = vadd.f32 %v8945_v46, %v8927_v47  ;;  %v9003_v63 = vadd.f32 %v9002_v61, %v8984_v12  ;;  %v8969_v47 = vpop.f32.mrf.mxu0  ;;  %v8932_v61 = vadd.f32 %v15634_v27, %v8913_v9  ;;  %v8988_v27 = vpop.f32.mrf.mxu1  ;;  %v8915_v12 = vadd.f32 %v15638_v21, %v8896_v15 }
 0x7bb   : > { %v8970_v55 = vadd.f32 %v8969_v47, %v15654_v7 }
 0x7bc   : > { %v9033_v32 = vmul.f32 0.01, %v8946_v11 }
 0x7bd   : > { %v8989_v4 = vadd.f32 %v8988_v27, %v8970_v55 }
 0x7be   : > { %v9049_v16 = vmax.f32 %v8946_v11, %v9033_v32 }
 0x7c0   : > { %v9076_v48 = vmul.f32 %v15667_v20, %v9049_v16  ;;  %v8877_v16 = vadd.f32 %v15632_v54, %v8858_v53 }
 0x7c1   : > { %v8947_v30 = vpop.f32.mrf.mxu3  ;;  %v9004_v46 = vpop.f32.mrf.mxu2 }
 0x7c2   : > { %v8948_v1 = vadd.f32 %v8947_v30, %v8929_v13  ;;  %v8856_v30 = vadd.f32 %v15622_v41, %v8837_v24  ;;  %v9051_v41 = vmax.f32 %v15614_v56, %v9035_v44  ;;  %v9005_v40 = vadd.f32 %v9004_v46, %v8986_v23  ;;  %v8971_v21 = vpop.f32.mrf.mxu0  ;;  %v8990_v9 = vpop.f32.mrf.mxu1 }
 0x7c3   : > { %v9091_v62 = vadd.f32 %v9090_v59, %v9076_v48  ;;  %v8972_v54 = vadd.f32 %v8971_v21, %v15654_v7 }
 0x7c4   : > { %v9037_v39 = vmul.f32 0.01, %v8948_v1  ;;  %v8875_v52 = vadd.f32 %v15630_v0, %v8856_v30  ;;  %v9079_v0 = vmul.f32 %v15661_v17, %v9052_v50  ;;  %v9078_v56 = vmul.f32 %v15665_v51, %v9051_v41 }
 0x7c5   : > { %v8991_v48 = vadd.f32 %v8990_v9, %v8972_v54 }
 0x7c6   : > { %v9053_v2 = vmax.f32 %v8948_v1, %v9037_v39  ;;  %v9040_v32 = vmul.f32 0.01, %v8875_v52  ;;  %v9095_v22 = vadd.f32 %v9079_v0, %v9078_v56 }
 0x7c8   : > { %v9080_v35 = vmul.f32 %v15667_v20, %v9053_v2  ;;  %v9056_v14 = vmax.f32 %v8875_v52, %v9040_v32  ;;  %v14632_v32 = vmov 0  }
 0x7c9   : > { %v15649_v25 = vpop.f32.mrf.mxu3  ;;  %v9007_v58 = vpop.f32.mrf.mxu2  ;;  %14383 = vset.pattern.permute.xlu2 %v14632_v32  ;;  %14384 = vset.pattern.permute.xlu0 %v14632_v32 }
 0x7ca   : > { %v8951_v49 = vadd.f32 %v15649_v25, %v8932_v61  ;;  %v9039_v25 = vmul.f32 0.01, %v15616_v37  ;;  %v9008_v8 = vadd.f32 %v9007_v58, %v8989_v4  ;;  %v9083_v42 = vmul.f32 %v15661_v17, %v9056_v14  ;;  %14385 = vset.pattern.permute.xlu1 %v14632_v32 }
 0x7cc   : > { %v9041_v13 = vmul.f32 0.01, %v8951_v49  ;;  %v9055_v24 = vmax.f32 %v15616_v37, %v9039_v25 }
 0x7ce   : > { %v9057_v36 = vmax.f32 %v8951_v49, %v9041_v13  ;;  %v9082_v37 = vmul.f32 %v15665_v51, %v9055_v24 }
 0x7d0   : > { %v9100_v47 = vadd.f32 %v9083_v42, %v9082_v37 }
 0x7d1   : > { %v15656_v6 = vpop.f32.mrf.mxu3 }
 0x7d9   : > { %v9021_v57 = vpop.f32.mrf.mxu3 }
 0x7da   : > { %v9022_v10 = vadd.f32 %v9021_v57, %v9003_v63  ;;  %v8934_v63 = vadd.f32 %v15643_v43, %v8915_v12  ;;  %v9096_v57 = vadd.f32 %v9095_v22, %v9080_v35  ;;  %v9043_v43 = vmul.f32 0.01, %v15620_v5 }
 0x7dc   : > { %v9034_v18 = vmul.f32 0.01, %v9022_v10  ;;  %v8953_v31 = vadd.f32 %v15656_v6, %v8934_v63  ;;  %v9084_v6 = vmul.f32 %v15667_v20, %v9057_v36  ;;  %v9059_v52 = vmax.f32 %v15620_v5, %v9043_v43 }
 0x7de   : > { %v9050_v11 = vmax.f32 %v9022_v10, %v9034_v18  ;;  %v9044_v10 = vmul.f32 0.01, %v8877_v16  ;;  %v9045_v30 = vmul.f32 0.01, %v8953_v31  ;;  %v9009_v18 = vpop.f32.mrf.mxu2  ;;  %v9101_v59 = vadd.f32 %v9100_v47, %v9084_v6 }
 0x7df   : > { %v9086_v49 = vmul.f32 %v15665_v51, %v9059_v52 }
 0x7e0   : > { %v9077_v38 = vmul.f32 %v15676_v19, %v9050_v11  ;;  %v9060_v23 = vmax.f32 %v8877_v16, %v9044_v10  ;;  %v9061_v61 = vmax.f32 %v8953_v31, %v9045_v30  ;;  %v9010_v11 = vadd.f32 %v9009_v18, %v8991_v48 }
 0x7e1   : > { %v9023_v26 = vpop.f32.mrf.mxu3 }
 0x7e2   : > { %v9024_v45 = vadd.f32 %v9023_v26, %v9005_v40  ;;  %v9092_v33 = vadd.f32 %v9091_v62, %v9077_v38  ;;  %v9087_v41 = vmul.f32 %v15661_v17, %v9060_v23  ;;  %v9088_v38 = vmul.f32 %v15667_v20, %v9061_v61 }
 0x7e4   : > { %v9038_v3 = vmul.f32 0.01, %v9024_v45  ;;  %9093 = vadd.xlane.f32.xlu0 %v9092_v33  ;;  %v9105_v0 = vadd.f32 %v9087_v41, %v9086_v49 }
 0x7e6   : > { %v9054_v1 = vmax.f32 %v9024_v45, %v9038_v3  ;;  %v9106_v27 = vadd.f32 %v9105_v0, %v9088_v38 }
 0x7e8   : > { %v9081_v46 = vmul.f32 %v15676_v19, %v9054_v1 }
 0x7e9   : > { %v9026_v60 = vpop.f32.mrf.mxu3 }
 0x7ea   : > { %v9027_v34 = vadd.f32 %v9026_v60, %v9008_v8  ;;  %v9097_v44 = vadd.f32 %v9096_v57, %v9081_v46 }
 0x7ec   : > { %v9042_v39 = vmul.f32 0.01, %v9027_v34  ;;  %9098 = vadd.xlane.f32.xlu0 %v9097_v44 }
 0x7ee   : > { %v9058_v50 = vmax.f32 %v9027_v34, %v9042_v39 }
 0x7f0   : > { %v9085_v7 = vmul.f32 %v15676_v19, %v9058_v50 }
 0x7f1   : > { %v9028_v29 = vpop.f32.mrf.mxu3 }
 0x7f2   : > { %v9029_v40 = vadd.f32 %v9028_v29, %v9010_v11  ;;  %v9102_v2 = vadd.f32 %v9101_v59, %v9085_v7 }
 0x7f4   : > { %v9046_v62 = vmul.f32 0.01, %v9029_v40  ;;  %9103 = vadd.xlane.f32.xlu1 %v9102_v2 }
 0x7f6   : > { %v9062_v15 = vmax.f32 %v9029_v40, %v9046_v62 }
 0x7f8   : > { %v9089_v5 = vmul.f32 %v15676_v19, %v9062_v15 }
 0x7fa   : > { %v9107_v26 = vadd.f32 %v9106_v27, %v9089_v5 }
 0x7fc   : > { %9108 = vadd.xlane.f32.xlu1 %v9107_v26 }
 0x857   : > { %v9094_v17 = vpop.xlane.xlu0 %9093 }
 0x858   : > { %v9112_v45 = vadd.f32 %v14388_v28, %v9094_v17 }
 0x85a   : > { %v13329_v33 = vmul.f32 -1.442695, %v9112_v45 }
 0x85c   : > { %14399 = vpow2.f32 %v13329_v33 }
 0x85f   : > { %v9099_v51 = vpop.xlane.xlu0 %9098 }
 0x860   : > { %v9113_v20 = vadd.f32 %v14388_v28, %v9099_v51 }
 0x862   : > { %v14400_v56 = vpop.eup %14399  ;;  %v13330_v55 = vmul.f32 -1.442695, %v9113_v20 }
 0x863   : > { %v9128_v25 = vadd.f32 1.0, %v14400_v56 }
 0x864   : > { %14401 = vpow2.f32 %v13330_v55 }
 0x865   : > { %14403 = vrcp.f32 %v9128_v25  ;;  %v9143_v14 = vand.u32 2147483648, %v9128_v25  ;;  %v9141_v1 = vand.u32 2147483647, %v9128_v25  ;;  %vm9137_vm9 = vweird.f32 %v9128_v25 }
 0x867   : > { %v9104_v19 = vpop.xlane.xlu1 %9103  ;;  %v9144_v46 = vor.u32 1.1754944e-38, %v9143_v14  ;;  %vm9142_vm11 = vcmp.eq.f32.partialorder %v9141_v1, 8.507059e+37 }
 0x868   : > { %v9114_v12 = vadd.f32 %v14388_v28, %v9104_v19 }
 0x86a   : > { %v14402_v58 = vpop.eup %14401  ;;  %v13331_v53 = vmul.f32 -1.442695, %v9114_v12 }
 0x86b   : > { %v14404_v35 = vpop.eup %14403  ;;  %v9129_v13 = vadd.f32 1.0, %v14402_v58 }
 0x86c   : > { %14405 = vpow2.f32 %v13331_v53  ;;  %v9133_v3 = vmul.f32 %v14404_v35, %v9128_v25  ;;  %vm9138_vm8 = vweird.f32 %v14404_v35 }
 0x86d   : > { %14407 = vrcp.f32 %v9129_v13  ;;  %vm9139_vm10 = vmor %vm9137_vm9, %vm9138_vm8  ;;  %v9158_v34 = vand.u32 2147483648, %v9129_v13  ;;  %v9156_v54 = vand.u32 2147483647, %v9129_v13  ;;  %vm9152_vm13 = vweird.f32 %v9129_v13 }
 0x86e   : > { %v9134_v4 = vsub.f32 1.0, %v9133_v3 }
 0x86f   : > { %v9109_v22 = vpop.xlane.xlu1 %9108  ;;  %v9159_v39 = vor.u32 1.1754944e-38, %v9158_v34  ;;  %vm9157_vm15 = vcmp.eq.f32.partialorder %v9156_v54, 8.507059e+37 }
 0x870   : > { %v9115_v16 = vadd.f32 %v14388_v28, %v9109_v22  ;;  %v9135_v63 = vmul.f32 %v14404_v35, %v9134_v4 }
 0x872   : > { %v14406_v24 = vpop.eup %14405  ;;  %v13332_v8 = vmul.f32 -1.442695, %v9115_v16  ;;  %v9136_v21 = vadd.f32 %v14404_v35, %v9135_v63 }
 0x873   : > { %v14408_v36 = vpop.eup %14407  ;;  %v9130_v31 = vadd.f32 1.0, %v14406_v24 }
 0x874   : > { %14409 = vpow2.f32 %v13332_v8  ;;  %v9140_v57 = vsel %vm9139_vm10, %v14404_v35, %v9136_v21  ;;  %v9148_v60 = vmul.f32 %v14408_v36, %v9129_v13  ;;  %vm9153_vm12 = vweird.f32 %v14408_v36 }
 0x875   : > { %14411 = vrcp.f32 %v9130_v31  ;;  %v9145_v42 = vsel %vm9142_vm11, %v9144_v46, %v9140_v57  ;;  %vm9154_vm14 = vmor %vm9152_vm13, %vm9153_vm12  ;;  %v9173_v50 = vand.u32 2147483648, %v9130_v31  ;;  %v9171_v52 = vand.u32 2147483647, %v9130_v31 }
 0x876   : > { %9194 = vperm.xlu2 %14383, %v9145_v42   ;;  %v9149_v10 = vsub.f32 1.0, %v9148_v60  ;;  %vm9167_vm1 = vweird.f32 %v9130_v31 }
 0x877   : > { %v9174_v7 = vor.u32 1.1754944e-38, %v9173_v50  ;;  %vm9172_vm3 = vcmp.eq.f32.partialorder %v9171_v52, 8.507059e+37 }
 0x878   : > { %v9150_v44 = vmul.f32 %v14408_v36, %v9149_v10 }
 0x87a   : > { %v14410_v43 = vpop.eup %14409  ;;  %v9151_v9 = vadd.f32 %v14408_v36, %v9150_v44 }
 0x87b   : > { %v14412_v37 = vpop.eup %14411  ;;  %v9131_v30 = vadd.f32 1.0, %v14410_v43 }
 0x87c   : > { %v9155_v6 = vsel %vm9154_vm14, %v14408_v36, %v9151_v9  ;;  %v9163_v18 = vmul.f32 %v14412_v37, %v9130_v31  ;;  %vm9168_vm0 = vweird.f32 %v14412_v37 }
 0x87d   : > { %14413 = vrcp.f32 %v9131_v30  ;;  %v9160_v48 = vsel %vm9157_vm15, %v9159_v39, %v9155_v6  ;;  %vm9169_vm2 = vmor %vm9167_vm1, %vm9168_vm0  ;;  %v9188_v2 = vand.u32 2147483648, %v9131_v30  ;;  %v9186_v38 = vand.u32 2147483647, %v9131_v30 }
 0x87e   : > { %9199 = vperm.xlu0 %14384, %v9160_v48   ;;  %v9164_v23 = vsub.f32 1.0, %v9163_v18  ;;  %vm9182_vm5 = vweird.f32 %v9131_v30 }
 0x87f   : > { %v9189_v15 = vor.u32 1.1754944e-38, %v9188_v2  ;;  %vm9187_vm7 = vcmp.eq.f32.partialorder %v9186_v38, 8.507059e+37 }
 0x880   : > { %v9165_v47 = vmul.f32 %v14412_v37, %v9164_v23 }
 0x882   : > { %v9166_v61 = vadd.f32 %v14412_v37, %v9165_v47 }
 0x883   : > { %v14414_v11 = vpop.eup %14413 }
 0x884   : > { %v9170_v59 = vsel %vm9169_vm2, %v14412_v37, %v9166_v61  ;;  %v9178_v29 = vmul.f32 %v14414_v11, %v9131_v30  ;;  %vm9183_vm4 = vweird.f32 %v14414_v11 }
 0x885   : > { %v9175_v41 = vsel %vm9172_vm3, %v9174_v7, %v9170_v59  ;;  %vm9184_vm6 = vmor %vm9182_vm5, %vm9183_vm4 }
 0x886   : > { %9204 = vperm.xlu1 %14385, %v9175_v41   ;;  %v9179_v40 = vsub.f32 1.0, %v9178_v29 }
 0x888   : > { %v9180_v49 = vmul.f32 %v14414_v11, %v9179_v40 }
 0x88a   : > { %v9181_v62 = vadd.f32 %v14414_v11, %v9180_v49 }
 0x88c   : > { %v9185_v0 = vsel %vm9184_vm6, %v14414_v11, %v9181_v62 }
 0x88d   : > { %v9190_v5 = vsel %vm9187_vm7, %v9189_v15, %v9185_v0 }
 0x88e   : > { %9209 = vperm.xlu2 %14383, %v9190_v5  }
 0x8d0   : > { %v9195_v27 = vpop.permute.xlu2 %9194 }
 0x8d1   : > { %9212 = vst [vmem:[%s15183_s22] sm:$0xff] %v9195_v27 }
 0x8e8   : > { %v9210_v26 = vpop.permute.xlu2 %9209 }
 0x8e9   : > { %9215 = vst [vmem:[%s15183_s22 + $0x18] sm:$0xff] %v9210_v26 }
 0x8f0   : > { %v9200_v28 = vpop.permute.xlu0 %9199 }
 0x8f1   : > { %9213 = vst [vmem:[%s15183_s22 + $0x8] sm:$0xff] %v9200_v28 }
 0x8f8   : > { %v9205_v32 = vpop.permute.xlu1 %9204 }
 0x8f9   : > { %9214 = vst [vmem:[%s15183_s22 + $0x10] sm:$0xff] %v9205_v32 }
 0x8fa PF: > { %s24_s13 = sadd.s32 1, %s14617_s13  }
 0x8fb   : > { %p21_p7 = scmp.ge.s32.totalorder %s24_s13, 6  }
 0x8fd   :  { %23 = sbr.rel (!%p21_p7) target bundleno = 4 (0x4), region = 137 }
 0x902   :  { %9239 = vsyncpa [#allocation4], 1 }
 0x903   :  { %9241 = vsyncpa [#allocation4 + $0x1], 1 }
 0x904   :  { %9242 = vsyncpa [#allocation6], 1 }
 0x905   :  { %9243 = vsyncpa [#allocation9], 1 }
 0x906   :  { %9244 = vsyncpa [#allocation12], 1 }

</bundles_post_ra>
